<compile_context>
chip_gen: v6e
topology: v6e:2x2x1
jax: 0.10.0
libtpu: 0.0.40
codegen_flags: <defaults>
</compile_context>

<pallas_src>
import functools

import jax
import jax.numpy as jnp
import numpy as np
from jax.experimental import pallas as pl
from jax.experimental.pallas import tpu as pltpu


def _hexpo(x):
    # Hexpo(x) = 1 - exp(-x) for x >= 0 ; exp(x) - 1 for x < 0  (single transcendental)
    e = jnp.exp(-jnp.abs(x))
    return jnp.where(x >= 0.0, 1.0 - e, e - 1.0)


def amcnn_kernel(x_ref, w2_ref, w1_ref, w1r_ref, eca_ref, bn1_ref, rep_ref,
                 abc_ref, w3d_ref, w3pf_ref, b3_ref, w4f_ref, b4_ref,
                 p2_ref, p3_ref, fcH_ref, fcb_ref, out_ref):
    f32 = jnp.float32
    X = x_ref[...]                                   # (Bt, E, S)
    Bt, E, S = X.shape
    C1, K = w1r_ref.shape
    F1 = w1_ref.shape[0]
    F2, C1K4 = w4f_ref.shape
    K4 = C1K4 // F2
    W1 = S - K + 1
    W2 = p2_ref.shape[1]
    K3 = w3d_ref.shape[1]
    W3 = W2 - K3 + 1
    W3p = p3_ref.shape[1]
    W4 = W3p - K4 + 1
    ncls = fcb_ref.shape[1]
    OUT_PAD = out_ref.shape[1]

    # ---- conv2's electrode mix applied first (exact commutation with conv1/BN1/ECA) ----
    w2 = w2_ref[...]                                  # (C1, E)
    w2b = jnp.broadcast_to(w2[None], (Bt, C1, E))
    z = jnp.einsum('bce,bes->bcs', w2b, X,
                   preferred_element_type=f32)        # (Bt, C1, S)

    # ---- ECA attention from x column statistics (== GAP of post-BN1 feature map) ----
    colmean = jnp.mean(X, axis=1, keepdims=True)      # (Bt, 1, S)
    cx = jnp.concatenate(
        [jnp.sum(colmean[:, :, k:k + W1], axis=2, keepdims=True) for k in range(K)],
        axis=2) * (1.0 / W1)                          # (Bt, 1, K)
    w1b = jnp.broadcast_to(w1_ref[...][None], (Bt, F1, K))
    pooled = jnp.einsum('bfk,bok->bfo', w1b, cx,
                        preferred_element_type=f32)   # (Bt, F1, 1)
    pooled = pooled * bn1_ref[0][None] + bn1_ref[1][None]
    zc = jnp.zeros((Bt, 1, 1), f32)
    pp = jnp.concatenate([zc, pooled, zc], axis=1)    # (Bt, F1+2, 1)
    att = jax.nn.sigmoid(eca_ref[0:1] * pp[:, 0:F1]
                         + eca_ref[1:2] * pp[:, 1:F1 + 1]
                         + eca_ref[2:3] * pp[:, 2:F1 + 2])    # (Bt, F1, 1)
    repb = jnp.broadcast_to(rep_ref[...][None], (Bt, C1, F1))
    attc = jnp.einsum('bcf,bfo->bco', repb, att,
                      preferred_element_type=f32)     # (Bt, C1, 1)

    # ---- temporal conv1 on z; BN1/ECA/conv2-bias/BN2 folded into A,B,C ----
    w1r3 = w1r_ref[...][None]                         # (1, C1, K)
    acc = w1r3[:, :, 0:1] * z[:, :, 0:W1]
    for k in range(1, K):
        acc = acc + w1r3[:, :, k:k + 1] * z[:, :, k:k + W1]
    y2 = attc * (abc_ref[0][None] * acc + abc_ref[1][None]) + abc_ref[2][None]
    y2 = _hexpo(y2)                                   # (Bt, C1, W1)
    # AvgPool2d((1,2)) as one lane-dense MXU matmul on the merged (Bt*C1, 2*W2) slab
    y2p = jnp.dot(y2[:, :, :2 * W2].reshape(Bt * C1, 2 * W2), p2_ref[...],
                  preferred_element_type=f32).reshape(Bt, C1, W2)

    # ---- SeparableConv2d: depthwise temporal + pointwise (all BN scales folded) ----
    w3d3 = w3d_ref[...][None]                         # (1, C1, K)
    acc3 = w3d3[:, :, 0:1] * y2p[:, :, 0:W3]
    for k in range(1, K3):
        acc3 = acc3 + w3d3[:, :, k:k + 1] * y2p[:, :, k:k + W3]
    w3pb = jnp.broadcast_to(w3pf_ref[...][None], (Bt, F2, C1))
    y3 = jnp.einsum('bfc,bcw->bfw', w3pb, acc3,
                    preferred_element_type=f32) + b3_ref[...][None]
    y3 = _hexpo(y3)
    y3p = jnp.dot(y3[:, :, :4 * W3p].reshape(Bt * F2, 4 * W3p), p3_ref[...],
                  preferred_element_type=f32).reshape(Bt, F2, W3p)

    # ---- conv4 (+BN4 scale) as ONE fused matmul over the (k, channel) contraction ----
    ys = jnp.concatenate([y3p[:, :, k:k + W4] for k in range(K4)], axis=1)  # (Bt, K4*F2, W4)
    w4b = jnp.broadcast_to(w4f_ref[...][None], (Bt, F2, K4 * F2))
    y4 = jnp.einsum('bgc,bcw->bgw', w4b, ys,
                    preferred_element_type=f32) + b4_ref[...][None]
    y4 = _hexpo(y4)                                   # (Bt, F2, W4)

    # ---- AvgPool2d((1,8)) + flatten + fc fused into one multiply-reduce per class ----
    cols = []
    for n in range(ncls):
        t = jnp.sum(y4 * fcH_ref[n][None], axis=2, keepdims=True)   # (Bt, F2, 1)
        cols.append(jnp.sum(t, axis=1, keepdims=True))              # (Bt, 1, 1)
    logits = jnp.concatenate(cols, axis=2)[:, 0, :] + fcb_ref[...]  # (Bt, ncls)

    # ---- softmax + lane-dense store ----
    logits = logits - jnp.max(logits, axis=1, keepdims=True)
    p = jnp.exp(logits)
    probs = p / jnp.sum(p, axis=1, keepdims=True)
    if OUT_PAD > ncls:
        probs = jnp.concatenate(
            [probs, jnp.zeros((Bt, OUT_PAD - ncls), f32)], axis=1)
    out_ref[...] = probs


def amcnn_forward(x, kparams, n_classes, block_batch=8):
    N, _, E, S = x.shape
    x3 = x.reshape(N, E, S)
    Bt = min(block_batch, N)
    Np = ((N + Bt - 1) // Bt) * Bt
    if Np != N:
        x3 = jnp.concatenate([x3, jnp.zeros((Np - N, E, S), x3.dtype)], axis=0)
    out_pad = 128 * ((n_classes + 127) // 128)

    in_specs = [pl.BlockSpec((Bt, E, S), lambda i: (i, 0, 0))]
    for p in kparams:
        nd = p.ndim
        in_specs.append(pl.BlockSpec(tuple(p.shape), lambda i, _nd=nd: (0,) * _nd))

    out = pl.pallas_call(
        amcnn_kernel,
        out_shape=jax.ShapeDtypeStruct((Np, out_pad), jnp.float32),
        grid=(Np // Bt,),
        in_specs=in_specs,
        out_specs=pl.BlockSpec((Bt, out_pad), lambda i: (i, 0)),
        compiler_params=pltpu.CompilerParams(dimension_semantics=("parallel",)),
    )(x3, *kparams)
    return out[:N, :n_classes]


# ----------------------------- parameter setup -----------------------------

def build_params(key, n_classes, channels, kernelLength, F1, D, F2):
    ks = jax.random.split(key, 24)

    def nrm(k, shape, s=0.1):
        return s * jax.random.normal(k, shape, jnp.float32)

    return dict(
        conv1_w=nrm(ks[0], (F1, 1, 1, kernelLength)),
        bn1_g=1.0 + nrm(ks[1], (F1,)), bn1_b=nrm(ks[2], (F1,)),
        eca_w=nrm(ks[3], (1, 1, 3), 0.5),
        conv2_w=nrm(ks[4], (F1 * D, 1, channels, 1)),
        conv2_b=nrm(ks[5], (F1 * D,), 0.05),
        bn2_g=1.0 + nrm(ks[6], (F1 * D,)), bn2_b=nrm(ks[7], (F1 * D,)),
        conv3_dw=nrm(ks[8], (F1 * D, 1, 1, kernelLength)),
        conv3_db=nrm(ks[9], (F1 * D,), 0.05),
        conv3_pw=nrm(ks[10], (F2, F1 * D, 1, 1)),
        conv3_pb=nrm(ks[11], (F2,), 0.05),
        sep_g=1.0 + nrm(ks[12], (F2,)), sep_b=nrm(ks[13], (F2,)),
        bn3_g=1.0 + nrm(ks[14], (F2,)), bn3_b=nrm(ks[15], (F2,)),
        conv4_w=nrm(ks[16], (F2, F2, 1, kernelLength // 2)),
        bn4_g=1.0 + nrm(ks[17], (F2,)), bn4_b=nrm(ks[18], (F2,)),
        fc_w=nrm(ks[19], (n_classes, F2 * 3)),
        fc_b=nrm(ks[20], (n_classes,), 0.05),
    )


def prepare_kernel_params(raw, n_classes, channels, samples, kernelLength, F1, D, F2):
    f32 = jnp.float32
    K = kernelLength
    C1 = F1 * D
    E = channels
    W1 = samples - K + 1
    W2 = W1 // 2
    W3 = W2 - K + 1
    W3p = W3 // 4
    K4 = K // 2
    W4 = W3p - K4 + 1
    W4p = W4 // 8
    assert F2 * W4p == raw['fc_w'].shape[1], "spatial sizes do not match fc layer"
    assert W4 == W4p * 8, "fused pool4+fc assumes conv4 width is a multiple of 8"

    def bn_fold(g, b, eps):  # eval-mode BN, running_mean=0, running_var=1
        return g / jnp.sqrt(1.0 + eps), b

    s1, t1 = bn_fold(raw['bn1_g'], raw['bn1_b'], 1e-3)
    s2, t2 = bn_fold(raw['bn2_g'], raw['bn2_b'], 1e-3)
    ss, bs = bn_fold(raw['sep_g'], raw['sep_b'], 1e-5)
    s3, b3 = bn_fold(raw['bn3_g'], raw['bn3_b'], 1e-3)
    s4, b4 = bn_fold(raw['bn4_g'], raw['bn4_b'], 1e-3)

    w1 = raw['conv1_w'].reshape(F1, K)
    w2 = raw['conv2_w'].reshape(C1, E)
    w1r = jnp.repeat(w1, D, axis=0)                    # row c -> w1[c // D]
    sw2 = jnp.sum(w2, axis=1)                          # (C1,)

    A = (s2 * jnp.repeat(s1, D)).reshape(C1, 1)
    B = (s2 * jnp.repeat(t1, D) * sw2).reshape(C1, 1)
    Cc = (s2 * raw['conv2_b'] + t2).reshape(C1, 1)
    abc = jnp.stack([A, B, Cc], axis=0)                # (3, C1, 1)

    bn1p = jnp.stack([s1.reshape(F1, 1), t1.reshape(F1, 1)], axis=0)   # (2, F1, 1)
    eca = raw['eca_w'].reshape(3, 1, 1)
    repT = (jnp.arange(C1)[:, None] // D ==
            jnp.arange(F1)[None, :]).astype(f32)       # (C1, F1) channel-repeat matrix

    w3d = raw['conv3_dw'].reshape(C1, K)
    scale3 = ss * s3
    w3pf = raw['conv3_pw'].reshape(F2, C1) * scale3[:, None]
    bias3 = (w3pf @ raw['conv3_db'] + raw['conv3_pb'] * scale3
             + bs * s3 + b3).reshape(F2, 1)

    w4f = (raw['conv4_w'].reshape(F2, F2, K4).transpose(0, 2, 1)
           .reshape(F2, K4 * F2)) * s4[:, None]        # column index = k*F2 + f
    b4c = b4.reshape(F2, 1)

    def pool_mat(win, p):
        wo = win // p
        wt = wo * p
        return (jnp.arange(wt)[:, None] // p ==
                jnp.arange(wo)[None, :]).astype(f32) / p

    p2 = pool_mat(W1, 2)       # (2*W2, W2)
    p3 = pool_mat(W3, 4)       # (4*W3p, W3p)

    # fused pool4 + flatten + fc constants: fcH[n, f, t] = fc_w[n, f*W4p + t//8] / 8
    fcH = jnp.repeat(raw['fc_w'].reshape(n_classes, F2, W4p), 8, axis=2) / 8.0
    fcb = raw['fc_b'].reshape(1, n_classes)

    return [w2, w1, w1r, eca, bn1p, repT, abc, w3d, w3pf, bias3, w4f, b4c,
            p2, p3, fcH, fcb]


# ------------------------- pure-JAX reference model -------------------------

def reference_forward(x, raw, F1, D):
    conv = functools.partial(jax.lax.conv_general_dilated,
                             window_strides=(1, 1), padding='VALID',
                             dimension_numbers=('NCHW', 'OIHW', 'NCHW'))

    def bn(y, g, b, eps):
        return y * (g / jnp.sqrt(1.0 + eps))[None, :, None, None] + b[None, :, None, None]

    def hexpo_ref(v):
        return jnp.where(v >= 0.0, 1.0 - jnp.exp(-v), jnp.exp(v) - 1.0)

    def pool_w(y, p):
        W = y.shape[-1]
        wo = W // p
        return y[..., :wo * p].reshape(y.shape[:-1] + (wo, p)).mean(-1)

    y = conv(x, raw['conv1_w'])
    y = bn(y, raw['bn1_g'], raw['bn1_b'], 1e-3)
    pooled = y.mean(axis=(2, 3))
    pad = jnp.pad(pooled, ((0, 0), (1, 1)))
    w = raw['eca_w'][0, 0]
    att = w[0] * pad[:, :-2] + w[1] * pad[:, 1:-1] + w[2] * pad[:, 2:]
    y = y * jax.nn.sigmoid(att)[:, :, None, None]
    y = conv(y, raw['conv2_w'], feature_group_count=F1) + raw['conv2_b'][None, :, None, None]
    y = bn(y, raw['bn2_g'], raw['bn2_b'], 1e-3)
    y = hexpo_ref(y)
    y = pool_w(y, 2)
    y = conv(y, raw['conv3_dw'], feature_group_count=F1 * D) + raw['conv3_db'][None, :, None, None]
    y = conv(y, raw['conv3_pw']) + raw['conv3_pb'][None, :, None, None]
    y = bn(y, raw['sep_g'], raw['sep_b'], 1e-5)
    y = bn(y, raw['bn3_g'], raw['bn3_b'], 1e-3)
    y = hexpo_ref(y)
    y = pool_w(y, 4)
    y = conv(y, raw['conv4_w'])
    y = bn(y, raw['bn4_g'], raw['bn4_b'], 1e-3)
    y = hexpo_ref(y)
    y = pool_w(y, 8)
    flat = y.reshape(y.shape[0], -1)
    logits = flat @ raw['fc_w'].T + raw['fc_b'][None, :]
    return jax.nn.softmax(logits, axis=1)


if __name__ == "__main__":
    # small config consistent with the module (fc expects F2*3 features):
    N = 16
    n_classes, channels, samples = 4, 4, 240
    kernelLength, F1, D, F2 = 8, 8, 2, 16

    key = jax.random.PRNGKey(0)
    kx, kp = jax.random.split(key)
    raw = build_params(kp, n_classes, channels, kernelLength, F1, D, F2)
    x = jax.random.normal(kx, (N, 1, channels, samples), jnp.float32)

    kparams = prepare_kernel_params(raw, n_classes, channels, samples,
                                    kernelLength, F1, D, F2)
    out = amcnn_forward(x, kparams, n_classes, block_batch=8)
    out = jax.block_until_ready(out)

    ref = reference_forward(x, raw, F1, D)
    assert out.shape == (N, n_classes)
    np.testing.assert_allclose(np.asarray(out), np.asarray(ref),
                               rtol=2e-3, atol=2e-3)
    print("KERNEL_OK")
</pallas_src>

<mosaic_0001>
module attributes {stable_mosaic.version = 11 : i64} {
  func.func @amcnn_kernel(%arg0: i32, %arg1: memref<8x4x240xf32, #tpu.memory_space<vmem>>, %arg2: memref<16x4xf32, #tpu.memory_space<vmem>>, %arg3: memref<8x8xf32, #tpu.memory_space<vmem>>, %arg4: memref<16x8xf32, #tpu.memory_space<vmem>>, %arg5: memref<3x1x1xf32, #tpu.memory_space<vmem>>, %arg6: memref<2x8x1xf32, #tpu.memory_space<vmem>>, %arg7: memref<16x8xf32, #tpu.memory_space<vmem>>, %arg8: memref<3x16x1xf32, #tpu.memory_space<vmem>>, %arg9: memref<16x8xf32, #tpu.memory_space<vmem>>, %arg10: memref<16x16xf32, #tpu.memory_space<vmem>>, %arg11: memref<16x1xf32, #tpu.memory_space<vmem>>, %arg12: memref<16x64xf32, #tpu.memory_space<vmem>>, %arg13: memref<16x1xf32, #tpu.memory_space<vmem>>, %arg14: memref<232x116xf32, #tpu.memory_space<vmem>>, %arg15: memref<108x27xf32, #tpu.memory_space<vmem>>, %arg16: memref<4x16x24xf32, #tpu.memory_space<vmem>>, %arg17: memref<1x4xf32, #tpu.memory_space<vmem>>, %arg18: memref<8x128xf32, #tpu.memory_space<vmem>>) attributes {dimension_semantics = [#tpu.dimension_semantics<parallel>], iteration_bounds = array<i64: 2>, scalar_prefetch = 0 : i64, scratch_operands = 0 : i64, tpu.core_type = #tpu.core_type<tc>, window_params = [{transform_indices = @transform_0, window_bounds = array<i64: 8, 4, 240>}, {pipeline_mode = #tpu.pipeline_mode<synchronous>, transform_indices = @transform_1, window_bounds = array<i64: 16, 4>}, {pipeline_mode = #tpu.pipeline_mode<synchronous>, transform_indices = @transform_2, window_bounds = array<i64: 8, 8>}, {pipeline_mode = #tpu.pipeline_mode<synchronous>, transform_indices = @transform_3, window_bounds = array<i64: 16, 8>}, {pipeline_mode = #tpu.pipeline_mode<synchronous>, transform_indices = @transform_4, window_bounds = array<i64: 3, 1, 1>}, {pipeline_mode = #tpu.pipeline_mode<synchronous>, transform_indices = @transform_5, window_bounds = array<i64: 2, 8, 1>}, {pipeline_mode = #tpu.pipeline_mode<synchronous>, transform_indices = @transform_6, window_bounds = array<i64: 16, 8>}, {pipeline_mode = #tpu.pipeline_mode<synchronous>, transform_indices = @transform_7, window_bounds = array<i64: 3, 16, 1>}, {pipeline_mode = #tpu.pipeline_mode<synchronous>, transform_indices = @transform_8, window_bounds = array<i64: 16, 8>}, {pipeline_mode = #tpu.pipeline_mode<synchronous>, transform_indices = @transform_9, window_bounds = array<i64: 16, 16>}, {pipeline_mode = #tpu.pipeline_mode<synchronous>, transform_indices = @transform_10, window_bounds = array<i64: 16, 1>}, {pipeline_mode = #tpu.pipeline_mode<synchronous>, transform_indices = @transform_11, window_bounds = array<i64: 16, 64>}, {pipeline_mode = #tpu.pipeline_mode<synchronous>, transform_indices = @transform_12, window_bounds = array<i64: 16, 1>}, {pipeline_mode = #tpu.pipeline_mode<synchronous>, transform_indices = @transform_13, window_bounds = array<i64: 232, 116>}, {pipeline_mode = #tpu.pipeline_mode<synchronous>, transform_indices = @transform_14, window_bounds = array<i64: 108, 27>}, {pipeline_mode = #tpu.pipeline_mode<synchronous>, transform_indices = @transform_15, window_bounds = array<i64: 4, 16, 24>}, {pipeline_mode = #tpu.pipeline_mode<synchronous>, transform_indices = @transform_16, window_bounds = array<i64: 1, 4>}, {transform_indices = @transform_17, window_bounds = array<i64: 8, 128>}]} {
    %c0 = arith.constant 0 : index
    %c0_0 = arith.constant 0 : index
    %c0_1 = arith.constant 0 : index
    %0 = vector.load %arg1[%c0, %c0_0, %c0_1] : memref<8x4x240xf32, #tpu.memory_space<vmem>>, vector<8x4x240xf32>
    %c0_2 = arith.constant 0 : index
    %c0_3 = arith.constant 0 : index
    %1 = vector.load %arg2[%c0_2, %c0_3] : memref<16x4xf32, #tpu.memory_space<vmem>>, vector<16x4xf32>
    %2 = vector.shape_cast %1 : vector<16x4xf32> to vector<1x16x4xf32>
    %3 = vector.shape_cast %2 : vector<1x16x4xf32> to vector<1x16x4xf32>
    %4 = vector.broadcast %3 : vector<1x16x4xf32> to vector<8x16x4xf32>
    "tpu.trace_start"() <{level = 10 : i32, message = "bce,bes->bcs"}> : () -> ()
    %cst = arith.constant dense<0.000000e+00> : vector<8x16x240xf32>
    %5 = tpu.matmul %4, %0, %cst {dimension_numbers = #tpu.dot_dimension_numbers<[2], [1], [1], [2], [0, 0, 0, 1, 1, 2], [0], [0]>} : vector<8x16x4xf32>, vector<8x4x240xf32>, vector<8x16x240xf32> -> vector<8x16x240xf32>
    "tpu.trace_stop"() : () -> ()
    %cst_4 = arith.constant dense<0.000000e+00> : vector<8x240xf32>
    %6 = vector.multi_reduction <add>, %0, %cst_4 [1] : vector<8x4x240xf32> to vector<8x240xf32>
    %7 = vector.shape_cast %6 : vector<8x240xf32> to vector<8x1x240xf32>
    %cst_5 = arith.constant 4.000000e+00 : f32
    %8 = vector.broadcast %cst_5 : f32 to vector<8x1x240xf32>
    %9 = arith.divf %7, %8 : vector<8x1x240xf32>
    %10 = vector.extract_strided_slice %9 {offsets = [0, 0, 0], sizes = [8, 1, 233], strides = [1, 1, 1]} : vector<8x1x240xf32> to vector<8x1x233xf32>
    %cst_6 = arith.constant dense<0.000000e+00> : vector<8x1xf32>
    %11 = vector.multi_reduction <add>, %10, %cst_6 [2] : vector<8x1x233xf32> to vector<8x1xf32>
    %12 = vector.shape_cast %11 : vector<8x1xf32> to vector<8x1x1xf32>
    %13 = vector.extract_strided_slice %9 {offsets = [0, 0, 1], sizes = [8, 1, 233], strides = [1, 1, 1]} : vector<8x1x240xf32> to vector<8x1x233xf32>
    %cst_7 = arith.constant dense<0.000000e+00> : vector<8x1xf32>
    %14 = vector.multi_reduction <add>, %13, %cst_7 [2] : vector<8x1x233xf32> to vector<8x1xf32>
    %15 = vector.shape_cast %14 : vector<8x1xf32> to vector<8x1x1xf32>
    %16 = vector.extract_strided_slice %9 {offsets = [0, 0, 2], sizes = [8, 1, 233], strides = [1, 1, 1]} : vector<8x1x240xf32> to vector<8x1x233xf32>
    %cst_8 = arith.constant dense<0.000000e+00> : vector<8x1xf32>
    %17 = vector.multi_reduction <add>, %16, %cst_8 [2] : vector<8x1x233xf32> to vector<8x1xf32>
    %18 = vector.shape_cast %17 : vector<8x1xf32> to vector<8x1x1xf32>
    %19 = vector.extract_strided_slice %9 {offsets = [0, 0, 3], sizes = [8, 1, 233], strides = [1, 1, 1]} : vector<8x1x240xf32> to vector<8x1x233xf32>
    %cst_9 = arith.constant dense<0.000000e+00> : vector<8x1xf32>
    %20 = vector.multi_reduction <add>, %19, %cst_9 [2] : vector<8x1x233xf32> to vector<8x1xf32>
    %21 = vector.shape_cast %20 : vector<8x1xf32> to vector<8x1x1xf32>
    %22 = vector.extract_strided_slice %9 {offsets = [0, 0, 4], sizes = [8, 1, 233], strides = [1, 1, 1]} : vector<8x1x240xf32> to vector<8x1x233xf32>
    %cst_10 = arith.constant dense<0.000000e+00> : vector<8x1xf32>
    %23 = vector.multi_reduction <add>, %22, %cst_10 [2] : vector<8x1x233xf32> to vector<8x1xf32>
    %24 = vector.shape_cast %23 : vector<8x1xf32> to vector<8x1x1xf32>
    %25 = vector.extract_strided_slice %9 {offsets = [0, 0, 5], sizes = [8, 1, 233], strides = [1, 1, 1]} : vector<8x1x240xf32> to vector<8x1x233xf32>
    %cst_11 = arith.constant dense<0.000000e+00> : vector<8x1xf32>
    %26 = vector.multi_reduction <add>, %25, %cst_11 [2] : vector<8x1x233xf32> to vector<8x1xf32>
    %27 = vector.shape_cast %26 : vector<8x1xf32> to vector<8x1x1xf32>
    %28 = vector.extract_strided_slice %9 {offsets = [0, 0, 6], sizes = [8, 1, 233], strides = [1, 1, 1]} : vector<8x1x240xf32> to vector<8x1x233xf32>
    %cst_12 = arith.constant dense<0.000000e+00> : vector<8x1xf32>
    %29 = vector.multi_reduction <add>, %28, %cst_12 [2] : vector<8x1x233xf32> to vector<8x1xf32>
    %30 = vector.shape_cast %29 : vector<8x1xf32> to vector<8x1x1xf32>
    %31 = vector.extract_strided_slice %9 {offsets = [0, 0, 7], sizes = [8, 1, 233], strides = [1, 1, 1]} : vector<8x1x240xf32> to vector<8x1x233xf32>
    %cst_13 = arith.constant dense<0.000000e+00> : vector<8x1xf32>
    %32 = vector.multi_reduction <add>, %31, %cst_13 [2] : vector<8x1x233xf32> to vector<8x1xf32>
    %33 = vector.shape_cast %32 : vector<8x1xf32> to vector<8x1x1xf32>
    %34 = tpu.concatenate %12, %15, %18, %21, %24, %27, %30, %33 in 2 : vector<8x1x1xf32>, vector<8x1x1xf32>, vector<8x1x1xf32>, vector<8x1x1xf32>, vector<8x1x1xf32>, vector<8x1x1xf32>, vector<8x1x1xf32>, vector<8x1x1xf32> -> vector<8x1x8xf32>
    %cst_14 = arith.constant 0.00429184549 : f32
    %35 = vector.broadcast %cst_14 : f32 to vector<8x1x8xf32>
    %36 = arith.mulf %34, %35 : vector<8x1x8xf32>
    %c0_15 = arith.constant 0 : index
    %c0_16 = arith.constant 0 : index
    %37 = vector.load %arg3[%c0_15, %c0_16] : memref<8x8xf32, #tpu.memory_space<vmem>>, vector<8x8xf32>
    %38 = vector.shape_cast %37 : vector<8x8xf32> to vector<1x8x8xf32>
    %39 = vector.shape_cast %38 : vector<1x8x8xf32> to vector<1x8x8xf32>
    %40 = vector.broadcast %39 : vector<1x8x8xf32> to vector<8x8x8xf32>
    "tpu.trace_start"() <{level = 10 : i32, message = "bfk,bok->bfo"}> : () -> ()
    %cst_17 = arith.constant dense<0.000000e+00> : vector<8x8x1xf32>
    %41 = tpu.matmul %40, %36, %cst_17 {dimension_numbers = #tpu.dot_dimension_numbers<[2], [2], [1], [1], [0, 0, 0, 1, 1, 1], [0], [0]>} : vector<8x8x8xf32>, vector<8x1x8xf32>, vector<8x8x1xf32> -> vector<8x8x1xf32>
    "tpu.trace_stop"() : () -> ()
    %c0_18 = arith.constant 0 : index
    %c0_19 = arith.constant 0 : index
    %c0_20 = arith.constant 0 : index
    %42 = vector.load %arg6[%c0_18, %c0_19, %c0_20] : memref<2x8x1xf32, #tpu.memory_space<vmem>>, vector<1x8x1xf32>
    %43 = vector.shape_cast %42 : vector<1x8x1xf32> to vector<8x1xf32>
    %44 = vector.shape_cast %43 : vector<8x1xf32> to vector<1x8x1xf32>
    %45 = vector.broadcast %44 : vector<1x8x1xf32> to vector<8x8x1xf32>
    %46 = arith.mulf %41, %45 : vector<8x8x1xf32>
    %c1 = arith.constant 1 : index
    %c0_21 = arith.constant 0 : index
    %c0_22 = arith.constant 0 : index
    %47 = vector.load %arg6[%c1, %c0_21, %c0_22] : memref<2x8x1xf32, #tpu.memory_space<vmem>>, vector<1x8x1xf32>
    %48 = vector.shape_cast %47 : vector<1x8x1xf32> to vector<8x1xf32>
    %49 = vector.shape_cast %48 : vector<8x1xf32> to vector<1x8x1xf32>
    %50 = vector.broadcast %49 : vector<1x8x1xf32> to vector<8x8x1xf32>
    %51 = arith.addf %46, %50 : vector<8x8x1xf32>
    %cst_23 = arith.constant 0.000000e+00 : f32
    %52 = vector.broadcast %cst_23 : f32 to vector<8x1x1xf32>
    %53 = tpu.concatenate %52, %51, %52 in 1 : vector<8x1x1xf32>, vector<8x8x1xf32>, vector<8x1x1xf32> -> vector<8x10x1xf32>
    %c0_24 = arith.constant 0 : index
    %c0_25 = arith.constant 0 : index
    %c0_26 = arith.constant 0 : index
    %54 = vector.load %arg5[%c0_24, %c0_25, %c0_26] : memref<3x1x1xf32, #tpu.memory_space<vmem>>, vector<1x1x1xf32>
    %55 = vector.extract_strided_slice %53 {offsets = [0, 0, 0], sizes = [8, 8, 1], strides = [1, 1, 1]} : vector<8x10x1xf32> to vector<8x8x1xf32>
    %56 = vector.broadcast %54 : vector<1x1x1xf32> to vector<8x8x1xf32>
    %57 = arith.mulf %56, %55 : vector<8x8x1xf32>
    %c1_27 = arith.constant 1 : index
    %c0_28 = arith.constant 0 : index
    %c0_29 = arith.constant 0 : index
    %58 = vector.load %arg5[%c1_27, %c0_28, %c0_29] : memref<3x1x1xf32, #tpu.memory_space<vmem>>, vector<1x1x1xf32>
    %59 = vector.extract_strided_slice %53 {offsets = [0, 1, 0], sizes = [8, 8, 1], strides = [1, 1, 1]} : vector<8x10x1xf32> to vector<8x8x1xf32>
    %60 = vector.broadcast %58 : vector<1x1x1xf32> to vector<8x8x1xf32>
    %61 = arith.mulf %60, %59 : vector<8x8x1xf32>
    %62 = arith.addf %57, %61 : vector<8x8x1xf32>
    %c2 = arith.constant 2 : index
    %c0_30 = arith.constant 0 : index
    %c0_31 = arith.constant 0 : index
    %63 = vector.load %arg5[%c2, %c0_30, %c0_31] : memref<3x1x1xf32, #tpu.memory_space<vmem>>, vector<1x1x1xf32>
    %64 = vector.extract_strided_slice %53 {offsets = [0, 2, 0], sizes = [8, 8, 1], strides = [1, 1, 1]} : vector<8x10x1xf32> to vector<8x8x1xf32>
    %65 = vector.broadcast %63 : vector<1x1x1xf32> to vector<8x8x1xf32>
    %66 = arith.mulf %65, %64 : vector<8x8x1xf32>
    %67 = arith.addf %62, %66 : vector<8x8x1xf32>
    %68 = arith.negf %67 : vector<8x8x1xf32>
    %69 = math.exp %68 : vector<8x8x1xf32>
    %cst_32 = arith.constant 1.000000e+00 : f32
    %70 = vector.broadcast %cst_32 : f32 to vector<8x8x1xf32>
    %71 = arith.addf %70, %69 : vector<8x8x1xf32>
    %72 = arith.divf %70, %71 : vector<8x8x1xf32>
    %c0_33 = arith.constant 0 : index
    %c0_34 = arith.constant 0 : index
    %73 = vector.load %arg7[%c0_33, %c0_34] : memref<16x8xf32, #tpu.memory_space<vmem>>, vector<16x8xf32>
    %74 = vector.shape_cast %73 : vector<16x8xf32> to vector<1x16x8xf32>
    %75 = vector.shape_cast %74 : vector<1x16x8xf32> to vector<1x16x8xf32>
    %76 = vector.broadcast %75 : vector<1x16x8xf32> to vector<8x16x8xf32>
    "tpu.trace_start"() <{level = 10 : i32, message = "bcf,bfo->bco"}> : () -> ()
    %cst_35 = arith.constant dense<0.000000e+00> : vector<8x16x1xf32>
    %77 = tpu.matmul %76, %72, %cst_35 {dimension_numbers = #tpu.dot_dimension_numbers<[2], [1], [1], [2], [0, 0, 0, 1, 1, 2], [0], [0]>} : vector<8x16x8xf32>, vector<8x8x1xf32>, vector<8x16x1xf32> -> vector<8x16x1xf32>
    "tpu.trace_stop"() : () -> ()
    %c0_36 = arith.constant 0 : index
    %c0_37 = arith.constant 0 : index
    %78 = vector.load %arg4[%c0_36, %c0_37] : memref<16x8xf32, #tpu.memory_space<vmem>>, vector<16x8xf32>
    %79 = vector.shape_cast %78 : vector<16x8xf32> to vector<1x16x8xf32>
    %80 = vector.extract_strided_slice %79 {offsets = [0, 0, 0], sizes = [1, 16, 1], strides = [1, 1, 1]} : vector<1x16x8xf32> to vector<1x16x1xf32>
    %81 = vector.extract_strided_slice %5 {offsets = [0, 0, 0], sizes = [8, 16, 233], strides = [1, 1, 1]} : vector<8x16x240xf32> to vector<8x16x233xf32>
    %82 = vector.broadcast %80 : vector<1x16x1xf32> to vector<8x16x233xf32>
    %83 = arith.mulf %82, %81 : vector<8x16x233xf32>
    %84 = vector.extract_strided_slice %79 {offsets = [0, 0, 1], sizes = [1, 16, 1], strides = [1, 1, 1]} : vector<1x16x8xf32> to vector<1x16x1xf32>
    %85 = vector.extract_strided_slice %5 {offsets = [0, 0, 1], sizes = [8, 16, 233], strides = [1, 1, 1]} : vector<8x16x240xf32> to vector<8x16x233xf32>
    %86 = vector.broadcast %84 : vector<1x16x1xf32> to vector<8x16x233xf32>
    %87 = arith.mulf %86, %85 : vector<8x16x233xf32>
    %88 = arith.addf %83, %87 : vector<8x16x233xf32>
    %89 = vector.extract_strided_slice %79 {offsets = [0, 0, 2], sizes = [1, 16, 1], strides = [1, 1, 1]} : vector<1x16x8xf32> to vector<1x16x1xf32>
    %90 = vector.extract_strided_slice %5 {offsets = [0, 0, 2], sizes = [8, 16, 233], strides = [1, 1, 1]} : vector<8x16x240xf32> to vector<8x16x233xf32>
    %91 = vector.broadcast %89 : vector<1x16x1xf32> to vector<8x16x233xf32>
    %92 = arith.mulf %91, %90 : vector<8x16x233xf32>
    %93 = arith.addf %88, %92 : vector<8x16x233xf32>
    %94 = vector.extract_strided_slice %79 {offsets = [0, 0, 3], sizes = [1, 16, 1], strides = [1, 1, 1]} : vector<1x16x8xf32> to vector<1x16x1xf32>
    %95 = vector.extract_strided_slice %5 {offsets = [0, 0, 3], sizes = [8, 16, 233], strides = [1, 1, 1]} : vector<8x16x240xf32> to vector<8x16x233xf32>
    %96 = vector.broadcast %94 : vector<1x16x1xf32> to vector<8x16x233xf32>
    %97 = arith.mulf %96, %95 : vector<8x16x233xf32>
    %98 = arith.addf %93, %97 : vector<8x16x233xf32>
    %99 = vector.extract_strided_slice %79 {offsets = [0, 0, 4], sizes = [1, 16, 1], strides = [1, 1, 1]} : vector<1x16x8xf32> to vector<1x16x1xf32>
    %100 = vector.extract_strided_slice %5 {offsets = [0, 0, 4], sizes = [8, 16, 233], strides = [1, 1, 1]} : vector<8x16x240xf32> to vector<8x16x233xf32>
    %101 = vector.broadcast %99 : vector<1x16x1xf32> to vector<8x16x233xf32>
    %102 = arith.mulf %101, %100 : vector<8x16x233xf32>
    %103 = arith.addf %98, %102 : vector<8x16x233xf32>
    %104 = vector.extract_strided_slice %79 {offsets = [0, 0, 5], sizes = [1, 16, 1], strides = [1, 1, 1]} : vector<1x16x8xf32> to vector<1x16x1xf32>
    %105 = vector.extract_strided_slice %5 {offsets = [0, 0, 5], sizes = [8, 16, 233], strides = [1, 1, 1]} : vector<8x16x240xf32> to vector<8x16x233xf32>
    %106 = vector.broadcast %104 : vector<1x16x1xf32> to vector<8x16x233xf32>
    %107 = arith.mulf %106, %105 : vector<8x16x233xf32>
    %108 = arith.addf %103, %107 : vector<8x16x233xf32>
    %109 = vector.extract_strided_slice %79 {offsets = [0, 0, 6], sizes = [1, 16, 1], strides = [1, 1, 1]} : vector<1x16x8xf32> to vector<1x16x1xf32>
    %110 = vector.extract_strided_slice %5 {offsets = [0, 0, 6], sizes = [8, 16, 233], strides = [1, 1, 1]} : vector<8x16x240xf32> to vector<8x16x233xf32>
    %111 = vector.broadcast %109 : vector<1x16x1xf32> to vector<8x16x233xf32>
    %112 = arith.mulf %111, %110 : vector<8x16x233xf32>
    %113 = arith.addf %108, %112 : vector<8x16x233xf32>
    %114 = vector.extract_strided_slice %79 {offsets = [0, 0, 7], sizes = [1, 16, 1], strides = [1, 1, 1]} : vector<1x16x8xf32> to vector<1x16x1xf32>
    %115 = vector.extract_strided_slice %5 {offsets = [0, 0, 7], sizes = [8, 16, 233], strides = [1, 1, 1]} : vector<8x16x240xf32> to vector<8x16x233xf32>
    %116 = vector.broadcast %114 : vector<1x16x1xf32> to vector<8x16x233xf32>
    %117 = arith.mulf %116, %115 : vector<8x16x233xf32>
    %118 = arith.addf %113, %117 : vector<8x16x233xf32>
    %c0_38 = arith.constant 0 : index
    %c0_39 = arith.constant 0 : index
    %c0_40 = arith.constant 0 : index
    %119 = vector.load %arg8[%c0_38, %c0_39, %c0_40] : memref<3x16x1xf32, #tpu.memory_space<vmem>>, vector<1x16x1xf32>
    %120 = vector.shape_cast %119 : vector<1x16x1xf32> to vector<16x1xf32>
    %121 = vector.shape_cast %120 : vector<16x1xf32> to vector<1x16x1xf32>
    %122 = vector.broadcast %121 : vector<1x16x1xf32> to vector<8x16x233xf32>
    %123 = arith.mulf %122, %118 : vector<8x16x233xf32>
    %c1_41 = arith.constant 1 : index
    %c0_42 = arith.constant 0 : index
    %c0_43 = arith.constant 0 : index
    %124 = vector.load %arg8[%c1_41, %c0_42, %c0_43] : memref<3x16x1xf32, #tpu.memory_space<vmem>>, vector<1x16x1xf32>
    %125 = vector.shape_cast %124 : vector<1x16x1xf32> to vector<16x1xf32>
    %126 = vector.shape_cast %125 : vector<16x1xf32> to vector<1x16x1xf32>
    %127 = vector.broadcast %126 : vector<1x16x1xf32> to vector<8x16x233xf32>
    %128 = arith.addf %123, %127 : vector<8x16x233xf32>
    %129 = vector.broadcast %77 : vector<8x16x1xf32> to vector<8x16x233xf32>
    %130 = arith.mulf %129, %128 : vector<8x16x233xf32>
    %c2_44 = arith.constant 2 : index
    %c0_45 = arith.constant 0 : index
    %c0_46 = arith.constant 0 : index
    %131 = vector.load %arg8[%c2_44, %c0_45, %c0_46] : memref<3x16x1xf32, #tpu.memory_space<vmem>>, vector<1x16x1xf32>
    %132 = vector.shape_cast %131 : vector<1x16x1xf32> to vector<16x1xf32>
    %133 = vector.shape_cast %132 : vector<16x1xf32> to vector<1x16x1xf32>
    %134 = vector.broadcast %133 : vector<1x16x1xf32> to vector<8x16x233xf32>
    %135 = arith.addf %130, %134 : vector<8x16x233xf32>
    %136 = math.absf %135 : vector<8x16x233xf32>
    %cst_47 = arith.constant 0.000000e+00 : f32
    %137 = vector.broadcast %cst_47 : f32 to vector<8x16x233xf32>
    %138 = arith.subf %137, %136 : vector<8x16x233xf32>
    %139 = math.exp %138 : vector<8x16x233xf32>
    %cst_48 = arith.constant 0.000000e+00 : f32
    %140 = vector.broadcast %cst_48 : f32 to vector<8x16x233xf32>
    %141 = arith.cmpf oge, %135, %140 : vector<8x16x233xf32>
    %cst_49 = arith.constant 1.000000e+00 : f32
    %142 = vector.broadcast %cst_49 : f32 to vector<8x16x233xf32>
    %143 = arith.subf %142, %139 : vector<8x16x233xf32>
    %cst_50 = arith.constant 1.000000e+00 : f32
    %144 = vector.broadcast %cst_50 : f32 to vector<8x16x233xf32>
    %145 = arith.subf %139, %144 : vector<8x16x233xf32>
    %146 = arith.select %141, %143, %145 : vector<8x16x233xi1>, vector<8x16x233xf32>
    %147 = vector.extract_strided_slice %146 {offsets = [0, 0, 0], sizes = [8, 16, 232], strides = [1, 1, 1]} : vector<8x16x233xf32> to vector<8x16x232xf32>
    %148 = vector.shape_cast %147 : vector<8x16x232xf32> to vector<128x232xf32>
    %c0_51 = arith.constant 0 : index
    %c0_52 = arith.constant 0 : index
    %149 = vector.load %arg14[%c0_51, %c0_52] : memref<232x116xf32, #tpu.memory_space<vmem>>, vector<232x116xf32>
    %cst_53 = arith.constant dense<0.000000e+00> : vector<128x116xf32>
    %150 = tpu.matmul %148, %149, %cst_53 {dimension_numbers = #tpu.dot_dimension_numbers<[1], [0], [0], [1], [0, 0, 1, 1], [], []>} : vector<128x232xf32>, vector<232x116xf32>, vector<128x116xf32> -> vector<128x116xf32>
    %151 = vector.shape_cast %150 : vector<128x116xf32> to vector<8x16x116xf32>
    %c0_54 = arith.constant 0 : index
    %c0_55 = arith.constant 0 : index
    %152 = vector.load %arg9[%c0_54, %c0_55] : memref<16x8xf32, #tpu.memory_space<vmem>>, vector<16x8xf32>
    %153 = vector.shape_cast %152 : vector<16x8xf32> to vector<1x16x8xf32>
    %154 = vector.extract_strided_slice %153 {offsets = [0, 0, 0], sizes = [1, 16, 1], strides = [1, 1, 1]} : vector<1x16x8xf32> to vector<1x16x1xf32>
    %155 = vector.extract_strided_slice %151 {offsets = [0, 0, 0], sizes = [8, 16, 109], strides = [1, 1, 1]} : vector<8x16x116xf32> to vector<8x16x109xf32>
    %156 = vector.broadcast %154 : vector<1x16x1xf32> to vector<8x16x109xf32>
    %157 = arith.mulf %156, %155 : vector<8x16x109xf32>
    %158 = vector.extract_strided_slice %153 {offsets = [0, 0, 1], sizes = [1, 16, 1], strides = [1, 1, 1]} : vector<1x16x8xf32> to vector<1x16x1xf32>
    %159 = vector.extract_strided_slice %151 {offsets = [0, 0, 1], sizes = [8, 16, 109], strides = [1, 1, 1]} : vector<8x16x116xf32> to vector<8x16x109xf32>
    %160 = vector.broadcast %158 : vector<1x16x1xf32> to vector<8x16x109xf32>
    %161 = arith.mulf %160, %159 : vector<8x16x109xf32>
    %162 = arith.addf %157, %161 : vector<8x16x109xf32>
    %163 = vector.extract_strided_slice %153 {offsets = [0, 0, 2], sizes = [1, 16, 1], strides = [1, 1, 1]} : vector<1x16x8xf32> to vector<1x16x1xf32>
    %164 = vector.extract_strided_slice %151 {offsets = [0, 0, 2], sizes = [8, 16, 109], strides = [1, 1, 1]} : vector<8x16x116xf32> to vector<8x16x109xf32>
    %165 = vector.broadcast %163 : vector<1x16x1xf32> to vector<8x16x109xf32>
    %166 = arith.mulf %165, %164 : vector<8x16x109xf32>
    %167 = arith.addf %162, %166 : vector<8x16x109xf32>
    %168 = vector.extract_strided_slice %153 {offsets = [0, 0, 3], sizes = [1, 16, 1], strides = [1, 1, 1]} : vector<1x16x8xf32> to vector<1x16x1xf32>
    %169 = vector.extract_strided_slice %151 {offsets = [0, 0, 3], sizes = [8, 16, 109], strides = [1, 1, 1]} : vector<8x16x116xf32> to vector<8x16x109xf32>
    %170 = vector.broadcast %168 : vector<1x16x1xf32> to vector<8x16x109xf32>
    %171 = arith.mulf %170, %169 : vector<8x16x109xf32>
    %172 = arith.addf %167, %171 : vector<8x16x109xf32>
    %173 = vector.extract_strided_slice %153 {offsets = [0, 0, 4], sizes = [1, 16, 1], strides = [1, 1, 1]} : vector<1x16x8xf32> to vector<1x16x1xf32>
    %174 = vector.extract_strided_slice %151 {offsets = [0, 0, 4], sizes = [8, 16, 109], strides = [1, 1, 1]} : vector<8x16x116xf32> to vector<8x16x109xf32>
    %175 = vector.broadcast %173 : vector<1x16x1xf32> to vector<8x16x109xf32>
    %176 = arith.mulf %175, %174 : vector<8x16x109xf32>
    %177 = arith.addf %172, %176 : vector<8x16x109xf32>
    %178 = vector.extract_strided_slice %153 {offsets = [0, 0, 5], sizes = [1, 16, 1], strides = [1, 1, 1]} : vector<1x16x8xf32> to vector<1x16x1xf32>
    %179 = vector.extract_strided_slice %151 {offsets = [0, 0, 5], sizes = [8, 16, 109], strides = [1, 1, 1]} : vector<8x16x116xf32> to vector<8x16x109xf32>
    %180 = vector.broadcast %178 : vector<1x16x1xf32> to vector<8x16x109xf32>
    %181 = arith.mulf %180, %179 : vector<8x16x109xf32>
    %182 = arith.addf %177, %181 : vector<8x16x109xf32>
    %183 = vector.extract_strided_slice %153 {offsets = [0, 0, 6], sizes = [1, 16, 1], strides = [1, 1, 1]} : vector<1x16x8xf32> to vector<1x16x1xf32>
    %184 = vector.extract_strided_slice %151 {offsets = [0, 0, 6], sizes = [8, 16, 109], strides = [1, 1, 1]} : vector<8x16x116xf32> to vector<8x16x109xf32>
    %185 = vector.broadcast %183 : vector<1x16x1xf32> to vector<8x16x109xf32>
    %186 = arith.mulf %185, %184 : vector<8x16x109xf32>
    %187 = arith.addf %182, %186 : vector<8x16x109xf32>
    %188 = vector.extract_strided_slice %153 {offsets = [0, 0, 7], sizes = [1, 16, 1], strides = [1, 1, 1]} : vector<1x16x8xf32> to vector<1x16x1xf32>
    %189 = vector.extract_strided_slice %151 {offsets = [0, 0, 7], sizes = [8, 16, 109], strides = [1, 1, 1]} : vector<8x16x116xf32> to vector<8x16x109xf32>
    %190 = vector.broadcast %188 : vector<1x16x1xf32> to vector<8x16x109xf32>
    %191 = arith.mulf %190, %189 : vector<8x16x109xf32>
    %192 = arith.addf %187, %191 : vector<8x16x109xf32>
    %c0_56 = arith.constant 0 : index
    %c0_57 = arith.constant 0 : index
    %193 = vector.load %arg10[%c0_56, %c0_57] : memref<16x16xf32, #tpu.memory_space<vmem>>, vector<16x16xf32>
    %194 = vector.shape_cast %193 : vector<16x16xf32> to vector<1x16x16xf32>
    %195 = vector.shape_cast %194 : vector<1x16x16xf32> to vector<1x16x16xf32>
    %196 = vector.broadcast %195 : vector<1x16x16xf32> to vector<8x16x16xf32>
    "tpu.trace_start"() <{level = 10 : i32, message = "bfc,bcw->bfw"}> : () -> ()
    %cst_58 = arith.constant dense<0.000000e+00> : vector<8x16x109xf32>
    %197 = tpu.matmul %196, %192, %cst_58 {dimension_numbers = #tpu.dot_dimension_numbers<[2], [1], [1], [2], [0, 0, 0, 1, 1, 2], [0], [0]>} : vector<8x16x16xf32>, vector<8x16x109xf32>, vector<8x16x109xf32> -> vector<8x16x109xf32>
    "tpu.trace_stop"() : () -> ()
    %c0_59 = arith.constant 0 : index
    %c0_60 = arith.constant 0 : index
    %198 = vector.load %arg11[%c0_59, %c0_60] : memref<16x1xf32, #tpu.memory_space<vmem>>, vector<16x1xf32>
    %199 = vector.shape_cast %198 : vector<16x1xf32> to vector<1x16x1xf32>
    %200 = vector.broadcast %199 : vector<1x16x1xf32> to vector<8x16x109xf32>
    %201 = arith.addf %197, %200 : vector<8x16x109xf32>
    %202 = math.absf %201 : vector<8x16x109xf32>
    %cst_61 = arith.constant 0.000000e+00 : f32
    %203 = vector.broadcast %cst_61 : f32 to vector<8x16x109xf32>
    %204 = arith.subf %203, %202 : vector<8x16x109xf32>
    %205 = math.exp %204 : vector<8x16x109xf32>
    %cst_62 = arith.constant 0.000000e+00 : f32
    %206 = vector.broadcast %cst_62 : f32 to vector<8x16x109xf32>
    %207 = arith.cmpf oge, %201, %206 : vector<8x16x109xf32>
    %cst_63 = arith.constant 1.000000e+00 : f32
    %208 = vector.broadcast %cst_63 : f32 to vector<8x16x109xf32>
    %209 = arith.subf %208, %205 : vector<8x16x109xf32>
    %cst_64 = arith.constant 1.000000e+00 : f32
    %210 = vector.broadcast %cst_64 : f32 to vector<8x16x109xf32>
    %211 = arith.subf %205, %210 : vector<8x16x109xf32>
    %212 = arith.select %207, %209, %211 : vector<8x16x109xi1>, vector<8x16x109xf32>
    %213 = vector.extract_strided_slice %212 {offsets = [0, 0, 0], sizes = [8, 16, 108], strides = [1, 1, 1]} : vector<8x16x109xf32> to vector<8x16x108xf32>
    %214 = vector.shape_cast %213 : vector<8x16x108xf32> to vector<128x108xf32>
    %c0_65 = arith.constant 0 : index
    %c0_66 = arith.constant 0 : index
    %215 = vector.load %arg15[%c0_65, %c0_66] : memref<108x27xf32, #tpu.memory_space<vmem>>, vector<108x27xf32>
    %cst_67 = arith.constant dense<0.000000e+00> : vector<128x27xf32>
    %216 = tpu.matmul %214, %215, %cst_67 {dimension_numbers = #tpu.dot_dimension_numbers<[1], [0], [0], [1], [0, 0, 1, 1], [], []>} : vector<128x108xf32>, vector<108x27xf32>, vector<128x27xf32> -> vector<128x27xf32>
    %217 = vector.shape_cast %216 : vector<128x27xf32> to vector<8x16x27xf32>
    %218 = vector.extract_strided_slice %217 {offsets = [0, 0, 0], sizes = [8, 16, 24], strides = [1, 1, 1]} : vector<8x16x27xf32> to vector<8x16x24xf32>
    %219 = vector.extract_strided_slice %217 {offsets = [0, 0, 1], sizes = [8, 16, 24], strides = [1, 1, 1]} : vector<8x16x27xf32> to vector<8x16x24xf32>
    %220 = vector.extract_strided_slice %217 {offsets = [0, 0, 2], sizes = [8, 16, 24], strides = [1, 1, 1]} : vector<8x16x27xf32> to vector<8x16x24xf32>
    %221 = vector.extract_strided_slice %217 {offsets = [0, 0, 3], sizes = [8, 16, 24], strides = [1, 1, 1]} : vector<8x16x27xf32> to vector<8x16x24xf32>
    %222 = tpu.concatenate %218, %219, %220, %221 in 1 : vector<8x16x24xf32>, vector<8x16x24xf32>, vector<8x16x24xf32>, vector<8x16x24xf32> -> vector<8x64x24xf32>
    %c0_68 = arith.constant 0 : index
    %c0_69 = arith.constant 0 : index
    %223 = vector.load %arg12[%c0_68, %c0_69] : memref<16x64xf32, #tpu.memory_space<vmem>>, vector<16x64xf32>
    %224 = vector.shape_cast %223 : vector<16x64xf32> to vector<1x16x64xf32>
    %225 = vector.shape_cast %224 : vector<1x16x64xf32> to vector<1x16x64xf32>
    %226 = vector.broadcast %225 : vector<1x16x64xf32> to vector<8x16x64xf32>
    "tpu.trace_start"() <{level = 10 : i32, message = "bgc,bcw->bgw"}> : () -> ()
    %cst_70 = arith.constant dense<0.000000e+00> : vector<8x16x24xf32>
    %227 = tpu.matmul %226, %222, %cst_70 {dimension_numbers = #tpu.dot_dimension_numbers<[2], [1], [1], [2], [0, 0, 0, 1, 1, 2], [0], [0]>} : vector<8x16x64xf32>, vector<8x64x24xf32>, vector<8x16x24xf32> -> vector<8x16x24xf32>
    "tpu.trace_stop"() : () -> ()
    %c0_71 = arith.constant 0 : index
    %c0_72 = arith.constant 0 : index
    %228 = vector.load %arg13[%c0_71, %c0_72] : memref<16x1xf32, #tpu.memory_space<vmem>>, vector<16x1xf32>
    %229 = vector.shape_cast %228 : vector<16x1xf32> to vector<1x16x1xf32>
    %230 = vector.broadcast %229 : vector<1x16x1xf32> to vector<8x16x24xf32>
    %231 = arith.addf %227, %230 : vector<8x16x24xf32>
    %232 = math.absf %231 : vector<8x16x24xf32>
    %cst_73 = arith.constant 0.000000e+00 : f32
    %233 = vector.broadcast %cst_73 : f32 to vector<8x16x24xf32>
    %234 = arith.subf %233, %232 : vector<8x16x24xf32>
    %235 = math.exp %234 : vector<8x16x24xf32>
    %cst_74 = arith.constant 0.000000e+00 : f32
    %236 = vector.broadcast %cst_74 : f32 to vector<8x16x24xf32>
    %237 = arith.cmpf oge, %231, %236 : vector<8x16x24xf32>
    %cst_75 = arith.constant 1.000000e+00 : f32
    %238 = vector.broadcast %cst_75 : f32 to vector<8x16x24xf32>
    %239 = arith.subf %238, %235 : vector<8x16x24xf32>
    %cst_76 = arith.constant 1.000000e+00 : f32
    %240 = vector.broadcast %cst_76 : f32 to vector<8x16x24xf32>
    %241 = arith.subf %235, %240 : vector<8x16x24xf32>
    %242 = arith.select %237, %239, %241 : vector<8x16x24xi1>, vector<8x16x24xf32>
    %c0_77 = arith.constant 0 : index
    %c0_78 = arith.constant 0 : index
    %c0_79 = arith.constant 0 : index
    %243 = vector.load %arg16[%c0_77, %c0_78, %c0_79] : memref<4x16x24xf32, #tpu.memory_space<vmem>>, vector<1x16x24xf32>
    %244 = vector.shape_cast %243 : vector<1x16x24xf32> to vector<16x24xf32>
    %245 = vector.shape_cast %244 : vector<16x24xf32> to vector<1x16x24xf32>
    %246 = vector.broadcast %245 : vector<1x16x24xf32> to vector<8x16x24xf32>
    %247 = arith.mulf %242, %246 : vector<8x16x24xf32>
    %cst_80 = arith.constant dense<0.000000e+00> : vector<8x16xf32>
    %248 = vector.multi_reduction <add>, %247, %cst_80 [2] : vector<8x16x24xf32> to vector<8x16xf32>
    %249 = vector.shape_cast %248 : vector<8x16xf32> to vector<8x16x1xf32>
    %cst_81 = arith.constant dense<0.000000e+00> : vector<8x1xf32>
    %250 = vector.multi_reduction <add>, %249, %cst_81 [1] : vector<8x16x1xf32> to vector<8x1xf32>
    %251 = vector.shape_cast %250 : vector<8x1xf32> to vector<8x1x1xf32>
    %c1_82 = arith.constant 1 : index
    %c0_83 = arith.constant 0 : index
    %c0_84 = arith.constant 0 : index
    %252 = vector.load %arg16[%c1_82, %c0_83, %c0_84] : memref<4x16x24xf32, #tpu.memory_space<vmem>>, vector<1x16x24xf32>
    %253 = vector.shape_cast %252 : vector<1x16x24xf32> to vector<16x24xf32>
    %254 = vector.shape_cast %253 : vector<16x24xf32> to vector<1x16x24xf32>
    %255 = vector.broadcast %254 : vector<1x16x24xf32> to vector<8x16x24xf32>
    %256 = arith.mulf %242, %255 : vector<8x16x24xf32>
    %cst_85 = arith.constant dense<0.000000e+00> : vector<8x16xf32>
    %257 = vector.multi_reduction <add>, %256, %cst_85 [2] : vector<8x16x24xf32> to vector<8x16xf32>
    %258 = vector.shape_cast %257 : vector<8x16xf32> to vector<8x16x1xf32>
    %cst_86 = arith.constant dense<0.000000e+00> : vector<8x1xf32>
    %259 = vector.multi_reduction <add>, %258, %cst_86 [1] : vector<8x16x1xf32> to vector<8x1xf32>
    %260 = vector.shape_cast %259 : vector<8x1xf32> to vector<8x1x1xf32>
    %c2_87 = arith.constant 2 : index
    %c0_88 = arith.constant 0 : index
    %c0_89 = arith.constant 0 : index
    %261 = vector.load %arg16[%c2_87, %c0_88, %c0_89] : memref<4x16x24xf32, #tpu.memory_space<vmem>>, vector<1x16x24xf32>
    %262 = vector.shape_cast %261 : vector<1x16x24xf32> to vector<16x24xf32>
    %263 = vector.shape_cast %262 : vector<16x24xf32> to vector<1x16x24xf32>
    %264 = vector.broadcast %263 : vector<1x16x24xf32> to vector<8x16x24xf32>
    %265 = arith.mulf %242, %264 : vector<8x16x24xf32>
    %cst_90 = arith.constant dense<0.000000e+00> : vector<8x16xf32>
    %266 = vector.multi_reduction <add>, %265, %cst_90 [2] : vector<8x16x24xf32> to vector<8x16xf32>
    %267 = vector.shape_cast %266 : vector<8x16xf32> to vector<8x16x1xf32>
    %cst_91 = arith.constant dense<0.000000e+00> : vector<8x1xf32>
    %268 = vector.multi_reduction <add>, %267, %cst_91 [1] : vector<8x16x1xf32> to vector<8x1xf32>
    %269 = vector.shape_cast %268 : vector<8x1xf32> to vector<8x1x1xf32>
    %c3 = arith.constant 3 : index
    %c0_92 = arith.constant 0 : index
    %c0_93 = arith.constant 0 : index
    %270 = vector.load %arg16[%c3, %c0_92, %c0_93] : memref<4x16x24xf32, #tpu.memory_space<vmem>>, vector<1x16x24xf32>
    %271 = vector.shape_cast %270 : vector<1x16x24xf32> to vector<16x24xf32>
    %272 = vector.shape_cast %271 : vector<16x24xf32> to vector<1x16x24xf32>
    %273 = vector.broadcast %272 : vector<1x16x24xf32> to vector<8x16x24xf32>
    %274 = arith.mulf %242, %273 : vector<8x16x24xf32>
    %cst_94 = arith.constant dense<0.000000e+00> : vector<8x16xf32>
    %275 = vector.multi_reduction <add>, %274, %cst_94 [2] : vector<8x16x24xf32> to vector<8x16xf32>
    %276 = vector.shape_cast %275 : vector<8x16xf32> to vector<8x16x1xf32>
    %cst_95 = arith.constant dense<0.000000e+00> : vector<8x1xf32>
    %277 = vector.multi_reduction <add>, %276, %cst_95 [1] : vector<8x16x1xf32> to vector<8x1xf32>
    %278 = vector.shape_cast %277 : vector<8x1xf32> to vector<8x1x1xf32>
    %279 = tpu.concatenate %251, %260, %269, %278 in 2 : vector<8x1x1xf32>, vector<8x1x1xf32>, vector<8x1x1xf32>, vector<8x1x1xf32> -> vector<8x1x4xf32>
    %280 = vector.shape_cast %279 : vector<8x1x4xf32> to vector<8x4xf32>
    %c0_96 = arith.constant 0 : index
    %c0_97 = arith.constant 0 : index
    %281 = vector.load %arg17[%c0_96, %c0_97] : memref<1x4xf32, #tpu.memory_space<vmem>>, vector<1x4xf32>
    %282 = vector.broadcast %281 : vector<1x4xf32> to vector<8x4xf32>
    %283 = arith.addf %280, %282 : vector<8x4xf32>
    %cst_98 = arith.constant dense<0xFF800000> : vector<8xf32>
    %284 = vector.multi_reduction <maximumf>, %283, %cst_98 [1] : vector<8x4xf32> to vector<8xf32>
    %285 = vector.shape_cast %284 : vector<8xf32> to vector<8x1xf32>
    %286 = vector.broadcast %285 : vector<8x1xf32> to vector<8x4xf32>
    %287 = arith.subf %283, %286 : vector<8x4xf32>
    %288 = math.exp %287 : vector<8x4xf32>
    %cst_99 = arith.constant dense<0.000000e+00> : vector<8xf32>
    %289 = vector.multi_reduction <add>, %288, %cst_99 [1] : vector<8x4xf32> to vector<8xf32>
    %290 = vector.shape_cast %289 : vector<8xf32> to vector<8x1xf32>
    %291 = vector.broadcast %290 : vector<8x1xf32> to vector<8x4xf32>
    %292 = arith.divf %288, %291 : vector<8x4xf32>
    %cst_100 = arith.constant 0.000000e+00 : f32
    %293 = vector.broadcast %cst_100 : f32 to vector<8x124xf32>
    %294 = tpu.concatenate %292, %293 in 1 : vector<8x4xf32>, vector<8x124xf32> -> vector<8x128xf32>
    %c0_101 = arith.constant 0 : index
    %c0_102 = arith.constant 0 : index
    %295 = vector.load %arg18[%c0_101, %c0_102] : memref<8x128xf32, #tpu.memory_space<vmem>>, vector<8x128xf32>
    tpu.vector_store %arg18[%c0_101, %c0_102], %294 {strides = array<i32>} : memref<8x128xf32, #tpu.memory_space<vmem>>, vector<8x128xf32>,
    return
  }
  func.func @transform_0(%arg0: i32) -> (i32, i32, i32) {
    %c0_i32 = arith.constant 0 : i32
    %c0_i32_0 = arith.constant 0 : i32
    %c0_i32_1 = arith.constant 0 : i32
    return %arg0, %c0_i32, %c0_i32_0 : i32, i32, i32
  }
  func.func @transform_1(%arg0: i32) -> (i32, i32) {
    %c0_i32 = arith.constant 0 : i32
    %c0_i32_0 = arith.constant 0 : i32
    %c0_i32_1 = arith.constant 0 : i32
    return %c0_i32, %c0_i32_0 : i32, i32
  }
  func.func @transform_2(%arg0: i32) -> (i32, i32) {
    %c0_i32 = arith.constant 0 : i32
    %c0_i32_0 = arith.constant 0 : i32
    %c0_i32_1 = arith.constant 0 : i32
    return %c0_i32, %c0_i32_0 : i32, i32
  }
  func.func @transform_3(%arg0: i32) -> (i32, i32) {
    %c0_i32 = arith.constant 0 : i32
    %c0_i32_0 = arith.constant 0 : i32
    %c0_i32_1 = arith.constant 0 : i32
    return %c0_i32, %c0_i32_0 : i32, i32
  }
  func.func @transform_4(%arg0: i32) -> (i32, i32, i32) {
    %c0_i32 = arith.constant 0 : i32
    %c0_i32_0 = arith.constant 0 : i32
    %c0_i32_1 = arith.constant 0 : i32
    %c0_i32_2 = arith.constant 0 : i32
    return %c0_i32, %c0_i32_0, %c0_i32_1 : i32, i32, i32
  }
  func.func @transform_5(%arg0: i32) -> (i32, i32, i32) {
    %c0_i32 = arith.constant 0 : i32
    %c0_i32_0 = arith.constant 0 : i32
    %c0_i32_1 = arith.constant 0 : i32
    %c0_i32_2 = arith.constant 0 : i32
    return %c0_i32, %c0_i32_0, %c0_i32_1 : i32, i32, i32
  }
  func.func @transform_6(%arg0: i32) -> (i32, i32) {
    %c0_i32 = arith.constant 0 : i32
    %c0_i32_0 = arith.constant 0 : i32
    %c0_i32_1 = arith.constant 0 : i32
    return %c0_i32, %c0_i32_0 : i32, i32
  }
  func.func @transform_7(%arg0: i32) -> (i32, i32, i32) {
    %c0_i32 = arith.constant 0 : i32
    %c0_i32_0 = arith.constant 0 : i32
    %c0_i32_1 = arith.constant 0 : i32
    %c0_i32_2 = arith.constant 0 : i32
    return %c0_i32, %c0_i32_0, %c0_i32_1 : i32, i32, i32
  }
  func.func @transform_8(%arg0: i32) -> (i32, i32) {
    %c0_i32 = arith.constant 0 : i32
    %c0_i32_0 = arith.constant 0 : i32
    %c0_i32_1 = arith.constant 0 : i32
    return %c0_i32, %c0_i32_0 : i32, i32
  }
  func.func @transform_9(%arg0: i32) -> (i32, i32) {
    %c0_i32 = arith.constant 0 : i32
    %c0_i32_0 = arith.constant 0 : i32
    %c0_i32_1 = arith.constant 0 : i32
    return %c0_i32, %c0_i32_0 : i32, i32
  }
  func.func @transform_10(%arg0: i32) -> (i32, i32) {
    %c0_i32 = arith.constant 0 : i32
    %c0_i32_0 = arith.constant 0 : i32
    %c0_i32_1 = arith.constant 0 : i32
    return %c0_i32, %c0_i32_0 : i32, i32
  }
  func.func @transform_11(%arg0: i32) -> (i32, i32) {
    %c0_i32 = arith.constant 0 : i32
    %c0_i32_0 = arith.constant 0 : i32
    %c0_i32_1 = arith.constant 0 : i32
    return %c0_i32, %c0_i32_0 : i32, i32
  }
  func.func @transform_12(%arg0: i32) -> (i32, i32) {
    %c0_i32 = arith.constant 0 : i32
    %c0_i32_0 = arith.constant 0 : i32
    %c0_i32_1 = arith.constant 0 : i32
    return %c0_i32, %c0_i32_0 : i32, i32
  }
  func.func @transform_13(%arg0: i32) -> (i32, i32) {
    %c0_i32 = arith.constant 0 : i32
    %c0_i32_0 = arith.constant 0 : i32
    %c0_i32_1 = arith.constant 0 : i32
    return %c0_i32, %c0_i32_0 : i32, i32
  }
  func.func @transform_14(%arg0: i32) -> (i32, i32) {
    %c0_i32 = arith.constant 0 : i32
    %c0_i32_0 = arith.constant 0 : i32
    %c0_i32_1 = arith.constant 0 : i32
    return %c0_i32, %c0_i32_0 : i32, i32
  }
  func.func @transform_15(%arg0: i32) -> (i32, i32, i32) {
    %c0_i32 = arith.constant 0 : i32
    %c0_i32_0 = arith.constant 0 : i32
    %c0_i32_1 = arith.constant 0 : i32
    %c0_i32_2 = arith.constant 0 : i32
    return %c0_i32, %c0_i32_0, %c0_i32_1 : i32, i32, i32
  }
  func.func @transform_16(%arg0: i32) -> (i32, i32) {
    %c0_i32 = arith.constant 0 : i32
    %c0_i32_0 = arith.constant 0 : i32
    %c0_i32_1 = arith.constant 0 : i32
    return %c0_i32, %c0_i32_0 : i32, i32
  }
  func.func @transform_17(%arg0: i32) -> (i32, i32) {
    %c0_i32 = arith.constant 0 : i32
    %c0_i32_0 = arith.constant 0 : i32
    return %arg0, %c0_i32 : i32, i32
  }
}

</mosaic_0001>

<bundles_post_ra>
// kernel: tpu_custom_call.1
= control target key start
LH: loop header
LB: loop body
LE: loop exit
PB: predicated region body
PF: predicated region fallthrough
CT: control target
= control target key end

     0   :  { %s14652_s0 = inlined_call_operand.vmem [shape: f32[16,4,240], index: 0, kind: input, shape index: {}]   ;;  %s14653_s1 = inlined_call_operand.vmem [shape: f32[16,4], index: 1, kind: input, shape index: {}]   ;;  %s14654_s2 = inlined_call_operand.hbm [shape: f32[8,8], index: 2, kind: input, shape index: {}]   ;;  %s14655_s3 = inlined_call_operand.vmem [shape: f32[16,8], index: 3, kind: input, shape index: {}]   ;;  %s14656_s4 = inlined_call_operand.vmem [shape: f32[3,1,1], index: 4, kind: input, shape index: {}]   ;;  %s14657_s5 = inlined_call_operand.vmem [shape: f32[2,8,1], index: 5, kind: input, shape index: {}]   ;;  %s14658_s6 = inlined_call_operand.vmem [shape: f32[16,8], index: 6, kind: input, shape index: {}]   ;;  %s14659_s7 = inlined_call_operand.vmem [shape: f32[3,16,1], index: 7, kind: input, shape index: {}]   ;;  %s14660_s8 = inlined_call_operand.vmem [shape: f32[16,8], index: 8, kind: input, shape index: {}]   ;;  %s14661_s9 = inlined_call_operand.hbm [shape: f32[16,16], index: 9, kind: input, shape index: {}]   ;;  %s14662_s10 = inlined_call_operand.vmem [shape: f32[16,1], index: 10, kind: input, shape index: {}]   ;;  %s14663_s11 = inlined_call_operand.hbm [shape: f32[16,64], index: 11, kind: input, shape index: {}]   ;;  %s14664_s12 = inlined_call_operand.vmem [shape: f32[16,1], index: 12, kind: input, shape index: {}]   ;;  %s14665_s13 = inlined_call_operand.vmem [shape: f32[232,116], index: 13, kind: input, shape index: {}]   ;;  %s14666_s14 = inlined_call_operand.vmem [shape: f32[108,27], index: 14, kind: input, shape index: {}]   ;;  %s14667_s15 = inlined_call_operand.hbm [shape: f32[4,16,24], index: 15, kind: input, shape index: {}]   ;;  %s14668_s16 = inlined_call_operand.vmem [shape: f32[1,4], index: 16, kind: input, shape index: {}]   ;;  %s14669_s17 = inlined_call_operand.hbm [shape: f32[16,128], index: 17, kind: output, shape index: {}]  }
   0x1   :  { %14788 = sst [smem:[#allocation58_spill]] %s14652_s0 }
   0x2   :  { %14789 = sst [smem:[#allocation59_spill]] %s14653_s1 }
   0x3   :  { %14790 = sst [smem:[#allocation60_spill]] %s14654_s2 }
   0x4   :  { %22 = vsyncpa [#allocation3], 0 }
   0x5   :  { %23 = vsyncpa [#allocation6], 0 }
   0x6   :  { %24 = vsyncpa [#allocation9], 0 }
   0x7   :  { %25 = vsyncpa [#allocation4], 0 }
   0x8   :  { %27 = vsyncpa [#allocation4 + $0x1], 0  ;;  %s10141_s24 = smov 0   ;;  %s10143_s25 = smov 0  }
   0x9   :  { %s10145_s26 = smov 0   ;;  %s10147_s27 = smov 0  }
   0xa LB: > { %14791 = sst [smem:[#allocation15_spill]] %s10014_s24  ;;  %s10162_s28 = sadd.s32 4294967295, %s10026_s27   ;;  %s10026_s27 = sphi %s10147_s27, %s15016_s27   ;;  %s10022_s26 = sphi %s10145_s26, %s15018_s26   ;;  %s10018_s25 = sphi %s10143_s25, %s15020_s25   ;;  %s10014_s24 = sphi %s10141_s24, %s15019_s24  }
   0xb   : > { %14792 = sst [smem:[#allocation16_spill]] %s10022_s26  ;;  %s8837_s29 = sadd.s32 4294967294, %s10026_s27  }
   0xc   : > { %14793 = sst [smem:[#allocation17_spill]] %s10026_s27  ;;  %s10166_s0 = sadd.s32 1, %s10026_s27  }
   0xd   : > { %14794 = sst [smem:[#allocation18_spill]] %s10166_s0  ;;  %s402_s30 = sadd.s32 1, %s10022_s26 }
   0xe   : > { %s399_s18 = ssub.s32 %s10026_s27, %s10166_s0  ;;  %p412_p0 = scmp.ne.s32.totalorder %s10022_s26, %s10018_s25 }
   0xf   : > { %p400_p1 = scmp.eq.s32.totalorder %s399_s18, 0  ;;  %p413_p2 = scmp.eq.s32.totalorder %s10162_s28, 1 }
  0x10   : > { %p418_p3 = scmp.ne.s32.totalorder %s10018_s25, %s10014_s24  ;;  %p419_p4 = scmp.eq.s32.totalorder %s8837_s29, 1 }
  0x11   : > { %s10177_s19 = scalar_select %p400_p1, %s10022_s26, %s402_s30  }
  0x12   : > { %p10179_p5 = por %p413_p2, %p412_p0  ;;  %p10183_p6 = por %p419_p4, %p418_p3 }
  0x13   : > { %14795 = sst [smem:[#allocation19_spill]] %s10177_s19  ;;  %p8838_p7 = scmp.ge.s32.totalorder %s10026_s27, 1 }
  0x14   : > { %s14796_s1 = scalar_select %p10179_p5, 1, 0 }
  0x15   : > { %s14797_s20 = scalar_select %p10183_p6, 1, 0 }
  0x16   : > { %p426_p8 = scmp.lt.s32.totalorder %s10026_s27, 3  ;;  %p14677_p9 = scmp.eq.s32.totalorder %s10162_s28, 0 }
  0x17   : > { %14798 = sst [smem:[#allocation20_spill]] %s14797_s20  ;;  %s10028_s22 = smov [#allocation5]  }
  0x18   : > { %p10190_p10 = pnand %p8838_p7, %p426_p8  ;;  %s470_s23 = sshll.u32 %s10028_s22, 4  ;;  %s471_s23 = int_to_ptr.vmem [resolvable:$true] %s470_s23 }
  0x19   : > { %s10029_s30 = smov [#allocation2]   ;;  %s10030_s19 = smov [#allocation7]  }
  0x1a   : > { %p9538_p11 = pneg %p10190_p10  ;;  %s442_s18 = sshll.u32 %s10029_s30, 4  ;;  %s443_s18 = int_to_ptr.vmem [resolvable:$true] %s442_s18 }
  0x1b   : > { %s486_s26 = sshll.u32 %s10030_s19, 4  ;;  %s9861_s0 = scalar_lea.vmem %s471_s23, 256  ;;  %s487_s26 = int_to_ptr.vmem [resolvable:$true] %s486_s26 }
  0x1c   : > { %p10198_p12 = pnand %p14677_p9, %p9538_p11  ;;  %p9862_p0 = scmp.ne.s32.totalorder %s471_s23, %s9861_s0 }
  0x1d   : > { %p9869_p3 = scmp.lt.s32.totalorder %s471_s23, %s471_s23  ;;  %p9870_p4 = scmp.lt.s32.totalorder %s9861_s0, %s9861_s0 }
  0x1e   : > { %p9852_p13 = pneg %p10198_p12 }
  0x1f   : > { %p9871_p7 = por %p9870_p4, %p9869_p3 }
  0x20   : > { %p9864_p1 = pnand %p9862_p0, %p9852_p13 }
  0x22   : > { %p9865_p2 = pneg %p9864_p1 }
  0x24   : > { %p9872_p8 = pnand %p9871_p7, %p9865_p2 }
  0x26   : > { %9875 = shalt.err (!%p9872_p8)
}
  0x27   : > { %s10031_s22 = smov 128   ;;  %s10032_s30 = smov 8  }
  0x28   : > { %9544 = dma.hbm_to_vmem [thread:$0]  (!%p10198_p12), %s14661_s9, 256, %s471_s23, [#allocation6], %s10031_s22, %s10031_s22, %s10032_s30  }
  0x29   : > { %s9887_s24 = scalar_lea.vmem %s443_s18, 128  ;;  %p9895_p2 = scmp.lt.s32.totalorder %s443_s18, %s443_s18 }
  0x2a   : > { %p9888_p11 = scmp.ne.s32.totalorder %s443_s18, %s9887_s24  ;;  %p9896_p3 = scmp.lt.s32.totalorder %s9887_s24, %s9887_s24 }
  0x2c   : > { %p9890_p0 = pnand %p9888_p11, %p9852_p13  ;;  %p9897_p4 = por %p9896_p3, %p9895_p2 }
  0x2e   : > { %p9891_p1 = pneg %p9890_p0 }
  0x30   : > { %p9898_p7 = pnand %p9897_p4, %p9891_p1 }
  0x32   : > { %9901 = shalt.err (!%p9898_p7)
}
  0x33   : > { %s14801_s2 = sld [smem:[#allocation60_spill]]  ;;  %s9913_s20 = scalar_lea.vmem %s487_s26, 256 }
  0x34   : > { %p9914_p8 = scmp.ne.s32.totalorder %s487_s26, %s9913_s20  ;;  %p9921_p0 = scmp.lt.s32.totalorder %s487_s26, %s487_s26 }
  0x35   : > { %p9922_p6 = scmp.lt.s32.totalorder %s9913_s20, %s9913_s20 }
  0x36   : > { %p9916_p9 = pnand %p9914_p8, %p9852_p13 }
  0x37   : > { %p9923_p5 = por %p9922_p6, %p9921_p0 }
  0x38   : > { %p9917_p11 = pneg %p9916_p9 }
  0x39   : > { %9541 = dma.hbm_to_vmem [thread:$0]  (!%p10198_p12), %s14801_s2, 128, %s443_s18, [#allocation3]  }
  0x3a   : > { %p9924_p2 = pnand %p9923_p5, %p9917_p11 }
  0x3c   : > { %9927 = shalt.err (!%p9924_p2)
}
  0x3d   : > { %9547 = dma.hbm_to_vmem [thread:$0]  (!%p10198_p12), %s14663_s11, 256, %s487_s26, [#allocation6], %s10031_s22, %s10031_s22, %s10032_s30  }
  0x3e   : > { %s10033_s23 = smov [#allocation8]  }
  0x3f   : > { %s508_s18 = sshll.u32 %s10033_s23, 4  ;;  %s509_s18 = int_to_ptr.vmem [resolvable:$true] %s508_s18 }
  0x40   : > { %s9939_s19 = scalar_lea.vmem %s509_s18, 1024  ;;  %p9947_p1 = scmp.lt.s32.totalorder %s509_s18, %s509_s18 }
  0x41   : > { %p9940_p9 = scmp.ne.s32.totalorder %s509_s18, %s9939_s19  ;;  %p9948_p3 = scmp.lt.s32.totalorder %s9939_s19, %s9939_s19 }
  0x43   : > { %p9942_p6 = pnand %p9940_p9, %p9852_p13  ;;  %p9949_p4 = por %p9948_p3, %p9947_p1 }
  0x45   : > { %p9943_p5 = pneg %p9942_p6 }
  0x47   : > { %p9950_p7 = pnand %p9949_p4, %p9943_p5 }
  0x49   : > { %9953 = shalt.err (!%p9950_p7)
}
  0x4a   : > { %9550 = dma.hbm_to_vmem [thread:$0]  (!%p10198_p12), %s14667_s15, 1024, %s509_s18, [#allocation9], %s10031_s22, %s10031_s22, %s10032_s30  }
  0x4b   : > { %537 = sbr.rel (%p10190_p10) target bundleno = 3318 (0xcf6), region = 88 }
  0x50   : > { %p14802_p13 = scmp.eq.s32.totalorder %s10162_s28, 0 }
  0x52   : > { %9997 = dma.done.wait (%p14802_p13), [#allocation3], 128   ;;  %p14803_p8 = pmov %p14802_p13 }
  0x54   : > { %9999 = vsyncadd (%p14803_p8), [#allocation3], 4294967168  ;;  %p14804_p11 = pmov %p14803_p8 }
  0x55   : > { %p14805_p0 = pmov %p14803_p8 }
  0x56   : > { %10001 = dma.done.wait (%p14804_p11), [#allocation6], 512  }
  0x57   : > { %10003 = vsyncadd (%p14805_p0), [#allocation6], 4294966784  ;;  %p14806_p2 = pmov %p14805_p0 }
  0x58   : > { %p14807_p12 = pmov %p14805_p0 }
  0x59   : > { %10005 = dma.done.wait (%p14806_p2), [#allocation9], 1024  }
  0x5a   : > { %10007 = vsyncadd (%p14807_p12), [#allocation9], 4294966272  ;;  %s8850_s21 = sshll.u32 %s10162_s28, 3  ;;  %vm14705_vm0 = vcmask 1043456   ;;  %s14808_s20 = sld [smem:[#allocation58_spill]]  ;;  %vm1306_vm1 = vcmask 912384  }
  0x5b   : > { %p603_p10 = scmp.lt.s32.totalorder %s8850_s21, 15  ;;  %s10034_s27 = smov 126   ;;  %vm1429_vm2 = vcmask 859136   ;;  %vm1510_vm3 = vcmask 1039360   ;;  %vm1599_vm4 = vcmask 1031168   ;;  %vm1688_vm5 = vcmask 1022976  }
  0x5c   : > { %s10035_s23 = smov 127   ;;  %s14714_s18 = smov 125   ;;  %vm1777_vm6 = vcmask 1014784   ;;  %vm1866_vm7 = vcmask 1006592   ;;  %vm1955_vm8 = vcmask 998400   ;;  %vm2044_vm9 = vcmask 990208  }
  0x5d   : > { %s15022_s21 = smov (!%p603_p10, %s8850_s21), 15  ;;  %s14712_s19 = smov 124   ;;  %vm621_vm10 = vcmask 31744   ;;  %vm2101_vm11 = vcmask 7168   ;;  %vm2110_vm12 = vcmask 15360   ;;  %vm2119_vm13 = vcmask 23552  }
  0x5e   : > { %s9053_s29 = sshll.u32 %s15022_s21, 3  ;;  %s14710_s26 = smov 123   ;;  %vm2136_vm14 = vcmask 39936   ;;  %vm2145_vm15 = vcmask 48128  }
  0x5f   : > { %s14708_s0 = smov 122   ;;  %s14706_s21 = smov 121  }
  0x60   : > { %s10263_s24 = scalar_lea.vmem %s14808_s20, %s9053_s29  ;;  %s14850_s30 = sld [smem:[#allocation59_spill]] }
  0x61   : > { %v609_v0 = vld [vmem:[%s10263_s24] sm:$0xff]  ;;  %v610_v1 = vld [vmem:[%s10263_s24 + $0x8] sm:$0xff]  ;;  %v10268_v2 = vld [vmem:[%s10263_s24 + $0x10] sm:$0xff]  ;;  %s14875_s22 = smov 121   ;;  %p15011_p6 = scmp.ne.s32.totalorder %s14796_s1, 0 }
  0x62   : > { %v1299_v3 = vsel %vm14705_vm0, %v609_v0, 0.0  ;;  %v620_v4 = vcombine.high %v609_v0, %v609_v0  ;;  %v711_v5 = vcombine.high %v610_v1, %v610_v1  ;;  %v10272_v6 = vld [vmem:[%s10263_s24 + $0x18] sm:$0xff]  ;;  %v794_v9 = vcombine.high %v10268_v2, %v10268_v2 }
  0x63   : > { %v1300_v7 = vrot.slane %v1299_v3, 4  ;;  %v10279_v10 = vcombine.high %v10272_v6, %v10272_v6  ;;  %v1314_v22 = vsel %vm14705_vm0, %v610_v1, 0.0  ;;  %v1328_v41 = vsel %vm14705_vm0, %v10268_v2, 0.0 }
  0x64   : > { %v1307_v8 = vsel %vm1306_vm1, %v620_v4, 0.0  ;;  %8853 = vmatprep.subr.msk.mxu0 %vm14705_vm0, %v620_v4  ;;  %8857 = vmatprep.subr.msk.mxu1 %vm14705_vm0, %v711_v5  ;;  %v1321_v21 = vsel %vm1306_vm1, %v711_v5, 0.0  ;;  %v1315_v27 = vrot.slane %v1314_v22, 4  ;;  %v1335_v40 = vsel %vm1306_vm1, %v794_v9, 0.0  ;;  %v613_v4 = vld [vmem:[%s10263_s24 + $0x20] sm:$0xff] }
  0x65   : > { %v1301_v11 = vadd.f32 %v1300_v7, %v1299_v3  ;;  %v1308_v12 = vrot.slane %v1307_v8, 4  ;;  %8854 = vmatpush1.msk.msra.mxu0 %vm14705_vm0, %v609_v0  ;;  %8858 = vmatpush1.msk.msra.mxu1 %vm14705_vm0, %v610_v1  ;;  %v1322_v26 = vrot.slane %v1321_v21, 4  ;;  %v1336_v42 = vrot.slane %v1335_v40, 4 }
  0x66   : > { %8865 = vmatprep.subr.msk.mxu1 %vm14705_vm0, %v10279_v10  ;;  %8861 = vmatprep.subr.msk.mxu0 %vm14705_vm0, %v794_v9  ;;  %v1316_v29 = vadd.f32 %v1315_v27, %v1314_v22  ;;  %v1329_v43 = vrot.slane %v1328_v41, 4  ;;  %v1349_v56 = vsel %vm1306_vm1, %v10279_v10, 0.0  ;;  %v1342_v57 = vsel %vm14705_vm0, %v10272_v6, 0.0  ;;  %v10424_v22 = vld [vmem:[%s10263_s24 + $0x28] sm:$0xff] }
  0x67   : > { %v1302_v13 = vrot.slane %v1301_v11, 2  ;;  %v1309_v14 = vadd.f32 %v1308_v12, %v1307_v8  ;;  %v1323_v28 = vadd.f32 %v1322_v26, %v1321_v21  ;;  %v1337_v44 = vadd.f32 %v1336_v42, %v1335_v40  ;;  %14810 = vst [vmem:[#allocation22_spill] sm:$0xff] %v10424_v22 }
  0x68   : > { %v1317_v31 = vrot.slane %v1316_v29, 2  ;;  %v1330_v45 = vadd.f32 %v1329_v43, %v1328_v41  ;;  %v1350_v58 = vrot.slane %v1349_v56, 4  ;;  %v1343_v59 = vrot.slane %v1342_v57, 4 }
  0x69   : > { %v1303_v15 = vadd.f32 %v1302_v13, %v1301_v11  ;;  %v1310_v16 = vrot.slane %v1309_v14, 2  ;;  %v1324_v30 = vrot.slane %v1323_v28, 2  ;;  %v1338_v46 = vrot.slane %v1337_v44, 2 }
  0x6a   : > { %v1318_v33 = vadd.f32 %v1317_v31, %v1316_v29  ;;  %v1331_v47 = vrot.slane %v1330_v45, 2  ;;  %v1351_v60 = vadd.f32 %v1350_v58, %v1349_v56  ;;  %v1344_v61 = vadd.f32 %v1343_v59, %v1342_v57 }
  0x6b   : > { %v1304_v17 = vrot.slane %v1303_v15, 1  ;;  %v1311_v18 = vadd.f32 %v1310_v16, %v1309_v14  ;;  %v1325_v32 = vadd.f32 %v1324_v30, %v1323_v28  ;;  %v1339_v48 = vadd.f32 %v1338_v46, %v1337_v44  ;;  %v10467_v44 = vld [vmem:[%s10263_s24 + $0x30] sm:$0xff] }
  0x6c   : > { %v1319_v35 = vrot.slane %v1318_v33, 1  ;;  %v1332_v49 = vadd.f32 %v1331_v47, %v1330_v45  ;;  %v1352_v62 = vrot.slane %v1351_v60, 2  ;;  %v1345_v63 = vrot.slane %v1344_v61, 2  ;;  %14813 = vst [vmem:[#allocation25_spill] sm:$0xff] %v10467_v44 }
  0x6d   : > { %v1305_v19 = vadd.f32 %v1304_v17, %v1303_v15  ;;  %v1312_v20 = vrot.slane %v1311_v18, 1  ;;  %v1326_v34 = vrot.slane %v1325_v32, 1  ;;  %v1340_v50 = vrot.slane %v1339_v48, 1 }
  0x6e   : > { %v1320_v37 = vadd.f32 %v1319_v35, %v1318_v33  ;;  %v1333_v51 = vrot.slane %v1332_v49, 1  ;;  %v1353_v0 = vadd.f32 %v1352_v62, %v1351_v60  ;;  %v1346_v1 = vadd.f32 %v1345_v63, %v1344_v61 }
  0x6f   : > { %v10290_v23 = vmul.f32 0.25, %v1305_v19  ;;  %v1313_v24 = vadd.f32 %v1312_v20, %v1311_v18  ;;  %v1327_v36 = vadd.f32 %v1326_v34, %v1325_v32  ;;  %v1341_v52 = vadd.f32 %v1340_v50, %v1339_v48 }
  0x70   : > { %v10324_v39 = vmul.f32 0.25, %v1320_v37  ;;  %v1334_v53 = vadd.f32 %v1333_v51, %v1332_v49  ;;  %v1354_v2 = vrot.slane %v1353_v0, 1  ;;  %v1347_v3 = vrot.slane %v1346_v1, 1 }
  0x71   : > { %1567 = vrot.lane.b32.xlu1 %v10290_v23, %s10034_s27  ;;  %1478 = vrot.lane.b32.xlu0 %v10290_v23, %s10035_s23  ;;  %v10296_v25 = vmul.f32 0.25, %v1313_v24  ;;  %v10322_v38 = vmul.f32 0.25, %v1327_v36  ;;  %v10357_v54 = vmul.f32 0.25, %v1341_v52  ;;  %v10390_v7 = vcombine.high %v613_v4, %v613_v4 }
  0x72   : > { %v10359_v55 = vmul.f32 0.25, %v1334_v53  ;;  %v1355_v5 = vadd.f32 %v1354_v2, %v1353_v0  ;;  %v1348_v6 = vadd.f32 %v1347_v3, %v1346_v1  ;;  %v1356_v11 = vsel %vm14705_vm0, %v613_v4, 0.0 }
  0x73   : > { %14809 = vst [vmem:[#allocation21_spill] sm:$0xff] %v10390_v7  ;;  %v1363_v10 = vsel %vm1306_vm1, %v10390_v7, 0.0  ;;  %v1357_v13 = vrot.slane %v1356_v11, 4  ;;  %v10432_v27 = vcombine.high %v10424_v22, %v10424_v22  ;;  %v1370_v31 = vsel %vm14705_vm0, %v10424_v22, 0.0 }
  0x74   : > { %v10396_v8 = vmul.f32 0.25, %v1355_v5  ;;  %v10398_v9 = vmul.f32 0.25, %v1348_v6  ;;  %v1364_v12 = vrot.slane %v1363_v10, 4  ;;  %v1371_v33 = vrot.slane %v1370_v31, 4 }
  0x75   : > { %1656 = vrot.lane.b32.xlu0 %v10290_v23, %s14714_s18  ;;  %1569 = vrot.lane.b32.xlu1 %v10296_v25, %s10034_s27  ;;  %v1358_v15 = vadd.f32 %v1357_v13, %v1356_v11  ;;  %14811 = vst [vmem:[#allocation23_spill] sm:$0xff] %v10432_v27  ;;  %v1377_v30 = vsel %vm1306_vm1, %v10432_v27, 0.0  ;;  %v10475_v47 = vcombine.high %v10467_v44, %v10467_v44  ;;  %v1384_v51 = vsel %vm14705_vm0, %v10467_v44, 0.0 }
  0x76   : > { %v1365_v14 = vadd.f32 %v1364_v12, %v1363_v10  ;;  %v1378_v32 = vrot.slane %v1377_v30, 4  ;;  %v1372_v35 = vadd.f32 %v1371_v33, %v1370_v31  ;;  %v1385_v53 = vrot.slane %v1384_v51, 4 }
  0x77   : > { %v1359_v17 = vrot.slane %v1358_v15, 2  ;;  %14814 = vst [vmem:[#allocation26_spill] sm:$0xff] %v10475_v47  ;;  %v1391_v50 = vsel %vm1306_vm1, %v10475_v47, 0.0 }
  0x78   : > { %v1366_v16 = vrot.slane %v1365_v14, 2  ;;  %v1379_v34 = vadd.f32 %v1378_v32, %v1377_v30  ;;  %v1373_v37 = vrot.slane %v1372_v35, 2  ;;  %v1392_v52 = vrot.slane %v1391_v50, 4 }
  0x79   : > { %1745 = vrot.lane.b32.xlu0 %v10290_v23, %s14712_s19  ;;  %1658 = vrot.lane.b32.xlu1 %v10296_v25, %s14714_s18  ;;  %v1360_v19 = vadd.f32 %v1359_v17, %v1358_v15  ;;  %v1386_v57 = vadd.f32 %v1385_v53, %v1384_v51 }
  0x7a   : > { %v1367_v18 = vadd.f32 %v1366_v16, %v1365_v14  ;;  %v1380_v36 = vrot.slane %v1379_v34, 2  ;;  %v1374_v41 = vadd.f32 %v1373_v37, %v1372_v35  ;;  %v1393_v56 = vadd.f32 %v1392_v52, %v1391_v50 }
  0x7b   : > { %v1361_v21 = vrot.slane %v1360_v19, 1  ;;  %v1387_v59 = vrot.slane %v1386_v57, 2  ;;  %v1430_v16 = vsel %vm1429_vm2, %v10296_v25, 0.0 }
  0x7c   : > { %v1368_v20 = vrot.slane %v1367_v18, 1  ;;  %v1381_v40 = vadd.f32 %v1380_v36, %v1379_v34  ;;  %v1375_v43 = vrot.slane %v1374_v41, 1  ;;  %v1394_v58 = vrot.slane %v1393_v56, 2  ;;  %v10579_v34 = vld [vmem:[%s10263_s24 + $0x38] sm:$0xff] }
  0x7d   : > { %1834 = vrot.lane.b32.xlu0 %v10290_v23, %s14710_s26  ;;  %1747 = vrot.lane.b32.xlu1 %v10296_v25, %s14712_s19  ;;  %v1362_v26 = vadd.f32 %v1361_v21, %v1360_v19  ;;  %v1388_v61 = vadd.f32 %v1387_v59, %v1386_v57  ;;  %v1431_v17 = vadd.f32 %v1430_v16, %v10290_v23  ;;  %v1398_v36 = vsel %vm14705_vm0, %v10579_v34, 0.0 }
  0x7e   : > { %v1369_v24 = vadd.f32 %v1368_v20, %v1367_v18  ;;  %v1382_v42 = vrot.slane %v1381_v40, 1  ;;  %v1376_v46 = vadd.f32 %v1375_v43, %v1374_v41  ;;  %v1395_v60 = vadd.f32 %v1394_v58, %v1393_v56  ;;  %14819 = vst [vmem:[#allocation31_spill] sm:$0xff] %v10579_v34 }
  0x7f   : > { %v10440_v29 = vmul.f32 0.25, %v1362_v26  ;;  %v1389_v63 = vrot.slane %v1388_v61, 1  ;;  %v10591_v43 = vcombine.high %v10579_v34, %v10579_v34 }
  0x80   : > { %v10438_v28 = vmul.f32 0.25, %v1369_v24  ;;  %v1383_v45 = vadd.f32 %v1382_v42, %v1381_v40  ;;  %v10483_v49 = vmul.f32 0.25, %v1376_v46  ;;  %v1396_v62 = vrot.slane %v1395_v60, 1 }
  0x81   : > { %1923 = vrot.lane.b32.xlu0 %v10290_v23, %s14708_s0  ;;  %1836 = vrot.lane.b32.xlu1 %v10296_v25, %s14710_s26  ;;  %14812 = vst [vmem:[#allocation24_spill] sm:$0xff] %v10440_v29  ;;  %v1390_v1 = vadd.f32 %v1389_v63, %v1388_v61  ;;  %v1399_v40 = vrot.slane %v1398_v36, 4  ;;  %14820 = vst [vmem:[#allocation32_spill] sm:$0xff] %v10591_v43  ;;  %v1405_v52 = vsel %vm1306_vm1, %v10591_v43, 0.0  ;;  %vm2154_vm1 = vcmask 56320  }
  0x82   : > { %v10481_v48 = vmul.f32 0.25, %v1383_v45  ;;  %14816 = vst [vmem:[#allocation28_spill] sm:$0xff] %v10483_v49  ;;  %v1397_v0 = vadd.f32 %v1396_v62, %v1395_v60  ;;  %v1406_v56 = vrot.slane %v1405_v52, 4 }
  0x83   : > { %v10519_v3 = vmul.f32 0.25, %v1390_v1  ;;  %v1400_v50 = vadd.f32 %v1399_v40, %v1398_v36 }
  0x84   : > { %14815 = vst [vmem:[#allocation27_spill] sm:$0xff] %v10481_v48  ;;  %v10517_v2 = vmul.f32 0.25, %v1397_v0  ;;  %v1407_v60 = vadd.f32 %v1406_v56, %v1405_v52 }
  0x85   : > { %2012 = vrot.lane.b32.xlu0 %v10290_v23, %s14706_s21  ;;  %1925 = vrot.lane.b32.xlu1 %v10296_v25, %s14708_s0  ;;  %14818 = vst [vmem:[#allocation30_spill] sm:$0xff] %v10519_v3  ;;  %v1401_v53 = vrot.slane %v1400_v50, 2 }
  0x86   : > { %14817 = vst [vmem:[#allocation29_spill] sm:$0xff] %v10517_v2  ;;  %v1408_v1 = vrot.slane %v1407_v60, 2 }
  0x87   : > { %v1402_v59 = vadd.f32 %v1401_v53, %v1400_v50 }
  0x88   : > { %v1409_v16 = vadd.f32 %v1408_v1, %v1407_v60 }
  0x89   : > { %2014 = vrot.lane.b32.xlu1 %v10296_v25, %s14706_s21  ;;  %1480 = vrot.lane.b32.xlu0 %v10296_v25, %s10035_s23  ;;  %v1403_v0 = vrot.slane %v1402_v59, 1 }
  0x8d   : > { %1484 = vrot.lane.b32.xlu1 %v10322_v38, %s10035_s23  ;;  %1482 = vrot.lane.b32.xlu0 %v10324_v39, %s10035_s23 }
  0x91   : > { %1573 = vrot.lane.b32.xlu1 %v10322_v38, %s10034_s27  ;;  %1571 = vrot.lane.b32.xlu0 %v10324_v39, %s10034_s27 }
  0x95   : > { %1662 = vrot.lane.b32.xlu1 %v10322_v38, %s14714_s18  ;;  %1660 = vrot.lane.b32.xlu0 %v10324_v39, %s14714_s18 }
  0x99   : > { %1751 = vrot.lane.b32.xlu1 %v10322_v38, %s14712_s19  ;;  %1749 = vrot.lane.b32.xlu0 %v10324_v39, %s14712_s19 }
  0x9d   : > { %1840 = vrot.lane.b32.xlu1 %v10322_v38, %s14710_s26  ;;  %1838 = vrot.lane.b32.xlu0 %v10324_v39, %s14710_s26 }
  0xa1   : > { %1929 = vrot.lane.b32.xlu1 %v10322_v38, %s14708_s0  ;;  %1927 = vrot.lane.b32.xlu0 %v10324_v39, %s14708_s0 }
  0xa5   : > { %2018 = vrot.lane.b32.xlu1 %v10322_v38, %s14706_s21  ;;  %2016 = vrot.lane.b32.xlu0 %v10324_v39, %s14706_s21 }
  0xa9   : > { %1488 = vrot.lane.b32.xlu1 %v10357_v54, %s10035_s23  ;;  %1486 = vrot.lane.b32.xlu0 %v10359_v55, %s10035_s23 }
  0xad   : > { %1577 = vrot.lane.b32.xlu1 %v10357_v54, %s10034_s27  ;;  %1575 = vrot.lane.b32.xlu0 %v10359_v55, %s10034_s27 }
  0xb1   : > { %1666 = vrot.lane.b32.xlu1 %v10357_v54, %s14714_s18  ;;  %1664 = vrot.lane.b32.xlu0 %v10359_v55, %s14714_s18 }
  0xb5   : > { %1755 = vrot.lane.b32.xlu1 %v10357_v54, %s14712_s19  ;;  %1753 = vrot.lane.b32.xlu0 %v10359_v55, %s14712_s19 }
  0xb9   : > { %1844 = vrot.lane.b32.xlu1 %v10357_v54, %s14710_s26  ;;  %1842 = vrot.lane.b32.xlu0 %v10359_v55, %s14710_s26 }
  0xbd   : > { %1933 = vrot.lane.b32.xlu1 %v10357_v54, %s14708_s0  ;;  %1931 = vrot.lane.b32.xlu0 %v10359_v55, %s14708_s0 }
  0xc1   : > { %2022 = vrot.lane.b32.xlu1 %v10357_v54, %s14706_s21  ;;  %2020 = vrot.lane.b32.xlu0 %v10359_v55, %s14706_s21 }
  0xc5   : > { %1492 = vrot.lane.b32.xlu1 %v10396_v8, %s10035_s23  ;;  %1490 = vrot.lane.b32.xlu0 %v10398_v9, %s10035_s23 }
  0xc9   : > { %1581 = vrot.lane.b32.xlu1 %v10396_v8, %s10034_s27  ;;  %1579 = vrot.lane.b32.xlu0 %v10398_v9, %s10034_s27 }
  0xcd   : > { %1670 = vrot.lane.b32.xlu1 %v10396_v8, %s14714_s18  ;;  %1668 = vrot.lane.b32.xlu0 %v10398_v9, %s14714_s18 }
  0xd1   : > { %1759 = vrot.lane.b32.xlu1 %v10396_v8, %s14712_s19  ;;  %1757 = vrot.lane.b32.xlu0 %v10398_v9, %s14712_s19 }
  0xd5   : > { %1848 = vrot.lane.b32.xlu1 %v10396_v8, %s14710_s26  ;;  %1846 = vrot.lane.b32.xlu0 %v10398_v9, %s14710_s26 }
  0xd9   : > { %1937 = vrot.lane.b32.xlu1 %v10396_v8, %s14708_s0  ;;  %1935 = vrot.lane.b32.xlu0 %v10398_v9, %s14708_s0 }
  0xdd   : > { %2026 = vrot.lane.b32.xlu1 %v10396_v8, %s14706_s21  ;;  %2024 = vrot.lane.b32.xlu0 %v10398_v9, %s14706_s21 }
  0xe1   : > { %1496 = vrot.lane.b32.xlu1 %v10438_v28, %s10035_s23  ;;  %1494 = vrot.lane.b32.xlu0 %v10440_v29, %s10035_s23 }
  0xe3   : > { %v1479_v4 = vpop.permute.xlu0 %1478  ;;  %v1568_v10 = vpop.permute.xlu1 %1567 }
  0xe5   : > { %1585 = vrot.lane.b32.xlu1 %v10438_v28, %s10034_s27  ;;  %1583 = vrot.lane.b32.xlu0 %v10440_v29, %s10034_s27 }
  0xe7   : > { %v1657_v5 = vpop.permute.xlu0 %1656  ;;  %v1570_v12 = vpop.permute.xlu1 %1569 }
  0xe8   : > { %v1600_v41 = vsel %vm1599_vm4, %v1568_v10, %v1570_v12  ;;  %v1624_v42 = vsel %vm1429_vm2, %v1570_v12, 0.0  ;;  %v1404_v12 = vadd.f32 %v1403_v0, %v1402_v59 }
  0xe9   : > { %1674 = vrot.lane.b32.xlu1 %v10438_v28, %s14714_s18  ;;  %1672 = vrot.lane.b32.xlu0 %v10440_v29, %s14714_s18  ;;  %v1625_v46 = vadd.f32 %v1624_v42, %v1600_v41 }
  0xeb   : > { %v10541_v6 = vpop.permute.xlu0 %1745  ;;  %v1659_v14 = vpop.permute.xlu1 %1658 }
  0xec   : > { %v1689_v61 = vsel %vm1688_vm5, %v1657_v5, %v1659_v14  ;;  %v1713_v62 = vsel %vm1429_vm2, %v1659_v14, 0.0 }
  0xed   : > { %1763 = vrot.lane.b32.xlu1 %v10438_v28, %s14712_s19  ;;  %1761 = vrot.lane.b32.xlu0 %v10440_v29, %s14712_s19  ;;  %v1714_v10 = vadd.f32 %v1713_v62, %v1689_v61 }
  0xef   : > { %v10543_v11 = vpop.permute.xlu0 %1834  ;;  %v10552_v18 = vpop.permute.xlu1 %1747 }
  0xf0   : > { %v1778_v59 = vsel %vm1777_vm6, %v10541_v6, %v10552_v18  ;;  %v1802_v60 = vsel %vm1429_vm2, %v10552_v18, 0.0 }
  0xf1   : > { %1852 = vrot.lane.b32.xlu1 %v10438_v28, %s14710_s26  ;;  %1850 = vrot.lane.b32.xlu0 %v10440_v29, %s14710_s26  ;;  %v1803_v62 = vadd.f32 %v1802_v60, %v1778_v59 }
  0xf3   : > { %v10545_v13 = vpop.permute.xlu0 %1923  ;;  %v10556_v26 = vpop.permute.xlu1 %1836 }
  0xf4   : > { %v1867_v6 = vsel %vm1866_vm7, %v10543_v11, %v10556_v26  ;;  %v1891_v18 = vsel %vm1429_vm2, %v10556_v26, 0.0 }
  0xf5   : > { %1941 = vrot.lane.b32.xlu1 %v10438_v28, %s14708_s0  ;;  %1939 = vrot.lane.b32.xlu0 %v10440_v29, %s14708_s0  ;;  %v1892_v59 = vadd.f32 %v1891_v18, %v1867_v6 }
  0xf7   : > { %v10547_v15 = vpop.permute.xlu0 %2012  ;;  %v10558_v30 = vpop.permute.xlu1 %1925 }
  0xf8   : > { %v1956_v47 = vsel %vm1955_vm8, %v10545_v13, %v10558_v30  ;;  %v1980_v43 = vsel %vm1429_vm2, %v10558_v30, 0.0 }
  0xf9   : > { %2030 = vrot.lane.b32.xlu1 %v10438_v28, %s14706_s21  ;;  %2028 = vrot.lane.b32.xlu0 %v10440_v29, %s14706_s21 }
  0xfb   : > { %v1481_v19 = vpop.permute.xlu0 %1480  ;;  %v10560_v31 = vpop.permute.xlu1 %2014 }
  0xfc   : > { %v1511_v20 = vsel %vm1510_vm3, %v1479_v4, %v1481_v19  ;;  %v1535_v21 = vsel %vm1429_vm2, %v1481_v19, 0.0  ;;  %v2069_v30 = vsel %vm1429_vm2, %v10560_v31, 0.0 }
  0xfd   : > { %1500 = vrot.lane.b32.xlu1 %v10481_v48, %s10035_s23  ;;  %1498 = vrot.lane.b32.xlu0 %v10483_v49, %s10035_s23  ;;  %v1536_v24 = vadd.f32 %v1535_v21, %v1511_v20  ;;  %v10613_v20 = vmul.f32 0.25, %v1404_v12  ;;  %v1410_v21 = vrot.slane %v1409_v16, 1 }
  0xff   : > { %v10562_v25 = vpop.permute.xlu1 %1484  ;;  %v10581_v35 = vpop.permute.xlu0 %1482  ;;  %14821 = vst [vmem:[#allocation33_spill] sm:$0xff] %v10613_v20  ;;  %v1411_v14 = vadd.f32 %v1410_v21, %v1409_v16 }
 0x101   : > { %1589 = vrot.lane.b32.xlu1 %v10481_v48, %s10034_s27  ;;  %1587 = vrot.lane.b32.xlu0 %v10483_v49, %s10034_s27  ;;  %v10621_v36 = vmul.f32 0.25, %v1411_v14 }
 0x103   : > { %v10570_v23 = vpop.permute.xlu1 %1573  ;;  %v10593_v45 = vpop.permute.xlu0 %1571  ;;  %14822 = vst [vmem:[#allocation34_spill] sm:$0xff] %v10621_v36 }
 0x105   : > { %1678 = vrot.lane.b32.xlu1 %v10481_v48, %s14714_s18  ;;  %1676 = vrot.lane.b32.xlu0 %v10483_v49, %s14714_s18 }
 0x107   : > { %v10574_v32 = vpop.permute.xlu1 %1662  ;;  %v10599_v57 = vpop.permute.xlu0 %1660 }
 0x109   : > { %1767 = vrot.lane.b32.xlu1 %v10481_v48, %s14712_s19  ;;  %1765 = vrot.lane.b32.xlu0 %v10483_v49, %s14712_s19 }
 0x10b   : > { %v10576_v33 = vpop.permute.xlu1 %1751  ;;  %v10605_v63 = vpop.permute.xlu0 %1749 }
 0x10d   : > { %1856 = vrot.lane.b32.xlu1 %v10481_v48, %s14710_s26  ;;  %1854 = vrot.lane.b32.xlu0 %v10483_v49, %s14710_s26 }
 0x10f   : > { %v10585_v37 = vpop.permute.xlu1 %1840 }
 0x111   : > { %1945 = vrot.lane.b32.xlu1 %v10481_v48, %s14708_s0  ;;  %1943 = vrot.lane.b32.xlu0 %v10483_v49, %s14708_s0 }
 0x113   : > { %v10595_v51 = vpop.permute.xlu1 %1929 }
 0x115   : > { %2034 = vrot.lane.b32.xlu1 %v10481_v48, %s14706_s21  ;;  %2032 = vrot.lane.b32.xlu0 %v10483_v49, %s14706_s21 }
 0x117   : > { %v10601_v58 = vpop.permute.xlu1 %2018 }
 0x119   : > { %1504 = vrot.lane.b32.xlu1 %v10517_v2, %s10035_s23  ;;  %1502 = vrot.lane.b32.xlu0 %v10519_v3, %s10035_s23 }
 0x11b   : > { %v10607_v4 = vpop.permute.xlu1 %1488 }
 0x11d   : > { %1593 = vrot.lane.b32.xlu1 %v10517_v2, %s10034_s27  ;;  %1591 = vrot.lane.b32.xlu0 %v10519_v3, %s10034_s27 }
 0x11f   : > { %v10611_v19 = vpop.permute.xlu1 %1577 }
 0x121   : > { %1682 = vrot.lane.b32.xlu1 %v10517_v2, %s14714_s18  ;;  %1680 = vrot.lane.b32.xlu0 %v10519_v3, %s14714_s18 }
 0x125   : > { %1771 = vrot.lane.b32.xlu1 %v10517_v2, %s14712_s19  ;;  %1769 = vrot.lane.b32.xlu0 %v10519_v3, %s14712_s19 }
 0x129   : > { %1860 = vrot.lane.b32.xlu1 %v10517_v2, %s14710_s26  ;;  %1858 = vrot.lane.b32.xlu0 %v10519_v3, %s14710_s26 }
 0x148   : > { %1432 = vadd.xlane.f32.xlu0 %v1431_v17  ;;  %v10609_v17 = vpop.permute.xlu0 %1838 }
 0x14c   : > { %v10615_v5 = vpop.permute.xlu0 %1927 }
 0x14d   : > { %1537 = vadd.xlane.f32.xlu1 %v1536_v24  ;;  %v10619_v24 = vpop.permute.xlu1 %1666 }
 0x150   : > { %v10623_v40 = vpop.permute.xlu0 %2016 }
 0x151   : > { %v10625_v41 = vpop.permute.xlu1 %1755 }
 0x154   : > { %v10629_v42 = vpop.permute.xlu0 %1486 }
 0x158   : > { %v10637_v50 = vpop.permute.xlu0 %1575 }
 0x15c   : > { %v10641_v53 = vpop.permute.xlu0 %1664 }
 0x15e   : > { %1949 = vrot.lane.b32.xlu1 %v10517_v2, %s14708_s0  ;;  %1947 = vrot.lane.b32.xlu0 %v10519_v3, %s14708_s0 }
 0x160   : > { %v10650_v61 = vpop.permute.xlu0 %1753 }
 0x162   : > { %2036 = vrot.lane.b32.xlu1 %v10519_v3, %s14706_s21  ;;  %v1981_v3 = vadd.f32 %v1980_v43, %v1956_v47 }
 0x164   : > { %v10654_v1 = vpop.permute.xlu0 %1842 }
 0x166   : > { %2038 = vrot.lane.b32.xlu1 %v10517_v2, %s14706_s21 }
 0x168   : > { %v10658_v12 = vpop.permute.xlu0 %1931 }
 0x16c   : > { %v10667_v21 = vpop.permute.xlu0 %2020 }
 0x170   : > { %v10671_v60 = vpop.permute.xlu0 %1490 }
 0x174   : > { %v10677_v44 = vpop.permute.xlu0 %1579 }
 0x178   : > { %v10681_v11 = vpop.permute.xlu0 %1668 }
 0x17c   : > { %v10687_v6 = vpop.permute.xlu0 %1757 }
 0x17d   : > { %1626 = vadd.xlane.f32.xlu0 %v1625_v46  ;;  %v10633_v46 = vpop.permute.xlu1 %1844 }
 0x181   : > { %v10639_v52 = vpop.permute.xlu1 %1933 }
 0x185   : > { %v10643_v56 = vpop.permute.xlu1 %2022 }
 0x189   : > { %v10652_v0 = vpop.permute.xlu1 %1492 }
 0x18a   : > { %1715 = vadd.xlane.f32.xlu1 %v1714_v10 }
 0x18d   : > { %v10656_v10 = vpop.permute.xlu1 %1581 }
 0x191   : > { %v10660_v16 = vpop.permute.xlu1 %1670 }
 0x193   : > { %1506 = vrot.lane.b32.xlu0 %v10613_v20, %s10035_s23 }
 0x195   : > { %v10669_v14 = vpop.permute.xlu1 %1759 }
 0x19b   : > { %1508 = vrot.lane.b32.xlu1 %v10621_v36, %s10035_s23 }
 0x19f   : > { %1595 = vrot.lane.b32.xlu1 %v10613_v20, %s10034_s27 }
 0x1a3   : > { %1597 = vrot.lane.b32.xlu1 %v10621_v36, %s10034_s27 }
 0x1b2   : > { %1804 = vadd.xlane.f32.xlu0 %v1803_v62  ;;  %v10675_v62 = vpop.permute.xlu1 %1848 }
 0x1b6   : > { %v10679_v34 = vpop.permute.xlu1 %1937 }
 0x1ba   : > { %v10683_v26 = vpop.permute.xlu1 %2026 }
 0x1be   : > { %v10689_v18 = vpop.permute.xlu1 %1496 }
 0x1bf   : > { %14823 = vst [vmem:[#allocation35_spill] sm:$0xff] %v10689_v18 }
 0x1c2   : > { %v10702_v22 = vpop.permute.xlu1 %1585 }
 0x1c6   : > { %v10706_v7 = vpop.permute.xlu1 %1674 }
 0x1c7   : > { %1893 = vadd.xlane.f32.xlu1 %v1892_v59  ;;  %v10693_v59 = vpop.permute.xlu0 %1846 }
 0x1c8   : > { %1684 = vrot.lane.b32.xlu0 %v10613_v20, %s14714_s18 }
 0x1ca   : > { %v10710_v49 = vpop.permute.xlu1 %1763 }
 0x1cb   : > { %v10704_v2 = vpop.permute.xlu0 %1935  ;;  %14824 = vst [vmem:[#allocation36_spill] sm:$0xff] %v10710_v49 }
 0x1ce   : > { %v10714_v18 = vpop.permute.xlu1 %1852 }
 0x1cf   : > { %v10708_v27 = vpop.permute.xlu0 %2024  ;;  %14825 = vst [vmem:[#allocation37_spill] sm:$0xff] %v10714_v18 }
 0x1d2   : > { %v10718_v29 = vpop.permute.xlu1 %1941 }
 0x1d3   : > { %v10712_v48 = vpop.permute.xlu0 %1494  ;;  %14826 = vst [vmem:[#allocation38_spill] sm:$0xff] %v10718_v29 }
 0x1d6   : > { %v10729_v43 = vpop.permute.xlu1 %2030 }
 0x1d7   : > { %v10716_v13 = vpop.permute.xlu0 %1583  ;;  %14827 = vst [vmem:[#allocation39_spill] sm:$0xff] %v10729_v43 }
 0x1d8   : > { %1686 = vrot.lane.b32.xlu1 %v10621_v36, %s14714_s18 }
 0x1da   : > { %v10737_v49 = vpop.permute.xlu1 %1500 }
 0x1db   : > { %v10722_v47 = vpop.permute.xlu0 %1672  ;;  %14829 = vst [vmem:[#allocation41_spill] sm:$0xff] %v10737_v49 }
 0x1dc   : > { %1773 = vrot.lane.b32.xlu1 %v10613_v20, %s14712_s19 }
 0x1df   : > { %v10733_v29 = vpop.permute.xlu0 %1761 }
 0x1e0   : > { %1775 = vrot.lane.b32.xlu1 %v10621_v36, %s14712_s19  ;;  %14828 = vst [vmem:[#allocation40_spill] sm:$0xff] %v10733_v29 }
 0x1e7   : > { %1982 = vadd.xlane.f32.xlu0 %v1981_v3  ;;  %v2045_v3 = vsel %vm2044_vm9, %v10547_v15, %v10560_v31  ;;  %v10741_v15 = vpop.permute.xlu0 %1850  ;;  %v10743_v31 = vpop.permute.xlu1 %1589 }
 0x1e8   : > { %v2070_v18 = vadd.f32 %v2069_v30, %v2045_v3  ;;  %14830 = vst [vmem:[#allocation42_spill] sm:$0xff] %v10741_v15  ;;  %14831 = vst [vmem:[#allocation43_spill] sm:$0xff] %v10743_v31 }
 0x1eb   : > { %v10747_v43 = vpop.permute.xlu0 %1939  ;;  %v10749_v3 = vpop.permute.xlu1 %1678 }
 0x1ec   : > { %14832 = vst [vmem:[#allocation44_spill] sm:$0xff] %v10747_v43  ;;  %14833 = vst [vmem:[#allocation45_spill] sm:$0xff] %v10749_v3  ;;  %v1434_v43 = vsel %vm1429_vm2, %v10322_v38, 0.0  ;;  %v1717_v38 = vsel %vm1429_vm2, %v10574_v32, 0.0 }
 0x1ed   : > { %v1435_v3 = vadd.f32 %v1434_v43, %v10324_v39  ;;  %v1690_v39 = vsel %vm1688_vm5, %v10599_v57, %v10574_v32 }
 0x1ef   : > { %v10755_v30 = vpop.permute.xlu1 %1767 }
 0x1f0   : > { %14834 = vst [vmem:[#allocation46_spill] sm:$0xff] %v10755_v30  ;;  %v1628_v30 = vsel %vm1429_vm2, %v10570_v23, 0.0 }
 0x1fd   : > { %1862 = vrot.lane.b32.xlu0 %v10613_v20, %s14710_s26 }
 0x201   : > { %1864 = vrot.lane.b32.xlu0 %v10621_v36, %s14710_s26 }
 0x204   : > { %2071 = vadd.xlane.f32.xlu1 %v2070_v18  ;;  %v10753_v18 = vpop.permute.xlu0 %2028 }
 0x205   : > { %1951 = vrot.lane.b32.xlu0 %v10613_v20, %s14708_s0 }
 0x208   : > { %v10757_v49 = vpop.permute.xlu0 %1498 }
 0x209   : > { %2040 = vrot.lane.b32.xlu0 %v10613_v20, %s14706_s21  ;;  %14835 = vst [vmem:[#allocation47_spill] sm:$0xff] %v10757_v49  ;;  %v10759_v20 = vpop.permute.xlu1 %1856 }
 0x20a   : > { %14836 = vst [vmem:[#allocation48_spill] sm:$0xff] %v10759_v20  ;;  %v1601_v20 = vsel %vm1599_vm4, %v10593_v45, %v10570_v23  ;;  %v1779_v23 = vsel %vm1777_vm6, %v10605_v63, %v10576_v33  ;;  %v1539_v45 = vsel %vm1429_vm2, %v10562_v25, 0.0  ;;  %v1984_v63 = vsel %vm1429_vm2, %v10595_v51, 0.0 }
 0x20c   : > { %v10761_v15 = vpop.permute.xlu0 %1587 }
 0x20d   : > { %2042 = vrot.lane.b32.xlu0 %v10621_v36, %s14706_s21  ;;  %14837 = vst [vmem:[#allocation49_spill] sm:$0xff] %v10761_v15  ;;  %v10763_v31 = vpop.permute.xlu1 %1945  ;;  %v1629_v15 = vadd.f32 %v1628_v30, %v1601_v20  ;;  %v1512_v20 = vsel %vm1510_vm3, %v10581_v35, %v10562_v25  ;;  %v1895_v30 = vsel %vm1429_vm2, %v10585_v37, 0.0  ;;  %v1957_v25 = vsel %vm1955_vm8, %v10615_v5, %v10595_v51 }
 0x20e   : > { %14838 = vst [vmem:[#allocation50_spill] sm:$0xff] %v10763_v31  ;;  %v1806_v31 = vsel %vm1429_vm2, %v10576_v33, 0.0  ;;  %v1868_v33 = vsel %vm1866_vm7, %v10609_v17, %v10585_v37  ;;  %v2046_v37 = vsel %vm2044_vm9, %v10623_v40, %v10601_v58 }
 0x20f   : > { %v1807_v32 = vadd.f32 %v1806_v31, %v1779_v23  ;;  %v1896_v35 = vadd.f32 %v1895_v30, %v1868_v33  ;;  %v1438_v31 = vsel %vm1429_vm2, %v10357_v54, 0.0  ;;  %v1543_v23 = vsel %vm1429_vm2, %v10607_v4, 0.0 }
 0x210   : > { %v10767_v29 = vpop.permute.xlu0 %1676  ;;  %v1439_v51 = vadd.f32 %v1438_v31, %v10359_v55  ;;  %v1513_v54 = vsel %vm1510_vm3, %v10629_v42, %v10607_v4  ;;  %v1691_v4 = vsel %vm1688_vm5, %v10641_v53, %v10619_v24  ;;  %v1810_v42 = vsel %vm1429_vm2, %v10625_v41, 0.0 }
 0x211   : > { %v1544_v55 = vadd.f32 %v1543_v23, %v1513_v54  ;;  %v1988_v53 = vsel %vm1429_vm2, %v10639_v52, 0.0  ;;  %v1725_v54 = vsel %vm1429_vm2, %v10660_v16, 0.0 }
 0x214   : > { %v10777_v49 = vpop.permute.xlu0 %1765 }
 0x215   : > { %1953 = vrot.lane.b32.xlu1 %v10621_v36, %s14708_s0  ;;  %v10770_v36 = vpop.permute.xlu1 %2034  ;;  %s14873_s0 = smov 122  }
 0x216   : > { %14839 = vst [vmem:[#allocation51_spill] sm:$0xff] %v10770_v36  ;;  %v1718_v36 = vadd.f32 %v1717_v38, %v1690_v39  ;;  %v1985_v38 = vadd.f32 %v1984_v63, %v1957_v25  ;;  %v2073_v39 = vsel %vm1429_vm2, %v10601_v58, 0.0  ;;  %v1602_v58 = vsel %vm1599_vm4, %v10637_v50, %v10611_v19 }
 0x217   : > { %v2074_v5 = vadd.f32 %v2073_v39, %v2046_v37  ;;  %v1899_v63 = vsel %vm1429_vm2, %v10633_v46, 0.0  ;;  %v1514_v37 = vsel %vm1510_vm3, %v10671_v60, %v10652_v0  ;;  %v1814_v60 = vsel %vm1429_vm2, %v10669_v14, 0.0 }
 0x219   : > { %v10784_v43 = vpop.permute.xlu1 %1504 }
 0x21d   : > { %v10798_v57 = vpop.permute.xlu1 %1593 }
 0x221   : > { %v10819_v17 = vpop.permute.xlu1 %1682 }
 0x22c   : > { %1436 = vadd.xlane.f32.xlu0 %v1435_v3  ;;  %v10796_v3 = vpop.permute.xlu0 %1854 }
 0x230   : > { %1630 = vadd.xlane.f32.xlu0 %v1629_v15  ;;  %v1540_v15 = vadd.f32 %v1539_v45, %v1512_v20  ;;  %v1632_v45 = vsel %vm1429_vm2, %v10611_v19, 0.0  ;;  %v10834_v20 = vpop.permute.xlu1 %1771  ;;  %v1780_v19 = vsel %vm1777_vm6, %v10650_v61, %v10625_v41  ;;  %v1958_v41 = vsel %vm1955_vm8, %v10658_v12, %v10639_v52 }
 0x231   : > { %v1811_v33 = vadd.f32 %v1810_v42, %v1780_v19  ;;  %v1989_v31 = vadd.f32 %v1988_v53, %v1958_v41 }
 0x234   : > { %1719 = vadd.xlane.f32.xlu0 %v1718_v36  ;;  %v10810_v36 = vpop.permute.xlu0 %1943  ;;  %v10858_v61 = vpop.permute.xlu1 %1860 }
 0x238   : > { %1808 = vadd.xlane.f32.xlu0 %v1807_v32  ;;  %v10832_v40 = vpop.permute.xlu0 %2032  ;;  %v1633_v32 = vadd.f32 %v1632_v45, %v1602_v58  ;;  %v10869_v39 = vpop.xlane.xlu1 %1537  ;;  %v1903_v58 = vsel %vm1429_vm2, %v10675_v62, 0.0 }
 0x239   : > { %1541 = vadd.xlane.f32.xlu1 %v1540_v15  ;;  %v1721_v15 = vsel %vm1429_vm2, %v10619_v24, 0.0  ;;  %v1869_v24 = vsel %vm1866_vm7, %v10654_v1, %v10633_v46  ;;  %v2047_v46 = vsel %vm2044_vm9, %v10667_v21, %v10643_v56 }
 0x23a   : > { %v1722_v50 = vadd.f32 %v1721_v15, %v1691_v4  ;;  %v1900_v25 = vadd.f32 %v1899_v63, %v1869_v24  ;;  %v1446_v15 = vsel %vm1429_vm2, %v10438_v28, 0.0  ;;  %v1640_v24 = vsel %vm1429_vm2, %v10702_v22, 0.0 }
 0x23c   : > { %1897 = vadd.xlane.f32.xlu0 %v1896_v35  ;;  %v10846_v30 = vpop.permute.xlu0 %1502  ;;  %v1442_v35 = vsel %vm1429_vm2, %v10396_v8, 0.0  ;;  %v1547_v8 = vsel %vm1429_vm2, %v10652_v0, 0.0  ;;  %v1692_v0 = vsel %vm1688_vm5, %v10681_v11, %v10660_v16  ;;  %v1992_v16 = vsel %vm1429_vm2, %v10679_v34, 0.0 }
 0x23d   : > { %1986 = vadd.xlane.f32.xlu1 %v1985_v38  ;;  %v2077_v38 = vsel %vm1429_vm2, %v10643_v56, 0.0  ;;  %v1443_v52 = vadd.f32 %v1442_v35, %v10398_v9  ;;  %v1603_v56 = vsel %vm1599_vm4, %v10677_v44, %v10656_v10  ;;  %v1548_v21 = vadd.f32 %v1547_v8, %v1514_v37  ;;  %v10884_v9 = vpop.permute.xlu1 %1949  ;;  %v14845_v37 = vld [vmem:[#allocation42_spill] sm:$0xff] }
 0x23e   : > { %v2078_v12 = vadd.f32 %v2077_v38, %v2047_v46  ;;  %v1781_v44 = vsel %vm1777_vm6, %v10687_v6, %v10669_v14  ;;  %v1959_v11 = vsel %vm1955_vm8, %v10704_v2, %v10679_v34  ;;  %v14840_v2 = vld [vmem:[#allocation24_spill] sm:$0xff]  ;;  %v1729_v35 = vsel %vm1429_vm2, %v10706_v7, 0.0 }
 0x23f   : > { %v1815_v45 = vadd.f32 %v1814_v60, %v1781_v44  ;;  %v1993_v4 = vadd.f32 %v1992_v16, %v1959_v11  ;;  %v1447_v34 = vadd.f32 %v1446_v15, %v14840_v2  ;;  %v14848_v60 = vld [vmem:[#allocation27_spill] sm:$0xff]  ;;  %v10041_v11 = vmov 0.0   ;;  %v14851_v15 = vld [vmem:[#allocation28_spill] sm:$0xff] }
 0x240   : > { %2075 = vadd.xlane.f32.xlu0 %v2074_v5  ;;  %v10867_v1 = vpop.permute.xlu0 %1591  ;;  %v1450_v44 = vsel %vm1429_vm2, %v14848_v60, 0.0  ;;  %697 = vmatprep.mubr.f32.mxu0 %v10041_v11 }
 0x241   : > { %1440 = vadd.xlane.f32.xlu1 %v1439_v51  ;;  %v1636_v51 = vsel %vm1429_vm2, %v10656_v10, 0.0  ;;  %v1726_v10 = vadd.f32 %v1725_v54, %v1692_v0  ;;  %v10908_v14 = vpop.permute.xlu1 %2036  ;;  %780 = vmatprep.mubr.f32.mxu1 %v10041_v11 }
 0x242   : > { %v1637_v23 = vadd.f32 %v1636_v51, %v1603_v56  ;;  %v14846_v56 = vld [vmem:[#allocation38_spill] sm:$0xff] }
 0x244   : > { %1545 = vadd.xlane.f32.xlu0 %v1544_v55  ;;  %v10882_v5 = vpop.permute.xlu0 %1680  ;;  %v1870_v55 = vsel %vm1866_vm7, %v10693_v59, %v10675_v62  ;;  %v2081_v62 = vsel %vm1429_vm2, %v10683_v26, 0.0  ;;  %v2048_v59 = vsel %vm2044_vm9, %v10708_v27, %v10683_v26  ;;  %v1604_v27 = vsel %vm1599_vm4, %v10716_v13, %v10702_v22  ;;  %v14843_v22 = vld [vmem:[#allocation40_spill] sm:$0xff] }
 0x245   : > { %1634 = vadd.xlane.f32.xlu1 %v1633_v32  ;;  %v1904_v6 = vadd.f32 %v1903_v58, %v1870_v55  ;;  %v2082_v42 = vadd.f32 %v2081_v62, %v2048_v59  ;;  %v14852_v59 = vld [vmem:[#allocation41_spill] sm:$0xff] }
 0x246   : > { %v1555_v2 = vsel %vm1429_vm2, %v14852_v59, 0.0 }
 0x248   : > { %1723 = vadd.xlane.f32.xlu0 %v1722_v50  ;;  %v10906_v32 = vpop.permute.xlu0 %1769  ;;  %v10920_v50 = vpop.permute.xlu1 %2038 }
 0x249   : > { %1812 = vadd.xlane.f32.xlu1 %v1811_v33  ;;  %v14841_v33 = vld [vmem:[#allocation35_spill] sm:$0xff] }
 0x24a   : > { %v1551_v28 = vsel %vm1429_vm2, %v14841_v33, 0.0  ;;  %v1515_v63 = vsel %vm1510_vm3, %v10712_v48, %v14841_v33  ;;  %v1693_v48 = vsel %vm1688_vm5, %v10722_v47, %v10706_v7  ;;  %v1996_v7 = vsel %vm1429_vm2, %v14846_v56, 0.0  ;;  %v14847_v47 = vld [vmem:[#allocation44_spill] sm:$0xff] }
 0x24b   : > { %v1552_v26 = vadd.f32 %v1551_v28, %v1515_v63  ;;  %v1730_v46 = vadd.f32 %v1729_v35, %v1693_v48  ;;  %v9847_v33 = vld [vmem:[%s10263_s24 + $0x10] sm:$0xff]  ;;  %v14854_v28 = vld [vmem:[#allocation43_spill] sm:$0xff] }
 0x24c   : > { %1901 = vadd.xlane.f32.xlu0 %v1900_v25  ;;  %v10918_v19 = vpop.permute.xlu0 %1858  ;;  %v10934_v41 = vpop.xlane.xlu1 %1715  ;;  %v1641_v25 = vadd.f32 %v1640_v24, %v1604_v27  ;;  %v1644_v63 = vsel %vm1429_vm2, %v14854_v28, 0.0  ;;  %v14855_v24 = vld [vmem:[#allocation49_spill] sm:$0xff]  ;;  %v14856_v48 = vld [vmem:[#allocation23_spill] sm:$0xff] }
 0x24d   : > { %1990 = vadd.xlane.f32.xlu1 %v1989_v31  ;;  %v14842_v31 = vld [vmem:[#allocation36_spill] sm:$0xff]  ;;  %v1605_v27 = vsel %vm1599_vm4, %v14855_v24, %v14854_v28  ;;  %v1517_v28 = vsel %vm1510_vm3, %v10846_v30, %v10784_v43  ;;  %v1826_v30 = vsel %vm1429_vm2, %v10834_v20, 0.0 }
 0x24e   : > { %v1818_v38 = vsel %vm1429_vm2, %v14842_v31, 0.0  ;;  %v1782_v13 = vsel %vm1777_vm6, %v14843_v22, %v14842_v31  ;;  %v14857_v31 = vld [vmem:[#allocation21_spill] sm:$0xff] }
 0x24f   : > { %v14858_v22 = vld [vmem:[#allocation45_spill] sm:$0xff] }
 0x250   : > { %2079 = vadd.xlane.f32.xlu0 %v2078_v12  ;;  %v10932_v53 = vpop.xlane.xlu0 %1432  ;;  %v14844_v12 = vld [vmem:[#allocation37_spill] sm:$0xff]  ;;  %v10958_v54 = vpop.permute.xlu1 %1508 }
 0x251   : > { %1444 = vadd.xlane.f32.xlu1 %v1443_v52  ;;  %v1819_v52 = vadd.f32 %v1818_v38, %v1782_v13  ;;  %v1907_v8 = vsel %vm1429_vm2, %v14844_v12, 0.0  ;;  %v1871_v51 = vsel %vm1866_vm7, %v14845_v37, %v14844_v12  ;;  %v1645_v38 = vadd.f32 %v1644_v63, %v1605_v27 }
 0x252   : > { %v1908_v0 = vadd.f32 %v1907_v8, %v1871_v51  ;;  %v1733_v13 = vsel %vm1429_vm2, %v14858_v22, 0.0  ;;  %v1648_v63 = vsel %vm1429_vm2, %v10798_v57, 0.0 }
 0x254   : > { %1549 = vadd.xlane.f32.xlu0 %v1548_v21  ;;  %v1960_v21 = vsel %vm1955_vm8, %v14847_v47, %v14846_v56  ;;  %v10978_v62 = vpop.permute.xlu1 %1595  ;;  %v14860_v47 = vld [vmem:[#allocation48_spill] sm:$0xff] }
 0x255   : > { %1638 = vadd.xlane.f32.xlu1 %v1637_v23  ;;  %v10956_v23 = vpop.permute.xlu0 %1947 }
 0x258   : > { %1727 = vadd.xlane.f32.xlu0 %v1726_v10  ;;  %v1997_v10 = vadd.f32 %v1996_v7, %v1960_v21  ;;  %v11015_v37 = vpop.permute.xlu1 %1597  ;;  %v1911_v21 = vsel %vm1429_vm2, %v14860_v47, 0.0 }
 0x259   : > { %1816 = vadd.xlane.f32.xlu1 %v1815_v45  ;;  %v14849_v45 = vld [vmem:[#allocation39_spill] sm:$0xff]  ;;  %v10967_v16 = vpop.xlane.xlu0 %1626 }
 0x25a   : > { %v2085_v58 = vsel %vm1429_vm2, %v14849_v45, 0.0  ;;  %v2049_v55 = vsel %vm2044_vm9, %v10753_v18, %v14849_v45 }
 0x25b   : > { %v2086_v18 = vadd.f32 %v2085_v58, %v2049_v55  ;;  %v14862_v58 = vld [vmem:[#allocation29_spill] sm:$0xff] }
 0x25c   : > { %1905 = vadd.xlane.f32.xlu0 %v1904_v6  ;;  %v10973_v6 = vld [vmem:[%s14850_s30] sm:$0xff]  ;;  %v1454_v55 = vsel %vm1429_vm2, %v14862_v58, 0.0 }
 0x25d   : > { %1994 = vadd.xlane.f32.xlu1 %v1993_v4  ;;  %v1451_v4 = vadd.f32 %v1450_v44, %v14851_v15  ;;  %8855 = vmatmul.mubr.msk.f32.vlgmr.msra.gmra.mxu0 %vm621_vm10, %v10973_v6  ;;  %v11029_v44 = vpop.xlane.xlu1 %1893 }
 0x25e   : > { %703 = vmatprep.mubr.f32.mxu0 %v10041_v11  ;;  %8859 = vmatmul.mubr.msk.f32.vlgmr.msra.gmra.mxu1 %vm621_vm10, %v10973_v6 }
 0x25f   : > { %8862 = vmatpush1.msk.msra.mxu0 %vm14705_vm0, %v9847_v33  ;;  %786 = vmatprep.mubr.f32.mxu1 %v10041_v11  ;;  %v1559_v33 = vsel %vm1429_vm2, %v10784_v43, 0.0  ;;  %v1695_v43 = vsel %vm1688_vm5, %v10882_v5, %v10819_v17 }
 0x260   : > { %2083 = vadd.xlane.f32.xlu0 %v2082_v42  ;;  %8869 = vmatprep.subr.msk.mxu0 %vm14705_vm0, %v14857_v31  ;;  %v1560_v27 = vadd.f32 %v1559_v33, %v1517_v28  ;;  %v1873_v31 = vsel %vm1866_vm7, %v10918_v19, %v10858_v61  ;;  %v14865_v19 = vld [vmem:[#allocation34_spill] sm:$0xff] }
 0x261   : > { %1448 = vadd.xlane.f32.xlu1 %v1447_v34  ;;  %v14853_v34 = vld [vmem:[#allocation47_spill] sm:$0xff] }
 0x262   : > { %v1516_v42 = vsel %vm1510_vm3, %v14853_v34, %v14852_v59 }
 0x263   : > { %v1556_v35 = vadd.f32 %v1555_v2, %v1516_v42  ;;  %v11043_v42 = vpop.permute.xlu1 %1686 }
 0x264   : > { %1553 = vadd.xlane.f32.xlu0 %v1552_v26  ;;  %v10996_v26 = vpop.permute.xlu0 %1506 }
 0x265   : > { %1642 = vadd.xlane.f32.xlu1 %v1641_v25  ;;  %v9848_v25 = vld [vmem:[%s10263_s24 + $0x18] sm:$0xff] }
 0x266   : > { %8866 = vmatpush1.msk.msra.mxu1 %vm14705_vm0, %v9848_v25 }
 0x267   : > { %8873 = vmatprep.subr.msk.mxu1 %vm14705_vm0, %v14856_v48  ;;  %v11072_v48 = vld [vmem:[%s14850_s30 + $0x8] sm:$0xff] }
 0x268   : > { %1731 = vadd.xlane.f32.xlu0 %v1730_v46  ;;  %v1694_v46 = vsel %vm1688_vm5, %v10767_v29, %v14858_v22  ;;  %v11017_v51 = vpop.xlane.xlu0 %1804  ;;  %v1872_v29 = vsel %vm1866_vm7, %v10796_v3, %v14860_v47  ;;  %8856 = vmatmul.mubr.msk.f32.gmra.mxu0 %vm621_vm10, %v11072_v48  ;;  %v1962_v22 = vsel %vm1955_vm8, %v10956_v23, %v10884_v9 }
 0x269   : > { %1820 = vadd.xlane.f32.xlu1 %v1819_v52  ;;  %v14859_v52 = vld [vmem:[#allocation46_spill] sm:$0xff]  ;;  %v1734_v56 = vadd.f32 %v1733_v13, %v1694_v46  ;;  %v1912_v45 = vadd.f32 %v1911_v21, %v1872_v29  ;;  %8860 = vmatmul.mubr.msk.f32.gmra.mxu1 %vm621_vm10, %v11072_v48  ;;  %v1458_v46 = vsel %vm1429_vm2, %v14865_v19, 0.0 }
 0x26a   : > { %v1822_v12 = vsel %vm1429_vm2, %v14859_v52, 0.0  ;;  %v1783_v8 = vsel %vm1777_vm6, %v10777_v49, %v14859_v52  ;;  %863 = vmatprep.mubr.f32.mxu0 %v10041_v11  ;;  %946 = vmatprep.mubr.f32.mxu1 %v10041_v11  ;;  %v2051_v52 = vsel %vm2044_vm9, %v10908_v14, %v10920_v50 }
 0x26b   : > { %v1823_v7 = vadd.f32 %v1822_v12, %v1783_v8  ;;  %v2093_v12 = vsel %vm1429_vm2, %v10920_v50, 0.0  ;;  %v14866_v8 = vld [vmem:[#allocation22_spill] sm:$0xff]  ;;  %v14867_v50 = vld [vmem:[#allocation33_spill] sm:$0xff] }
 0x26c   : > { %1909 = vadd.xlane.f32.xlu0 %v1908_v0  ;;  %v14861_v0 = vld [vmem:[#allocation50_spill] sm:$0xff]  ;;  %8863 = vmatmul.mubr.msk.f32.vlgmr.msra.gmra.mxu0 %vm621_vm10, %v10973_v6  ;;  %v1459_v47 = vadd.f32 %v1458_v46, %v14867_v50  ;;  %v2094_v29 = vadd.f32 %v2093_v12, %v2051_v52 }
 0x26d   : > { %1998 = vadd.xlane.f32.xlu1 %v1997_v10  ;;  %v2000_v60 = vsel %vm1429_vm2, %v14861_v0, 0.0  ;;  %v1961_v49 = vsel %vm1955_vm8, %v10810_v36, %v14861_v0  ;;  %v11031_v10 = vpop.permute.xlu0 %1684  ;;  %v14864_v36 = vld [vmem:[#allocation30_spill] sm:$0xff]  ;;  %8867 = vmatmul.mubr.msk.f32.vlgmr.msra.gmra.mxu1 %vm621_vm10, %v10973_v6  ;;  %v1518_v0 = vsel %vm1510_vm3, %v10996_v26, %v10958_v54 }
 0x26e   : > { %v2001_v15 = vadd.f32 %v2000_v60, %v1961_v49  ;;  %v1455_v2 = vadd.f32 %v1454_v55, %v14864_v36  ;;  %869 = vmatprep.mubr.f32.mxu0 %v10041_v11  ;;  %952 = vmatprep.mubr.f32.mxu1 %v10041_v11  ;;  %v1607_v49 = vsel %vm1599_vm4, %v10978_v62, %v11015_v37  ;;  %v1741_v62 = vsel %vm1429_vm2, %v11043_v42, 0.0 }
 0x26f   : > { %8874 = vmatpush1.msk.msra.mxu1 %vm14705_vm0, %v14866_v8 }
 0x270   : > { %2087 = vadd.xlane.f32.xlu0 %v2086_v18  ;;  %8864 = vmatmul.mubr.msk.f32.gmra.mxu0 %vm621_vm10, %v11072_v48 }
 0x271   : > { %1452 = vadd.xlane.f32.xlu1 %v1451_v4  ;;  %v14863_v4 = vld [vmem:[#allocation51_spill] sm:$0xff]  ;;  %v11040_v59 = vpop.xlane.xlu0 %1982  ;;  %8868 = vmatmul.mubr.msk.f32.gmra.mxu1 %vm621_vm10, %v11072_v48 }
 0x272   : > { %v2089_v3 = vsel %vm1429_vm2, %v14863_v4, 0.0  ;;  %v2050_v18 = vsel %vm2044_vm9, %v10832_v40, %v14863_v4  ;;  %v1606_v40 = vsel %vm1599_vm4, %v10867_v1, %v10798_v57  ;;  %v1784_v57 = vsel %vm1777_vm6, %v10906_v32, %v10834_v20  ;;  %v11067_v1 = vpop.permute.xlu1 %1773  ;;  %1029 = vmatprep.mubr.f32.mxu0 %v10041_v11  ;;  %1112 = vmatprep.mubr.f32.mxu1 %v10041_v11 }
 0x273   : > { %v2090_v34 = vadd.f32 %v2089_v3, %v2050_v18  ;;  %v1649_v25 = vadd.f32 %v1648_v63, %v1606_v40  ;;  %v1827_v20 = vadd.f32 %v1826_v30, %v1784_v57  ;;  %v1915_v32 = vsel %vm1429_vm2, %v10858_v61, 0.0  ;;  %v14870_v3 = vld [vmem:[#allocation31_spill] sm:$0xff] }
 0x274   : > { %1557 = vadd.xlane.f32.xlu0 %v1556_v35  ;;  %v1737_v35 = vsel %vm1429_vm2, %v10819_v17, 0.0  ;;  %v1916_v13 = vadd.f32 %v1915_v32, %v1873_v31 }
 0x275   : > { %1646 = vadd.xlane.f32.xlu1 %v1645_v38  ;;  %v11055_v24 = vpop.permute.xlu0 %1862  ;;  %v1738_v17 = vadd.f32 %v1737_v35, %v1695_v43  ;;  %v2004_v38 = vsel %vm1429_vm2, %v10884_v9, 0.0  ;;  %v2102_v9 = vsel %vm2101_vm11, %v10932_v53, %v10869_v39  ;;  %v9849_v53 = vld [vmem:[%s10263_s24 + $0x20] sm:$0xff]  ;;  %8875 = vmatmul.mubr.msk.f32.vlgmr.msra.gmra.mxu1 %vm621_vm10, %v10973_v6  ;;  %s14898_s24 = smov 123  }
 0x276   : > { %v1776_v61 = vpop.permute.xlu1 %1775  ;;  %v2005_v23 = vadd.f32 %v2004_v38, %v1962_v22  ;;  %8870 = vmatpush1.msk.msra.mxu0 %vm14705_vm0, %v9849_v53  ;;  %1118 = vmatprep.mubr.f32.mxu1 %v10041_v11  ;;  %v11178_v43 = vld [vmem:[#allocation2] sm:$0xff] }
 0x277   : > { %8871 = vmatmul.mubr.msk.f32.vlgmr.msra.gmra.mxu0 %vm621_vm10, %v10973_v6  ;;  %v1785_v18 = vsel %vm1777_vm6, %v11067_v1, %v1776_v61 }
 0x278   : > { %1735 = vadd.xlane.f32.xlu0 %v1734_v56  ;;  %v2111_v56 = vsel %vm2110_vm12, %v2102_v9, %v10967_v16  ;;  %1035 = vmatprep.mubr.f32.mxu0 %v10041_v11 }
 0x279   : > { %1824 = vadd.xlane.f32.xlu1 %v1823_v7  ;;  %v11076_v5 = vpop.permute.xlu0 %1864  ;;  %v2172_v7 = vlaneseq  ;;  %v2120_v14 = vsel %vm2119_vm13, %v2111_v56, %v10934_v41  ;;  %v1563_v41 = vsel %vm1429_vm2, %v10958_v54, 0.0  ;;  %v14869_v54 = vld [vmem:[#allocation26_spill] sm:$0xff]  ;;  %8876 = vmatmul.mubr.msk.f32.gmra.mxu1 %vm621_vm10, %v11072_v48 }
 0x27a   : > { %v2128_v16 = vsel %vm621_vm10, %v2120_v14, %v11017_v51  ;;  %v14868_v51 = vld [vmem:[#allocation32_spill] sm:$0xff]  ;;  %8877 = vmatprep.subr.msk.mxu0 %vm14705_vm0, %v14869_v54  ;;  %v1919_v28 = vsel %vm1429_vm2, %v11076_v5, 0.0  ;;  %1278 = vmatprep.mubr.f32.mxu1 %v10041_v11 }
 0x27b   : > { %v2137_v60 = vsel %vm2136_vm14, %v2128_v16, %v11029_v44  ;;  %8881 = vmatprep.subr.msk.mxu1 %vm14705_vm0, %v14868_v51  ;;  %v2173_v55 = vshrl.u32 %v2172_v7, 7  ;;  %v1564_v44 = vadd.f32 %v1563_v41, %v1518_v0  ;;  %8872 = vmatmul.mubr.msk.f32.gmra.mxu0 %vm621_vm10, %v11072_v48 }
 0x27c   : > { %1913 = vadd.xlane.f32.xlu0 %v1912_v45  ;;  %v1652_v45 = vsel %vm1429_vm2, %v11015_v37, 0.0  ;;  %v2146_v58 = vsel %vm2145_vm15, %v2137_v60, %v11040_v59  ;;  %v1696_v37 = vsel %vm1688_vm5, %v11031_v10, %v11043_v42  ;;  %8882 = vmatpush1.msk.msra.mxu1 %vm14705_vm0, %v14870_v3  ;;  %v1830_v59 = vsel %vm1429_vm2, %v1776_v61, 0.0 }
 0x27d   : > { %2002 = vadd.xlane.f32.xlu1 %v2001_v15  ;;  %v1952_v39 = vpop.permute.xlu0 %1951  ;;  %v1653_v4 = vadd.f32 %v1652_v45, %v1607_v49  ;;  %v11160_v36 = vsub.s32 0, %v2173_v55  ;;  %v1742_v10 = vadd.f32 %v1741_v62, %v1696_v37  ;;  %1195 = vmatprep.mubr.f32.mxu0 %v10041_v11  ;;  %v1874_v42 = vsel %vm1866_vm7, %v11055_v24, %v11076_v5  ;;  %v11216_v37 = vld [vmem:[%s14658_s6] sm:$0xff] }
 0x27e   : > { %v1831_v63 = vadd.f32 %v1830_v59, %v1785_v18  ;;  %v1920_v24 = vadd.f32 %v1919_v28, %v1874_v42  ;;  %8883 = vmatmul.mubr.msk.f32.vlgmr.msra.gmra.mxu1 %vm621_vm10, %v10973_v6 }
 0x27f   : > { %1284 = vmatprep.mubr.f32.mxu1 %v10041_v11 }
 0x280   : > { %2091 = vadd.xlane.f32.xlu0 %v2090_v34  ;;  %v14871_v34 = vld [vmem:[#allocation25_spill] sm:$0xff] }
 0x281   : > { %1456 = vadd.xlane.f32.xlu1 %v1455_v2  ;;  %v2041_v15 = vpop.permute.xlu0 %2040  ;;  %8878 = vmatpush1.msk.msra.mxu0 %vm14705_vm0, %v14871_v34  ;;  %vm2177_vm0 = vcmask 64512  }
 0x282   : > { %8879 = vmatmul.mubr.msk.f32.vlgmr.msra.gmra.mxu0 %vm621_vm10, %v10973_v6  ;;  %8884 = vmatmul.mubr.msk.f32.gmra.mxu1 %vm621_vm10, %v11072_v48 }
 0x283   : > { %1201 = vmatprep.mubr.f32.mxu0 %v10041_v11  ;;  %9227 = vmatprep.mubr.msk.f32.mxu1 %vm2177_vm0, %v11216_v37 }
 0x284   : > { %1561 = vadd.xlane.f32.xlu0 %v1560_v27 }
 0x285   : > { %1650 = vadd.xlane.f32.xlu1 %v1649_v25  ;;  %v2043_v35 = vpop.permute.xlu0 %2042 }
 0x286   : > { %v2052_v57 = vsel %vm2044_vm9, %v2041_v15, %v2043_v35  ;;  %v2097_v1 = vsel %vm1429_vm2, %v2043_v35, 0.0  ;;  %8880 = vmatmul.mubr.msk.f32.gmra.mxu0 %vm621_vm10, %v11072_v48 }
 0x287   : > { %v2098_v5 = vadd.f32 %v2097_v1, %v2052_v57  ;;  %9222 = vmatprep.mubr.msk.f32.mxu0 %vm2177_vm0, %v11216_v37 }
 0x288   : > { %1739 = vadd.xlane.f32.xlu0 %v1738_v17 }
 0x289   : > { %1828 = vadd.xlane.f32.xlu1 %v1827_v20  ;;  %v14728_v20 = vmov 1  }
 0x28a   : > { %9618 = vset.pattern.permute.xlu1 %v14728_v20 }
 0x28c   : > { %1917 = vadd.xlane.f32.xlu0 %v1916_v13  ;;  %v14727_v13 = vmov 2  }
 0x28d   : > { %2006 = vadd.xlane.f32.xlu1 %v2005_v23  ;;  %v2072_v21 = vpop.xlane.xlu1 %2071  ;;  %9619 = vset.pattern.permute.xlu0 %v14727_v13 }
 0x28e   : > { %v2155_v26 = vsel %vm2154_vm1, %v2146_v58, %v2072_v21 }
 0x28f   : > { %v2163_v2 = vmul.f32 0.0042918455, %v2155_v26 }
 0x290   : > { %2095 = vadd.xlane.f32.xlu0 %v2094_v29 }
 0x291   : > { %1460 = vadd.xlane.f32.xlu1 %v1459_v47  ;;  %v1954_v33 = vpop.permute.xlu1 %1953  ;;  %v2175_v40 = vrot.slane %v2163_v2, %v11160_v36 }
 0x292   : > { %v2008_v27 = vsel %vm1429_vm2, %v1954_v33, 0.0  ;;  %v1963_v25 = vsel %vm1955_vm8, %v1952_v39, %v1954_v33  ;;  %vm2280_vm2 = vcmask 1040384  }
 0x293   : > { %v2009_v30 = vadd.f32 %v2008_v27, %v1963_v25  ;;  %v2176_v17 = vmul.f32 %v2175_v40, %v11178_v43 }
 0x294   : > { %1565 = vadd.xlane.f32.xlu0 %v1564_v44 }
 0x295   : > { %1654 = vadd.xlane.f32.xlu1 %v1653_v4  ;;  %v2178_v6 = vsel %vm2177_vm0, %v2176_v17, 0.0 }
 0x298   : > { %1743 = vadd.xlane.f32.xlu0 %v1742_v10 }
 0x299   : > { %1832 = vadd.xlane.f32.xlu1 %v1831_v63 }
 0x29c   : > { %1921 = vadd.xlane.f32.xlu0 %v1920_v24 }
 0x29d   : > { %2010 = vadd.xlane.f32.xlu1 %v2009_v30 }
 0x2a0   : > { %2099 = vadd.xlane.f32.xlu0 %v2098_v5 }
 0x2a1   : > { %2179 = vadd.xlane.f32.xlu1 %v2178_v6 }
 0x2b5   : > { %v1437_v32 = vpop.xlane.xlu0 %1436 }
 0x2b9   : > { %v1631_v31 = vpop.xlane.xlu0 %1630 }
 0x2bd   : > { %v1720_v38 = vpop.xlane.xlu0 %1719 }
 0x2c1   : > { %v1809_v22 = vpop.xlane.xlu0 %1808 }
 0x2c2   : > { %v1542_v61 = vpop.xlane.xlu1 %1541 }
 0x2c3   : > { %v2103_v19 = vsel %vm2101_vm11, %v1437_v32, %v1542_v61 }
 0x2c4   : > { %v2112_v46 = vsel %vm2110_vm12, %v2103_v19, %v1631_v31 }
 0x2c5   : > { %v2121_v48 = vsel %vm2119_vm13, %v2112_v46, %v1720_v38  ;;  %v1898_v9 = vpop.xlane.xlu0 %1897 }
 0x2c6   : > { %v2129_v23 = vsel %vm621_vm10, %v2121_v48, %v1809_v22  ;;  %v1987_v52 = vpop.xlane.xlu1 %1986 }
 0x2c7   : > { %v2138_v12 = vsel %vm2136_vm14, %v2129_v23, %v1898_v9 }
 0x2c8   : > { %v2147_v8 = vsel %vm2145_vm15, %v2138_v12, %v1987_v52 }
 0x2c9   : > { %v2076_v56 = vpop.xlane.xlu0 %2075 }
 0x2ca   : > { %v2156_v7 = vsel %vm2154_vm1, %v2147_v8, %v2076_v56  ;;  %v1441_v39 = vpop.xlane.xlu1 %1440 }
 0x2cb   : > { %v2164_v53 = vmul.f32 0.0042918455, %v2156_v7 }
 0x2cd   : > { %v2184_v14 = vrot.slane %v2164_v53, %v11160_v36  ;;  %v1546_v50 = vpop.xlane.xlu0 %1545 }
 0x2ce   : > { %v2104_v47 = vsel %vm2101_vm11, %v1441_v39, %v1546_v50  ;;  %v1635_v16 = vpop.xlane.xlu1 %1634 }
 0x2cf   : > { %v2185_v21 = vmul.f32 %v2184_v14, %v11178_v43  ;;  %v2113_v29 = vsel %vm2110_vm12, %v2104_v47, %v1635_v16 }
 0x2d1   : > { %v1724_v41 = vpop.xlane.xlu0 %1723  ;;  %v2186_v0 = vsel %vm2177_vm0, %v2185_v21, 0.0 }
 0x2d2   : > { %v2122_v60 = vsel %vm2119_vm13, %v2113_v29, %v1724_v41  ;;  %v1813_v51 = vpop.xlane.xlu1 %1812  ;;  %2187 = vadd.xlane.f32.xlu0 %v2186_v0 }
 0x2d3   : > { %v2130_v49 = vsel %vm621_vm10, %v2122_v60, %v1813_v51 }
 0x2d5   : > { %v1902_v45 = vpop.xlane.xlu0 %1901 }
 0x2d6   : > { %v2139_v58 = vsel %vm2136_vm14, %v2130_v49, %v1902_v45  ;;  %v1991_v55 = vpop.xlane.xlu1 %1990 }
 0x2d7   : > { %v2148_v54 = vsel %vm2145_vm15, %v2139_v58, %v1991_v55 }
 0x2d9   : > { %v2080_v26 = vpop.xlane.xlu0 %2079 }
 0x2da   : > { %v2157_v44 = vsel %vm2154_vm1, %v2148_v54, %v2080_v26  ;;  %v1445_v15 = vpop.xlane.xlu1 %1444 }
 0x2db   : > { %v2165_v62 = vmul.f32 0.0042918455, %v2157_v44 }
 0x2dd   : > { %v2192_v4 = vrot.slane %v2165_v62, %v11160_v36  ;;  %v1550_v3 = vpop.xlane.xlu0 %1549 }
 0x2de   : > { %v2105_v18 = vsel %vm2101_vm11, %v1445_v15, %v1550_v3  ;;  %v1639_v59 = vpop.xlane.xlu1 %1638 }
 0x2df   : > { %v2193_v2 = vmul.f32 %v2192_v4, %v11178_v43  ;;  %v2114_v34 = vsel %vm2110_vm12, %v2105_v18, %v1639_v59 }
 0x2e1   : > { %v1728_v33 = vpop.xlane.xlu0 %1727  ;;  %v2194_v10 = vsel %vm2177_vm0, %v2193_v2, 0.0 }
 0x2e2   : > { %v2123_v42 = vsel %vm2119_vm13, %v2114_v34, %v1728_v33  ;;  %v1817_v28 = vpop.xlane.xlu1 %1816  ;;  %2195 = vadd.xlane.f32.xlu1 %v2194_v10 }
 0x2e3   : > { %v2131_v63 = vsel %vm621_vm10, %v2123_v42, %v1817_v28 }
 0x2e5   : > { %v1906_v40 = vpop.xlane.xlu0 %1905 }
 0x2e6   : > { %v2140_v27 = vsel %vm2136_vm14, %v2131_v63, %v1906_v40  ;;  %v1995_v25 = vpop.xlane.xlu1 %1994 }
 0x2e7   : > { %v2149_v35 = vsel %vm2145_vm15, %v2140_v27, %v1995_v25 }
 0x2e9   : > { %v2084_v24 = vpop.xlane.xlu0 %2083 }
 0x2ea   : > { %v2158_v30 = vsel %vm2154_vm1, %v2149_v35, %v2084_v24  ;;  %v1449_v57 = vpop.xlane.xlu1 %1448 }
 0x2eb   : > { %v2166_v1 = vmul.f32 0.0042918455, %v2158_v30 }
 0x2ed   : > { %v2200_v17 = vrot.slane %v2166_v1, %v11160_v36  ;;  %v1554_v5 = vpop.xlane.xlu0 %1553 }
 0x2ee   : > { %v2106_v6 = vsel %vm2101_vm11, %v1449_v57, %v1554_v5  ;;  %v1643_v32 = vpop.xlane.xlu1 %1642 }
 0x2ef   : > { %v2201_v31 = vmul.f32 %v2200_v17, %v11178_v43  ;;  %v2115_v38 = vsel %vm2110_vm12, %v2106_v6, %v1643_v32 }
 0x2f1   : > { %v1732_v22 = vpop.xlane.xlu0 %1731  ;;  %v2202_v61 = vsel %vm2177_vm0, %v2201_v31, 0.0 }
 0x2f2   : > { %v2124_v19 = vsel %vm2119_vm13, %v2115_v38, %v1732_v22  ;;  %v1821_v46 = vpop.xlane.xlu1 %1820  ;;  %2203 = vadd.xlane.f32.xlu0 %v2202_v61 }
 0x2f3   : > { %v2132_v48 = vsel %vm621_vm10, %v2124_v19, %v1821_v46 }
 0x2f5   : > { %v1910_v9 = vpop.xlane.xlu0 %1909 }
 0x2f6   : > { %v2141_v23 = vsel %vm2136_vm14, %v2132_v48, %v1910_v9  ;;  %v1999_v52 = vpop.xlane.xlu1 %1998 }
 0x2f7   : > { %v2150_v12 = vsel %vm2145_vm15, %v2141_v23, %v1999_v52  ;;  %v11273_v52 = vld [vmem:[%s14657_s5] sm:$0xff] }
 0x2f9   : > { %v2088_v8 = vpop.xlane.xlu0 %2087 }
 0x2fa   : > { %v2159_v56 = vsel %vm2154_vm1, %v2150_v12, %v2088_v8  ;;  %v1453_v7 = vpop.xlane.xlu1 %1452 }
 0x2fb   : > { %v2167_v39 = vmul.f32 0.0042918455, %v2159_v56 }
 0x2fd   : > { %v2208_v53 = vrot.slane %v2167_v39, %v11160_v36  ;;  %v1558_v14 = vpop.xlane.xlu0 %1557 }
 0x2fe   : > { %v2107_v50 = vsel %vm2101_vm11, %v1453_v7, %v1558_v14  ;;  %v1647_v47 = vpop.xlane.xlu1 %1646  ;;  %v11280_v7 = vld [vmem:[%s14657_s5 + $0x8] sm:$0xff] }
 0x2ff   : > { %v2209_v16 = vmul.f32 %v2208_v53, %v11178_v43  ;;  %v2116_v21 = vsel %vm2110_vm12, %v2107_v50, %v1647_v47 }
 0x301   : > { %v1736_v29 = vpop.xlane.xlu0 %1735  ;;  %v2210_v41 = vsel %vm2177_vm0, %v2209_v16, 0.0  ;;  %v11288_v16 = vld [vmem:[%s14656_s4 + $0x1] ss:$0 sm:$0xff] }
 0x302   : > { %v2125_v0 = vsel %vm2119_vm13, %v2116_v21, %v1736_v29  ;;  %v1825_v60 = vpop.xlane.xlu1 %1824  ;;  %2211 = vadd.xlane.f32.xlu1 %v2210_v41  ;;  %v11293_v21 = vld [vmem:[%s14656_s4 + $0x2] ss:$0 sm:$0xff] }
 0x303   : > { %v2133_v51 = vsel %vm621_vm10, %v2125_v0, %v1825_v60 }
 0x305   : > { %v1914_v49 = vpop.xlane.xlu0 %1913 }
 0x306   : > { %v2142_v45 = vsel %vm2136_vm14, %v2133_v51, %v1914_v49  ;;  %v2003_v58 = vpop.xlane.xlu1 %2002  ;;  %v11307_v49 = vld [vmem:[%s14656_s4] ss:$0 sm:$0xff] }
 0x307   : > { %v2151_v55 = vsel %vm2145_vm15, %v2142_v45, %v2003_v58 }
 0x309   : > { %v2092_v54 = vpop.xlane.xlu0 %2091 }
 0x30a   : > { %v2160_v26 = vsel %vm2154_vm1, %v2151_v55, %v2092_v54  ;;  %v1457_v44 = vpop.xlane.xlu1 %1456 }
 0x30b   : > { %v2168_v15 = vmul.f32 0.0042918455, %v2160_v26 }
 0x30d   : > { %v2216_v62 = vrot.slane %v2168_v15, %v11160_v36  ;;  %v1562_v4 = vpop.xlane.xlu0 %1561  ;;  %v11317_v15 = vld [vmem:[%s14655_s3 + $0x8] sm:$0xff] }
 0x30e   : > { %v2108_v3 = vsel %vm2101_vm11, %v1457_v44, %v1562_v4  ;;  %v1651_v18 = vpop.xlane.xlu1 %1650 }
 0x30f   : > { %v2217_v59 = vmul.f32 %v2216_v62, %v11178_v43  ;;  %v2117_v2 = vsel %vm2110_vm12, %v2108_v3, %v1651_v18 }
 0x311   : > { %v1740_v34 = vpop.xlane.xlu0 %1739  ;;  %v2218_v33 = vsel %vm2177_vm0, %v2217_v59, 0.0 }
 0x312   : > { %v2126_v10 = vsel %vm2119_vm13, %v2117_v2, %v1740_v34  ;;  %v1829_v42 = vpop.xlane.xlu1 %1828  ;;  %2219 = vadd.xlane.f32.xlu0 %v2218_v33  ;;  %v14725_v33 = vmov 3  }
 0x313   : > { %v2134_v28 = vsel %vm621_vm10, %v2126_v10, %v1829_v42  ;;  %v14723_v10 = vmov 4  }
 0x315   : > { %v1918_v63 = vpop.xlane.xlu0 %1917 }
 0x316   : > { %v2143_v40 = vsel %vm2136_vm14, %v2134_v28, %v1918_v63  ;;  %v2007_v27 = vpop.xlane.xlu1 %2006  ;;  %v14722_v63 = vmov 5  }
 0x317   : > { %v2152_v25 = vsel %vm2145_vm15, %v2143_v40, %v2007_v27  ;;  %v14718_v40 = vmov 7   ;;  %v14716_v27 = vmov 0  }
 0x319   : > { %v2096_v35 = vpop.xlane.xlu0 %2095 }
 0x31a   : > { %v2161_v24 = vsel %vm2154_vm1, %v2152_v25, %v2096_v35  ;;  %v1461_v30 = vpop.xlane.xlu1 %1460  ;;  %v14720_v25 = vmov 6  }
 0x31b   : > { %v2169_v57 = vmul.f32 0.0042918455, %v2161_v24  ;;  %v11345_v24 = vld [vmem:[%s14658_s6 + $0x8] sm:$0xff] }
 0x31d   : > { %v2224_v1 = vrot.slane %v2169_v57, %v11160_v36  ;;  %v1566_v17 = vpop.xlane.xlu0 %1565 }
 0x31e   : > { %v2109_v5 = vsel %vm2101_vm11, %v1461_v30, %v1566_v17  ;;  %v1655_v6 = vpop.xlane.xlu1 %1654 }
 0x31f   : > { %v2225_v32 = vmul.f32 %v2224_v1, %v11178_v43  ;;  %v2118_v31 = vsel %vm2110_vm12, %v2109_v5, %v1655_v6 }
 0x321   : > { %v1744_v38 = vpop.xlane.xlu0 %1743  ;;  %v2226_v22 = vsel %vm2177_vm0, %v2225_v32, 0.0 }
 0x322   : > { %v2127_v61 = vsel %vm2119_vm13, %v2118_v31, %v1744_v38  ;;  %v1833_v19 = vpop.xlane.xlu1 %1832  ;;  %2227 = vadd.xlane.f32.xlu1 %v2226_v22 }
 0x323   : > { %v2135_v46 = vsel %vm621_vm10, %v2127_v61, %v1833_v19 }
 0x325   : > { %v1922_v48 = vpop.xlane.xlu0 %1921 }
 0x326   : > { %v2144_v9 = vsel %vm2136_vm14, %v2135_v46, %v1922_v48  ;;  %v2011_v23 = vpop.xlane.xlu1 %2010  ;;  %vm2352_vm14 = vcmask 1046528  }
 0x327   : > { %v2153_v12 = vsel %vm2145_vm15, %v2144_v9, %v2011_v23  ;;  %vm2433_vm15 = vcmask 1045504  }
 0x329   : > { %v2100_v8 = vpop.xlane.xlu0 %2099 }
 0x32a   : > { %v2162_v56 = vsel %vm2154_vm1, %v2153_v12, %v2100_v8  ;;  %v2180_v39 = vpop.xlane.xlu1 %2179 }
 0x32b   : > { %v2170_v53 = vmul.f32 0.0042918455, %v2162_v56  ;;  %v2238_v14 = vmul.f32 %v11273_v52, %v2180_v39 }
 0x32d   : > { %v2232_v50 = vrot.slane %v2170_v53, %v11160_v36  ;;  %v2248_v47 = vadd.f32 %v11280_v7, %v2238_v14  ;;  %v11299_v36 = vld [vmem:[%s14655_s3] sm:$0xff] }
 0x32f   : > { %v2264_v29 = vrot.slane %v2248_v47, 7  ;;  %v2233_v41 = vmul.f32 %v2232_v50, %v11178_v43 }
 0x331   : > { %v2281_v0 = vsel %vm2280_vm2, 0.0, %v2264_v29  ;;  %v2289_v60 = vsel %vm2280_vm2, %v2264_v29, 0.0  ;;  %v2234_v51 = vsel %vm2177_vm0, %v2233_v41, 0.0 }
 0x332   : > { %v2320_v45 = vmul.f32 %v11288_v16, %v2281_v0  ;;  %v2321_v43 = vmul.f32 %v11288_v16, %v2289_v60  ;;  %v2401_v58 = vmul.f32 %v11293_v21, %v2281_v0  ;;  %2235 = vadd.xlane.f32.xlu0 %v2234_v51  ;;  %v2402_v55 = vmul.f32 %v11293_v21, %v2289_v60 }
 0x333   : > { %3175 = vperm.xlu1 %9618, %v11299_v36   ;;  %v2304_v62 = vmul.f32 %v11307_v49, %v2281_v0 }
 0x334   : > { %v2353_v54 = vrot.slane %v2320_v45, 1  ;;  %v2354_v26 = vrot.slane %v2321_v43, 1  ;;  %v2434_v44 = vrot.slane %v2401_v58, 2  ;;  %v2435_v4 = vrot.slane %v2402_v55, 2 }
 0x336   : > { %v2355_v3 = vsel %vm2352_vm14, %v2353_v54, %v2354_v26  ;;  %v2436_v59 = vsel %vm2433_vm15, %v2434_v44, %v2435_v4 }
 0x337   : > { %v2385_v18 = vadd.f32 %v2355_v3, %v2304_v62  ;;  %3179 = vperm.xlu1 %9618, %v11317_v15  }
 0x339   : > { %v2466_v2 = vadd.f32 %v2436_v59, %v2385_v18 }
 0x33b   : > { %v8891_v34 = vmul.f32 -1.442695, %v2466_v2  ;;  %9620 = vset.pattern.permute.xlu1 %v14725_v33 }
 0x33c   : > { %3607 = vperm.xlu1 %9620, %v11299_v36  }
 0x33d   : > { %9655 = vpow2.f32 %v8891_v34 }
 0x340   : > { %9621 = vset.pattern.permute.xlu1 %v14727_v13 }
 0x341   : > { %3395 = vperm.xlu1 %9621, %v11317_v15  }
 0x345   : > { %9622 = vset.pattern.permute.xlu1 %v14723_v10 }
 0x346   : > { %3823 = vperm.xlu1 %9622, %v11299_v36  }
 0x348   : > { %3391 = vperm.xlu0 %9619, %v11299_v36  }
 0x34a   : > { %v9656_v42 = vpop.eup %9655  ;;  %9623 = vset.pattern.permute.xlu1 %v14725_v33 }
 0x34b   : > { %v2498_v28 = vadd.f32 1.0, %v9656_v42  ;;  %3611 = vperm.xlu1 %9623, %v11317_v15  }
 0x34c   : > { %9627 = vset.pattern.permute.xlu0 %v14722_v63 }
 0x34d   : > { %9657 = vrcp.f32 %v2498_v28  ;;  %4043 = vperm.xlu0 %9627, %v11317_v15  }
 0x34f   : > { %9624 = vset.pattern.permute.xlu1 %v14722_v63 }
 0x350   : > { %4039 = vperm.xlu1 %9624, %v11299_v36  }
 0x351   : > { %9630 = vset.pattern.permute.xlu0 %v14718_v40 }
 0x352   : > { %4475 = vperm.xlu0 %9630, %v11317_v15  }
 0x354   : > { %9625 = vset.pattern.permute.xlu1 %v14723_v10 }
 0x355   : > { %3827 = vperm.xlu1 %9625, %v11317_v15  }
 0x356   : > { %9632 = vset.pattern.permute.xlu0 %v14716_v27 }
 0x359   : > { %9626 = vset.pattern.permute.xlu1 %v14720_v25 }
 0x35a   : > { %v9658_v35 = vpop.eup %9657  ;;  %4255 = vperm.xlu1 %9626, %v11299_v36  }
 0x35b   : > { %v2188_v30 = vpop.xlane.xlu0 %2187  ;;  %9220 = vmatprep.subr.mxu0 %v9658_v35 }
 0x35c   : > { %v2239_v57 = vmul.f32 %v11273_v52, %v2188_v30  ;;  %9221 = vmatpush3.msra.mxu0 %v9658_v35 }
 0x35d   : > { %9223 = vmatmul.mubr.msk.f32.vlgmr.msra.gmra.mxu0 %vm2177_vm0, %v11345_v24 }
 0x35e   : > { %v2249_v1 = vadd.f32 %v11280_v7, %v2239_v57  ;;  %9628 = vset.pattern.permute.xlu1 %v14718_v40  ;;  %9232 = vmatprep.mubr.msk.f32.mxu0 %vm2177_vm0, %v11216_v37 }
 0x35f   : > { %4471 = vperm.xlu1 %9628, %v11299_v36  }
 0x360   : > { %v2265_v17 = vrot.slane %v2249_v1, 7 }
 0x362   : > { %v2282_v5 = vsel %vm2280_vm2, 0.0, %v2265_v17  ;;  %v2290_v6 = vsel %vm2280_vm2, %v2265_v17, 0.0 }
 0x363   : > { %v2322_v32 = vmul.f32 %v11288_v16, %v2282_v5  ;;  %v2323_v31 = vmul.f32 %v11288_v16, %v2290_v6  ;;  %v2403_v38 = vmul.f32 %v11293_v21, %v2282_v5  ;;  %9629 = vset.pattern.permute.xlu1 %v14720_v25  ;;  %v2404_v22 = vmul.f32 %v11293_v21, %v2290_v6 }
 0x364   : > { %4259 = vperm.xlu1 %9629, %v11317_v15   ;;  %v2305_v48 = vmul.f32 %v11307_v49, %v2282_v5 }
 0x365   : > { %v2356_v61 = vrot.slane %v2322_v32, 1  ;;  %v2357_v19 = vrot.slane %v2323_v31, 1  ;;  %v2437_v46 = vrot.slane %v2403_v38, 2  ;;  %v2438_v9 = vrot.slane %v2404_v22, 2 }
 0x367   : > { %v2358_v23 = vsel %vm2352_vm14, %v2356_v61, %v2357_v19  ;;  %v2439_v8 = vsel %vm2433_vm15, %v2437_v46, %v2438_v9 }
 0x368   : > { %v2386_v12 = vadd.f32 %v2358_v23, %v2305_v48  ;;  %9631 = vset.pattern.permute.xlu1 %v14716_v27 }
 0x369   : > { %3134 = vperm.xlu1 %9631, %v11299_v36  }
 0x36a   : > { %v2467_v56 = vadd.f32 %v2439_v8, %v2386_v12 }
 0x36b   : > { %v2196_v39 = vpop.xlane.xlu1 %2195 }
 0x36c   : > { %v8892_v53 = vmul.f32 -1.442695, %v2467_v56  ;;  %v2240_v14 = vmul.f32 %v11273_v52, %v2196_v39 }
 0x36d   : > { %3139 = vperm.xlu1 %9631, %v11317_v15  }
 0x36e   : > { %9659 = vpow2.f32 %v8892_v53  ;;  %v2250_v50 = vadd.f32 %v11280_v7, %v2240_v14 }
 0x370   : > { %v2266_v47 = vrot.slane %v2250_v50, 7 }
 0x372   : > { %v2283_v29 = vsel %vm2280_vm2, 0.0, %v2266_v47  ;;  %v2291_v41 = vsel %vm2280_vm2, %v2266_v47, 0.0 }
 0x373   : > { %v2324_v0 = vmul.f32 %v11288_v16, %v2283_v29  ;;  %v2325_v60 = vmul.f32 %v11288_v16, %v2291_v41  ;;  %v2405_v36 = vmul.f32 %v11293_v21, %v2283_v29  ;;  %v2406_v51 = vmul.f32 %v11293_v21, %v2291_v41 }
 0x374   : > { %v2306_v55 = vmul.f32 %v11307_v49, %v2283_v29 }
 0x375   : > { %v2359_v45 = vrot.slane %v2324_v0, 1  ;;  %v2360_v43 = vrot.slane %v2325_v60, 1  ;;  %v2440_v58 = vrot.slane %v2405_v36, 2  ;;  %v2441_v54 = vrot.slane %v2406_v51, 2 }
 0x377   : > { %v2361_v26 = vsel %vm2352_vm14, %v2359_v45, %v2360_v43  ;;  %v2442_v15 = vsel %vm2433_vm15, %v2440_v58, %v2441_v54 }
 0x378   : > { %v2387_v44 = vadd.f32 %v2361_v26, %v2306_v55 }
 0x37a   : > { %v2468_v62 = vadd.f32 %v2442_v15, %v2387_v44 }
 0x37b   : > { %v9660_v4 = vpop.eup %9659  ;;  %v2204_v3 = vpop.xlane.xlu0 %2203 }
 0x37c   : > { %v2499_v18 = vadd.f32 1.0, %v9660_v4  ;;  %v8893_v59 = vmul.f32 -1.442695, %v2468_v62  ;;  %v2241_v2 = vmul.f32 %v11273_v52, %v2204_v3 }
 0x37e   : > { %9661 = vrcp.f32 %v2499_v18  ;;  %v2251_v34 = vadd.f32 %v11280_v7, %v2241_v2 }
 0x37f   : > { %9663 = vpow2.f32 %v8893_v59 }
 0x380   : > { %v2267_v42 = vrot.slane %v2251_v34, 7 }
 0x382   : > { %v2284_v28 = vsel %vm2280_vm2, 0.0, %v2267_v42  ;;  %v2292_v35 = vsel %vm2280_vm2, %v2267_v42, 0.0 }
 0x383   : > { %v2326_v30 = vmul.f32 %v11288_v16, %v2284_v28  ;;  %v2327_v57 = vmul.f32 %v11288_v16, %v2292_v35  ;;  %v2407_v1 = vmul.f32 %v11293_v21, %v2284_v28  ;;  %v2408_v17 = vmul.f32 %v11293_v21, %v2292_v35 }
 0x384   : > { %v2307_v31 = vmul.f32 %v11307_v49, %v2284_v28 }
 0x385   : > { %v2362_v5 = vrot.slane %v2326_v30, 1  ;;  %v2363_v6 = vrot.slane %v2327_v57, 1  ;;  %v2443_v32 = vrot.slane %v2407_v1, 2  ;;  %v2444_v38 = vrot.slane %v2408_v17, 2 }
 0x387   : > { %v2364_v22 = vsel %vm2352_vm14, %v2362_v5, %v2363_v6  ;;  %v2445_v19 = vsel %vm2433_vm15, %v2443_v32, %v2444_v38 }
 0x388   : > { %v2388_v61 = vadd.f32 %v2364_v22, %v2307_v31 }
 0x38a   : > { %v2469_v46 = vadd.f32 %v2445_v19, %v2388_v61  ;;  %v11422_v61 = vpop.f32.mrf.mxu0 }
 0x38b   : > { %v9662_v48 = vpop.eup %9661  ;;  %v2212_v9 = vpop.xlane.xlu1 %2211 }
 0x38c   : > { %v9664_v23 = vpop.eup %9663  ;;  %v8894_v12 = vmul.f32 -1.442695, %v2469_v46  ;;  %v2242_v8 = vmul.f32 %v11273_v52, %v2212_v9  ;;  %9225 = vmatprep.subr.mxu1 %v9662_v48 }
 0x38d   : > { %v2500_v56 = vadd.f32 1.0, %v9664_v23  ;;  %9226 = vmatpush3.msra.mxu1 %v9662_v48 }
 0x38e   : > { %9665 = vpow2.f32 %v8894_v12  ;;  %v2252_v39 = vadd.f32 %v11280_v7, %v2242_v8  ;;  %9228 = vmatmul.mubr.msk.f32.vlgmr.msra.gmra.mxu1 %vm2177_vm0, %v11345_v24 }
 0x38f   : > { %9667 = vrcp.f32 %v2500_v56  ;;  %9237 = vmatprep.mubr.msk.f32.mxu1 %vm2177_vm0, %v11216_v37  ;;  %v11425_v56 = vpop.f32.mrf.mxu0 }
 0x390   : > { %v2268_v53 = vrot.slane %v2252_v39, 7 }
 0x392   : > { %v2285_v14 = vsel %vm2280_vm2, 0.0, %v2268_v53  ;;  %v2293_v50 = vsel %vm2280_vm2, %v2268_v53, 0.0 }
 0x393   : > { %v2328_v47 = vmul.f32 %v11288_v16, %v2285_v14  ;;  %v2329_v29 = vmul.f32 %v11288_v16, %v2293_v50  ;;  %v2409_v41 = vmul.f32 %v11293_v21, %v2285_v14  ;;  %v2410_v0 = vmul.f32 %v11293_v21, %v2293_v50 }
 0x394   : > { %v2308_v45 = vmul.f32 %v11307_v49, %v2285_v14 }
 0x395   : > { %v2365_v60 = vrot.slane %v2328_v47, 1  ;;  %v2366_v36 = vrot.slane %v2329_v29, 1  ;;  %v2446_v51 = vrot.slane %v2409_v41, 2  ;;  %v2447_v43 = vrot.slane %v2410_v0, 2 }
 0x397   : > { %v2367_v58 = vsel %vm2352_vm14, %v2365_v60, %v2366_v36  ;;  %v2448_v54 = vsel %vm2433_vm15, %v2446_v51, %v2447_v43 }
 0x398   : > { %v2389_v55 = vadd.f32 %v2367_v58, %v2308_v45 }
 0x39a   : > { %v2470_v26 = vadd.f32 %v2448_v54, %v2389_v55 }
 0x39b   : > { %v9666_v44 = vpop.eup %9665  ;;  %v2220_v15 = vpop.xlane.xlu0 %2219 }
 0x39c   : > { %v9668_v62 = vpop.eup %9667  ;;  %v2501_v4 = vadd.f32 1.0, %v9666_v44  ;;  %v8895_v3 = vmul.f32 -1.442695, %v2470_v26  ;;  %v2243_v18 = vmul.f32 %v11273_v52, %v2220_v15 }
 0x39d   : > { %9230 = vmatprep.subr.mxu0 %v9668_v62 }
 0x39e   : > { %9669 = vrcp.f32 %v2501_v4  ;;  %v2253_v59 = vadd.f32 %v11280_v7, %v2243_v18  ;;  %9231 = vmatpush3.msra.mxu0 %v9668_v62 }
 0x39f   : > { %9671 = vpow2.f32 %v8895_v3  ;;  %9233 = vmatmul.mubr.msk.f32.vlgmr.msra.gmra.mxu0 %vm2177_vm0, %v11345_v24 }
 0x3a0   : > { %v2269_v2 = vrot.slane %v2253_v59, 7  ;;  %9242 = vmatprep.mubr.msk.f32.mxu0 %vm2177_vm0, %v11216_v37 }
 0x3a2   : > { %v2286_v34 = vsel %vm2280_vm2, 0.0, %v2269_v2  ;;  %v2294_v42 = vsel %vm2280_vm2, %v2269_v2, 0.0 }
 0x3a3   : > { %v2330_v28 = vmul.f32 %v11288_v16, %v2286_v34  ;;  %v2331_v35 = vmul.f32 %v11288_v16, %v2294_v42  ;;  %v2411_v30 = vmul.f32 %v11293_v21, %v2286_v34  ;;  %v2412_v57 = vmul.f32 %v11293_v21, %v2294_v42 }
 0x3a4   : > { %v2309_v6 = vmul.f32 %v11307_v49, %v2286_v34 }
 0x3a5   : > { %v2368_v1 = vrot.slane %v2330_v28, 1  ;;  %v2369_v17 = vrot.slane %v2331_v35, 1  ;;  %v2449_v5 = vrot.slane %v2411_v30, 2  ;;  %v2450_v32 = vrot.slane %v2412_v57, 2  ;;  %v11455_v30 = vpop.f32.mrf.mxu0 }
 0x3a7   : > { %v2370_v31 = vsel %vm2352_vm14, %v2368_v1, %v2369_v17  ;;  %v2451_v22 = vsel %vm2433_vm15, %v2449_v5, %v2450_v32  ;;  %v11463_v17 = vpop.f32.mrf.mxu0 }
 0x3a8   : > { %v2390_v38 = vadd.f32 %v2370_v31, %v2309_v6 }
 0x3aa   : > { %v2471_v19 = vadd.f32 %v2451_v22, %v2390_v38 }
 0x3ab   : > { %v9670_v46 = vpop.eup %9669  ;;  %v2228_v48 = vpop.xlane.xlu1 %2227 }
 0x3ac   : > { %v9672_v9 = vpop.eup %9671  ;;  %v8896_v23 = vmul.f32 -1.442695, %v2471_v19  ;;  %v2244_v12 = vmul.f32 %v11273_v52, %v2228_v48  ;;  %9235 = vmatprep.subr.mxu1 %v9670_v46 }
 0x3ad   : > { %v2502_v8 = vadd.f32 1.0, %v9672_v9  ;;  %9236 = vmatpush3.msra.mxu1 %v9670_v46 }
 0x3ae   : > { %9673 = vpow2.f32 %v8896_v23  ;;  %v2254_v39 = vadd.f32 %v11280_v7, %v2244_v12  ;;  %9238 = vmatmul.mubr.msk.f32.vlgmr.msra.gmra.mxu1 %vm2177_vm0, %v11345_v24 }
 0x3af   : > { %9675 = vrcp.f32 %v2502_v8  ;;  %v11430_v53 = vpop.permute.xlu1 %3175  ;;  %9247 = vmatprep.mubr.msk.f32.mxu1 %vm2177_vm0, %v11216_v37 }
 0x3b0   : > { %v2270_v14 = vrot.slane %v2254_v39, 7  ;;  %v3182_v50 = vmul.f32 %v11430_v53, %v11422_v61  ;;  %v3183_v47 = vmul.f32 %v11430_v53, %v11425_v56 }
 0x3b2   : > { %v2287_v29 = vsel %vm2280_vm2, 0.0, %v2270_v14  ;;  %v2295_v41 = vsel %vm2280_vm2, %v2270_v14, 0.0  ;;  %3246 = vrot.lane.b32.xlu0 %v3182_v50, %s10035_s23  ;;  %3248 = vrot.lane.b32.xlu1 %v3183_v47, %s10035_s23 }
 0x3b3   : > { %v2332_v0 = vmul.f32 %v11288_v16, %v2287_v29  ;;  %v2333_v60 = vmul.f32 %v11288_v16, %v2295_v41  ;;  %v2413_v36 = vmul.f32 %v11293_v21, %v2287_v29  ;;  %v2414_v51 = vmul.f32 %v11293_v21, %v2295_v41  ;;  %v11448_v44 = vpop.permute.xlu1 %3179 }
 0x3b4   : > { %v2310_v55 = vmul.f32 %v11307_v49, %v2287_v29  ;;  %v3184_v12 = vmul.f32 %v11448_v44, %v11455_v30 }
 0x3b5   : > { %v2371_v45 = vrot.slane %v2332_v0, 1  ;;  %v2372_v43 = vrot.slane %v2333_v60, 1  ;;  %v2452_v58 = vrot.slane %v2413_v36, 2  ;;  %v2453_v54 = vrot.slane %v2414_v51, 2 }
 0x3b7   : > { %v2373_v26 = vsel %vm2352_vm14, %v2371_v45, %v2372_v43  ;;  %v2454_v62 = vsel %vm2433_vm15, %v2452_v58, %v2453_v54  ;;  %v11452_v28 = vpop.permute.xlu1 %3607 }
 0x3b8   : > { %v2391_v15 = vadd.f32 %v2373_v26, %v2310_v55  ;;  %v3615_v29 = vmul.f32 %v11452_v28, %v11425_v56 }
 0x3ba   : > { %v2472_v4 = vadd.f32 %v2454_v62, %v2391_v15 }
 0x3bb   : > { %v9674_v3 = vpop.eup %9673  ;;  %v2236_v18 = vpop.xlane.xlu0 %2235 }
 0x3bc   : > { %v9676_v59 = vpop.eup %9675  ;;  %v2503_v2 = vadd.f32 1.0, %v9674_v3  ;;  %v8897_v34 = vmul.f32 -1.442695, %v2472_v4  ;;  %v2245_v42 = vmul.f32 %v11273_v52, %v2236_v18  ;;  %v11470_v31 = vpop.permute.xlu1 %3395 }
 0x3bd   : > { %9240 = vmatprep.subr.mxu0 %v9676_v59  ;;  %v3400_v51 = vmul.f32 %v11470_v31, %v11455_v30  ;;  %v3401_v45 = vmul.f32 %v11470_v31, %v11463_v17 }
 0x3be   : > { %9677 = vrcp.f32 %v2503_v2  ;;  %v2255_v35 = vadd.f32 %v11280_v7, %v2245_v42  ;;  %9241 = vmatpush3.msra.mxu0 %v9676_v59  ;;  %v4686_v2 = vld [vmem:[%s14659_s7] sm:$0xff] }
 0x3bf   : > { %9679 = vpow2.f32 %v8897_v34  ;;  %9243 = vmatmul.mubr.msk.f32.vlgmr.msra.gmra.mxu0 %vm2177_vm0, %v11345_v24 }
 0x3c0   : > { %v2271_v57 = vrot.slane %v2255_v35, 7  ;;  %9252 = vmatprep.mubr.msk.f32.mxu0 %vm2177_vm0, %v11216_v37 }
 0x3c1   : > { %v11486_v50 = vpop.permute.xlu1 %3823 }
 0x3c2   : > { %v2288_v1 = vsel %vm2280_vm2, 0.0, %v2271_v57  ;;  %v2296_v52 = vsel %vm2280_vm2, %v2271_v57, 0.0  ;;  %v3830_v58 = vmul.f32 %v11486_v50, %v11422_v61  ;;  %v3831_v55 = vmul.f32 %v11486_v50, %v11425_v56 }
 0x3c3   : > { %v2334_v5 = vmul.f32 %v11288_v16, %v2288_v1  ;;  %v2335_v7 = vmul.f32 %v11288_v16, %v2296_v52  ;;  %v2415_v6 = vmul.f32 %v11293_v21, %v2288_v1  ;;  %v11468_v32 = vpop.permute.xlu0 %3391  ;;  %v2416_v38 = vmul.f32 %v11293_v21, %v2296_v52 }
 0x3c4   : > { %v3398_v22 = vmul.f32 %v11468_v32, %v11422_v61  ;;  %v3399_v19 = vmul.f32 %v11468_v32, %v11425_v56  ;;  %v2311_v23 = vmul.f32 %v11307_v49, %v2288_v1  ;;  %v3185_v21 = vmul.f32 %v11448_v44, %v11463_v17  ;;  %v8915_v1 = vld [vmem:[%s14659_s7 + $0x10] sm:$0xff] }
 0x3c5   : > { %v2374_v46 = vrot.slane %v2334_v5, 1  ;;  %v2375_v48 = vrot.slane %v2335_v7, 1  ;;  %v2455_v9 = vrot.slane %v2415_v6, 2  ;;  %v2456_v16 = vrot.slane %v2416_v38, 2 }
 0x3c6   : > { %3462 = vrot.lane.b32.xlu0 %v3398_v22, %s10034_s27  ;;  %3464 = vrot.lane.b32.xlu1 %v3399_v19, %s10034_s27  ;;  %v3614_v49 = vmul.f32 %v11452_v28, %v11422_v61  ;;  %v11500_v43 = vpop.permute.xlu1 %3611  ;;  %v11562_v22 = vpop.f32.mrf.mxu0 }
 0x3c7   : > { %v2376_v8 = vsel %vm2352_vm14, %v2374_v46, %v2375_v48  ;;  %v2457_v14 = vsel %vm2433_vm15, %v2455_v9, %v2456_v16  ;;  %v3616_v26 = vmul.f32 %v11500_v43, %v11455_v30  ;;  %14874 = vst [vmem:[#allocation35_spill] sm:$0xff] %v11562_v22 }
 0x3c8   : > { %v2392_v39 = vadd.f32 %v2376_v8, %v2311_v23  ;;  %v11552_v5 = vpop.permute.xlu0 %4043  ;;  %v11572_v9 = vpop.f32.mrf.mxu0  ;;  %v8916_v8 = vld [vmem:[%s14659_s7 + $0x18] sm:$0xff] }
 0x3c9   : > { %v4049_v7 = vmul.f32 %v11552_v5, %v11463_v17  ;;  %v4048_v38 = vmul.f32 %v11552_v5, %v11455_v30  ;;  %v3407_v10 = vmul.f32 %v11468_v32, %v11572_v9 }
 0x3ca   : > { %v2473_v47 = vadd.f32 %v2457_v14, %v2392_v39  ;;  %3250 = vrot.lane.b32.xlu0 %v3184_v12, %s10035_s23  ;;  %3252 = vrot.lane.b32.xlu1 %v3185_v21, %s10035_s23  ;;  %v11578_v23 = vpop.f32.mrf.mxu0  ;;  %v11592_v14 = vpop.f32.mrf.mxu1 }
 0x3cb   : > { %v9678_v41 = vpop.eup %9677  ;;  %v11512_v54 = vpop.permute.xlu1 %4039  ;;  %14876 = vst [vmem:[#allocation36_spill] sm:$0xff] %v11578_v23  ;;  %14879 = vst [vmem:[#allocation42_spill] sm:$0xff] %v11592_v14 }
 0x3cc   : > { %v9680_v0 = vpop.eup %9679  ;;  %v8898_v60 = vmul.f32 -1.442695, %v2473_v47  ;;  %9245 = vmatprep.subr.mxu1 %v9678_v41  ;;  %14872 = vst [vmem:[#allocation24_spill] sm:$0xff] %v11512_v54  ;;  %v4046_v15 = vmul.f32 %v11512_v54, %v11422_v61  ;;  %v4047_v3 = vmul.f32 %v11512_v54, %v11425_v56  ;;  %v11584_v21 = vpop.f32.mrf.mxu0  ;;  %v3186_v47 = vmul.f32 %v11430_v53, %v11592_v14 }
 0x3cd   : > { %v2504_v36 = vadd.f32 1.0, %v9680_v0  ;;  %9246 = vmatpush3.msra.mxu1 %v9678_v41  ;;  %14877 = vst [vmem:[#allocation40_spill] sm:$0xff] %v11584_v21  ;;  %v5203_v41 = vld [vmem:[%s14665_s13 + $0x78] sm:$0xff] }
 0x3ce   : > { %9681 = vpow2.f32 %v8898_v60  ;;  %3678 = vrot.lane.b32.xlu0 %v3614_v49, %s14714_s18  ;;  %3680 = vrot.lane.b32.xlu1 %v3615_v29, %s14714_s18  ;;  %v11590_v39 = vpop.f32.mrf.mxu0  ;;  %v11596_v49 = vpop.permute.xlu0 %4475  ;;  %v5202_v60 = vld [vmem:[%s14665_s13 + $0x70] sm:$0xff] }
 0x3cf   : > { %9683 = vrcp.f32 %v2504_v36  ;;  %9248 = vmatmul.mubr.msk.f32.vlgmr.msra.gmra.mxu1 %vm2177_vm0, %v11345_v24  ;;  %14878 = vst [vmem:[#allocation37_spill] sm:$0xff] %v11590_v39  ;;  %v4480_v0 = vmul.f32 %v11596_v49, %v11455_v30 }
 0x3d0   : > { %9257 = vmatprep.mubr.msk.f32.mxu1 %vm2177_vm0, %v11216_v37  ;;  %v3617_v37 = vmul.f32 %v11500_v43, %v11463_v17  ;;  %v11524_v4 = vpop.permute.xlu1 %3827  ;;  %v11598_v29 = vpop.f32.mrf.mxu0 }
 0x3d1   : > { %v3832_v34 = vmul.f32 %v11524_v4, %v11455_v30  ;;  %v3833_v57 = vmul.f32 %v11524_v4, %v11463_v17  ;;  %14880 = vst [vmem:[#allocation38_spill] sm:$0xff] %v11598_v29 }
 0x3d2   : > { %3466 = vrot.lane.b32.xlu0 %v3400_v51, %s10034_s27  ;;  %3468 = vrot.lane.b32.xlu1 %v3401_v45, %s10034_s27  ;;  %v11610_v36 = vpop.f32.mrf.mxu0  ;;  %v5201_v51 = vld [vmem:[%s14665_s13 + $0x68] sm:$0xff]  ;;  %v5200_v45 = vld [vmem:[%s14665_s13 + $0x60] sm:$0xff] }
 0x3d3   : > { %14881 = vst [vmem:[#allocation44_spill] sm:$0xff] %v11610_v36 }
 0x3d5   : > { %v11538_v42 = vpop.permute.xlu1 %4255 }
 0x3d6   : > { %3894 = vrot.lane.b32.xlu0 %v3830_v58, %s14712_s19  ;;  %3896 = vrot.lane.b32.xlu1 %v3831_v55, %s14712_s19  ;;  %v4262_v35 = vmul.f32 %v11538_v42, %v11422_v61  ;;  %v4263_v52 = vmul.f32 %v11538_v42, %v11425_v56  ;;  %v11621_v58 = vpop.f32.mrf.mxu0  ;;  %v5199_v55 = vld [vmem:[%s14665_s13 + $0x58] sm:$0xff] }
 0x3d7   : > { %14882 = vst [vmem:[#allocation27_spill] sm:$0xff] %v11621_v58 }
 0x3da   : > { %3682 = vrot.lane.b32.xlu0 %v3616_v26, %s14714_s18  ;;  %3684 = vrot.lane.b32.xlu1 %v3617_v37, %s14714_s18  ;;  %v11564_v19 = vpop.permute.xlu1 %4471  ;;  %v5198_v26 = vld [vmem:[%s14665_s13 + $0x50] sm:$0xff]  ;;  %v11631_v37 = vpop.f32.mrf.mxu0 }
 0x3db   : > { %v9682_v62 = vpop.eup %9681  ;;  %v4479_v46 = vmul.f32 %v11564_v19, %v11425_v56  ;;  %v4478_v48 = vmul.f32 %v11564_v19, %v11422_v61  ;;  %14883 = vst [vmem:[#allocation39_spill] sm:$0xff] %v11631_v37 }
 0x3dc   : > { %v9684_v18 = vpop.eup %9683  ;;  %v2505_v59 = vadd.f32 1.0, %v9682_v62  ;;  %v5196_v62 = vld [vmem:[%s14665_s13 + $0x40] sm:$0xff] }
 0x3dd   : > { %9250 = vmatprep.subr.mxu0 %v9684_v18 }
 0x3de   : > { %9685 = vrcp.f32 %v2505_v59  ;;  %9251 = vmatpush3.msra.mxu0 %v9684_v18  ;;  %4110 = vrot.lane.b32.xlu0 %v4046_v15, %s14710_s26  ;;  %v5197_v15 = vld [vmem:[%s14665_s13 + $0x48] sm:$0xff]  ;;  %v5195_v18 = vld [vmem:[%s14665_s13 + $0x38] sm:$0xff]  ;;  %v5194_v59 = vld [vmem:[%s14665_s13 + $0x30] sm:$0xff] }
 0x3df   : > { %4112 = vrot.lane.b32.xlu1 %v4047_v3, %s14710_s26  ;;  %5266 = vmatprep.subr.mxu0 %v10041_v11  ;;  %v11580_v16 = vpop.permute.xlu1 %4259  ;;  %v11641_v3 = vpop.f32.mrf.mxu0 }
 0x3e0   : > { %9253 = vmatmul.mubr.msk.f32.vlgmr.msra.gmra.mxu0 %vm2177_vm0, %v11345_v24  ;;  %v4264_v12 = vmul.f32 %v11580_v16, %v11455_v30  ;;  %14884 = vst [vmem:[#allocation28_spill] sm:$0xff] %v11641_v3 }
 0x3e1   : > { %5267 = vmatpush1.msra.mxu0 %v5203_v41  ;;  %v5216_v41 = vld [vmem:[%s14665_s13 + $0xe0] sm:$0xff] }
 0x3e2   : > { %4690 = vperm.xlu0 %9632, %v4686_v2   ;;  %5268 = vmatprep.subr.mxu0 %v10041_v11  ;;  %v11651_v2 = vpop.f32.mrf.mxu0 }
 0x3e3   : > { %3898 = vrot.lane.b32.xlu1 %v3832_v34, %s14712_s19  ;;  %5269 = vmatpush1.msra.mxu0 %v5202_v60  ;;  %14885 = vst [vmem:[#allocation41_spill] sm:$0xff] %v11651_v2  ;;  %v5193_v34 = vld [vmem:[%s14665_s13 + $0x28] sm:$0xff]  ;;  %v8917_v60 = vld [vmem:[%s14659_s7 + $0x20] sm:$0xff] }
 0x3e4   : > { %5270 = vmatprep.subr.mxu0 %v10041_v11 }
 0x3e5   : > { %5271 = vmatpush1.msra.mxu0 %v5201_v51  ;;  %v5215_v51 = vld [vmem:[%s14665_s13 + $0xd8] sm:$0xff] }
 0x3e6   : > { %4326 = vrot.lane.b32.xlu0 %v4262_v35, %s14873_s0  ;;  %5272 = vmatprep.subr.mxu0 %v10041_v11  ;;  %v5192_v35 = vld [vmem:[%s14665_s13 + $0x20] sm:$0xff] }
 0x3e7   : > { %3900 = vrot.lane.b32.xlu1 %v3833_v57, %s14712_s19  ;;  %5273 = vmatpush1.msra.mxu0 %v5200_v45  ;;  %v11661_v57 = vpop.f32.mrf.mxu0  ;;  %v3618_v45 = vmul.f32 %v11452_v28, %v11592_v14  ;;  %s14893_s19 = smov 124  }
 0x3e8   : > { %5274 = vmatprep.subr.mxu0 %v10041_v11  ;;  %14886 = vst [vmem:[#allocation47_spill] sm:$0xff] %v11661_v57 }
 0x3e9   : > { %5275 = vmatpush1.msra.mxu0 %v5199_v55 }
 0x3ea   : > { %4735 = vperm.xlu0 %9632, %v8915_v1   ;;  %5276 = vmatprep.subr.mxu0 %v10041_v11  ;;  %v5191_v1 = vld [vmem:[%s14665_s13 + $0x18] sm:$0xff] }
 0x3eb   : > { %v9686_v6 = vpop.eup %9685  ;;  %4328 = vrot.lane.b32.xlu1 %v4263_v52, %s14873_s0  ;;  %5277 = vmatpush1.msra.mxu0 %v5198_v26  ;;  %v11667_v52 = vpop.f32.mrf.mxu1  ;;  %v5214_v26 = vld [vmem:[%s14665_s13 + $0xd0] sm:$0xff] }
 0x3ec   : > { %9255 = vmatprep.subr.mxu1 %v9686_v6  ;;  %5278 = vmatprep.subr.mxu0 %v10041_v11  ;;  %14887 = vst [vmem:[#allocation43_spill] sm:$0xff] %v11667_v52  ;;  %v4051_v25 = vmul.f32 %v11512_v54, %v11667_v52 }
 0x3ed   : > { %9256 = vmatpush3.msra.mxu1 %v9686_v6  ;;  %5279 = vmatpush1.msra.mxu0 %v5197_v15  ;;  %v5190_v6 = vld [vmem:[%s14665_s13 + $0x10] sm:$0xff]  ;;  %v3187_v15 = vmul.f32 %v11430_v53, %v11667_v52 }
 0x3ee   : > { %4116 = vrot.lane.b32.xlu0 %v4049_v7, %s14710_s26  ;;  %9258 = vmatmul.mubr.msk.f32.vlgmr.msra.gmra.mxu1 %vm2177_vm0, %v11345_v24  ;;  %v4687_v24 = vld [vmem:[%s14659_s7 + $0x8] sm:$0xff]  ;;  %vm5217_vm0 = vcmask 850944  }
 0x3ef   : > { %4114 = vrot.lane.b32.xlu1 %v4048_v38, %s14710_s26  ;;  %5280 = vmatprep.subr.mxu0 %v10041_v11  ;;  %s14896_s26 = smov 125  }
 0x3f0   : > { %5281 = vmatpush1.msra.mxu0 %v5196_v62  ;;  %v5213_v62 = vld [vmem:[%s14665_s13 + $0xc8] sm:$0xff] }
 0x3f1   : > { %5282 = vmatprep.subr.mxu0 %v10041_v11 }
 0x3f2   : > { %4544 = vrot.lane.b32.xlu0 %v4479_v46, %s14875_s22  ;;  %5283 = vmatpush1.msra.mxu0 %v5195_v18  ;;  %v3403_v46 = vmul.f32 %v11468_v32, %v11667_v52  ;;  %v11720_v18 = vpop.permute.xlu1 %3134 }
 0x3f3   : > { %4542 = vrot.lane.b32.xlu1 %v4478_v48, %s14875_s22  ;;  %5284 = vmatprep.subr.mxu0 %v10041_v11  ;;  %v11676_v48 = vpop.f32.mrf.mxu1  ;;  %v3142_v36 = vmul.f32 %v11720_v18, %v11422_v61 }
 0x3f4   : > { %5285 = vmatpush1.msra.mxu0 %v5194_v59  ;;  %14888 = vst [vmem:[#allocation49_spill] sm:$0xff] %v11676_v48  ;;  %v3404_v59 = vmul.f32 %v11470_v31, %v11676_v48 }
 0x3f5   : > { %5286 = vmatprep.subr.mxu0 %v10041_v11 }
 0x3f6   : > { %5287 = vmatpush1.msra.mxu0 %v5193_v34 }
 0x3f7   : > { %4695 = vperm.xlu1 %9631, %v4687_v24   ;;  %5288 = vmatprep.subr.mxu0 %v10041_v11  ;;  %v5189_v24 = vld [vmem:[%s14665_s13 + $0x8] sm:$0xff] }
 0x3f8   : > { %5289 = vmatpush1.msra.mxu0 %v5192_v35  ;;  %v5212_v35 = vld [vmem:[%s14665_s13 + $0xc0] sm:$0xff] }
 0x3f9   : > { %5290 = vmatprep.subr.mxu0 %v10041_v11 }
 0x3fa   : > { %5291 = vmatpush1.msra.mxu0 %v5191_v1  ;;  %v4481_v1 = vmul.f32 %v11596_v49, %v11463_v17 }
 0x3fb   : > { %4330 = vrot.lane.b32.xlu1 %v4264_v12, %s14873_s0  ;;  %5292 = vmatprep.subr.mxu0 %v10041_v11  ;;  %v4265_v12 = vmul.f32 %v11580_v16, %v11463_v17 }
 0x3fc   : > { %5293 = vmatpush1.msra.mxu0 %v5190_v6  ;;  %v11738_v6 = vpop.permute.xlu1 %3139 }
 0x3fd   : > { %5294 = vmatprep.subr.mxu0 %v10041_v11 }
 0x3fe   : > { %5295 = vmatpush1.msra.mxu0 %v5189_v24  ;;  %v5210_v24 = vld [vmem:[%s14665_s13 + $0xb0] sm:$0xff] }
 0x3ff   : > { %4740 = vperm.xlu1 %9631, %v8916_v8   ;;  %v5188_v8 = vld [vmem:[%s14665_s13] sm:$0xff]  ;;  %5296 = vmatprep.subr.mxu0 %v10041_v11 }
 0x400   : > { %5297 = vmatpush1.msra.mxu0 %v5188_v8  ;;  %v5209_v8 = vld [vmem:[%s14665_s13 + $0xa8] sm:$0xff] }
 0x401   : > { %5304 = vmatprep.subr.mxu0 %v10041_v11 }
 0x402   : > { %5305 = vmatpush2.msra.mxu0 %v5216_v41  ;;  %v3190_v41 = vmul.f32 %v11430_v53, %v11562_v22 }
 0x403   : > { %3254 = vrot.lane.b32.xlu1 %v3186_v47, %s10035_s23  ;;  %v3188_v47 = vmul.f32 %v11448_v44, %v11676_v48  ;;  %5306 = vmatprep.subr.mxu0 %v10041_v11 }
 0x404   : > { %5307 = vmatpush2.msra.mxu0 %v5215_v51 }
 0x405   : > { %5308 = vmatprep.subr.mxu0 %v10041_v11 }
 0x406   : > { %5309 = vmatpush2.msra.mxu0 %v5214_v26  ;;  %v5207_v26 = vld [vmem:[%s14665_s13 + $0x98] sm:$0xff] }
 0x407   : > { %4546 = vrot.lane.b32.xlu1 %v4480_v0, %s14875_s22  ;;  %v11694_v0 = vpop.f32.mrf.mxu1  ;;  %5310 = vmatprep.subr.mxu0 %v10041_v11 }
 0x408   : > { %14889 = vst [vmem:[#allocation23_spill] sm:$0xff] %v11694_v0  ;;  %5311 = vmatpush2.msra.mxu0 %v5213_v62  ;;  %v3620_v62 = vmul.f32 %v11500_v43, %v11676_v48  ;;  %v3837_v13 = vmul.f32 %v11524_v4, %v11694_v0 }
 0x409   : > { %v11707_v55 = vpop.f32.mrf.mxu1  ;;  %5312 = vmatprep.subr.mxu0 %v10041_v11 }
 0x40a   : > { %14890 = vst [vmem:[#allocation21_spill] sm:$0xff] %v11707_v55  ;;  %5313 = vmatpush2.msra.mxu0 %v5212_v35  ;;  %v5206_v35 = vld [vmem:[%s14665_s13 + $0x90] sm:$0xff]  ;;  %v3626_v61 = vmul.f32 %v11452_v28, %v11707_v55 }
 0x40b   : > { %v11725_v34 = vpop.f32.mrf.mxu1  ;;  %5314 = vmatprep.subr.mxu0 %v10041_v11 }
 0x40c   : > { %14891 = vst [vmem:[#allocation45_spill] sm:$0xff] %v11725_v34 }
 0x41d   : > { %v9224_v7 = vpop.f32.mrf.mxu0 }
 0x41e   : > { %4782 = vperm.xlu1 %9631, %v9224_v7   ;;  %v5211_v7 = vld [vmem:[%s14665_s13 + $0xb8] sm:$0xff] }
 0x41f   : > { %v2596_v38 = vpop.f32.mrf.mxu0  ;;  %5315 = vmatpush2.msra.mxu0 %v5211_v7  ;;  %v5205_v7 = vld [vmem:[%s14665_s13 + $0x88] sm:$0xff] }
 0x420   : > { %4777 = vperm.xlu0 %9632, %v2596_v38   ;;  %v3834_v38 = vmul.f32 %v11486_v50, %v11592_v14  ;;  %5316 = vmatprep.subr.mxu0 %v10041_v11 }
 0x421   : > { %5317 = vmatpush2.msra.mxu0 %v5210_v24 }
 0x422   : > { %3472 = vrot.lane.b32.xlu1 %v3403_v46, %s10034_s27  ;;  %v11743_v46 = vpop.f32.mrf.mxu1  ;;  %5318 = vmatprep.subr.mxu0 %v10041_v11 }
 0x423   : > { %14892 = vst [vmem:[#allocation46_spill] sm:$0xff] %v11743_v46  ;;  %5319 = vmatpush2.msra.mxu0 %v5209_v8  ;;  %v5204_v8 = vld [vmem:[%s14665_s13 + $0x80] sm:$0xff] }
 0x424   : > { %4332 = vrot.lane.b32.xlu0 %v4265_v12, %s14873_s0  ;;  %v3402_v12 = vmul.f32 %v11468_v32, %v11592_v14  ;;  %v11764_v51 = vpop.f32.mrf.mxu1  ;;  %5320 = vmatprep.subr.mxu0 %v10041_v11 }
 0x425   : > { %14894 = vst [vmem:[#allocation48_spill] sm:$0xff] %v11764_v51 }
 0x426   : > { %3258 = vrot.lane.b32.xlu1 %v3188_v47, %s10035_s23  ;;  %v11756_v47 = vpop.permute.xlu1 %3248 }
 0x428   : > { %4892 = vperm.xlu0 %9632, %v8917_v60   ;;  %v5208_v60 = vld [vmem:[%s14665_s13 + $0xa0] sm:$0xff] }
 0x429   : > { %5321 = vmatpush2.msra.mxu0 %v5208_v60  ;;  %v3406_v60 = vmul.f32 %v11468_v32, %v11562_v22 }
 0x42a   : > { %3686 = vrot.lane.b32.xlu1 %v3618_v45, %s14714_s18  ;;  %v8918_v45 = vld [vmem:[%s14659_s7 + $0x28] sm:$0xff]  ;;  %5322 = vmatprep.subr.mxu0 %v10041_v11 }
 0x42b   : > { %5323 = vmatpush2.msra.mxu0 %v5207_v26 }
 0x42c   : > { %3256 = vrot.lane.b32.xlu0 %v3187_v15, %s10035_s23  ;;  %5324 = vmatprep.subr.mxu0 %v10041_v11 }
 0x42d   : > { %5325 = vmatpush2.msra.mxu0 %v5206_v35 }
 0x42e   : > { %3474 = vrot.lane.b32.xlu1 %v3404_v59, %s10034_s27  ;;  %v11779_v59 = vpop.f32.mrf.mxu1  ;;  %5326 = vmatprep.subr.mxu0 %v10041_v11 }
 0x42f   : > { %14895 = vst [vmem:[#allocation50_spill] sm:$0xff] %v11779_v59  ;;  %5327 = vmatpush2.msra.mxu0 %v5205_v7  ;;  %v4266_v7 = vmul.f32 %v11538_v42, %v11592_v14 }
 0x430   : > { %4548 = vrot.lane.b32.xlu0 %v4481_v1, %s14875_s22  ;;  %v3189_v1 = vmul.f32 %v11448_v44, %v11694_v0  ;;  %v11795_v24 = vpop.f32.mrf.mxu1  ;;  %5328 = vmatprep.subr.mxu0 %v10041_v11  ;;  %v3405_v11 = vmul.f32 %v11470_v31, %v11694_v0 }
 0x431   : > { %14897 = vst [vmem:[#allocation29_spill] sm:$0xff] %v11795_v24  ;;  %5329 = vmatpush2.msra.mxu0 %v5204_v8 }
 0x432   : > { %3902 = vrot.lane.b32.xlu1 %v3834_v38, %s14893_s19  ;;  %v4050_v38 = vmul.f32 %v11512_v54, %v11592_v14 }
 0x434   : > { %3470 = vrot.lane.b32.xlu0 %v3402_v12, %s10034_s27 }
 0x436   : > { %3262 = vrot.lane.b32.xlu1 %v3190_v41, %s10035_s23  ;;  %v3619_v41 = vmul.f32 %v11452_v28, %v11667_v52 }
 0x438   : > { %v11775_v15 = vpop.permute.xlu1 %3464  ;;  %4897 = vperm.xlu0 %9632, %v8918_v45   ;;  %v11809_v45 = vpop.f32.mrf.mxu1 }
 0x439   : > { %14899 = vst [vmem:[#allocation51_spill] sm:$0xff] %v11809_v45 }
 0x43a   : > { %3690 = vrot.lane.b32.xlu1 %v3620_v62, %s14896_s26  ;;  %v3836_v62 = vmul.f32 %v11524_v4, %v11676_v48  ;;  %v11819_v35 = vpop.f32.mrf.mxu1 }
 0x43b   : > { %14900 = vst [vmem:[#allocation30_spill] sm:$0xff] %v11819_v35 }
 0x43c   : > { %3260 = vrot.lane.b32.xlu0 %v3189_v1, %s10035_s23  ;;  %v11797_v12 = vpop.permute.xlu1 %3252  ;;  %v3835_v1 = vmul.f32 %v11486_v50, %v11667_v52 }
 0x43e   : > { %4118 = vrot.lane.b32.xlu1 %v4050_v38, %s14898_s24  ;;  %v11827_v38 = vpop.f32.mrf.mxu1 }
 0x43f   : > { %14901 = vst [vmem:[#allocation34_spill] sm:$0xff] %v11827_v38  ;;  %v3193_v38 = vmul.f32 %v11448_v44, %v11584_v21 }
 0x440   : > { %3688 = vrot.lane.b32.xlu0 %v3619_v41, %s14896_s26  ;;  %v11814_v26 = vpop.permute.xlu1 %3680  ;;  %v3191_v41 = vmul.f32 %v11430_v53, %v11572_v9 }
 0x442   : > { %3478 = vrot.lane.b32.xlu1 %v3406_v60, %s10034_s27  ;;  %v3192_v60 = vmul.f32 %v11448_v44, %v11578_v23 }
 0x444   : > { %3476 = vrot.lane.b32.xlu0 %v3405_v11, %s10034_s27  ;;  %v11829_v8 = vpop.permute.xlu1 %3468  ;;  %v11837_v11 = vpop.f32.mrf.mxu1 }
 0x445   : > { %14902 = vst [vmem:[#allocation22_spill] sm:$0xff] %v11837_v11 }
 0x446   : > { %3906 = vrot.lane.b32.xlu1 %v3836_v62, %s14893_s19  ;;  %v11839_v62 = vpop.permute.xlu0 %3246 }
 0x447   : > { %v3310_v58 = vsel %vm1510_vm3, %v11839_v62, %v11756_v47 }
 0x448   : > { %3904 = vrot.lane.b32.xlu0 %v3835_v1, %s14893_s19  ;;  %v3621_v1 = vmul.f32 %v11500_v43, %v11694_v0  ;;  %v11844_v27 = vpop.permute.xlu1 %3896 }
 0x44a   : > { %4334 = vrot.lane.b32.xlu1 %v4266_v7, %s14873_s0  ;;  %v3622_v7 = vmul.f32 %v11452_v28, %v11562_v22  ;;  %v11851_v40 = vpop.permute.xlu0 %3462 }
 0x44b   : > { %v3526_v39 = vsel %vm1599_vm4, %v11851_v40, %v11775_v15 }
 0x44c   : > { %3264 = vrot.lane.b32.xlu0 %v3191_v41, %s10035_s23  ;;  %v11849_v41 = vpop.f32.mrf.mxu1 }
 0x44d   : > { %14903 = vst [vmem:[#allocation33_spill] sm:$0xff] %v11849_v41  ;;  %v4267_v41 = vmul.f32 %v11538_v42, %v11667_v52 }
 0x44e   : > { %3266 = vrot.lane.b32.xlu1 %v3192_v60, %s10035_s23  ;;  %v4052_v60 = vmul.f32 %v11552_v5, %v11676_v48  ;;  %v11859_v63 = vpop.f32.mrf.mxu1 }
 0x44f   : > { %14904 = vst [vmem:[#allocation32_spill] sm:$0xff] %v11859_v63 }
 0x450   : > { %3692 = vrot.lane.b32.xlu0 %v3621_v1, %s14896_s26  ;;  %v11861_v1 = vpop.permute.xlu1 %3684  ;;  %v11866_v33 = vpop.f32.mrf.mxu1 }
 0x452   : > { %3694 = vrot.lane.b32.xlu1 %v3622_v7, %s14896_s26  ;;  %v11868_v7 = vpop.permute.xlu0 %3250 }
 0x454   : > { %4120 = vrot.lane.b32.xlu0 %v4051_v25, %s14898_s24  ;;  %v4482_v25 = vmul.f32 %v11564_v19, %v11592_v14  ;;  %v11876_v20 = vpop.permute.xlu1 %4112 }
 0x456   : > { %4122 = vrot.lane.b32.xlu1 %v4052_v60, %s14898_s24  ;;  %v2671_v60 = vpop.f32.mrf.mxu1  ;;  %v11879_v63 = vpop.permute.xlu0 %3678 }
 0x458   : > { %3480 = vrot.lane.b32.xlu0 %v3407_v10, %s10034_s27  ;;  %v3409_v10 = vmul.f32 %v11470_v31, %v11584_v21 }
 0x45a   : > { %4550 = vrot.lane.b32.xlu1 %v4482_v25, %s14875_s22  ;;  %v11886_v25 = vpop.permute.xlu1 %3898  ;;  %v11891_v11 = vpop.permute.xlu0 %3466 }
 0x45c   : > { %3908 = vrot.lane.b32.xlu0 %v3837_v13, %s14893_s19  ;;  %v3839_v13 = vmul.f32 %v11486_v50, %v11572_v9 }
 0x45e   : > { %4787 = vperm.xlu1 %9631, %v2671_v60   ;;  %v11899_v60 = vpop.permute.xlu1 %3900  ;;  %v3895_v57 = vpop.permute.xlu0 %3894 }
 0x45f   : > { %v3958_v40 = vsel %vm1777_vm6, %v3895_v57, %v11844_v27  ;;  %v3411_v57 = vmul.f32 %v11468_v32, %v11725_v34 }
 0x460   : > { %4336 = vrot.lane.b32.xlu0 %v4267_v41, %s14873_s0  ;;  %v3623_v41 = vmul.f32 %v11452_v28, %v11572_v9 }
 0x462   : > { %3484 = vrot.lane.b32.xlu1 %v3409_v10, %s10034_s27  ;;  %v4269_v10 = vmul.f32 %v11580_v16, %v11694_v0  ;;  %v11910_v2 = vpop.permute.xlu1 %4328  ;;  %v11915_v37 = vpop.permute.xlu0 %3682 }
 0x464   : > { %3268 = vrot.lane.b32.xlu0 %v3193_v38, %s10035_s23  ;;  %v4053_v38 = vmul.f32 %v11552_v5, %v11694_v0 }
 0x466   : > { %3912 = vrot.lane.b32.xlu1 %v3839_v13, %s14893_s19  ;;  %v3195_v13 = vmul.f32 %v11430_v53, %v11725_v34  ;;  %v11923_v3 = vpop.permute.xlu1 %4114  ;;  %v4111_v35 = vpop.permute.xlu0 %4110 }
 0x468   : > { %3696 = vrot.lane.b32.xlu0 %v3623_v41, %s14896_s26  ;;  %v4483_v41 = vmul.f32 %v11564_v19, %v11667_v52 }
 0x46a   : > { %4340 = vrot.lane.b32.xlu1 %v4269_v10, %s14873_s0  ;;  %v3625_v10 = vmul.f32 %v11500_v43, %v11584_v21  ;;  %v4543_v45 = vpop.permute.xlu1 %4542  ;;  %v11934_v59 = vpop.permute.xlu0 %4690 }
 0x46c   : > { %4124 = vrot.lane.b32.xlu0 %v4053_v38, %s14898_s24  ;;  %v3408_v38 = vmul.f32 %v11470_v31, %v11578_v23 }
 0x46e   : > { %3272 = vrot.lane.b32.xlu1 %v3195_v13, %s10035_s23  ;;  %v4055_v13 = vmul.f32 %v11512_v54, %v11572_v9 }
 0x470   : > { %4552 = vrot.lane.b32.xlu0 %v4483_v41, %s14875_s22  ;;  %v3838_v41 = vmul.f32 %v11486_v50, %v11562_v22 }
 0x472   : > { %3700 = vrot.lane.b32.xlu1 %v3625_v10, %s14896_s26  ;;  %v4485_v10 = vmul.f32 %v11596_v49, %v11694_v0  ;;  %v11942_v24 = vpop.permute.xlu1 %4695  ;;  %v4327_v0 = vpop.permute.xlu0 %4326 }
 0x474   : > { %3482 = vrot.lane.b32.xlu0 %v3408_v38, %s10034_s27  ;;  %v4268_v38 = vmul.f32 %v11580_v16, %v11676_v48 }
 0x476   : > { %4128 = vrot.lane.b32.xlu1 %v4055_v13, %s14898_s24  ;;  %v3410_v13 = vmul.f32 %v11468_v32, %v11707_v55  ;;  %v11953_v14 = vpop.permute.xlu1 %4330  ;;  %v11958_v52 = vpop.permute.xlu0 %4735 }
 0x478   : > { %3910 = vrot.lane.b32.xlu0 %v3838_v41, %s14893_s19  ;;  %v3194_v41 = vmul.f32 %v11430_v53, %v11707_v55 }
 0x47a   : > { %4556 = vrot.lane.b32.xlu1 %v4485_v10, %s14875_s22  ;;  %v3840_v10 = vmul.f32 %v11524_v4, %v11578_v23 }
 0x47c   : > { %4338 = vrot.lane.b32.xlu0 %v4268_v38, %s14873_s0  ;;  %v3624_v38 = vmul.f32 %v11500_v43, %v11578_v23 }
 0x47e   : > { %3486 = vrot.lane.b32.xlu1 %v3410_v13, %s10034_s27  ;;  %v4270_v13 = vmul.f32 %v11538_v42, %v11562_v22 }
 0x480   : > { %3270 = vrot.lane.b32.xlu0 %v3194_v41, %s10035_s23  ;;  %v4054_v41 = vmul.f32 %v11512_v54, %v11562_v22  ;;  %v3358_v54 = vadd.f32 %v3310_v58, %v3142_v36 }
 0x482   : > { %3914 = vrot.lane.b32.xlu1 %v3840_v10, %s14893_s19  ;;  %v3196_v10 = vmul.f32 %v11448_v44, %v11743_v46  ;;  %v11982_v46 = vpop.permute.xlu0 %4116 }
 0x484   : > { %3698 = vrot.lane.b32.xlu0 %v3624_v38, %s14896_s26  ;;  %v11969_v38 = vpop.permute.xlu1 %4740 }
 0x486   : > { %4342 = vrot.lane.b32.xlu1 %v4270_v13, %s14873_s0  ;;  %v3143_v13 = vmul.f32 %v11720_v18, %v11425_v56  ;;  %v3742_v56 = vsel %vm1688_vm5, %v11879_v63, %v11814_v26  ;;  %v4174_v63 = vsel %vm1866_vm7, %v4111_v35, %v11876_v20  ;;  %v4486_v35 = vmul.f32 %v11564_v19, %v11562_v22 }
 0x487   : > { %v3631_v22 = vmul.f32 %v11452_v28, %v11598_v29 }
 0x488   : > { %4126 = vrot.lane.b32.xlu0 %v4054_v41, %s14898_s24  ;;  %v4484_v41 = vmul.f32 %v11596_v49, %v11676_v48  ;;  %v3359_v62 = vadd.f32 %v11756_v47, %v3143_v13  ;;  %v11994_v36 = vpop.permute.xlu1 %3254  ;;  %v4056_v13 = vmul.f32 %v11552_v5, %v11578_v23 }
 0x48a   : > { %3274 = vrot.lane.b32.xlu1 %v3196_v10, %s10035_s23  ;;  %v3574_v10 = vadd.f32 %v3526_v39, %v3358_v54  ;;  %v3575_v48 = vadd.f32 %v11775_v15, %v3359_v62  ;;  %v4545_v15 = vpop.permute.xlu0 %4544 }
 0x48c   : > { %4554 = vrot.lane.b32.xlu0 %v4484_v41, %s14875_s22  ;;  %v3790_v58 = vadd.f32 %v3742_v56, %v3574_v10  ;;  %v3791_v47 = vadd.f32 %v11814_v26, %v3575_v48  ;;  %v4390_v48 = vsel %vm1955_vm8, %v4327_v0, %v11910_v2  ;;  %v12008_v26 = vpop.f32.mrf.mxu0  ;;  %v12015_v62 = vpop.permute.xlu1 %4546  ;;  %v3841_v0 = vmul.f32 %v11524_v4, %v11584_v21 }
 0x48e   : > { %3702 = vrot.lane.b32.xlu1 %v3626_v61, %s14896_s26  ;;  %v4006_v54 = vadd.f32 %v3958_v40, %v3790_v58  ;;  %v4007_v39 = vadd.f32 %v11844_v27, %v3791_v47  ;;  %v4606_v27 = vsel %vm2044_vm9, %v4543_v45, %v4545_v15  ;;  %v2746_v10 = vpop.f32.mrf.mxu0  ;;  %v4271_v45 = vmul.f32 %v11538_v42, %v11572_v9 }
 0x490   : > { %4792 = vperm.xlu0 %9632, %v11866_v33   ;;  %v4222_v33 = vadd.f32 %v4174_v63, %v4006_v54  ;;  %v4223_v41 = vadd.f32 %v11876_v20, %v4007_v39  ;;  %v3413_v63 = vmul.f32 %v11470_v31, %v11764_v51  ;;  %v3145_v39 = vmul.f32 %v11738_v6, %v11463_v17 }
 0x491   : > { %v3527_v17 = vsel %vm1599_vm4, %v11891_v11, %v11829_v8 }
 0x492   : > { %4130 = vrot.lane.b32.xlu1 %v4056_v13, %s14898_s24  ;;  %v4439_v61 = vadd.f32 %v11910_v2, %v4223_v41  ;;  %v4438_v56 = vadd.f32 %v4390_v48, %v4222_v33  ;;  %v3144_v48 = vmul.f32 %v11738_v6, %v11455_v30  ;;  %v3843_v41 = vmul.f32 %v11486_v50, %v11725_v34 }
 0x493   : > { %v3627_v30 = vmul.f32 %v11452_v28, %v11725_v34 }
 0x494   : > { %3488 = vrot.lane.b32.xlu0 %v3411_v57, %s10034_s27  ;;  %v4654_v40 = vadd.f32 %v4606_v27, %v4438_v56  ;;  %v4655_v20 = vadd.f32 %v4545_v15, %v4439_v61  ;;  %v3311_v15 = vsel %vm1510_vm3, %v11868_v7, %v11797_v12  ;;  %v3197_v57 = vmul.f32 %v11448_v44, %v11764_v51 }
 0x495   : > { %v3360_v61 = vadd.f32 %v3311_v15, %v3144_v48 }
 0x496   : > { %4558 = vrot.lane.b32.xlu1 %v4486_v35, %s14875_s22  ;;  %v4698_v2 = vmul.f32 %v11934_v59, %v4654_v40  ;;  %v4699_v13 = vmul.f32 %v11934_v59, %v4655_v20  ;;  %v3361_v35 = vadd.f32 %v11797_v12, %v3145_v39  ;;  %v3743_v12 = vsel %vm1688_vm5, %v11915_v37, %v11861_v1 }
 0x497   : > { %v3576_v40 = vadd.f32 %v3527_v17, %v3360_v61  ;;  %v4057_v39 = vmul.f32 %v11552_v5, %v11584_v21 }
 0x498   : > { %3916 = vrot.lane.b32.xlu0 %v3841_v0, %s14893_s19  ;;  %v4743_v7 = vadd.f32 %v11958_v52, %v4698_v2  ;;  %v4744_v27 = vadd.f32 %v11958_v52, %v4699_v13  ;;  %v3577_v0 = vadd.f32 %v11829_v8, %v3361_v35  ;;  %v3959_v8 = vsel %vm1777_vm6, %v11886_v25, %v11899_v60 }
 0x499   : > { %v12022_v58 = vpop.permute.xlu1 %4782  ;;  %v3792_v13 = vadd.f32 %v3743_v12, %v3576_v40  ;;  %v4175_v25 = vsel %vm1866_vm7, %v11923_v3, %v11982_v46  ;;  %v3199_v35 = vmul.f32 %v11430_v53, %v11598_v29 }
 0x49a   : > { %4797 = vperm.xlu1 %9631, %v2746_v10   ;;  %v3793_v2 = vadd.f32 %v11861_v1, %v3577_v0  ;;  %v4487_v0 = vmul.f32 %v11564_v19, %v11572_v9 }
 0x49b   : > { %v4778_v47 = vpop.permute.xlu0 %4777  ;;  %v4008_v48 = vadd.f32 %v3959_v8, %v3792_v13  ;;  %v14906_v13 = vld [vmem:[#allocation46_spill] sm:$0xff] }
 0x49c   : > { %4344 = vrot.lane.b32.xlu0 %v4271_v45, %s14873_s0  ;;  %v4855_v10 = vmul.f32 %v4778_v47, %v4743_v7  ;;  %v4856_v11 = vmul.f32 %v4778_v47, %v4744_v27  ;;  %v4273_v45 = vmul.f32 %v11580_v16, %v11584_v21  ;;  %v4009_v1 = vadd.f32 %v11899_v60, %v3793_v2 }
 0x49d   : > { %v12031_v54 = vpop.permute.xlu1 %3472  ;;  %v4224_v27 = vadd.f32 %v4175_v25, %v4008_v48 }
 0x49e   : > { %3492 = vrot.lane.b32.xlu1 %v3413_v63, %s10034_s27  ;;  %v4225_v17 = vadd.f32 %v11982_v46, %v4009_v1 }
 0x49f   : > { %v4333_v33 = vpop.permute.xlu0 %4332 }
 0x4a0   : > { %3276 = vrot.lane.b32.xlu0 %v3197_v57, %s10035_s23  ;;  %v4391_v60 = vsel %vm1955_vm8, %v11953_v14, %v4333_v33 }
 0x4a1   : > { %v12052_v56 = vpop.permute.xlu1 %3258 }
 0x4a2   : > { %3920 = vrot.lane.b32.xlu1 %v3843_v41, %s14893_s19 }
 0x4a3   : > { %v12061_v20 = vpop.permute.xlu0 %4892 }
 0x4a4   : > { %14905 = vst [vmem:[#allocation26_spill] sm:$0xff] %v12061_v20  ;;  %3704 = vrot.lane.b32.xlu0 %v3627_v30, %s14896_s26  ;;  %v12071_v37 = vadd.f32 %v12061_v20, %v4856_v11  ;;  %v12074_v47 = vadd.f32 %v12061_v20, %v4855_v10  ;;  %v4441_v30 = vadd.f32 %v4333_v33, %v4225_v17 }
 0x4a5   : > { %v12076_v63 = vpop.permute.xlu1 %3686  ;;  %v4440_v11 = vadd.f32 %v4391_v60, %v4224_v27  ;;  %v3842_v60 = vmul.f32 %v11486_v50, %v11707_v55  ;;  %v4489_v27 = vmul.f32 %v11596_v49, %v11584_v21  ;;  %v4060_v21 = vmul.f32 %v11552_v5, %v14906_v13 }
 0x4a6   : > { %4348 = vrot.lane.b32.xlu1 %v4273_v45, %s14873_s0  ;;  %v4933_v15 = vand.u32 2147483647, %v12071_v37  ;;  %v4932_v57 = vand.u32 2147483647, %v12074_v47  ;;  %v3629_v45 = vmul.f32 %v11500_v43, %v11764_v51  ;;  %vm5061_vm1 = vcmp.ge.f32.partialorder %v12071_v37, 0.0 }
 0x4a7   : > { %v12087_v41 = vpop.permute.xlu0 %3256  ;;  %vm5060_vm2 = vcmp.ge.f32.partialorder %v12074_v47, 0.0  ;;  %v3628_v37 = vmul.f32 %v11500_v43, %v14906_v13  ;;  %v4274_v47 = vmul.f32 %v11538_v42, %v11707_v55 }
 0x4a8   : > { %4132 = vrot.lane.b32.xlu0 %v4057_v39, %s14898_s24  ;;  %v4965_v3 = vsub.f32 0.0, %v4933_v15  ;;  %v4964_v7 = vsub.f32 0.0, %v4932_v57  ;;  %v3412_v39 = vmul.f32 %v11470_v31, %v14906_v13  ;;  %v14907_v15 = vld [vmem:[#allocation24_spill] sm:$0xff] }
 0x4a9   : > { %v12095_v61 = vpop.permute.xlu1 %3474  ;;  %v4059_v57 = vmul.f32 %v14907_v15, %v11725_v34 }
 0x4aa   : > { %3280 = vrot.lane.b32.xlu1 %v3199_v35, %s10035_s23  ;;  %v4998_v12 = vmul.f32 1.442695, %v4965_v3  ;;  %v4996_v10 = vmul.f32 1.442695, %v4964_v7 }
 0x4ab   : > { %v4549_v46 = vpop.permute.xlu0 %4548 }
 0x4ac   : > { %v4607_v14 = vsel %vm2044_vm9, %v12015_v62, %v4549_v46  ;;  %v4657_v40 = vadd.f32 %v4549_v46, %v4441_v30  ;;  %4560 = vrot.lane.b32.xlu0 %v4487_v0, %s14875_s22  ;;  %9687 = vpow2.f32 %v4998_v12 }
 0x4ad   : > { %v4656_v33 = vadd.f32 %v4607_v14, %v4440_v11  ;;  %v12105_v2 = vpop.permute.xlu1 %3902  ;;  %9689 = vpow2.f32 %v4996_v10  ;;  %v4272_v10 = vmul.f32 %v11580_v16, %v11578_v23  ;;  %v14909_v14 = vld [vmem:[#allocation37_spill] sm:$0xff] }
 0x4ae   : > { %v4701_v8 = vmul.f32 %v11942_v24, %v4657_v40  ;;  %3708 = vrot.lane.b32.xlu1 %v3629_v45, %s14896_s26  ;;  %v3414_v40 = vmul.f32 %v11468_v32, %v14909_v14 }
 0x4af   : > { %v4700_v62 = vmul.f32 %v11942_v24, %v4656_v33  ;;  %v12112_v1 = vpop.permute.xlu0 %3470 }
 0x4b0   : > { %v4746_v25 = vadd.f32 %v11969_v38, %v4701_v8  ;;  %3490 = vrot.lane.b32.xlu0 %v3412_v39, %s10034_s27  ;;  %v3198_v39 = vmul.f32 %v11430_v53, %v14909_v14 }
 0x4b1   : > { %v4745_v48 = vadd.f32 %v11969_v38, %v4700_v62  ;;  %v12119_v35 = vpop.permute.xlu1 %3262 }
 0x4b2   : > { %14908 = vst [vmem:[#allocation31_spill] sm:$0xff] %v12119_v35  ;;  %v4858_v17 = vmul.f32 %v12022_v58, %v4746_v25  ;;  %4136 = vrot.lane.b32.xlu1 %v4059_v57, %s14898_s24  ;;  %v14919_v35 = vld [vmem:[#allocation42_spill] sm:$0xff] }
 0x4b3   : > { %v12125_v3 = vpop.permute.xlu0 %4897  ;;  %v4857_v7 = vmul.f32 %v12022_v58, %v4745_v48 }
 0x4b4   : > { %3918 = vrot.lane.b32.xlu0 %v3842_v60, %s14893_s19  ;;  %v12132_v30 = vadd.f32 %v12125_v3, %v4858_v17 }
 0x4b5   : > { %v12134_v0 = vpop.permute.xlu1 %3690  ;;  %v12137_v12 = vadd.f32 %v12125_v3, %v4857_v7 }
 0x4b6   : > { %4564 = vrot.lane.b32.xlu1 %v4489_v27, %s14875_s22  ;;  %v4935_v58 = vand.u32 2147483647, %v12132_v30  ;;  %vm5063_vm14 = vcmp.ge.f32.partialorder %v12132_v30, 0.0  ;;  %v3415_v30 = vmul.f32 %v11468_v32, %v11598_v29 }
 0x4b7   : > { %v12143_v11 = vpop.permute.xlu0 %3260  ;;  %v4934_v46 = vand.u32 2147483647, %v12137_v12  ;;  %vm5062_vm15 = vcmp.ge.f32.partialorder %v12137_v12, 0.0 }
 0x4b8   : > { %4346 = vrot.lane.b32.xlu0 %v4272_v10, %s14873_s0  ;;  %v4967_v45 = vsub.f32 0.0, %v4935_v58 }
 0x4b9   : > { %v9688_v33 = vpop.eup %9687  ;;  %v12149_v8 = vpop.permute.xlu1 %4118  ;;  %v4966_v62 = vsub.f32 0.0, %v4934_v46  ;;  %v3844_v46 = vmul.f32 %v11524_v4, %v14906_v13 }
 0x4ba   : > { %v9690_v25 = vpop.eup %9689  ;;  %3494 = vrot.lane.b32.xlu1 %v3414_v40, %s10034_s27  ;;  %v5093_v57 = vsub.f32 1.0, %v9688_v33  ;;  %v8920_v48 = vadd.f32 -1.0, %v9688_v33  ;;  %v5002_v17 = vmul.f32 1.442695, %v4967_v45 }
 0x4bb   : > { %v12154_v60 = vpop.permute.xlu0 %3688  ;;  %v5092_v7 = vsub.f32 1.0, %v9690_v25  ;;  %v8919_v27 = vadd.f32 -1.0, %v9690_v25  ;;  %v5000_v10 = vmul.f32 1.442695, %v4966_v62  ;;  %v4058_v62 = vmul.f32 %v14907_v15, %v11707_v55 }
 0x4bc   : > { %3278 = vrot.lane.b32.xlu0 %v3198_v39, %s10035_s23  ;;  %v5157_v58 = vsel %vm5061_vm1, %v5093_v57, %v8920_v48  ;;  %9691 = vpow2.f32 %v5002_v17  ;;  %v14911_v57 = vld [vmem:[#allocation44_spill] sm:$0xff] }
 0x4bd   : > { %v12161_v40 = vpop.permute.xlu1 %3478  ;;  %8951 = vmatprep.mubr.msk.f32.mxu0 %vm5217_vm0, %v5157_v58  ;;  %v5156_v45 = vsel %vm5060_vm2, %v5092_v7, %v8919_v27  ;;  %9693 = vpow2.f32 %v5000_v10  ;;  %v3200_v48 = vmul.f32 %v11448_v44, %v14911_v57  ;;  %v4488_v7 = vmul.f32 %v11596_v49, %v11578_v23 }
 0x4be   : > { %14910 = vst [vmem:[#allocation25_spill] sm:$0xff] %v12161_v40  ;;  %5331 = vmatmul.mubr.f32.vlgmr.msra.gmra.mxu0 %v5156_v45  ;;  %3922 = vrot.lane.b32.xlu1 %v3844_v46, %s14893_s19  ;;  %v3630_v10 = vmul.f32 %v11452_v28, %v14909_v14  ;;  %v3847_v40 = vmul.f32 %v11486_v50, %v11598_v29 }
 0x4bf   : > { %v12167_v33 = vpop.permute.xlu0 %3476 }
 0x4c0   : > { %3706 = vrot.lane.b32.xlu0 %v3628_v37, %s14896_s26 }
 0x4c1   : > { %v12172_v39 = vpop.permute.xlu1 %3906 }
 0x4c2   : > { %4350 = vrot.lane.b32.xlu1 %v4274_v47, %s14873_s0 }
 0x4c3   : > { %v12177_v25 = vpop.permute.xlu0 %3904 }
 0x4c4   : > { %4134 = vrot.lane.b32.xlu0 %v4058_v62, %s14898_s24 }
 0x4c5   : > { %v12182_v17 = vpop.permute.xlu1 %4334 }
 0x4c6   : > { %3282 = vrot.lane.b32.xlu1 %v3200_v48, %s10035_s23 }
 0x4c7   : > { %v12187_v27 = vpop.permute.xlu0 %3264 }
 0x4c8   : > { %14912 = vst [vmem:[#allocation24_spill] sm:$0xff] %v12187_v27  ;;  %4562 = vrot.lane.b32.xlu0 %v4488_v7, %s14875_s22 }
 0x4c9   : > { %v9692_v58 = vpop.eup %9691  ;;  %v12192_v46 = vpop.permute.xlu1 %3266 }
 0x4ca   : > { %14913 = vst [vmem:[#allocation52_spill] sm:$0xff] %v12192_v46  ;;  %v9694_v45 = vpop.eup %9693  ;;  %3710 = vrot.lane.b32.xlu1 %v3630_v10, %s14896_s26  ;;  %v5095_v37 = vsub.f32 1.0, %v9692_v58  ;;  %v8922_v47 = vadd.f32 -1.0, %v9692_v58 }
 0x4cb   : > { %v12195_v62 = vpop.permute.xlu0 %3692  ;;  %v5094_v48 = vsub.f32 1.0, %v9694_v45  ;;  %v8921_v23 = vadd.f32 -1.0, %v9694_v45  ;;  %v12208_v45 = vpop.f32.mrf.mxu1 }
 0x4cc   : > { %4802 = vperm.xlu0 %9632, %v12008_v26   ;;  %v5159_v7 = vsel %vm5063_vm14, %v5095_v37, %v8922_v47  ;;  %v4490_v26 = vmul.f32 %v11564_v19, %v11707_v55 }
 0x4cd   : > { %v12202_v46 = vpop.permute.xlu1 %3694  ;;  %8952 = vmatprep.mubr.msk.f32.mxu0 %vm5217_vm0, %v5159_v7  ;;  %v5158_v10 = vsel %vm5062_vm15, %v5094_v48, %v8921_v23  ;;  %v3845_v23 = vmul.f32 %v11524_v4, %v11764_v51  ;;  %v4275_v48 = vmul.f32 %v11538_v42, %v11725_v34 }
 0x4ce   : > { %14914 = vst [vmem:[#allocation53_spill] sm:$0xff] %v12202_v46  ;;  %5336 = vmatmul.mubr.f32.gmra.mxu0 %v5158_v10  ;;  %4138 = vrot.lane.b32.xlu1 %v4060_v21, %s14898_s24  ;;  %v2821_v21 = vpop.f32.mrf.mxu1  ;;  %v14916_v10 = vld [vmem:[#allocation27_spill] sm:$0xff] }
 0x4cf   : > { %v4121_v58 = vpop.permute.xlu0 %4120  ;;  %v3201_v55 = vmul.f32 %v11448_v44, %v14916_v10  ;;  %v14917_v46 = vld [vmem:[#allocation43_spill] sm:$0xff] }
 0x4d0   : > { %3496 = vrot.lane.b32.xlu0 %v3415_v30, %s10034_s27  ;;  %v3417_v30 = vmul.f32 %v11470_v31, %v14916_v10 }
 0x4d1   : > { %v12213_v12 = vpop.permute.xlu1 %4122 }
 0x4d2   : > { %4566 = vrot.lane.b32.xlu1 %v4490_v26, %s14875_s22 }
 0x4d3   : > { %v12218_v37 = vpop.permute.xlu0 %3480 }
 0x4d4   : > { %14915 = vst [vmem:[#allocation54_spill] sm:$0xff] %v12218_v37  ;;  %3924 = vrot.lane.b32.xlu0 %v3845_v23, %s14893_s19  ;;  %v3312_v37 = vsel %vm1510_vm3, %v11994_v36, %v12087_v41  ;;  %v4277_v36 = vmul.f32 %v11580_v16, %v11764_v51 }
 0x4d5   : > { %v4551_v47 = vpop.permute.xlu1 %4550 }
 0x4d6   : > { %4807 = vperm.xlu1 %9631, %v2821_v21   ;;  %v3147_v21 = vmul.f32 %v11720_v18, %v14917_v46  ;;  %v3146_v46 = vmul.f32 %v11720_v18, %v14919_v35  ;;  %v3744_v35 = vsel %vm1688_vm5, %v12076_v63, %v12154_v60 }
 0x4d7   : > { %v12223_v7 = vpop.permute.xlu0 %3908 }
 0x4d8   : > { %4352 = vrot.lane.b32.xlu0 %v4275_v48, %s14873_s0 }
 0x4d9   : > { %v12228_v26 = vpop.permute.xlu1 %4787 }
 0x4da   : > { %3500 = vrot.lane.b32.xlu1 %v3417_v30, %s10034_s27  ;;  %v3363_v30 = vadd.f32 %v12087_v41, %v3147_v21  ;;  %v3362_v41 = vadd.f32 %v3312_v37, %v3146_v46  ;;  %v3960_v37 = vsel %vm1777_vm6, %v12105_v2, %v12177_v25 }
 0x4db   : > { %v4337_v23 = vpop.permute.xlu0 %4336 }
 0x4dc   : > { %3284 = vrot.lane.b32.xlu0 %v3201_v55, %s10035_s23 }
 0x4dd   : > { %v12238_v48 = vpop.permute.xlu1 %3484 }
 0x4de   : > { %14918 = vst [vmem:[#allocation43_spill] sm:$0xff] %v12238_v48  ;;  %3928 = vrot.lane.b32.xlu1 %v3847_v40, %s14893_s19  ;;  %v3528_v48 = vsel %vm1599_vm4, %v12112_v1, %v12031_v54  ;;  %v3579_v40 = vadd.f32 %v12031_v54, %v3363_v30  ;;  %v14921_v54 = vld [vmem:[#allocation29_spill] sm:$0xff] }
 0x4df   : > { %v12249_v55 = vpop.permute.xlu0 %3268  ;;  %v3578_v1 = vadd.f32 %v3528_v48, %v3362_v41  ;;  %v3203_v30 = vmul.f32 %v11430_v53, %v14921_v54  ;;  %v4176_v48 = vsel %vm1866_vm7, %v12149_v8, %v4121_v58 }
 0x4e0   : > { %14920 = vst [vmem:[#allocation42_spill] sm:$0xff] %v12249_v55  ;;  %3712 = vrot.lane.b32.xlu0 %v3631_v22, %s14896_s26  ;;  %v4061_v55 = vmul.f32 %v11552_v5, %v11764_v51  ;;  %v3795_v22 = vadd.f32 %v12154_v60, %v3579_v40  ;;  %v4491_v60 = vmul.f32 %v11564_v19, %v11725_v34 }
 0x4e1   : > { %v12257_v21 = vpop.permute.xlu1 %3912  ;;  %v3794_v63 = vadd.f32 %v3744_v35, %v3578_v1  ;;  %v4392_v40 = vsel %vm1955_vm8, %v12182_v17, %v4337_v23  ;;  %v4063_v17 = vmul.f32 %v14907_v15, %v11598_v29 }
 0x4e2   : > { %4356 = vrot.lane.b32.xlu1 %v4277_v36, %s14873_s0  ;;  %v4011_v36 = vadd.f32 %v12177_v25, %v3795_v22  ;;  %v3633_v25 = vmul.f32 %v11500_v43, %v14916_v10  ;;  %v3416_v22 = vmul.f32 %v11470_v31, %v14911_v57 }
 0x4e3   : > { %v12266_v27 = vpop.permute.xlu0 %3696  ;;  %v4010_v41 = vadd.f32 %v3960_v37, %v3794_v63 }
 0x4e4   : > { %4140 = vrot.lane.b32.xlu0 %v4061_v55, %s14898_s24  ;;  %v4227_v55 = vadd.f32 %v4121_v58, %v4011_v36 }
 0x4e5   : > { %v12275_v46 = vpop.permute.xlu1 %4340  ;;  %v4226_v35 = vadd.f32 %v4176_v48, %v4010_v41 }
 0x4e6   : > { %3288 = vrot.lane.b32.xlu1 %v3203_v30, %s10035_s23  ;;  %v4443_v8 = vadd.f32 %v4337_v23, %v4227_v55 }
 0x4e7   : > { %v12283_v2 = vpop.permute.xlu0 %4124  ;;  %v4442_v37 = vadd.f32 %v4392_v40, %v4226_v35  ;;  %v4493_v40 = vmul.f32 %v11596_v49, %v11764_v51 }
 0x4e8   : > { %4568 = vrot.lane.b32.xlu0 %v4491_v60, %s14875_s22  ;;  %v3846_v60 = vmul.f32 %v11486_v50, %v14909_v14 }
 0x4e9   : > { %v12290_v1 = vpop.permute.xlu1 %3272 }
 0x4ea   : > { %14922 = vst [vmem:[#allocation55_spill] sm:$0xff] %v12290_v1  ;;  %3716 = vrot.lane.b32.xlu1 %v3633_v25, %s14896_s26 }
 0x4eb   : > { %v4553_v30 = vpop.permute.xlu0 %4552 }
 0x4ec   : > { %v4608_v58 = vsel %vm2044_vm9, %v4551_v47, %v4553_v30  ;;  %v4659_v63 = vadd.f32 %v4553_v30, %v4443_v8  ;;  %3498 = vrot.lane.b32.xlu0 %v3416_v22, %s10034_s27  ;;  %v14925_v8 = vld [vmem:[#allocation23_spill] sm:$0xff]  ;;  %v4276_v30 = vmul.f32 %v11580_v16, %v14906_v13 }
 0x4ed   : > { %v4658_v36 = vadd.f32 %v4608_v58, %v4442_v37  ;;  %v12299_v48 = vpop.permute.xlu1 %3700  ;;  %v3149_v22 = vmul.f32 %v11738_v6, %v14925_v8 }
 0x4ee   : > { %14923 = vst [vmem:[#allocation56_spill] sm:$0xff] %v12299_v48  ;;  %v4703_v23 = vmul.f32 %v11934_v59, %v4659_v63  ;;  %4144 = vrot.lane.b32.xlu1 %v4063_v17, %s14898_s24 }
 0x4ef   : > { %v4702_v41 = vmul.f32 %v11934_v59, %v4658_v36  ;;  %v12306_v55 = vpop.permute.xlu0 %3482  ;;  %v3365_v17 = vadd.f32 %v12143_v11, %v3149_v22  ;;  %v14926_v36 = vld [vmem:[#allocation50_spill] sm:$0xff] }
 0x4f0   : > { %14924 = vst [vmem:[#allocation57_spill] sm:$0xff] %v12306_v55  ;;  %v4748_v47 = vadd.f32 %v11958_v52, %v4703_v23  ;;  %3926 = vrot.lane.b32.xlu0 %v3846_v60, %s14893_s19  ;;  %v3418_v23 = vmul.f32 %v11468_v32, %v14926_v36 }
 0x4f1   : > { %v4747_v25 = vadd.f32 %v11958_v52, %v4702_v41  ;;  %v12313_v35 = vpop.permute.xlu1 %4128 }
 0x4f2   : > { %v4860_v37 = vmul.f32 %v12228_v26, %v4748_v47  ;;  %4572 = vrot.lane.b32.xlu1 %v4493_v40, %s14875_s22  ;;  %v3581_v40 = vadd.f32 %v12167_v33, %v3365_v17 }
 0x4f3   : > { %v12321_v58 = vpop.permute.xlu0 %3910  ;;  %v4859_v63 = vmul.f32 %v12228_v26, %v4747_v25  ;;  %v3202_v26 = vmul.f32 %v11430_v53, %v14926_v36 }
 0x4f4   : > { %4354 = vrot.lane.b32.xlu0 %v4276_v30, %s14873_s0  ;;  %v12329_v60 = vadd.f32 %v12061_v20, %v4860_v37  ;;  %v3797_v30 = vadd.f32 %v12195_v62, %v3581_v40  ;;  %v3848_v37 = vmul.f32 %v11524_v4, %v14911_v57  ;;  %v3632_v40 = vmul.f32 %v11500_v43, %v14911_v57 }
 0x4f5   : > { %v4557_v41 = vpop.permute.xlu1 %4556  ;;  %v12332_v47 = vadd.f32 %v12061_v20, %v4859_v63 }
 0x4f6   : > { %3502 = vrot.lane.b32.xlu1 %v3418_v23, %s10034_s27  ;;  %v4937_v25 = vand.u32 2147483647, %v12329_v60  ;;  %v3313_v23 = vsel %vm1510_vm3, %v12052_v56, %v12143_v11  ;;  %v4013_v1 = vadd.f32 %v12223_v7, %v3797_v30  ;;  %v4278_v11 = vmul.f32 %v11538_v42, %v14909_v14 }
 0x4f7   : > { %v4339_v8 = vpop.permute.xlu0 %4338  ;;  %v4936_v22 = vand.u32 2147483647, %v12332_v47  ;;  %vm5065_vm1 = vcmp.ge.f32.partialorder %v12329_v60, 0.0  ;;  %vm5064_vm2 = vcmp.ge.f32.partialorder %v12332_v47, 0.0 }
 0x4f8   : > { %3286 = vrot.lane.b32.xlu0 %v3202_v26, %s10035_s23  ;;  %v4969_v63 = vsub.f32 0.0, %v4937_v25  ;;  %v14927_v26 = vld [vmem:[#allocation49_spill] sm:$0xff]  ;;  %v4229_v56 = vadd.f32 %v12283_v2, %v4013_v1 }
 0x4f9   : > { %v12344_v51 = vpop.permute.xlu1 %3486  ;;  %v4968_v17 = vsub.f32 0.0, %v4936_v22  ;;  %v3148_v55 = vmul.f32 %v11738_v6, %v14927_v26  ;;  %v3529_v22 = vsel %vm1599_vm4, %v12095_v61, %v12167_v33  ;;  %v4062_v61 = vmul.f32 %v14907_v15, %v14909_v14 }
 0x4fa   : > { %3930 = vrot.lane.b32.xlu1 %v3848_v37, %s14893_s19  ;;  %v5006_v34 = vmul.f32 1.442695, %v4969_v63  ;;  %v3745_v63 = vsel %vm1688_vm5, %v12134_v0, %v12195_v62 }
 0x4fb   : > { %v12355_v48 = vpop.permute.xlu0 %3270  ;;  %v5004_v25 = vmul.f32 1.442695, %v4968_v17  ;;  %v3364_v30 = vadd.f32 %v3313_v23, %v3148_v55  ;;  %v4445_v55 = vadd.f32 %v12275_v46, %v4229_v56  ;;  %v14928_v17 = vld [vmem:[#allocation51_spill] sm:$0xff]  ;;  %v3634_v56 = vmul.f32 %v11452_v28, %v14926_v36 }
 0x4fc   : > { %3714 = vrot.lane.b32.xlu0 %v3632_v40, %s14896_s26  ;;  %9695 = vpow2.f32 %v5006_v34  ;;  %v3961_v34 = vsel %vm1777_vm6, %v12172_v39, %v12223_v7  ;;  %v3204_v23 = vmul.f32 %v11448_v44, %v14928_v17  ;;  %v4177_v40 = vsel %vm1866_vm7, %v12213_v12, %v12283_v2 }
 0x4fd   : > { %v12364_v37 = vpop.permute.xlu1 %3914  ;;  %9697 = vpow2.f32 %v5004_v25  ;;  %v3580_v33 = vadd.f32 %v3529_v22, %v3364_v30  ;;  %v4661_v26 = vadd.f32 %v4557_v41, %v4445_v55  ;;  %v4492_v39 = vmul.f32 %v11596_v49, %v14906_v13 }
 0x4fe   : > { %4358 = vrot.lane.b32.xlu1 %v4278_v11, %s14873_s0  ;;  %v4393_v22 = vsel %vm1955_vm8, %v4339_v8, %v12275_v46  ;;  %v4064_v46 = vmul.f32 %v11552_v5, %v14911_v57 }
 0x4ff   : > { %v12372_v1 = vpop.permute.xlu0 %3698  ;;  %v3796_v0 = vadd.f32 %v3745_v63, %v3580_v33  ;;  %v4705_v12 = vmul.f32 %v11942_v24, %v4661_v26 }
 0x500   : > { %4142 = vrot.lane.b32.xlu0 %v4062_v61, %s14898_s24 }
 0x501   : > { %v12381_v62 = vpop.permute.xlu1 %4342  ;;  %v4012_v7 = vadd.f32 %v3961_v34, %v3796_v0  ;;  %v3419_v0 = vmul.f32 %v11468_v32, %v14921_v54 }
 0x502   : > { %3290 = vrot.lane.b32.xlu1 %v3204_v23, %s10035_s23  ;;  %v4750_v23 = vadd.f32 %v11969_v38, %v4705_v12  ;;  %v4494_v12 = vmul.f32 %v11564_v19, %v14909_v14  ;;  %v14936_v14 = vld [vmem:[#allocation54_spill] sm:$0xff] }
 0x503   : > { %v12389_v25 = vpop.permute.xlu0 %4126  ;;  %v4228_v11 = vadd.f32 %v4177_v40, %v4012_v7 }
 0x504   : > { %4570 = vrot.lane.b32.xlu0 %v4492_v39, %s14875_s22 }
 0x505   : > { %v12396_v30 = vpop.permute.xlu1 %3274  ;;  %v4444_v2 = vadd.f32 %v4393_v22, %v4228_v11  ;;  %v12412_v22 = vpop.f32.mrf.mxu0 }
 0x506   : > { %14929 = vst [vmem:[#allocation23_spill] sm:$0xff] %v12396_v30  ;;  %3718 = vrot.lane.b32.xlu1 %v3634_v56, %s14896_s26 }
 0x507   : > { %v4555_v63 = vpop.permute.xlu0 %4554 }
 0x508   : > { %v4609_v61 = vsel %vm2044_vm9, %v4555_v63, %v4557_v41  ;;  %4812 = vperm.xlu0 %9632, %v12208_v45  }
 0x509   : > { %v9696_v8 = vpop.eup %9695  ;;  %v4660_v33 = vadd.f32 %v4609_v61, %v4444_v2  ;;  %v12404_v34 = vpop.permute.xlu1 %3702 }
 0x50a   : > { %v9698_v55 = vpop.eup %9697  ;;  %4146 = vrot.lane.b32.xlu1 %v4064_v46, %s14898_s24  ;;  %v5097_v40 = vsub.f32 1.0, %v9696_v8  ;;  %v8924_v26 = vadd.f32 -1.0, %v9696_v8  ;;  %v3849_v46 = vmul.f32 %v11524_v4, %v14916_v10 }
 0x50b   : > { %v4704_v41 = vmul.f32 %v11942_v24, %v4660_v33  ;;  %v4793_v45 = vpop.permute.xlu0 %4792  ;;  %v5096_v39 = vsub.f32 1.0, %v9698_v55  ;;  %v8923_v7 = vadd.f32 -1.0, %v9698_v55  ;;  %v2896_v33 = vpop.f32.mrf.mxu0 }
 0x50c   : > { %v4862_v56 = vmul.f32 %v4793_v45, %v4750_v23  ;;  %3504 = vrot.lane.b32.xlu0 %v3419_v0, %s10034_s27  ;;  %v5161_v11 = vsel %vm5065_vm1, %v5097_v40, %v8924_v26  ;;  %v4279_v26 = vmul.f32 %v11538_v42, %v11598_v29 }
 0x50d   : > { %v4749_v2 = vadd.f32 %v11969_v38, %v4704_v41  ;;  %v12419_v63 = vpop.permute.xlu1 %4130  ;;  %8953 = vmatprep.mubr.msk.f32.mxu0 %vm5217_vm0, %v5161_v11  ;;  %v5160_v60 = vsel %vm5064_vm2, %v5096_v39, %v8923_v7  ;;  %v14930_v7 = vld [vmem:[#allocation30_spill] sm:$0xff] }
 0x50e   : > { %v12423_v61 = vadd.f32 %v12125_v3, %v4862_v56  ;;  %5341 = vmatmul.mubr.f32.gmra.mxu0 %v5160_v60  ;;  %4574 = vrot.lane.b32.xlu1 %v4494_v12, %s14875_s22  ;;  %v3421_v56 = vmul.f32 %v11470_v31, %v14930_v7 }
 0x50f   : > { %v4861_v47 = vmul.f32 %v4793_v45, %v4749_v2  ;;  %v12428_v8 = vpop.permute.xlu0 %3488  ;;  %v3205_v2 = vmul.f32 %v11448_v44, %v14930_v7 }
 0x510   : > { %v4939_v55 = vand.u32 2147483647, %v12423_v61  ;;  %3932 = vrot.lane.b32.xlu0 %v3849_v46, %s14893_s19  ;;  %vm5067_vm14 = vcmp.ge.f32.partialorder %v12423_v61, 0.0  ;;  %v4067_v61 = vmul.f32 %v14907_v15, %v14921_v54 }
 0x511   : > { %v12433_v23 = vadd.f32 %v12125_v3, %v4861_v47  ;;  %v12435_v0 = vpop.permute.xlu1 %4558  ;;  %v3151_v47 = vmul.f32 %v11720_v18, %v11572_v9  ;;  %v14934_v9 = vld [vmem:[#allocation35_spill] sm:$0xff] }
 0x512   : > { %v4971_v40 = vsub.f32 0.0, %v4939_v55  ;;  %4817 = vperm.xlu1 %9631, %v2896_v33   ;;  %v3851_v33 = vmul.f32 %v11486_v50, %v14921_v54 }
 0x513   : > { %v4938_v41 = vand.u32 2147483647, %v12433_v23  ;;  %v12440_v45 = vpop.permute.xlu0 %3916  ;;  %vm5066_vm15 = vcmp.ge.f32.partialorder %v12433_v23, 0.0  ;;  %v14944_v23 = vld [vmem:[#allocation40_spill] sm:$0xff] }
 0x514   : > { %v5010_v39 = vmul.f32 1.442695, %v4971_v40  ;;  %4360 = vrot.lane.b32.xlu0 %v4279_v26, %s14873_s0  ;;  %v14932_v40 = vld [vmem:[#allocation24_spill] sm:$0xff]  ;;  %v14933_v26 = vld [vmem:[#allocation31_spill] sm:$0xff] }
 0x515   : > { %v4970_v11 = vsub.f32 0.0, %v4938_v41  ;;  %v12445_v12 = vpop.permute.xlu1 %4797  ;;  %v3314_v41 = vsel %vm1510_vm3, %v14933_v26, %v14932_v40  ;;  %v14939_v26 = vld [vmem:[#allocation53_spill] sm:$0xff] }
 0x516   : > { %9699 = vpow2.f32 %v5010_v39  ;;  %3508 = vrot.lane.b32.xlu1 %v3421_v56, %s10034_s27  ;;  %v3367_v39 = vadd.f32 %v14932_v40, %v3151_v47  ;;  %v3635_v56 = vmul.f32 %v11452_v28, %v14921_v54  ;;  %v4281_v47 = vmul.f32 %v11580_v16, %v14916_v10 }
 0x517   : > { %v5008_v60 = vmul.f32 1.442695, %v4970_v11  ;;  %v4345_v46 = vpop.permute.xlu0 %4344  ;;  %v3150_v11 = vmul.f32 %v11720_v18, %v14934_v9  ;;  %v3746_v9 = vsel %vm1688_vm5, %v14939_v26, %v12266_v27 }
 0x518   : > { %3292 = vrot.lane.b32.xlu0 %v3205_v2, %s10035_s23  ;;  %v3583_v30 = vadd.f32 %v14936_v14, %v3367_v39 }
 0x519   : > { %9701 = vpow2.f32 %v5008_v60  ;;  %v12455_v55 = vpop.permute.xlu1 %3492  ;;  %v14937_v60 = vld [vmem:[#allocation25_spill] sm:$0xff] }
 0x51a   : > { %14931 = vst [vmem:[#allocation49_spill] sm:$0xff] %v12455_v55  ;;  %3936 = vrot.lane.b32.xlu1 %v3851_v33, %s14893_s19  ;;  %v3530_v13 = vsel %vm1599_vm4, %v14937_v60, %v14936_v14  ;;  %v3366_v33 = vadd.f32 %v3314_v41, %v3150_v11  ;;  %v3799_v55 = vadd.f32 %v12266_v27, %v3583_v30 }
 0x51b   : > { %v12466_v2 = vpop.permute.xlu0 %3276  ;;  %v4065_v60 = vmul.f32 %v11552_v5, %v14916_v10  ;;  %v3962_v41 = vsel %vm1777_vm6, %v12321_v58, %v12257_v21  ;;  %v4495_v30 = vmul.f32 %v11564_v19, %v11598_v29 }
 0x51c   : > { %14935 = vst [vmem:[#allocation51_spill] sm:$0xff] %v12466_v2  ;;  %3720 = vrot.lane.b32.xlu0 %v3635_v56, %s14896_s26  ;;  %v3582_v14 = vadd.f32 %v3530_v13, %v3366_v33  ;;  %v14940_v56 = vld [vmem:[#allocation28_spill] sm:$0xff]  ;;  %v4015_v27 = vadd.f32 %v12257_v21, %v3799_v55  ;;  %v4178_v13 = vsel %vm1866_vm7, %v12389_v25, %v12313_v35 }
 0x51d   : > { %v12475_v40 = vpop.permute.xlu1 %3920  ;;  %v3207_v11 = vmul.f32 %v11430_v53, %v14940_v56  ;;  %v4394_v21 = vsel %vm1955_vm8, %v12381_v62, %v4345_v46 }
 0x51e   : > { %14938 = vst [vmem:[#allocation24_spill] sm:$0xff] %v12475_v40  ;;  %4364 = vrot.lane.b32.xlu1 %v4281_v47, %s14873_s0  ;;  %v3798_v26 = vadd.f32 %v3746_v9, %v3582_v14  ;;  %v3637_v9 = vmul.f32 %v11500_v43, %v14930_v7 }
 0x51f   : > { %v12484_v39 = vpop.permute.xlu0 %3704 }
 0x520   : > { %4148 = vrot.lane.b32.xlu0 %v4065_v60, %s14898_s24  ;;  %v4014_v47 = vadd.f32 %v3962_v41, %v3798_v26  ;;  %v4231_v60 = vadd.f32 %v12313_v35, %v4015_v27  ;;  %v3420_v35 = vmul.f32 %v11470_v31, %v14928_v17 }
 0x521   : > { %v12492_v2 = vpop.permute.xlu1 %4348 }
 0x522   : > { %3296 = vrot.lane.b32.xlu1 %v3207_v11, %s10035_s23  ;;  %v4230_v14 = vadd.f32 %v4178_v13, %v4014_v47  ;;  %v4447_v26 = vadd.f32 %v4345_v46, %v4231_v60 }
 0x523   : > { %v9700_v58 = vpop.eup %9699  ;;  %v12501_v33 = vpop.permute.xlu0 %4132 }
 0x524   : > { %4576 = vrot.lane.b32.xlu0 %v4495_v30, %s14875_s22  ;;  %v5099_v25 = vsub.f32 1.0, %v9700_v58  ;;  %v8926_v55 = vadd.f32 -1.0, %v9700_v58  ;;  %v4446_v27 = vadd.f32 %v4394_v21, %v4230_v14 }
 0x525   : > { %v12509_v11 = vpop.permute.xlu1 %3280 }
 0x526   : > { %14941 = vst [vmem:[#allocation31_spill] sm:$0xff] %v12509_v11  ;;  %v9702_v41 = vpop.eup %9701  ;;  %3724 = vrot.lane.b32.xlu1 %v3637_v9, %s14896_s26  ;;  %v5163_v29 = vsel %vm5067_vm14, %v5099_v25, %v8926_v55  ;;  %v3153_v25 = vmul.f32 %v11738_v6, %v14944_v23 }
 0x527   : > { %8954 = vmatprep.mubr.msk.f32.mxu0 %vm5217_vm0, %v5163_v29  ;;  %v4561_v62 = vpop.permute.xlu0 %4560  ;;  %v5098_v30 = vsub.f32 1.0, %v9702_v41  ;;  %v8925_v40 = vadd.f32 -1.0, %v9702_v41 }
 0x528   : > { %v4610_v13 = vsel %vm2044_vm9, %v12435_v0, %v4561_v62  ;;  %v4663_v58 = vadd.f32 %v4561_v62, %v4447_v26  ;;  %3506 = vrot.lane.b32.xlu0 %v3420_v35, %s10034_s27  ;;  %v3850_v0 = vmul.f32 %v11486_v50, %v14926_v36  ;;  %v14945_v26 = vld [vmem:[#allocation42_spill] sm:$0xff]  ;;  %v4280_v62 = vmul.f32 %v11580_v16, %v14911_v57 }
 0x529   : > { %v4662_v46 = vadd.f32 %v4610_v13, %v4446_v27  ;;  %v12522_v47 = vpop.permute.xlu1 %3708  ;;  %v5162_v9 = vsel %vm5066_vm15, %v5098_v30, %v8925_v40  ;;  %v4497_v40 = vmul.f32 %v11596_v49, %v14916_v10  ;;  %v3369_v35 = vadd.f32 %v14945_v26, %v3153_v25 }
 0x52a   : > { %14942 = vst [vmem:[#allocation35_spill] sm:$0xff] %v12522_v47  ;;  %v4707_v29 = vmul.f32 %v11934_v59, %v4663_v58  ;;  %5346 = vmatmul.mubr.f32.gmra.mxu0 %v5162_v9  ;;  %4152 = vrot.lane.b32.xlu1 %v4067_v61, %s14898_s24  ;;  %v14946_v58 = vld [vmem:[#allocation39_spill] sm:$0xff] }
 0x52b   : > { %v4706_v60 = vmul.f32 %v11934_v59, %v4662_v46  ;;  %v12529_v21 = vpop.permute.xlu0 %3490  ;;  %v3422_v61 = vmul.f32 %v11468_v32, %v14946_v58  ;;  %v3206_v23 = vmul.f32 %v11430_v53, %v14946_v58 }
 0x52c   : > { %14943 = vst [vmem:[#allocation54_spill] sm:$0xff] %v12529_v21  ;;  %v4752_v55 = vadd.f32 %v11958_v52, %v4707_v29  ;;  %3934 = vrot.lane.b32.xlu0 %v3850_v0, %s14893_s19  ;;  %v14947_v0 = vld [vmem:[#allocation43_spill] sm:$0xff] }
 0x52d   : > { %v4751_v14 = vadd.f32 %v11958_v52, %v4706_v60  ;;  %v12538_v41 = vpop.permute.xlu1 %4136  ;;  %v3585_v60 = vadd.f32 %v14947_v0, %v3369_v35 }
 0x52e   : > { %v4864_v27 = vmul.f32 %v12445_v12, %v4752_v55  ;;  %4580 = vrot.lane.b32.xlu1 %v4497_v40, %s14875_s22  ;;  %v14948_v40 = vld [vmem:[#allocation56_spill] sm:$0xff] }
 0x52f   : > { %v12545_v30 = vpop.permute.xlu0 %3918  ;;  %v4863_v13 = vmul.f32 %v12445_v12, %v4751_v14  ;;  %v3801_v14 = vadd.f32 %v14948_v40, %v3585_v60  ;;  %v3636_v60 = vmul.f32 %v11500_v43, %v14928_v17 }
 0x530   : > { %4362 = vrot.lane.b32.xlu0 %v4280_v62, %s14873_s0  ;;  %v12552_v46 = vadd.f32 %v12061_v20, %v4864_v27  ;;  %v3852_v27 = vmul.f32 %v11524_v4, %v14928_v17 }
 0x531   : > { %v4565_v9 = vpop.permute.xlu1 %4564  ;;  %v12555_v29 = vadd.f32 %v12061_v20, %v4863_v13  ;;  %v4017_v11 = vadd.f32 %v12440_v45, %v3801_v14  ;;  %v4282_v14 = vmul.f32 %v11538_v42, %v14926_v36 }
 0x532   : > { %3510 = vrot.lane.b32.xlu1 %v3422_v61, %s10034_s27  ;;  %v4941_v12 = vand.u32 2147483647, %v12552_v46  ;;  %v14950_v61 = vld [vmem:[#allocation52_spill] sm:$0xff]  ;;  %vm5069_vm1 = vcmp.ge.f32.partialorder %v12552_v46, 0.0 }
 0x533   : > { %v4347_v25 = vpop.permute.xlu0 %4346  ;;  %v4940_v55 = vand.u32 2147483647, %v12555_v29  ;;  %v3315_v10 = vsel %vm1510_vm3, %v14950_v61, %v14945_v26  ;;  %v4233_v26 = vadd.f32 %v12501_v33, %v4017_v11  ;;  %vm5068_vm2 = vcmp.ge.f32.partialorder %v12555_v29, 0.0 }
 0x534   : > { %3294 = vrot.lane.b32.xlu0 %v3206_v23, %s10035_s23  ;;  %v4973_v62 = vsub.f32 0.0, %v4941_v12  ;;  %v14951_v23 = vld [vmem:[#allocation36_spill] sm:$0xff] }
 0x535   : > { %v12567_v13 = vpop.permute.xlu1 %3494  ;;  %v4972_v35 = vsub.f32 0.0, %v4940_v55  ;;  %v3152_v47 = vmul.f32 %v11738_v6, %v14951_v23  ;;  %v14952_v55 = vld [vmem:[#allocation57_spill] sm:$0xff] }
 0x536   : > { %14949 = vst [vmem:[#allocation25_spill] sm:$0xff] %v12567_v13  ;;  %3938 = vrot.lane.b32.xlu1 %v3852_v27, %s14893_s19  ;;  %v5014_v21 = vmul.f32 1.442695, %v4973_v62  ;;  %v3531_v13 = vsel %vm1599_vm4, %v14952_v55, %v14947_v0  ;;  %v4066_v0 = vmul.f32 %v14907_v15, %v14926_v36  ;;  %v4395_v55 = vsel %vm1955_vm8, %v4347_v25, %v12492_v2 }
 0x537   : > { %v12578_v20 = vpop.permute.xlu0 %3278  ;;  %v5012_v12 = vmul.f32 1.442695, %v4972_v35  ;;  %v3368_v27 = vadd.f32 %v3315_v10, %v3152_v47  ;;  %v3747_v35 = vsel %vm1688_vm5, %v12372_v1, %v14948_v40  ;;  %v4449_v10 = vadd.f32 %v12492_v2, %v4233_v26  ;;  %v14953_v47 = vld [vmem:[#allocation41_spill] sm:$0xff] }
 0x538   : > { %3722 = vrot.lane.b32.xlu0 %v3636_v60, %s14896_s26  ;;  %9703 = vpow2.f32 %v5014_v21  ;;  %v3963_v21 = vsel %vm1777_vm6, %v12364_v37, %v12440_v45  ;;  %v3208_v60 = vmul.f32 %v11448_v44, %v14953_v47  ;;  %v4496_v37 = vmul.f32 %v11596_v49, %v14911_v57 }
 0x539   : > { %v12587_v62 = vpop.permute.xlu1 %3922  ;;  %9705 = vpow2.f32 %v5012_v12  ;;  %v3584_v11 = vadd.f32 %v3531_v13, %v3368_v27  ;;  %v4179_v13 = vsel %vm1866_vm7, %v12419_v63, %v12501_v33  ;;  %v4665_v23 = vadd.f32 %v4565_v9, %v4449_v10 }
 0x53a   : > { %4366 = vrot.lane.b32.xlu1 %v4282_v14, %s14873_s0  ;;  %v3638_v26 = vmul.f32 %v11452_v28, %v14946_v58  ;;  %v4068_v2 = vmul.f32 %v11552_v5, %v14928_v17 }
 0x53b   : > { %v12595_v61 = vpop.permute.xlu0 %3706  ;;  %v3800_v1 = vadd.f32 %v3747_v35, %v3584_v11  ;;  %v4709_v63 = vmul.f32 %v11942_v24, %v4665_v23 }
 0x53c   : > { %4150 = vrot.lane.b32.xlu0 %v4066_v0, %s14898_s24 }
 0x53d   : > { %v12604_v40 = vpop.permute.xlu1 %4350  ;;  %v4016_v45 = vadd.f32 %v3963_v21, %v3800_v1  ;;  %v3423_v1 = vmul.f32 %v11468_v32, %v14940_v56 }
 0x53e   : > { %3298 = vrot.lane.b32.xlu1 %v3208_v60, %s10035_s23  ;;  %v4754_v60 = vadd.f32 %v11969_v38, %v4709_v63  ;;  %v4498_v63 = vmul.f32 %v11564_v19, %v14926_v36 }
 0x53f   : > { %v12612_v12 = vpop.permute.xlu0 %4134  ;;  %v4232_v14 = vadd.f32 %v4179_v13, %v4016_v45 }
 0x540   : > { %4578 = vrot.lane.b32.xlu0 %v4496_v37, %s14875_s22 }
 0x541   : > { %v12619_v27 = vpop.permute.xlu1 %3282  ;;  %v4448_v33 = vadd.f32 %v4395_v55, %v4232_v14  ;;  %v12635_v55 = vpop.f32.mrf.mxu1 }
 0x542   : > { %14954 = vst [vmem:[#allocation53_spill] sm:$0xff] %v12619_v27  ;;  %3726 = vrot.lane.b32.xlu1 %v3638_v26, %s14896_s26 }
 0x543   : > { %v4563_v35 = vpop.permute.xlu0 %4562 }
 0x544   : > { %v4611_v0 = vsel %vm2044_vm9, %v4563_v35, %v4565_v9  ;;  %4822 = vperm.xlu0 %9632, %v12412_v22  }
 0x545   : > { %v9704_v25 = vpop.eup %9703  ;;  %v4664_v11 = vadd.f32 %v4611_v0, %v4448_v33  ;;  %v12627_v21 = vpop.permute.xlu1 %3710 }
 0x546   : > { %v9706_v10 = vpop.eup %9705  ;;  %4154 = vrot.lane.b32.xlu1 %v4068_v2, %s14898_s24  ;;  %v5101_v13 = vsub.f32 1.0, %v9704_v25  ;;  %v8928_v23 = vadd.f32 -1.0, %v9704_v25  ;;  %v3853_v2 = vmul.f32 %v11524_v4, %v14930_v7 }
 0x547   : > { %v4708_v9 = vmul.f32 %v11942_v24, %v4664_v11  ;;  %v4803_v22 = vpop.permute.xlu0 %4802  ;;  %v5100_v37 = vsub.f32 1.0, %v9706_v10  ;;  %v8927_v45 = vadd.f32 -1.0, %v9706_v10  ;;  %v2971_v11 = vpop.f32.mrf.mxu1 }
 0x548   : > { %v4866_v26 = vmul.f32 %v4803_v22, %v4754_v60  ;;  %3512 = vrot.lane.b32.xlu0 %v3423_v1, %s10034_s27  ;;  %v5165_v14 = vsel %vm5069_vm1, %v5101_v13, %v8928_v23  ;;  %v4283_v23 = vmul.f32 %v11538_v42, %v14921_v54 }
 0x549   : > { %v4753_v33 = vadd.f32 %v11969_v38, %v4708_v9  ;;  %8955 = vmatprep.mubr.msk.f32.mxu0 %vm5217_vm0, %v5165_v14  ;;  %v12643_v35 = vpop.permute.xlu1 %4138  ;;  %v5164_v46 = vsel %vm5068_vm2, %v5100_v37, %v8927_v45  ;;  %v14955_v45 = vld [vmem:[#allocation47_spill] sm:$0xff] }
 0x54a   : > { %v12646_v0 = vadd.f32 %v12125_v3, %v4866_v26  ;;  %5351 = vmatmul.mubr.f32.gmra.mxu0 %v5164_v46  ;;  %4582 = vrot.lane.b32.xlu1 %v4498_v63, %s14875_s22  ;;  %v3425_v26 = vmul.f32 %v11470_v31, %v14955_v45 }
 0x54b   : > { %v4865_v29 = vmul.f32 %v4803_v22, %v4753_v33  ;;  %v12651_v25 = vpop.permute.xlu0 %3496  ;;  %v3209_v33 = vmul.f32 %v11448_v44, %v14955_v45 }
 0x54c   : > { %v4943_v10 = vand.u32 2147483647, %v12646_v0  ;;  %3940 = vrot.lane.b32.xlu0 %v3853_v2, %s14893_s19  ;;  %vm5071_vm14 = vcmp.ge.f32.partialorder %v12646_v0, 0.0  ;;  %v4071_v0 = vmul.f32 %v14907_v15, %v14940_v56 }
 0x54d   : > { %v12656_v60 = vadd.f32 %v12125_v3, %v4865_v29  ;;  %v12658_v1 = vpop.permute.xlu1 %4566  ;;  %v14956_v29 = vld [vmem:[#allocation45_spill] sm:$0xff] }
 0x54e   : > { %v4975_v13 = vsub.f32 0.0, %v4943_v10  ;;  %4827 = vperm.xlu1 %9631, %v2971_v11   ;;  %v3155_v11 = vmul.f32 %v11720_v18, %v14956_v29  ;;  %v3855_v10 = vmul.f32 %v11486_v50, %v14940_v56 }
 0x54f   : > { %v4942_v9 = vand.u32 2147483647, %v12656_v60  ;;  %v12663_v22 = vpop.permute.xlu0 %3924  ;;  %vm5070_vm15 = vcmp.ge.f32.partialorder %v12656_v60, 0.0  ;;  %v14965_v60 = vld [vmem:[#allocation48_spill] sm:$0xff] }
 0x550   : > { %v5018_v37 = vmul.f32 1.442695, %v4975_v13  ;;  %4368 = vrot.lane.b32.xlu0 %v4283_v23, %s14873_s0  ;;  %v14958_v23 = vld [vmem:[#allocation55_spill] sm:$0xff] }
 0x551   : > { %v4974_v14 = vsub.f32 0.0, %v4942_v9  ;;  %v12668_v63 = vpop.permute.xlu1 %4807  ;;  %v3371_v9 = vadd.f32 %v14958_v23, %v3155_v11 }
 0x552   : > { %9707 = vpow2.f32 %v5018_v37  ;;  %3516 = vrot.lane.b32.xlu1 %v3425_v26, %s10034_s27  ;;  %v3316_v37 = vsel %vm1510_vm3, %v12355_v48, %v14958_v23  ;;  %v3639_v26 = vmul.f32 %v11452_v28, %v14940_v56  ;;  %v4285_v48 = vmul.f32 %v11580_v16, %v14930_v7 }
 0x553   : > { %v5016_v46 = vmul.f32 1.442695, %v4974_v14  ;;  %v4353_v2 = vpop.permute.xlu0 %4352  ;;  %v14959_v14 = vld [vmem:[#allocation21_spill] sm:$0xff]  ;;  %v3587_v11 = vadd.f32 %v12428_v8, %v3371_v9 }
 0x554   : > { %3300 = vrot.lane.b32.xlu0 %v3209_v33, %s10035_s23  ;;  %v3154_v33 = vmul.f32 %v11720_v18, %v14959_v14  ;;  %v3748_v14 = vsel %vm1688_vm5, %v12404_v34, %v12484_v39 }
 0x555   : > { %9709 = vpow2.f32 %v5016_v46  ;;  %v12678_v13 = vpop.permute.xlu1 %3500  ;;  %v3532_v46 = vsel %vm1599_vm4, %v12344_v51, %v12428_v8  ;;  %v3803_v36 = vadd.f32 %v12484_v39, %v3587_v11  ;;  %v4069_v51 = vmul.f32 %v11552_v5, %v14930_v7 }
 0x556   : > { %14957 = vst [vmem:[#allocation28_spill] sm:$0xff] %v12678_v13  ;;  %3944 = vrot.lane.b32.xlu1 %v3855_v10, %s14893_s19  ;;  %v3370_v10 = vadd.f32 %v3316_v37, %v3154_v33  ;;  %v14961_v33 = vld [vmem:[#allocation22_spill] sm:$0xff]  ;;  %v4499_v11 = vmul.f32 %v11564_v19, %v14921_v54 }
 0x557   : > { %v12689_v29 = vpop.permute.xlu0 %3284  ;;  %v3211_v57 = vmul.f32 %v11430_v53, %v14961_v33 }
 0x558   : > { %3728 = vrot.lane.b32.xlu0 %v3639_v26, %s14896_s26  ;;  %v3586_v8 = vadd.f32 %v3532_v46, %v3370_v10  ;;  %v14960_v26 = vld [vmem:[#allocation24_spill] sm:$0xff]  ;;  %v4180_v46 = vsel %vm1866_vm7, %v12612_v12, %v12538_v41 }
 0x559   : > { %v12698_v23 = vpop.permute.xlu1 %3928  ;;  %v3964_v37 = vsel %vm1777_vm6, %v12545_v30, %v14960_v26  ;;  %v4019_v39 = vadd.f32 %v14960_v26, %v3803_v36  ;;  %v4396_v36 = vsel %vm1955_vm8, %v12604_v40, %v4353_v2 }
 0x55a   : > { %4372 = vrot.lane.b32.xlu1 %v4285_v48, %s14873_s0  ;;  %v3802_v34 = vadd.f32 %v3748_v14, %v3586_v8  ;;  %v3641_v14 = vmul.f32 %v11500_v43, %v14955_v45 }
 0x55b   : > { %v12707_v9 = vpop.permute.xlu0 %3712 }
 0x55c   : > { %4156 = vrot.lane.b32.xlu0 %v4069_v51, %s14898_s24  ;;  %v4018_v48 = vadd.f32 %v3964_v37, %v3802_v34  ;;  %v4235_v51 = vadd.f32 %v12538_v41, %v4019_v39  ;;  %v3424_v41 = vmul.f32 %v11470_v31, %v14953_v47 }
 0x55d   : > { %v12715_v27 = vpop.permute.xlu1 %4356 }
 0x55e   : > { %3304 = vrot.lane.b32.xlu1 %v3211_v57, %s10035_s23  ;;  %v4234_v57 = vadd.f32 %v4180_v46, %v4018_v48  ;;  %v4451_v34 = vadd.f32 %v4353_v2, %v4235_v51 }
 0x55f   : > { %v9708_v30 = vpop.eup %9707  ;;  %v12724_v10 = vpop.permute.xlu0 %4140 }
 0x560   : > { %4584 = vrot.lane.b32.xlu0 %v4499_v11, %s14875_s22  ;;  %v5103_v12 = vsub.f32 1.0, %v9708_v30  ;;  %v8930_v8 = vadd.f32 -1.0, %v9708_v30  ;;  %v4450_v39 = vadd.f32 %v4396_v36, %v4234_v57  ;;  %v3157_v36 = vmul.f32 %v11738_v6, %v14965_v60 }
 0x561   : > { %v12732_v26 = vpop.permute.xlu1 %3288 }
 0x562   : > { %14962 = vst [vmem:[#allocation40_spill] sm:$0xff] %v12732_v26  ;;  %v9710_v37 = vpop.eup %9709  ;;  %3732 = vrot.lane.b32.xlu1 %v3641_v14, %s14896_s26  ;;  %v5167_v54 = vsel %vm5071_vm14, %v5103_v12, %v8930_v8  ;;  %v4501_v8 = vmul.f32 %v11596_v49, %v14930_v7 }
 0x563   : > { %v4569_v13 = vpop.permute.xlu0 %4568  ;;  %8956 = vmatprep.mubr.msk.f32.mxu0 %vm5217_vm0, %v5167_v54  ;;  %v5102_v40 = vsub.f32 1.0, %v9710_v37  ;;  %v8929_v11 = vadd.f32 -1.0, %v9710_v37  ;;  %v3854_v54 = vmul.f32 %v11486_v50, %v14946_v58 }
 0x564   : > { %v4612_v46 = vsel %vm2044_vm9, %v12658_v1, %v4569_v13  ;;  %v4667_v30 = vadd.f32 %v4569_v13, %v4451_v34  ;;  %3514 = vrot.lane.b32.xlu0 %v3424_v41, %s10034_s27  ;;  %v14966_v34 = vld [vmem:[#allocation51_spill] sm:$0xff] }
 0x565   : > { %v4666_v2 = vadd.f32 %v4612_v46, %v4450_v39  ;;  %v12745_v48 = vpop.permute.xlu1 %3716  ;;  %v5166_v14 = vsel %vm5070_vm15, %v5102_v40, %v8929_v11  ;;  %v3373_v41 = vadd.f32 %v14966_v34, %v3157_v36  ;;  %v4284_v40 = vmul.f32 %v11580_v16, %v14928_v17 }
 0x566   : > { %14963 = vst [vmem:[#allocation42_spill] sm:$0xff] %v12745_v48  ;;  %v4711_v51 = vmul.f32 %v11934_v59, %v4667_v30  ;;  %5356 = vmatmul.mubr.f32.gmra.mxu0 %v5166_v14  ;;  %4160 = vrot.lane.b32.xlu1 %v4071_v0, %s14898_s24  ;;  %v14967_v30 = vld [vmem:[#allocation34_spill] sm:$0xff] }
 0x567   : > { %v4710_v1 = vmul.f32 %v11934_v59, %v4666_v2  ;;  %v12752_v13 = vpop.permute.xlu0 %3498  ;;  %v3426_v0 = vmul.f32 %v11468_v32, %v14967_v30  ;;  %v14968_v2 = vld [vmem:[#allocation26_spill] sm:$0xff]  ;;  %v3210_v36 = vmul.f32 %v11430_v53, %v14967_v30 }
 0x568   : > { %14964 = vst [vmem:[#allocation43_spill] sm:$0xff] %v12752_v13  ;;  %v4756_v12 = vadd.f32 %v11958_v52, %v4711_v51  ;;  %3942 = vrot.lane.b32.xlu0 %v3854_v54, %s14893_s19 }
 0x569   : > { %v4755_v57 = vadd.f32 %v11958_v52, %v4710_v1  ;;  %v12761_v37 = vpop.permute.xlu1 %4144  ;;  %v14969_v1 = vld [vmem:[#allocation49_spill] sm:$0xff] }
 0x56a   : > { %v4868_v39 = vmul.f32 %v12668_v63, %v4756_v12  ;;  %4588 = vrot.lane.b32.xlu1 %v4501_v8, %s14875_s22  ;;  %v3589_v60 = vadd.f32 %v14969_v1, %v3373_v41 }
 0x56b   : > { %v12768_v11 = vpop.permute.xlu0 %3926  ;;  %v4867_v46 = vmul.f32 %v12668_v63, %v4755_v57  ;;  %v14970_v57 = vld [vmem:[#allocation35_spill] sm:$0xff] }
 0x56c   : > { %4370 = vrot.lane.b32.xlu0 %v4284_v40, %s14873_s0  ;;  %v12775_v14 = vadd.f32 %v14968_v2, %v4868_v39  ;;  %v3805_v40 = vadd.f32 %v14970_v57, %v3589_v60  ;;  %v3856_v39 = vmul.f32 %v11524_v4, %v14953_v47  ;;  %v3640_v60 = vmul.f32 %v11500_v43, %v14953_v47 }
 0x56d   : > { %v4573_v51 = vpop.permute.xlu1 %4572  ;;  %v12778_v54 = vadd.f32 %v14968_v2, %v4867_v46 }
 0x56e   : > { %3518 = vrot.lane.b32.xlu1 %v3426_v0, %s10034_s27  ;;  %v4945_v63 = vand.u32 2147483647, %v12775_v14  ;;  %v14972_v0 = vld [vmem:[#allocation23_spill] sm:$0xff]  ;;  %v4021_v26 = vadd.f32 %v12663_v22, %v3805_v40  ;;  %v4286_v40 = vmul.f32 %v11538_v42, %v14946_v58  ;;  %vm5073_vm1 = vcmp.ge.f32.partialorder %v12775_v14, 0.0 }
 0x56f   : > { %v4355_v12 = vpop.permute.xlu0 %4354  ;;  %v4944_v8 = vand.u32 2147483647, %v12778_v54  ;;  %v3317_v53 = vsel %vm1510_vm3, %v14972_v0, %v14966_v34  ;;  %vm5072_vm2 = vcmp.ge.f32.partialorder %v12778_v54, 0.0 }
 0x570   : > { %3302 = vrot.lane.b32.xlu0 %v3210_v36, %s10035_s23  ;;  %v4977_v46 = vsub.f32 0.0, %v4945_v63  ;;  %v14973_v36 = vld [vmem:[#allocation46_spill] sm:$0xff]  ;;  %v4237_v34 = vadd.f32 %v12724_v10, %v4021_v26  ;;  %v12818_v26 = vpop.f32.mrf.mxu0 }
 0x571   : > { %v12790_v7 = vpop.permute.xlu1 %3502  ;;  %v4976_v41 = vsub.f32 0.0, %v4944_v8  ;;  %v3156_v48 = vmul.f32 %v11738_v6, %v14973_v36  ;;  %v14974_v8 = vld [vmem:[#allocation54_spill] sm:$0xff] }
 0x572   : > { %14971 = vst [vmem:[#allocation56_spill] sm:$0xff] %v12790_v7  ;;  %3946 = vrot.lane.b32.xlu1 %v3856_v39, %s14893_s19  ;;  %v5022_v13 = vmul.f32 1.442695, %v4977_v46  ;;  %v3533_v7 = vsel %vm1599_vm4, %v14974_v8, %v14969_v1  ;;  %v4070_v1 = vmul.f32 %v14907_v15, %v14946_v58 }
 0x573   : > { %v12801_v2 = vpop.permute.xlu0 %3286  ;;  %v5020_v63 = vmul.f32 1.442695, %v4976_v41  ;;  %v3372_v39 = vadd.f32 %v3317_v53, %v3156_v48  ;;  %v3749_v41 = vsel %vm1688_vm5, %v12595_v61, %v14970_v57  ;;  %v3965_v48 = vsel %vm1777_vm6, %v12587_v62, %v12663_v22  ;;  %v14975_v53 = vld [vmem:[#allocation33_spill] sm:$0xff]  ;;  %v3046_v22 = vpop.f32.mrf.mxu0 }
 0x574   : > { %3730 = vrot.lane.b32.xlu0 %v3640_v60, %s14896_s26  ;;  %9711 = vpow2.f32 %v5022_v13  ;;  %v4453_v13 = vadd.f32 %v12715_v27, %v4237_v34  ;;  %v3212_v61 = vmul.f32 %v11448_v44, %v14975_v53  ;;  %v4500_v62 = vmul.f32 %v11596_v49, %v14928_v17 }
 0x575   : > { %v12810_v46 = vpop.permute.xlu1 %3930  ;;  %9713 = vpow2.f32 %v5020_v63  ;;  %v3588_v0 = vadd.f32 %v3533_v7, %v3372_v39  ;;  %v4181_v7 = vsel %vm1866_vm7, %v12643_v35, %v12724_v10  ;;  %v3642_v39 = vmul.f32 %v11452_v28, %v14967_v30 }
 0x576   : > { %4374 = vrot.lane.b32.xlu1 %v4286_v40, %s14873_s0  ;;  %v4669_v63 = vadd.f32 %v4573_v51, %v4453_v13  ;;  %v4397_v40 = vsel %vm1955_vm8, %v4355_v12, %v12715_v27  ;;  %v4072_v12 = vmul.f32 %v11552_v5, %v14953_v47 }
 0x577   : > { %v12820_v60 = vpop.permute.xlu0 %3714  ;;  %v3804_v57 = vadd.f32 %v3749_v41, %v3588_v0 }
 0x578   : > { %4158 = vrot.lane.b32.xlu0 %v4070_v1, %s14898_s24  ;;  %v4713_v10 = vmul.f32 %v11942_v24, %v4669_v63 }
 0x579   : > { %v12829_v36 = vpop.permute.xlu1 %4358  ;;  %v4020_v8 = vadd.f32 %v3965_v48, %v3804_v57 }
 0x57a   : > { %3306 = vrot.lane.b32.xlu1 %v3212_v61, %s10035_s23  ;;  %v4758_v63 = vadd.f32 %v11969_v38, %v4713_v10  ;;  %v4502_v10 = vmul.f32 %v11564_v19, %v14946_v58 }
 0x57b   : > { %v12837_v34 = vpop.permute.xlu0 %4142  ;;  %v4236_v41 = vadd.f32 %v4181_v7, %v4020_v8  ;;  %v3427_v8 = vmul.f32 %v11468_v32, %v14961_v33 }
 0x57c   : > { %4586 = vrot.lane.b32.xlu0 %v4500_v62, %s14875_s22 }
 0x57d   : > { %v12844_v35 = vpop.permute.xlu1 %3290  ;;  %v4452_v0 = vadd.f32 %v4397_v40, %v4236_v41 }
 0x57e   : > { %3734 = vrot.lane.b32.xlu1 %v3642_v39, %s14896_s26  ;;  %v12848_v1 = vpop.f32.mrf.mxu0 }
 0x57f   : > { %14976 = vst [vmem:[#allocation52_spill] sm:$0xff] %v12848_v1  ;;  %v4571_v48 = vpop.permute.xlu0 %4570 }
 0x580   : > { %v4613_v13 = vsel %vm2044_vm9, %v4571_v48, %v4573_v51  ;;  %4832 = vperm.xlu0 %9632, %v12635_v55   ;;  %v5334_v27 = vpop.f32.mrf.mxu0 }
 0x581   : > { %v9712_v61 = vpop.eup %9711  ;;  %v4668_v57 = vadd.f32 %v4613_v13, %v4452_v0  ;;  %v12854_v7 = vpop.permute.xlu1 %3718 }
 0x582   : > { %v9714_v62 = vpop.eup %9713  ;;  %4162 = vrot.lane.b32.xlu1 %v4072_v12, %s14898_s24  ;;  %v5105_v40 = vsub.f32 1.0, %v9712_v61  ;;  %v8932_v51 = vadd.f32 -1.0, %v9712_v61  ;;  %v3857_v61 = vmul.f32 %v11524_v4, %v14955_v45 }
 0x583   : > { %v4712_v55 = vmul.f32 %v11942_v24, %v4668_v57  ;;  %v4813_v39 = vpop.permute.xlu0 %4812  ;;  %v5104_v41 = vsub.f32 1.0, %v9714_v62  ;;  %v8931_v48 = vadd.f32 -1.0, %v9714_v62 }
 0x584   : > { %v4870_v0 = vmul.f32 %v4813_v39, %v4758_v63  ;;  %3520 = vrot.lane.b32.xlu0 %v3427_v8, %s10034_s27  ;;  %v5169_v13 = vsel %vm5073_vm1, %v5105_v40, %v8932_v51  ;;  %v4287_v51 = vmul.f32 %v11538_v42, %v14940_v56 }
 0x585   : > { %v4757_v32 = vadd.f32 %v11969_v38, %v4712_v55  ;;  %8957 = vmatprep.mubr.msk.f32.mxu0 %vm5217_vm0, %v5169_v13  ;;  %v12868_v27 = vpop.permute.xlu1 %4146  ;;  %v5168_v12 = vsel %vm5072_vm2, %v5104_v41, %v8931_v48  ;;  %v14977_v48 = vld [vmem:[#allocation32_spill] sm:$0xff] }
 0x586   : > { %v12871_v14 = vadd.f32 %v12125_v3, %v4870_v0  ;;  %5361 = vmatmul.mubr.f32.gmra.mxu0 %v5168_v12  ;;  %4590 = vrot.lane.b32.xlu1 %v4502_v10, %s14875_s22  ;;  %v3429_v0 = vmul.f32 %v11470_v31, %v14977_v48 }
 0x587   : > { %v4869_v54 = vmul.f32 %v4813_v39, %v4757_v32  ;;  %v12876_v57 = vpop.permute.xlu0 %3504  ;;  %v3213_v32 = vmul.f32 %v11448_v44, %v14977_v48 }
 0x588   : > { %v4947_v62 = vand.u32 2147483647, %v12871_v14  ;;  %3948 = vrot.lane.b32.xlu0 %v3857_v61, %s14893_s19  ;;  %vm5075_vm14 = vcmp.ge.f32.partialorder %v12871_v14, 0.0  ;;  %v4505_v14 = vmul.f32 %v11596_v49, %v14955_v45 }
 0x589   : > { %v12881_v63 = vadd.f32 %v12125_v3, %v4869_v54  ;;  %v12883_v8 = vpop.permute.xlu1 %4574  ;;  %v14979_v54 = vld [vmem:[#allocation38_spill] sm:$0xff] }
 0x58a   : > { %v4979_v40 = vsub.f32 0.0, %v4947_v62  ;;  %4837 = vperm.xlu1 %9631, %v3046_v22   ;;  %v3159_v62 = vmul.f32 %v11720_v18, %v14979_v54  ;;  %v14981_v54 = vld [vmem:[#allocation37_spill] sm:$0xff] }
 0x58b   : > { %v4946_v55 = vand.u32 2147483647, %v12881_v63  ;;  %v12888_v41 = vpop.permute.xlu0 %3932  ;;  %vm5074_vm15 = vcmp.ge.f32.partialorder %v12881_v63, 0.0  ;;  %v14983_v63 = vld [vmem:[#allocation27_spill] sm:$0xff] }
 0x58c   : > { %v5026_v39 = vmul.f32 1.442695, %v4979_v40  ;;  %4376 = vrot.lane.b32.xlu0 %v4287_v51, %s14873_s0  ;;  %v3859_v51 = vmul.f32 %v11486_v50, %v14961_v33 }
 0x58d   : > { %v4978_v13 = vsub.f32 0.0, %v4946_v55  ;;  %v12893_v10 = vpop.permute.xlu1 %4817 }
 0x58e   : > { %9715 = vpow2.f32 %v5026_v39  ;;  %3524 = vrot.lane.b32.xlu1 %v3429_v0, %s10034_s27  ;;  %v12896_v22 = vpop.f32.mrf.mxu0  ;;  %v14980_v39 = vld [vmem:[#allocation31_spill] sm:$0xff] }
 0x58f   : > { %14978 = vst [vmem:[#allocation36_spill] sm:$0xff] %v12896_v22  ;;  %v5024_v12 = vmul.f32 1.442695, %v4978_v13  ;;  %v4361_v61 = vpop.permute.xlu0 %4360  ;;  %v3375_v0 = vadd.f32 %v14980_v39, %v3159_v62  ;;  %v3318_v44 = vsel %vm1510_vm3, %v12578_v20, %v14980_v39  ;;  %v3643_v13 = vmul.f32 %v11452_v28, %v14961_v33 }
 0x590   : > { %3308 = vrot.lane.b32.xlu0 %v3213_v32, %s10035_s23  ;;  %v5339_v40 = vpop.f32.mrf.mxu0  ;;  %v3158_v32 = vmul.f32 %v11720_v18, %v14981_v54  ;;  %v4289_v20 = vmul.f32 %v11580_v16, %v14955_v45  ;;  %v3750_v28 = vsel %vm1688_vm5, %v12627_v21, %v12707_v9 }
 0x591   : > { %9717 = vpow2.f32 %v5024_v12  ;;  %v12905_v55 = vpop.permute.xlu1 %3508  ;;  %v14982_v12 = vld [vmem:[#allocation25_spill] sm:$0xff]  ;;  %v3591_v62 = vadd.f32 %v12651_v25, %v3375_v0 }
 0x592   : > { %3952 = vrot.lane.b32.xlu1 %v3859_v51, %s14893_s19  ;;  %v3534_v1 = vsel %vm1599_vm4, %v14982_v12, %v12651_v25  ;;  %v3374_v51 = vadd.f32 %v3318_v44, %v3158_v32  ;;  %v4073_v12 = vmul.f32 %v11552_v5, %v14955_v45  ;;  %v3966_v44 = vsel %vm1777_vm6, %v12768_v11, %v12698_v23 }
 0x593   : > { %v12916_v40 = vpop.permute.xlu0 %3292  ;;  %v3807_v54 = vadd.f32 %v12707_v9, %v3591_v62  ;;  %v4503_v62 = vmul.f32 %v11564_v19, %v14940_v56 }
 0x594   : > { %3736 = vrot.lane.b32.xlu0 %v3643_v13, %s14896_s26  ;;  %v3590_v25 = vadd.f32 %v3534_v1, %v3374_v51  ;;  %v3645_v13 = vmul.f32 %v11500_v43, %v14977_v48  ;;  %v4182_v1 = vsel %vm1866_vm7, %v12837_v34, %v12761_v37 }
 0x595   : > { %v12925_v39 = vpop.permute.xlu1 %3936  ;;  %v4023_v9 = vadd.f32 %v12698_v23, %v3807_v54  ;;  %v4398_v23 = vsel %vm1955_vm8, %v12829_v36, %v4361_v61 }
 0x596   : > { %4380 = vrot.lane.b32.xlu1 %v4289_v20, %s14873_s0  ;;  %v3806_v21 = vadd.f32 %v3750_v28, %v3590_v25  ;;  %v4075_v28 = vmul.f32 %v14907_v15, %v14961_v33 }
 0x597   : > { %v12934_v0 = vpop.permute.xlu0 %3720 }
 0x598   : > { %4164 = vrot.lane.b32.xlu0 %v4073_v12, %s14898_s24  ;;  %v4022_v20 = vadd.f32 %v3966_v44, %v3806_v21  ;;  %v4239_v12 = vadd.f32 %v12761_v37, %v4023_v9  ;;  %v3428_v37 = vmul.f32 %v11470_v31, %v14975_v53 }
 0x599   : > { %v12942_v32 = vpop.permute.xlu1 %4364 }
 0x59a   : > { %3740 = vrot.lane.b32.xlu1 %v3645_v13, %s14896_s26  ;;  %v4238_v25 = vadd.f32 %v4182_v1, %v4022_v20  ;;  %v4455_v21 = vadd.f32 %v4361_v61, %v4239_v12  ;;  %v3161_v12 = vmul.f32 %v11738_v6, %v14983_v63  ;;  %v14986_v63 = vld [vmem:[#allocation42_spill] sm:$0xff] }
 0x59b   : > { %v9716_v11 = vpop.eup %9715  ;;  %v12951_v51 = vpop.permute.xlu0 %4148 }
 0x59c   : > { %4592 = vrot.lane.b32.xlu0 %v4503_v62, %s14875_s22  ;;  %v5107_v34 = vsub.f32 1.0, %v9716_v11  ;;  %v8934_v54 = vadd.f32 -1.0, %v9716_v11  ;;  %v4454_v9 = vadd.f32 %v4398_v23, %v4238_v25 }
 0x59d   : > { %v12959_v13 = vpop.permute.xlu1 %3296 }
 0x59e   : > { %v9718_v44 = vpop.eup %9717  ;;  %4168 = vrot.lane.b32.xlu1 %v4075_v28, %s14898_s24  ;;  %v5171_v22 = vsel %vm5075_vm14, %v5107_v34, %v8934_v54  ;;  %v3860_v34 = vmul.f32 %v11524_v4, %v14975_v53 }
 0x59f   : > { %v4577_v58 = vpop.permute.xlu0 %4576  ;;  %8958 = vmatprep.mubr.msk.f32.mxu0 %vm5217_vm0, %v5171_v22  ;;  %v5106_v36 = vsub.f32 1.0, %v9718_v44  ;;  %v8933_v62 = vadd.f32 -1.0, %v9718_v44 }
 0x5a0   : > { %v4614_v1 = vsel %vm2044_vm9, %v12883_v8, %v4577_v58  ;;  %v4671_v11 = vadd.f32 %v4577_v58, %v4455_v21  ;;  %3522 = vrot.lane.b32.xlu0 %v3428_v37, %s10034_s27  ;;  %v3858_v8 = vmul.f32 %v11486_v50, %v14967_v30  ;;  %v3377_v50 = vadd.f32 %v12689_v29, %v3161_v12 }
 0x5a1   : > { %v4670_v61 = vadd.f32 %v4614_v1, %v4454_v9  ;;  %v12972_v20 = vpop.permute.xlu1 %3724  ;;  %v5170_v31 = vsel %vm5074_vm15, %v5106_v36, %v8933_v62  ;;  %v4288_v21 = vmul.f32 %v11580_v16, %v14953_v47  ;;  %v4290_v36 = vmul.f32 %v11538_v42, %v14967_v30  ;;  %v14984_v62 = vld [vmem:[#allocation26_spill] sm:$0xff] }
 0x5a2   : > { %v4715_v28 = vmul.f32 %v11934_v59, %v4671_v11  ;;  %5366 = vmatmul.mubr.f32.gmra.mxu0 %v5170_v31  ;;  %4596 = vrot.lane.b32.xlu1 %v4505_v14, %s14875_s22 }
 0x5a3   : > { %v4714_v58 = vmul.f32 %v11934_v59, %v4670_v61  ;;  %v12979_v22 = vpop.permute.xlu0 %3506  ;;  %v14985_v61 = vld [vmem:[#allocation28_spill] sm:$0xff] }
 0x5a4   : > { %v4760_v23 = vadd.f32 %v11958_v52, %v4715_v28  ;;  %3950 = vrot.lane.b32.xlu0 %v3858_v8, %s14893_s19  ;;  %v3593_v31 = vadd.f32 %v14985_v61, %v3377_v50  ;;  %v3644_v28 = vmul.f32 %v11500_v43, %v14975_v53 }
 0x5a5   : > { %v4759_v54 = vadd.f32 %v11958_v52, %v4714_v58  ;;  %v12988_v25 = vpop.permute.xlu1 %4152 }
 0x5a6   : > { %v4872_v44 = vmul.f32 %v12893_v10, %v4760_v23  ;;  %3954 = vrot.lane.b32.xlu1 %v3860_v34, %s14893_s19  ;;  %v3809_v12 = vadd.f32 %v14986_v63, %v3593_v31  ;;  %v4076_v23 = vmul.f32 %v11552_v5, %v14975_v53  ;;  %v14989_v31 = vld [vmem:[#allocation44_spill] sm:$0xff] }
 0x5a7   : > { %v12995_v37 = vpop.permute.xlu0 %3934  ;;  %v4871_v9 = vmul.f32 %v12893_v10, %v4759_v54 }
 0x5a8   : > { %4378 = vrot.lane.b32.xlu0 %v4288_v21, %s14873_s0  ;;  %v13002_v1 = vadd.f32 %v14984_v62, %v4872_v44  ;;  %v14988_v44 = vld [vmem:[#allocation53_spill] sm:$0xff]  ;;  %v4025_v21 = vadd.f32 %v12888_v41, %v3809_v12 }
 0x5a9   : > { %v4581_v11 = vpop.permute.xlu1 %4580  ;;  %v13005_v14 = vadd.f32 %v14984_v62, %v4871_v9  ;;  %v3319_v43 = vsel %vm1510_vm3, %v14988_v44, %v12689_v29  ;;  %v4074_v9 = vmul.f32 %v14907_v15, %v14967_v30  ;;  %v4506_v15 = vmul.f32 %v11564_v19, %v14967_v30 }
 0x5aa   : > { %4382 = vrot.lane.b32.xlu1 %v4290_v36, %s14873_s0  ;;  %v4949_v10 = vand.u32 2147483647, %v13002_v1  ;;  %v4241_v12 = vadd.f32 %v12951_v51, %v4025_v21  ;;  %vm5077_vm1 = vcmp.ge.f32.partialorder %v13002_v1, 0.0 }
 0x5ab   : > { %v4363_v8 = vpop.permute.xlu0 %4362  ;;  %v4948_v58 = vand.u32 2147483647, %v13005_v14  ;;  %vm5076_vm2 = vcmp.ge.f32.partialorder %v13005_v14, 0.0 }
 0x5ac   : > { %3738 = vrot.lane.b32.xlu0 %v3644_v28, %s14896_s26  ;;  %v4981_v34 = vsub.f32 0.0, %v4949_v10  ;;  %v3160_v28 = vmul.f32 %v11738_v6, %v14989_v31  ;;  %v13030_v10 = vpop.f32.mrf.mxu1 }
 0x5ad   : > { %v13017_v54 = vpop.permute.xlu1 %3510  ;;  %v4980_v50 = vsub.f32 0.0, %v4948_v58 }
 0x5ae   : > { %14987 = vst [vmem:[#allocation57_spill] sm:$0xff] %v13017_v54  ;;  %4170 = vrot.lane.b32.xlu1 %v4076_v23, %s14898_s24  ;;  %v5030_v36 = vmul.f32 1.442695, %v4981_v34  ;;  %v14990_v54 = vld [vmem:[#allocation43_spill] sm:$0xff]  ;;  %v3376_v23 = vadd.f32 %v3319_v43, %v3160_v28  ;;  %v3121_v21 = vpop.f32.mrf.mxu1  ;;  %v3967_v43 = vsel %vm1777_vm6, %v12810_v46, %v12888_v41  ;;  %v4293_v46 = vmul.f32 %v11580_v16, %v14977_v48 }
 0x5af   : > { %v13028_v45 = vpop.permute.xlu0 %3294  ;;  %v5028_v58 = vmul.f32 1.442695, %v4980_v50  ;;  %v3535_v29 = vsel %vm1599_vm4, %v14990_v54, %v14985_v61  ;;  %v3751_v50 = vsel %vm1688_vm5, %v12820_v60, %v14986_v63  ;;  %v4504_v61 = vmul.f32 %v11596_v49, %v14953_v47 }
 0x5b0   : > { %4166 = vrot.lane.b32.xlu0 %v4074_v9, %s14898_s24  ;;  %9719 = vpow2.f32 %v5030_v36  ;;  %v3592_v54 = vadd.f32 %v3535_v29, %v3376_v23  ;;  %v4457_v9 = vadd.f32 %v12942_v32, %v4241_v12  ;;  %v4183_v60 = vsel %vm1866_vm7, %v12868_v27, %v12951_v51 }
 0x5b1   : > { %v13039_v34 = vpop.permute.xlu1 %3938  ;;  %9721 = vpow2.f32 %v5028_v58  ;;  %v4399_v29 = vsel %vm1955_vm8, %v4363_v8, %v12942_v32  ;;  %v3861_v27 = vmul.f32 %v11524_v4, %v14977_v48 }
 0x5b2   : > { %4598 = vrot.lane.b32.xlu1 %v4506_v15, %s14875_s22  ;;  %v3808_v36 = vadd.f32 %v3751_v50, %v3592_v54  ;;  %v4673_v63 = vadd.f32 %v4581_v11, %v4457_v9  ;;  %v14991_v50 = vmov 1  }
 0x5b3   : > { %v13047_v44 = vpop.permute.xlu0 %3722 }
 0x5b4   : > { %4594 = vrot.lane.b32.xlu0 %v4504_v61, %s14875_s22  ;;  %v4024_v28 = vadd.f32 %v3967_v43, %v3808_v36  ;;  %v4717_v15 = vmul.f32 %v11942_v24, %v4673_v63  ;;  %v4291_v43 = vmul.f32 %v11538_v42, %v14961_v33 }
 0x5b5   : > { %v13054_v31 = vpop.permute.xlu1 %4366 }
 0x5b6   : > { %4847 = vperm.xlu1 %9631, %v3121_v21   ;;  %v4240_v41 = vadd.f32 %v4183_v60, %v4024_v28  ;;  %v4762_v4 = vadd.f32 %v11969_v38, %v4717_v15 }
 0x5b7   : > { %v13059_v58 = vpop.permute.xlu0 %4150 }
 0x5b8   : > { %4842 = vperm.xlu0 %9632, %v12818_v26   ;;  %v4456_v51 = vadd.f32 %v4399_v29, %v4240_v41  ;;  %v4509_v26 = vmul.f32 %v11596_v49, %v14977_v48  ;;  %v13088_v29 = vld [vmem:[%s14660_s8 + $0x8] sm:$0xff] }
 0x5b9   : > { %v13066_v12 = vpop.permute.xlu1 %3298 }
 0x5ba   : > { %4388 = vrot.lane.b32.xlu1 %v4293_v46, %s14873_s0 }
 0x5bb   : > { %v4579_v23 = vpop.permute.xlu0 %4578  ;;  %9633 = vset.pattern.permute.xlu1 %v14991_v50 }
 0x5bc   : > { %v4615_v32 = vsel %vm2044_vm9, %v4579_v23, %v4581_v11  ;;  %3956 = vrot.lane.b32.xlu0 %v3861_v27, %s14893_s19 }
 0x5bd   : > { %v9720_v8 = vpop.eup %9719  ;;  %v4672_v61 = vadd.f32 %v4615_v32, %v4456_v51  ;;  %v13077_v54 = vpop.permute.xlu1 %3726  ;;  %v4077_v51 = vmul.f32 %v11552_v5, %v14977_v48 }
 0x5be   : > { %v9722_v21 = vpop.eup %9721  ;;  %4604 = vrot.lane.b32.xlu1 %v4509_v26, %s14875_s22  ;;  %v5109_v9 = vsub.f32 1.0, %v9720_v8  ;;  %v8936_v36 = vadd.f32 -1.0, %v9720_v8 }
 0x5bf   : > { %v4716_v11 = vmul.f32 %v11942_v24, %v4672_v61  ;;  %v4823_v60 = vpop.permute.xlu0 %4822  ;;  %v5108_v63 = vsub.f32 1.0, %v9722_v21  ;;  %v8935_v28 = vadd.f32 -1.0, %v9722_v21  ;;  %v14992_v21 = vmov 2  }
 0x5c0   : > { %v4874_v46 = vmul.f32 %v4823_v60, %v4762_v4  ;;  %4384 = vrot.lane.b32.xlu0 %v4291_v43, %s14873_s0  ;;  %v5173_v41 = vsel %vm5077_vm1, %v5109_v9, %v8936_v36  ;;  %v4507_v4 = vmul.f32 %v11564_v19, %v14961_v33  ;;  %v13122_v36 = vld [vmem:[%s14660_s8] sm:$0xff]  ;;  %v4292_v19 = vmul.f32 %v11580_v16, %v14975_v53 }
 0x5c1   : > { %v4761_v42 = vadd.f32 %v11969_v38, %v4716_v11  ;;  %8959 = vmatprep.mubr.msk.f32.mxu0 %vm5217_vm0, %v5173_v41  ;;  %v13094_v15 = vpop.permute.xlu1 %4154  ;;  %v5172_v1 = vsel %vm5076_vm2, %v5108_v63, %v8935_v28  ;;  %v4508_v16 = vmul.f32 %v11596_v49, %v14975_v53 }
 0x5c2   : > { %v13097_v27 = vadd.f32 %v12125_v3, %v4874_v46  ;;  %5371 = vmatmul.mubr.f32.gmra.mxu0 %v5172_v1  ;;  %5444 = vperm.xlu1 %9633, %v13088_v29   ;;  %v14993_v46 = vld [vmem:[#allocation29_spill] sm:$0xff]  ;;  %v14994_v1 = vld [vmem:[#allocation40_spill] sm:$0xff] }
 0x5c3   : > { %v4873_v23 = vmul.f32 %v4823_v60, %v4761_v42  ;;  %v13102_v32 = vpop.permute.xlu0 %3512  ;;  %v3163_v41 = vmul.f32 %v11720_v18, %v14993_v46  ;;  %v3752_v46 = vsel %vm1688_vm5, %v12854_v7, %v12934_v0 }
 0x5c4   : > { %v4951_v14 = vand.u32 2147483647, %v13097_v27  ;;  %4172 = vrot.lane.b32.xlu0 %v4077_v51, %s14898_s24  ;;  %vm5079_vm14 = vcmp.ge.f32.partialorder %v13097_v27, 0.0 }
 0x5c5   : > { %v13107_v26 = vadd.f32 %v12125_v3, %v4873_v23  ;;  %v13109_v8 = vpop.permute.xlu1 %4582  ;;  %v3379_v51 = vadd.f32 %v14994_v1, %v3163_v41  ;;  %v3320_v23 = vsel %vm1510_vm3, %v12801_v2, %v14994_v1 }
 0x5c6   : > { %v4983_v61 = vsub.f32 0.0, %v4951_v14  ;;  %9635 = vset.pattern.permute.xlu1 %v14992_v21 }
 0x5c7   : > { %v4950_v5 = vand.u32 2147483647, %v13107_v26  ;;  %v13115_v43 = vpop.permute.xlu0 %3940  ;;  %5548 = vperm.xlu1 %9635, %v13088_v29   ;;  %vm5078_vm15 = vcmp.ge.f32.partialorder %v13107_v26, 0.0 }
 0x5c8   : > { %v5034_v9 = vmul.f32 1.442695, %v4983_v61  ;;  %4600 = vrot.lane.b32.xlu0 %v4507_v4, %s14875_s22  ;;  %v14995_v61 = vld [vmem:[#allocation50_spill] sm:$0xff] }
 0x5c9   : > { %v4982_v11 = vsub.f32 0.0, %v4950_v5  ;;  %v13124_v60 = vpop.permute.xlu1 %4827  ;;  %v3162_v21 = vmul.f32 %v11720_v18, %v14995_v61  ;;  %v14996_v5 = vmov 3  }
 0x5ca   : > { %9723 = vpow2.f32 %v5034_v9  ;;  %v14997_v9 = vld [vmem:[#allocation56_spill] sm:$0xff] }
 0x5cb   : > { %v5032_v63 = vmul.f32 1.442695, %v4982_v11  ;;  %v4369_v28 = vpop.permute.xlu0 %4368  ;;  %5544 = vperm.xlu1 %9635, %v13122_v36   ;;  %v3536_v11 = vsel %vm1599_vm4, %v14997_v9, %v12876_v57 }
 0x5cc   : > { %4386 = vrot.lane.b32.xlu0 %v4292_v19, %s14873_s0  ;;  %v3595_v19 = vadd.f32 %v12876_v57, %v3379_v51  ;;  %v3968_v57 = vsel %vm1777_vm6, %v12995_v37, %v12925_v39  ;;  %v14998_v51 = vmov 4  }
 0x5cd   : > { %9725 = vpow2.f32 %v5032_v63  ;;  %v13132_v42 = vpop.permute.xlu1 %3516  ;;  %v3378_v63 = vadd.f32 %v3320_v23, %v3162_v21 }
 0x5ce   : > { %v13138_v14 = vpop.f32.mrf.mxu0  ;;  %v3811_v41 = vadd.f32 %v12934_v0, %v3595_v19  ;;  %v4184_v0 = vsel %vm1866_vm7, %v13059_v58, %v12988_v25 }
 0x5cf   : > { %v13144_v4 = vpop.permute.xlu0 %3300  ;;  %9637 = vset.pattern.permute.xlu1 %v14996_v5  ;;  %v3594_v1 = vadd.f32 %v3536_v11, %v3378_v63 }
 0x5d0   : > { %4602 = vrot.lane.b32.xlu0 %v4508_v16, %s14875_s22  ;;  %5648 = vperm.xlu1 %9637, %v13122_v36   ;;  %v5344_v2 = vpop.f32.mrf.mxu0  ;;  %v4027_v7 = vadd.f32 %v12925_v39, %v3811_v41  ;;  %v14999_v39 = vmov 5  }
 0x5d1   : > { %v13153_v49 = vpop.permute.xlu1 %3944  ;;  %v3810_v23 = vadd.f32 %v3752_v46, %v3594_v1 }
 0x5d2   : > { %v4243_v37 = vadd.f32 %v12988_v25, %v4027_v7 }
 0x5d3   : > { %v13159_v61 = vpop.permute.xlu0 %3728  ;;  %v4026_v9 = vadd.f32 %v3968_v57, %v3810_v23 }
 0x5d4   : > { %4852 = vperm.xlu0 %9632, %v13030_v10   ;;  %9638 = vset.pattern.permute.xlu1 %v14998_v51  ;;  %v4400_v10 = vsel %vm1955_vm8, %v13054_v31, %v4369_v28  ;;  %v4459_v41 = vadd.f32 %v4369_v28, %v4243_v37 }
 0x5d5   : > { %v13166_v16 = vpop.permute.xlu1 %4372  ;;  %5756 = vperm.xlu1 %9638, %v13088_v29   ;;  %v4242_v63 = vadd.f32 %v4184_v0, %v4026_v9 }
 0x5d7   : > { %v9724_v21 = vpop.eup %9723  ;;  %v13173_v11 = vpop.permute.xlu0 %4156  ;;  %v4458_v1 = vadd.f32 %v4400_v10, %v4242_v63 }
 0x5d8   : > { %9634 = vset.pattern.permute.xlu0 %v14991_v50  ;;  %v5111_v19 = vsub.f32 1.0, %v9724_v21  ;;  %v8938_v2 = vadd.f32 -1.0, %v9724_v21 }
 0x5d9   : > { %v13179_v46 = vpop.permute.xlu1 %3304  ;;  %5440 = vperm.xlu0 %9634, %v13122_v36   ;;  %9640 = vset.pattern.permute.xlu1 %v14999_v39  ;;  %v15001_v39 = vmov 6  }
 0x5da   : > { %v9726_v58 = vpop.eup %9725  ;;  %5860 = vperm.xlu1 %9640, %v13088_v29   ;;  %v5175_v25 = vsel %vm5079_vm14, %v5111_v19, %v8938_v2 }
 0x5db   : > { %v4585_v31 = vpop.permute.xlu0 %4584  ;;  %8960 = vmatprep.mubr.msk.f32.mxu0 %vm5217_vm0, %v5175_v25  ;;  %v5110_v50 = vsub.f32 1.0, %v9726_v58  ;;  %v8937_v57 = vadd.f32 -1.0, %v9726_v58 }
 0x5dc   : > { %v4616_v23 = vsel %vm2044_vm9, %v13109_v8, %v4585_v31  ;;  %v4675_v7 = vadd.f32 %v4585_v31, %v4459_v41  ;;  %v15000_v8 = vld [vmem:[#allocation30_spill] sm:$0xff] }
 0x5dd   : > { %v4674_v0 = vadd.f32 %v4616_v23, %v4458_v1  ;;  %v13189_v21 = vpop.permute.xlu1 %3732  ;;  %9636 = vset.pattern.permute.xlu0 %v14996_v5  ;;  %v5174_v27 = vsel %vm5078_vm15, %v5110_v50, %v8937_v57  ;;  %v3165_v26 = vmul.f32 %v11738_v6, %v15000_v8 }
 0x5de   : > { %v4719_v28 = vmul.f32 %v11934_v59, %v4675_v7  ;;  %5376 = vmatmul.mubr.f32.gmra.mxu0 %v5174_v27  ;;  %5652 = vperm.xlu0 %9636, %v13088_v29   ;;  %v15002_v7 = vmov 7  }
 0x5df   : > { %v4718_v9 = vmul.f32 %v11934_v59, %v4674_v0  ;;  %5856 = vperm.xlu1 %9640, %v13122_v36   ;;  %v13196_v37 = vpop.permute.xlu0 %3514  ;;  %v3381_v2 = vadd.f32 %v12916_v40, %v3165_v26 }
 0x5e0   : > { %v4764_v10 = vadd.f32 %v11958_v52, %v4719_v28 }
 0x5e1   : > { %v4763_v19 = vadd.f32 %v11958_v52, %v4718_v9  ;;  %v13202_v5 = vpop.permute.xlu1 %4160  ;;  %v3597_v50 = vadd.f32 %v12905_v55, %v3381_v2  ;;  %v3321_v9 = vsel %vm1510_vm3, %v12844_v35, %v12916_v40 }
 0x5e2   : > { %v4876_v63 = vmul.f32 %v13124_v60, %v4764_v10  ;;  %9639 = vset.pattern.permute.xlu0 %v14998_v51 }
 0x5e3   : > { %9642 = vset.pattern.permute.xlu1 %v15001_v39  ;;  %v13208_v58 = vpop.permute.xlu0 %3942  ;;  %5752 = vperm.xlu0 %9639, %v13122_v36   ;;  %v4875_v41 = vmul.f32 %v13124_v60, %v4763_v19  ;;  %v3813_v60 = vadd.f32 %v12972_v20, %v3597_v50  ;;  %v3164_v19 = vmul.f32 %v11738_v6, %v14928_v17  ;;  %v15003_v50 = vmov 0  }
 0x5e4   : > { %5960 = vperm.xlu1 %9642, %v13122_v36   ;;  %v13214_v25 = vadd.f32 %v14984_v62, %v4876_v63  ;;  %v3753_v17 = vsel %vm1688_vm5, %v13047_v44, %v12972_v20  ;;  %v4185_v20 = vsel %vm1866_vm7, %v13094_v15, %v13173_v11 }
 0x5e5   : > { %v4589_v1 = vpop.permute.xlu1 %4588  ;;  %v13217_v31 = vadd.f32 %v14984_v62, %v4875_v41  ;;  %v4029_v8 = vadd.f32 %v13115_v43, %v3813_v60  ;;  %v3380_v40 = vadd.f32 %v3321_v9, %v3164_v19 }
 0x5e6   : > { %v4953_v51 = vand.u32 2147483647, %v13214_v25  ;;  %vm5081_vm1 = vcmp.ge.f32.partialorder %v13214_v25, 0.0 }
 0x5e7   : > { %v4371_v57 = vpop.permute.xlu0 %4370  ;;  %9641 = vset.pattern.permute.xlu0 %v15001_v39  ;;  %v4952_v23 = vand.u32 2147483647, %v13217_v31  ;;  %v3537_v39 = vsel %vm1599_vm4, %v12979_v22, %v12905_v55  ;;  %v4245_v41 = vadd.f32 %v13173_v11, %v4029_v8  ;;  %vm5080_vm2 = vcmp.ge.f32.partialorder %v13217_v31, 0.0 }
 0x5e8   : > { %9643 = vset.pattern.permute.xlu1 %v15002_v7  ;;  %5964 = vperm.xlu0 %9641, %v13088_v29   ;;  %v4985_v0 = vsub.f32 0.0, %v4953_v51  ;;  %v3596_v55 = vadd.f32 %v3537_v39, %v3380_v40 }
 0x5e9   : > { %6068 = vperm.xlu1 %9643, %v13088_v29   ;;  %v13227_v27 = vpop.permute.xlu1 %3518  ;;  %v4984_v28 = vsub.f32 0.0, %v4952_v23  ;;  %v3969_v23 = vsel %vm1777_vm6, %v13039_v34, %v13115_v43  ;;  %v4461_v60 = vadd.f32 %v13166_v16, %v4245_v41  ;;  %v4401_v34 = vsel %vm1955_vm8, %v4371_v57, %v13166_v16 }
 0x5ea   : > { %v13233_v26 = vpop.f32.mrf.mxu0  ;;  %v5038_v10 = vmul.f32 1.442695, %v4985_v0 }
 0x5eb   : > { %v13237_v2 = vpop.permute.xlu0 %3302  ;;  %v5036_v63 = vmul.f32 1.442695, %v4984_v28  ;;  %v4677_v44 = vadd.f32 %v4589_v1, %v4461_v60 }
 0x5ec   : > { %9644 = vset.pattern.permute.xlu0 %v15002_v7  ;;  %v5349_v35 = vpop.f32.mrf.mxu0  ;;  %9727 = vpow2.f32 %v5038_v10  ;;  %v3812_v7 = vadd.f32 %v3753_v17, %v3596_v55 }
 0x5ed   : > { %9645 = vset.pattern.permute.xlu1 %v15003_v50  ;;  %v13245_v51 = vpop.permute.xlu1 %3946  ;;  %6064 = vperm.xlu0 %9644, %v13122_v36   ;;  %9729 = vpow2.f32 %v5036_v63  ;;  %v4721_v8 = vmul.f32 %v11942_v24, %v4677_v44 }
 0x5ee   : > { %5420 = vperm.xlu1 %9645, %v13088_v29   ;;  %v4028_v29 = vadd.f32 %v3969_v23, %v3812_v7 }
 0x5ef   : > { %v13252_v22 = vpop.permute.xlu0 %3730  ;;  %v4766_v41 = vadd.f32 %v11969_v38, %v4721_v8 }
 0x5f0   : > { %v4244_v43 = vadd.f32 %v4185_v20, %v4028_v29 }
 0x5f1   : > { %v13258_v0 = vpop.permute.xlu1 %4374  ;;  %9646 = vset.pattern.permute.xlu0 %v15003_v50 }
 0x5f2   : > { %5415 = vperm.xlu1 %9645, %v13122_v36   ;;  %v4460_v10 = vadd.f32 %v4401_v34, %v4244_v43 }
 0x5f3   : > { %v13265_v28 = vpop.permute.xlu0 %4158 }
 0x5f5   : > { %v13269_v9 = vpop.permute.xlu1 %3306 }
 0x5f7   : > { %v4587_v19 = vpop.permute.xlu0 %4586 }
 0x5f8   : > { %v4617_v63 = vsel %vm2044_vm9, %v4587_v19, %v4589_v1 }
 0x5f9   : > { %v9728_v39 = vpop.eup %9727  ;;  %v4676_v15 = vadd.f32 %v4617_v63, %v4460_v10  ;;  %v13273_v11 = vpop.permute.xlu1 %3734 }
 0x5fa   : > { %v9730_v36 = vpop.eup %9729  ;;  %v5113_v35 = vsub.f32 1.0, %v9728_v39  ;;  %v8940_v40 = vadd.f32 -1.0, %v9728_v39 }
 0x5fb   : > { %v4720_v16 = vmul.f32 %v11942_v24, %v4676_v15  ;;  %v4833_v57 = vpop.permute.xlu0 %4832  ;;  %v5112_v50 = vsub.f32 1.0, %v9730_v36  ;;  %v8939_v17 = vadd.f32 -1.0, %v9730_v36 }
 0x5fc   : > { %v4878_v55 = vmul.f32 %v4833_v57, %v4766_v41  ;;  %v5177_v23 = vsel %vm5081_vm1, %v5113_v35, %v8940_v40  ;;  %v3167_v41 = vmul.f32 %v11720_v18, %v14940_v56 }
 0x5fd   : > { %v4765_v1 = vadd.f32 %v11969_v38, %v4720_v16  ;;  %8961 = vmatprep.mubr.msk.f32.mxu0 %vm5217_vm0, %v5177_v23  ;;  %v13281_v60 = vpop.permute.xlu1 %4162  ;;  %v5176_v7 = vsel %vm5080_vm2, %v5112_v50, %v8939_v17  ;;  %v3322_v16 = vsel %vm1510_vm3, %v13028_v45, %v12959_v13  ;;  %v15004_v50 = vld [vmem:[#allocation39_spill] sm:$0xff]  ;;  %v15005_v23 = vld [vmem:[#allocation57_spill] sm:$0xff]  ;;  %v3754_v45 = vsel %vm1688_vm5, %v13077_v54, %v13159_v61 }
 0x5fe   : > { %v4923_v20 = vadd.f32 %v12125_v3, %v4878_v55  ;;  %5381 = vmatmul.mubr.f32.gmra.mxu0 %v5176_v7  ;;  %v3383_v40 = vadd.f32 %v12959_v13, %v3167_v41  ;;  %v3166_v17 = vmul.f32 %v11720_v18, %v15004_v50  ;;  %v3538_v56 = vsel %vm1599_vm4, %v15005_v23, %v13102_v32 }
 0x5ff   : > { %v4877_v44 = vmul.f32 %v4833_v57, %v4765_v1  ;;  %v13284_v29 = vpop.permute.xlu0 %3520  ;;  %v4186_v41 = vsel %vm1866_vm7, %v13265_v28, %v13202_v5 }
 0x600   : > { %v4955_v25 = vand.u32 2147483647, %v4923_v20  ;;  %v3599_v1 = vadd.f32 %v13102_v32, %v3383_v40  ;;  %vm5083_vm14 = vcmp.ge.f32.partialorder %v4923_v20, 0.0 }
 0x601   : > { %v4922_v34 = vadd.f32 %v12125_v3, %v4877_v44  ;;  %v4591_v43 = vpop.permute.xlu1 %4590  ;;  %v3382_v44 = vadd.f32 %v3322_v16, %v3166_v17 }
 0x602   : > { %v4987_v8 = vsub.f32 0.0, %v4955_v25  ;;  %v3815_v13 = vadd.f32 %v13159_v61, %v3599_v1 }
 0x603   : > { %v4954_v10 = vand.u32 2147483647, %v4922_v34  ;;  %v13287_v31 = vpop.permute.xlu0 %3948  ;;  %vm5082_vm15 = vcmp.ge.f32.partialorder %v4922_v34, 0.0 }
 0x604   : > { %v5042_v19 = vmul.f32 1.442695, %v4987_v8  ;;  %v3598_v8 = vadd.f32 %v3538_v56, %v3382_v44  ;;  %v4031_v32 = vadd.f32 %v13153_v49, %v3815_v13 }
 0x605   : > { %v4986_v63 = vsub.f32 0.0, %v4954_v10  ;;  %v4838_v39 = vpop.permute.xlu1 %4837 }
 0x606   : > { %9731 = vpow2.f32 %v5042_v19  ;;  %v3970_v19 = vsel %vm1777_vm6, %v13208_v58, %v13153_v49  ;;  %v4247_v61 = vadd.f32 %v13202_v5, %v4031_v32 }
 0x607   : > { %v5040_v15 = vmul.f32 1.442695, %v4986_v63  ;;  %v4377_v36 = vpop.permute.xlu0 %4376  ;;  %v3814_v63 = vadd.f32 %v3754_v45, %v3598_v8  ;;  %v15006_v8 = vld [vmem:[#allocation47_spill] sm:$0xff] }
 0x608   : > { %v4402_v50 = vsel %vm1955_vm8, %v13258_v0, %v4377_v36  ;;  %v4463_v1 = vadd.f32 %v4377_v36, %v4247_v61  ;;  %v3169_v5 = vmul.f32 %v11738_v6, %v15006_v8 }
 0x609   : > { %9733 = vpow2.f32 %v5040_v15  ;;  %v13291_v35 = vpop.permute.xlu1 %3524  ;;  %v4030_v54 = vadd.f32 %v3970_v19, %v3814_v63 }
 0x60a   : > { %v13297_v57 = vpop.f32.mrf.mxu0  ;;  %v3385_v36 = vadd.f32 %v13144_v4, %v3169_v5 }
 0x60b   : > { %v13301_v55 = vpop.permute.xlu0 %3308  ;;  %v4246_v23 = vadd.f32 %v4186_v41, %v4030_v54 }
 0x60c   : > { %v5354_v7 = vpop.f32.mrf.mxu0  ;;  %v3601_v34 = vadd.f32 %v13132_v42, %v3385_v36 }
 0x60d   : > { %v13307_v25 = vpop.permute.xlu1 %3952  ;;  %v4462_v44 = vadd.f32 %v4402_v50, %v4246_v23 }
 0x60f   : > { %v13313_v10 = vpop.permute.xlu0 %3736 }
 0x611   : > { %v13318_v15 = vpop.permute.xlu1 %4380 }
 0x613   : > { %v9732_v40 = vpop.eup %9731  ;;  %v13324_v16 = vpop.permute.xlu0 %4164 }
 0x614   : > { %v5115_v17 = vsub.f32 1.0, %v9732_v40  ;;  %v8942_v58 = vadd.f32 -1.0, %v9732_v40 }
 0x615   : > { %v13329_v56 = vpop.permute.xlu1 %3740 }
 0x616   : > { %v9734_v49 = vpop.eup %9733  ;;  %v5179_v7 = vsel %vm5083_vm14, %v5115_v17, %v8942_v58 }
 0x617   : > { %v4593_v28 = vpop.permute.xlu0 %4592  ;;  %8962 = vmatprep.mubr.msk.f32.mxu0 %vm5217_vm0, %v5179_v7  ;;  %v5114_v45 = vsub.f32 1.0, %v9734_v49  ;;  %v8941_v13 = vadd.f32 -1.0, %v9734_v49  ;;  %v3817_v49 = vadd.f32 %v13189_v21, %v3601_v34 }
 0x618   : > { %v4618_v0 = vsel %vm2044_vm9, %v4591_v43, %v4593_v28  ;;  %v4679_v19 = vadd.f32 %v4593_v28, %v4463_v1  ;;  %v3323_v28 = vsel %vm1510_vm3, %v13066_v12, %v13144_v4  ;;  %v3755_v4 = vsel %vm1688_vm5, %v13252_v22, %v13189_v21 }
 0x619   : > { %v4678_v63 = vadd.f32 %v4618_v0, %v4462_v44  ;;  %v13335_v32 = vpop.permute.xlu1 %4168  ;;  %v5178_v20 = vsel %vm5082_vm15, %v5114_v45, %v8941_v13  ;;  %v4033_v45 = vadd.f32 %v13287_v31, %v3817_v49  ;;  %v3539_v0 = vsel %vm1599_vm4, %v13196_v37, %v13132_v42 }
 0x61a   : > { %v4723_v41 = vmul.f32 %v11934_v59, %v4679_v19  ;;  %5386 = vmatmul.mubr.f32.gmra.mxu0 %v5178_v20  ;;  %v3971_v42 = vsel %vm1777_vm6, %v13245_v51, %v13287_v31  ;;  %v4187_v21 = vsel %vm1866_vm7, %v13281_v60, %v13324_v16 }
 0x61b   : > { %v4722_v40 = vmul.f32 %v11934_v59, %v4678_v63  ;;  %v13340_v54 = vpop.permute.xlu0 %3522  ;;  %v4249_v19 = vadd.f32 %v13324_v16, %v4033_v45 }
 0x61c   : > { %v4768_v61 = vadd.f32 %v11958_v52, %v4723_v41 }
 0x61d   : > { %v4767_v50 = vadd.f32 %v11958_v52, %v4722_v40  ;;  %v4597_v43 = vpop.permute.xlu1 %4596  ;;  %v4465_v37 = vadd.f32 %v13318_v15, %v4249_v19  ;;  %v3171_v19 = vmul.f32 %v11720_v18, %v14961_v33  ;;  %v3324_v33 = vsel %vm1510_vm3, %v13237_v2, %v13179_v46 }
 0x61e   : > { %v4880_v17 = vmul.f32 %v4838_v39, %v4768_v61  ;;  %v3540_v2 = vsel %vm1599_vm4, %v13227_v27, %v13284_v29  ;;  %v3756_v27 = vsel %vm1688_vm5, %v13273_v11, %v13313_v10 }
 0x61f   : > { %v13345_v58 = vpop.permute.xlu0 %3950  ;;  %v4879_v23 = vmul.f32 %v4838_v39, %v4767_v50  ;;  %v3168_v39 = vmul.f32 %v11738_v6, %v14953_v47  ;;  %v4681_v22 = vadd.f32 %v4597_v43, %v4465_v37 }
 0x620   : > { %v13349_v1 = vadd.f32 %v14984_v62, %v4880_v17 }
 0x621   : > { %v13351_v7 = vpop.permute.xlu1 %3954  ;;  %v13354_v44 = vadd.f32 %v14984_v62, %v4879_v23  ;;  %v3384_v20 = vadd.f32 %v3323_v28, %v3168_v39  ;;  %v4725_v31 = vmul.f32 %v11942_v24, %v4681_v22 }
 0x622   : > { %v4957_v13 = vand.u32 2147483647, %v13349_v1  ;;  %vm5085_vm1 = vcmp.ge.f32.partialorder %v13349_v1, 0.0 }
 0x623   : > { %v4379_v8 = vpop.permute.xlu0 %4378  ;;  %v4956_v5 = vand.u32 2147483647, %v13354_v44  ;;  %v3600_v40 = vadd.f32 %v3539_v0, %v3384_v20  ;;  %v4770_v16 = vadd.f32 %v11969_v38, %v4725_v31  ;;  %v3387_v20 = vadd.f32 %v13179_v46, %v3171_v19 }
 0x624   : > { %v4989_v63 = vsub.f32 0.0, %v4957_v13  ;;  %v4403_v45 = vsel %vm1955_vm8, %v4379_v8, %v13318_v15  ;;  %vm5084_vm2 = vcmp.ge.f32.partialorder %v13354_v44, 0.0 }
 0x625   : > { %v13368_v36 = vpop.permute.xlu1 %4382  ;;  %v4988_v12 = vsub.f32 0.0, %v4956_v5  ;;  %v3816_v17 = vadd.f32 %v3755_v4, %v3600_v40  ;;  %v3603_v40 = vadd.f32 %v13284_v29, %v3387_v20  ;;  %v3972_v20 = vsel %vm1777_vm6, %v13345_v58, %v13307_v25 }
 0x626   : > { %v13373_v41 = vpop.f32.mrf.mxu0  ;;  %v5046_v47 = vmul.f32 1.442695, %v4989_v63  ;;  %v3172_v58 = vmul.f32 %v11738_v6, %v14975_v53 }
 0x627   : > { %v13375_v61 = vpop.permute.xlu0 %3738  ;;  %v5044_v50 = vmul.f32 1.442695, %v4988_v12  ;;  %v4032_v49 = vadd.f32 %v3971_v42, %v3816_v17  ;;  %v3173_v12 = vmul.f32 %v11738_v6, %v14977_v48  ;;  %v3819_v31 = vadd.f32 %v13313_v10, %v3603_v40 }
 0x628   : > { %v5359_v34 = vpop.f32.mrf.mxu0  ;;  %9735 = vpow2.f32 %v5046_v47  ;;  %v3757_v6 = vsel %vm1688_vm5, %v13375_v61, %v13329_v56 }
 0x629   : > { %v13381_v23 = vpop.permute.xlu1 %4170  ;;  %9737 = vpow2.f32 %v5044_v50  ;;  %v4248_v13 = vadd.f32 %v4187_v21, %v4032_v49  ;;  %v3389_v34 = vadd.f32 %v13301_v55, %v3173_v12  ;;  %v4035_v10 = vadd.f32 %v13307_v25, %v3819_v31 }
 0x62a   : > { %v3541_v25 = vsel %vm1599_vm4, %v13340_v54, %v13291_v35 }
 0x62b   : > { %v4167_v28 = vpop.permute.xlu0 %4166  ;;  %v4464_v39 = vadd.f32 %v4403_v45, %v4248_v13  ;;  %v3605_v29 = vadd.f32 %v13291_v35, %v3389_v34 }
 0x62d   : > { %v13388_v51 = vpop.permute.xlu1 %4598 }
 0x62f   : > { %v4595_v5 = vpop.permute.xlu0 %4594 }
 0x630   : > { %v4619_v0 = vsel %vm2044_vm9, %v4595_v5, %v4597_v43  ;;  %v3170_v43 = vmul.f32 %v11720_v18, %v14967_v30 }
 0x631   : > { %v4680_v63 = vadd.f32 %v4619_v0, %v4464_v39  ;;  %v13394_v60 = vpop.permute.xlu1 %4847 }
 0x632   : > { %v3386_v13 = vadd.f32 %v3324_v33, %v3170_v43  ;;  %v15007_v33 = vld [vmem:[#allocation36_spill] sm:$0xff] }
 0x633   : > { %v4724_v15 = vmul.f32 %v11942_v24, %v4680_v63  ;;  %v4843_v8 = vpop.permute.xlu0 %4842 }
 0x634   : > { %v4882_v4 = vmul.f32 %v4843_v8, %v4770_v16  ;;  %v3602_v44 = vadd.f32 %v3540_v2, %v3386_v13  ;;  %v3821_v16 = vadd.f32 %v13329_v56, %v3605_v29 }
 0x635   : > { %v9736_v47 = vpop.eup %9735  ;;  %v4769_v50 = vadd.f32 %v11969_v38, %v4724_v15  ;;  %v13408_v42 = vpop.permute.xlu1 %4388 }
 0x636   : > { %v9738_v37 = vpop.eup %9737  ;;  %v13412_v48 = vadd.f32 %v12125_v3, %v4882_v4  ;;  %v5117_v17 = vsub.f32 1.0, %v9736_v47  ;;  %v8944_v21 = vadd.f32 -1.0, %v9736_v47  ;;  %v3818_v11 = vadd.f32 %v3756_v27, %v3602_v44 }
 0x637   : > { %v4881_v22 = vmul.f32 %v4843_v8, %v4769_v50  ;;  %v3957_v18 = vpop.permute.xlu0 %3956  ;;  %v5116_v30 = vsub.f32 1.0, %v9738_v37  ;;  %v8943_v46 = vadd.f32 -1.0, %v9738_v37  ;;  %v3325_v8 = vsel %vm1510_vm3, %v13269_v9, %v13301_v55 }
 0x638   : > { %v4959_v49 = vand.u32 2147483647, %v13412_v48  ;;  %v5181_v45 = vsel %vm5085_vm1, %v5117_v17, %v8944_v21  ;;  %v4188_v47 = vsel %vm1866_vm7, %v4167_v28, %v13335_v32  ;;  %v4037_v43 = vadd.f32 %v3957_v18, %v3821_v16 }
 0x639   : > { %v13422_v39 = vadd.f32 %v12125_v3, %v4881_v22  ;;  %8963 = vmatprep.mubr.msk.f32.mxu0 %vm5217_vm0, %v5181_v45  ;;  %v13425_v1 = vpop.permute.xlu1 %4604  ;;  %v5180_v5 = vsel %vm5084_vm2, %v5116_v30, %v8943_v46  ;;  %v4034_v50 = vadd.f32 %v3972_v20, %v3818_v11  ;;  %v4251_v55 = vadd.f32 %v13335_v32, %v4035_v10 }
 0x63a   : > { %v4991_v0 = vsub.f32 0.0, %v4959_v49  ;;  %5391 = vmatmul.mubr.f32.gmra.mxu0 %v5180_v5  ;;  %v3388_v17 = vadd.f32 %v3325_v8, %v3172_v58  ;;  %v3973_v46 = vsel %vm1777_vm6, %v13351_v7, %v3957_v18  ;;  %vm5087_vm3 = vcmp.ge.f32.partialorder %v13412_v48, 0.0 }
 0x63b   : > { %v4958_v19 = vand.u32 2147483647, %v13422_v39  ;;  %v4385_v63 = vpop.permute.xlu0 %4384  ;;  %v4250_v21 = vadd.f32 %v4188_v47, %v4034_v50  ;;  %vm5086_vm4 = vcmp.ge.f32.partialorder %v13422_v39, 0.0  ;;  %vm6930_vm1 = vcmask 883712  }
 0x63c   : > { %v5050_v15 = vmul.f32 1.442695, %v4991_v0  ;;  %v4404_v28 = vsel %vm1955_vm8, %v13368_v36, %v4385_v63  ;;  %v4467_v53 = vadd.f32 %v4385_v63, %v4251_v55  ;;  %v3604_v30 = vadd.f32 %v3541_v25, %v3388_v17 }
 0x63d   : > { %v4990_v12 = vsub.f32 0.0, %v4958_v19  ;;  %v13440_v4 = vpop.permute.xlu1 %5444  ;;  %v4466_v35 = vadd.f32 %v4404_v28, %v4250_v21 }
 0x63e   : > { %9739 = vpow2.f32 %v5050_v15  ;;  %v5448_v40 = vmul.f32 %v13440_v4, %v15007_v33  ;;  %v3820_v45 = vadd.f32 %v3757_v6, %v3604_v30 }
 0x63f   : > { %v5048_v37 = vmul.f32 1.442695, %v4990_v12  ;;  %v4173_v9 = vpop.permute.xlu0 %4172 }
 0x640   : > { %v4253_v34 = vadd.f32 %v4173_v9, %v4037_v43  ;;  %5481 = vrot.lane.b32.xlu0 %v5448_v40, %s10035_s23  ;;  %v4189_v61 = vsel %vm1866_vm7, %v13381_v23, %v4173_v9  ;;  %v4036_v7 = vadd.f32 %v3973_v46, %v3820_v45 }
 0x641   : > { %9741 = vpow2.f32 %v5048_v37 }
 0x642   : > { %v4469_v32 = vadd.f32 %v13408_v42, %v4253_v34  ;;  %v13459_v22 = vpop.permute.xlu1 %5548  ;;  %v4252_v19 = vadd.f32 %v4189_v61, %v4036_v7 }
 0x643   : > { %v4601_v54 = vpop.permute.xlu0 %4600  ;;  %v5552_v36 = vmul.f32 %v13459_v22, %v15007_v33 }
 0x644   : > { %v4620_v2 = vsel %vm2044_vm9, %v13388_v51, %v4601_v54  ;;  %v4683_v49 = vadd.f32 %v4601_v54, %v4467_v53  ;;  %v4685_v13 = vadd.f32 %v13425_v1, %v4469_v32 }
 0x645   : > { %v4682_v56 = vadd.f32 %v4620_v2, %v4466_v35  ;;  %5585 = vrot.lane.b32.xlu0 %v5552_v36, %s10034_s27 }
 0x646   : > { %v4727_v31 = vmul.f32 %v11934_v59, %v4683_v49  ;;  %v13472_v5 = vpop.permute.xlu1 %5544  ;;  %v13474_v27 = vpop.f32.mrf.mxu0  ;;  %v4729_v16 = vmul.f32 %v11942_v24, %v4685_v13 }
 0x647   : > { %v4726_v18 = vmul.f32 %v11934_v59, %v4682_v56  ;;  %v4387_v51 = vpop.permute.xlu0 %4386 }
 0x648   : > { %v4772_v29 = vadd.f32 %v11958_v52, %v4727_v31  ;;  %v4405_v0 = vsel %vm1955_vm8, %v4387_v51, %v13408_v42  ;;  %v5364_v44 = vpop.f32.mrf.mxu0  ;;  %v4774_v58 = vadd.f32 %v11969_v38, %v4729_v16 }
 0x649   : > { %v4771_v23 = vadd.f32 %v11958_v52, %v4726_v18  ;;  %v4468_v15 = vadd.f32 %v4405_v0, %v4252_v19 }
 0x64a   : > { %v4884_v63 = vmul.f32 %v13394_v60, %v4772_v29 }
 0x64b   : > { %v9740_v20 = vpop.eup %9739  ;;  %v4603_v8 = vpop.permute.xlu0 %4602  ;;  %v4883_v59 = vmul.f32 %v13394_v60, %v4771_v23 }
 0x64c   : > { %v13483_v11 = vpop.permute.xlu1 %5648  ;;  %v4621_v10 = vsel %vm2044_vm9, %v4603_v8, %v13425_v1  ;;  %v5119_v12 = vsub.f32 1.0, %v9740_v20  ;;  %v8946_v42 = vadd.f32 -1.0, %v9740_v20  ;;  %v13490_v52 = vadd.f32 %v14984_v62, %v4884_v63 }
 0x64d   : > { %v4684_v47 = vadd.f32 %v4621_v10, %v4468_v15  ;;  %v13493_v43 = vadd.f32 %v14984_v62, %v4883_v59  ;;  %vm6181_vm9 = vcmask 130048  }
 0x64e   : > { %v9742_v40 = vpop.eup %9741  ;;  %v5183_v50 = vsel %vm5087_vm3, %v5119_v12, %v8946_v42  ;;  %v4961_v55 = vand.u32 2147483647, %v13490_v52  ;;  %vm5089_vm5 = vcmp.ge.f32.partialorder %v13490_v52, 0.0 }
 0x64f   : > { %v4728_v60 = vmul.f32 %v11942_v24, %v4684_v47  ;;  %v4853_v37 = vpop.permute.xlu0 %4852  ;;  %8964 = vmatprep.mubr.msk.f32.mxu0 %vm5217_vm0, %v5183_v50  ;;  %v5118_v1 = vsub.f32 1.0, %v9742_v40  ;;  %v8945_v9 = vadd.f32 -1.0, %v9742_v40  ;;  %v4960_v62 = vand.u32 2147483647, %v13493_v43 }
 0x650   : > { %v4886_v48 = vmul.f32 %v4853_v37, %v4774_v58  ;;  %v13499_v25 = vpop.permute.xlu1 %5756  ;;  %v4993_v17 = vsub.f32 0.0, %v4961_v55  ;;  %vm5088_vm6 = vcmp.ge.f32.partialorder %v13493_v43, 0.0 }
 0x651   : > { %v4773_v28 = vadd.f32 %v11969_v38, %v4728_v60  ;;  %v5182_v34 = vsel %vm5086_vm4, %v5118_v1, %v8945_v9  ;;  %v4992_v21 = vsub.f32 0.0, %v4960_v62  ;;  %v15008_v38 = vld [vmem:[#allocation52_spill] sm:$0xff]  ;;  %v5760_v51 = vmul.f32 %v13499_v25, %v15007_v33 }
 0x652   : > { %v13505_v24 = vadd.f32 %v12125_v3, %v4886_v48  ;;  %5396 = vmatmul.mubr.f32.gmra.mxu0 %v5182_v34  ;;  %v5054_v53 = vmul.f32 1.442695, %v4993_v17  ;;  %v5655_v7 = vmul.f32 %v13483_v11, %v15008_v38  ;;  %v5450_v17 = vmul.f32 %v13440_v4, %v13233_v26 }
 0x653   : > { %v4885_v6 = vmul.f32 %v4853_v37, %v4773_v28  ;;  %v5052_v35 = vmul.f32 1.442695, %v4992_v21  ;;  %v5554_v21 = vmul.f32 %v13459_v22, %v13233_v26 }
 0x654   : > { %v4963_v32 = vand.u32 2147483647, %v13505_v24  ;;  %v13508_v30 = vpop.permute.xlu0 %5440  ;;  %9743 = vpow2.f32 %v5054_v53  ;;  %vm5091_vm7 = vcmp.ge.f32.partialorder %v13505_v24, 0.0 }
 0x655   : > { %v13511_v39 = vadd.f32 %v12125_v3, %v4885_v6  ;;  %v13513_v54 = vpop.permute.xlu1 %5860  ;;  %v5447_v36 = vmul.f32 %v13508_v30, %v15008_v38  ;;  %9745 = vpow2.f32 %v5052_v35  ;;  %v5551_v3 = vmul.f32 %v13472_v5, %v15008_v38 }
 0x656   : > { %v4995_v46 = vsub.f32 0.0, %v4963_v32  ;;  %v5864_v23 = vmul.f32 %v13513_v54, %v15007_v33  ;;  %v5449_v24 = vmul.f32 %v13508_v30, %v13138_v14  ;;  %v5553_v6 = vmul.f32 %v13472_v5, %v13138_v14 }
 0x657   : > { %v4962_v2 = vand.u32 2147483647, %v13511_v39  ;;  %5479 = vrot.lane.b32.xlu1 %v5447_v36, %s10035_s23  ;;  %vm5090_vm8 = vcmp.ge.f32.partialorder %v13511_v39, 0.0  ;;  %v5657_v32 = vmul.f32 %v13483_v11, %v13138_v14  ;;  %v5762_v35 = vmul.f32 %v13499_v25, %v13233_v26 }
 0x658   : > { %v5058_v49 = vmul.f32 1.442695, %v4995_v46  ;;  %v5866_v36 = vmul.f32 %v13513_v54, %v13233_v26  ;;  %v13600_v46 = vld [vmem:[#allocation5] sm:$0xff] }
 0x659   : > { %v4994_v45 = vsub.f32 0.0, %v4962_v2  ;;  %v13519_v56 = vpop.permute.xlu0 %5652  ;;  %9264 = vmatprep.mubr.msk.f32.mxu1 %vm6181_vm9, %v13600_v46 }
 0x65a   : > { %9747 = vpow2.f32 %v5058_v49  ;;  %v5656_v61 = vmul.f32 %v13519_v56, %v15007_v33  ;;  %v13525_v31 = vpop.permute.xlu1 %5856  ;;  %v5658_v53 = vmul.f32 %v13519_v56, %v13233_v26 }
 0x65b   : > { %v5056_v13 = vmul.f32 1.442695, %v4994_v45  ;;  %5583 = vrot.lane.b32.xlu1 %v5551_v3, %s10034_s27  ;;  %v5863_v42 = vmul.f32 %v13525_v31, %v15008_v38  ;;  %v5865_v2 = vmul.f32 %v13525_v31, %v13138_v14 }
 0x65c   : > { %5689 = vrot.lane.b32.xlu0 %v5656_v61, %s14896_s26  ;;  %v5452_v61 = vmul.f32 %v13440_v4, %v13373_v41 }
 0x65d   : > { %9749 = vpow2.f32 %v5056_v13 }
 0x65e   : > { %v13531_v18 = vpop.permute.xlu0 %5752 }
 0x65f   : > { %5687 = vrot.lane.b32.xlu1 %v5655_v7, %s14896_s26  ;;  %v13537_v29 = vpop.permute.xlu1 %5960  ;;  %v5759_v0 = vmul.f32 %v13531_v18, %v15008_v38  ;;  %v5761_v39 = vmul.f32 %v13531_v18, %v13138_v14 }
 0x660   : > { %5793 = vrot.lane.b32.xlu0 %v5760_v51, %s14893_s19  ;;  %v5967_v43 = vmul.f32 %v13537_v29, %v15008_v38  ;;  %v5969_v13 = vmul.f32 %v13537_v29, %v13138_v14  ;;  %v5451_v51 = vmul.f32 %v13508_v30, %v13297_v57 }
 0x661   : > { %v9744_v44 = vpop.eup %9743 }
 0x662   : > { %v13541_v19 = vpop.f32.mrf.mxu0  ;;  %v9746_v63 = vpop.eup %9745  ;;  %v5121_v20 = vsub.f32 1.0, %v9744_v44  ;;  %v8948_v15 = vadd.f32 -1.0, %v9744_v44 }
 0x663   : > { %v13545_v16 = vpop.permute.xlu0 %5964  ;;  %5791 = vrot.lane.b32.xlu1 %v5759_v0, %s14893_s19  ;;  %v5120_v59 = vsub.f32 1.0, %v9746_v63  ;;  %v8947_v10 = vadd.f32 -1.0, %v9746_v63  ;;  %v5556_v0 = vmul.f32 %v13459_v22, %v13373_v41  ;;  %v5555_v63 = vmul.f32 %v13472_v5, %v13297_v57 }
 0x664   : > { %5897 = vrot.lane.b32.xlu0 %v5864_v23, %s14898_s24  ;;  %v5369_v8 = vpop.f32.mrf.mxu0  ;;  %v5185_v12 = vsel %vm5089_vm5, %v5121_v20, %v8948_v15  ;;  %v5968_v40 = vmul.f32 %v13545_v16, %v15007_v33  ;;  %v13556_v50 = vpop.permute.xlu1 %6068  ;;  %v5970_v45 = vmul.f32 %v13545_v16, %v13233_v26  ;;  %v5454_v23 = vmul.f32 %v13440_v4, %v13541_v19 }
 0x665   : > { %8965 = vmatprep.mubr.msk.f32.mxu0 %vm5217_vm0, %v5185_v12  ;;  %v5184_v47 = vsel %vm5088_vm6, %v5120_v59, %v8947_v10  ;;  %v6072_v55 = vmul.f32 %v13556_v50, %v15007_v33  ;;  %v6074_v7 = vmul.f32 %v13556_v50, %v13233_v26  ;;  %v5660_v20 = vmul.f32 %v13519_v56, %v13373_v41 }
 0x666   : > { %5401 = vmatmul.mubr.f32.gmra.mxu0 %v5184_v47  ;;  %v5453_v15 = vmul.f32 %v13508_v30, %v13474_v27  ;;  %v5558_v8 = vmul.f32 %v13459_v22, %v13541_v19  ;;  %v5659_v59 = vmul.f32 %v13483_v11, %v13297_v57  ;;  %v5764_v10 = vmul.f32 %v13499_v25, %v13373_v41 }
 0x667   : > { %v9748_v58 = vpop.eup %9747  ;;  %5895 = vrot.lane.b32.xlu1 %v5863_v42, %s14898_s24  ;;  %v5557_v42 = vmul.f32 %v13472_v5, %v13474_v27 }
 0x668   : > { %6001 = vrot.lane.b32.xlu0 %v5968_v40, %s14873_s0  ;;  %v5123_v52 = vsub.f32 1.0, %v9748_v58  ;;  %v8950_v60 = vadd.f32 -1.0, %v9748_v58  ;;  %v13563_v1 = vpop.permute.xlu0 %6064  ;;  %v5662_v40 = vmul.f32 %v13519_v56, %v13541_v19  ;;  %v5763_v58 = vmul.f32 %v13531_v18, %v13297_v57 }
 0x669   : > { %v6071_v34 = vmul.f32 %v13563_v1, %v15008_v38  ;;  %v6073_v44 = vmul.f32 %v13563_v1, %v13138_v14 }
 0x66a   : > { %v9750_v37 = vpop.eup %9749  ;;  %v5187_v9 = vsel %vm5091_vm7, %v5123_v52, %v8950_v60  ;;  %v5868_v52 = vmul.f32 %v13513_v54, %v13373_v41  ;;  %v5661_v60 = vmul.f32 %v13483_v11, %v13474_v27 }
 0x66b   : > { %8966 = vmatprep.mubr.msk.f32.mxu0 %vm5217_vm0, %v5187_v9  ;;  %5999 = vrot.lane.b32.xlu1 %v5967_v43, %s14873_s0  ;;  %v5122_v48 = vsub.f32 1.0, %v9750_v37  ;;  %v8949_v62 = vadd.f32 -1.0, %v9750_v37  ;;  %v5766_v43 = vmul.f32 %v13499_v25, %v13541_v19  ;;  %v5867_v37 = vmul.f32 %v13525_v31, %v13297_v57 }
 0x66c   : > { %6105 = vrot.lane.b32.xlu0 %v6072_v55, %s14875_s22  ;;  %v5972_v9 = vmul.f32 %v13545_v16, %v13373_v41  ;;  %v5765_v55 = vmul.f32 %v13531_v18, %v13474_v27  ;;  %vm15009_vm0 = vcmask 1043456  }
 0x66d   : > { %v5186_v28 = vsel %vm5090_vm8, %v5122_v48, %v8949_v62  ;;  %v5870_v48 = vmul.f32 %v13513_v54, %v13541_v19  ;;  %v5971_v62 = vmul.f32 %v13537_v29, %v13297_v57  ;;  %vm15010_vm14 = vmmov %vm15009_vm0 }
 0x66e   : > { %5406 = vmatmul.mubr.f32.gmra.mxu0 %v5186_v28  ;;  %v6076_v28 = vmul.f32 %v13556_v50, %v13373_v41 }
 0x66f   : > { %6103 = vrot.lane.b32.xlu1 %v6071_v34, %s14875_s22  ;;  %v5869_v34 = vmul.f32 %v13525_v31, %v13474_v27 }
 0x670   : > { %5485 = vrot.lane.b32.xlu0 %v5450_v17, %s10035_s23  ;;  %v5974_v17 = vmul.f32 %v13545_v16, %v13541_v19 }
 0x673   : > { %5483 = vrot.lane.b32.xlu1 %v5449_v24, %s10035_s23  ;;  %v6075_v24 = vmul.f32 %v13563_v1, %v13297_v57 }
 0x674   : > { %5589 = vrot.lane.b32.xlu0 %v5554_v21, %s10034_s27 }
 0x677   : > { %5587 = vrot.lane.b32.xlu1 %v5553_v6, %s10034_s27 }
 0x678   : > { %5693 = vrot.lane.b32.xlu0 %v5658_v53, %s14896_s26  ;;  %v5973_v53 = vmul.f32 %v13537_v29, %v13474_v27 }
 0x67b   : > { %5691 = vrot.lane.b32.xlu1 %v5657_v32, %s14896_s26  ;;  %v13705_v32 = vpop.permute.xlu1 %5420 }
 0x67c   : > { %5797 = vrot.lane.b32.xlu0 %v5762_v35, %s14893_s19 }
 0x67f   : > { %5795 = vrot.lane.b32.xlu1 %v5761_v39, %s14893_s19  ;;  %v6078_v39 = vmul.f32 %v13556_v50, %v13541_v19 }
 0x680   : > { %5901 = vrot.lane.b32.xlu0 %v5866_v36, %s14898_s24 }
 0x682   : > { %v13607_v49 = vpop.f32.mrf.mxu0 }
 0x683   : > { %5899 = vrot.lane.b32.xlu1 %v5865_v2, %s14898_s24  ;;  %v5455_v36 = vmul.f32 %v13508_v30, %v13607_v49 }
 0x684   : > { %6005 = vrot.lane.b32.xlu0 %v5970_v45, %s14873_s0  ;;  %v5374_v3 = vpop.f32.mrf.mxu0  ;;  %v13715_v45 = vpop.permute.xlu1 %5415 }
 0x687   : > { %5489 = vrot.lane.b32.xlu1 %v5452_v61, %s10035_s23  ;;  %v6077_v61 = vmul.f32 %v13563_v1, %v13474_v27 }
 0x688   : > { %6003 = vrot.lane.b32.xlu0 %v5969_v13, %s14873_s0 }
 0x68b   : > { %6109 = vrot.lane.b32.xlu1 %v6074_v7, %s14875_s22 }
 0x68c   : > { %5487 = vrot.lane.b32.xlu0 %v5451_v51, %s10035_s23  ;;  %v5559_v51 = vmul.f32 %v13472_v5, %v13607_v49 }
 0x68f   : > { %5593 = vrot.lane.b32.xlu1 %v5556_v0, %s10034_s27 }
 0x690   : > { %6107 = vrot.lane.b32.xlu0 %v6073_v44, %s14875_s22 }
 0x693   : > { %5493 = vrot.lane.b32.xlu1 %v5454_v23, %s10035_s23 }
 0x694   : > { %5591 = vrot.lane.b32.xlu0 %v5555_v63, %s10034_s27  ;;  %v5424_v63 = vmul.f32 %v13705_v32, %v15007_v33 }
 0x697   : > { %5697 = vrot.lane.b32.xlu1 %v5660_v20, %s14896_s26 }
 0x698   : > { %5491 = vrot.lane.b32.xlu0 %v5453_v15, %s10035_s23 }
 0x69b   : > { %5597 = vrot.lane.b32.xlu1 %v5558_v8, %s10034_s27  ;;  %v5663_v8 = vmul.f32 %v13483_v11, %v13607_v49 }
 0x69c   : > { %5695 = vrot.lane.b32.xlu0 %v5659_v59, %s14896_s26 }
 0x69e   : > { %v13651_v12 = vpop.f32.mrf.mxu0 }
 0x69f   : > { %5801 = vrot.lane.b32.xlu1 %v5764_v10, %s14893_s19  ;;  %v5456_v21 = vmul.f32 %v13440_v4, %v13651_v12  ;;  %v5560_v3 = vmul.f32 %v13459_v22, %v13651_v12  ;;  %v5423_v10 = vmul.f32 %v13715_v45, %v15008_v38  ;;  %v5767_v38 = vmul.f32 %v13531_v18, %v13607_v49 }
 0x6a0   : > { %5595 = vrot.lane.b32.xlu0 %v5557_v42, %s10034_s27  ;;  %v5379_v47 = vpop.f32.mrf.mxu0 }
 0x6a3   : > { %5701 = vrot.lane.b32.xlu1 %v5662_v40, %s14896_s26 }
 0x6a4   : > { %5799 = vrot.lane.b32.xlu0 %v5763_v58, %s14893_s19 }
 0x6a7   : > { %5905 = vrot.lane.b32.xlu1 %v5868_v52, %s14898_s24 }
 0x6a8   : > { %5699 = vrot.lane.b32.xlu0 %v5661_v60, %s14896_s26 }
 0x6ab   : > { %5805 = vrot.lane.b32.xlu1 %v5766_v43, %s14893_s19 }
 0x6ac   : > { %5903 = vrot.lane.b32.xlu0 %v5867_v37, %s14898_s24 }
 0x6af   : > { %6009 = vrot.lane.b32.xlu1 %v5972_v9, %s14873_s0 }
 0x6b0   : > { %5803 = vrot.lane.b32.xlu0 %v5765_v55, %s14893_s19 }
 0x6b2   : > { %v5482_v2 = vpop.permute.xlu0 %5481 }
 0x6b3   : > { %5909 = vrot.lane.b32.xlu1 %v5870_v48, %s14898_s24  ;;  %v5528_v59 = vadd.f32 %v5482_v2, %v5424_v63  ;;  %v5664_v2 = vmul.f32 %v13519_v56, %v13651_v12 }
 0x6b4   : > { %6007 = vrot.lane.b32.xlu0 %v5971_v62, %s14873_s0 }
 0x6b7   : > { %6113 = vrot.lane.b32.xlu1 %v6076_v28, %s14875_s22  ;;  %v5586_v7 = vpop.permute.xlu0 %5585 }
 0x6b8   : > { %5907 = vrot.lane.b32.xlu0 %v5869_v34, %s14898_s24  ;;  %v5632_v42 = vadd.f32 %v5586_v7, %v5528_v59 }
 0x6bb   : > { %6013 = vrot.lane.b32.xlu1 %v5974_v17, %s14873_s0 }
 0x6bc   : > { %6111 = vrot.lane.b32.xlu0 %v6075_v24, %s14875_s22 }
 0x6be   : > { %v13701_v6 = vpop.f32.mrf.mxu0 }
 0x6bf   : > { %5497 = vrot.lane.b32.xlu1 %v5456_v21, %s10035_s23  ;;  %v5457_v23 = vmul.f32 %v13508_v30, %v13701_v6  ;;  %v5561_v52 = vmul.f32 %v13472_v5, %v13701_v6 }
 0x6c0   : > { %6011 = vrot.lane.b32.xlu0 %v5973_v53, %s14873_s0  ;;  %v5384_v35 = vpop.f32.mrf.mxu0 }
 0x6c3   : > { %6117 = vrot.lane.b32.xlu1 %v6078_v39, %s14875_s22  ;;  %v5665_v39 = vmul.f32 %v13483_v11, %v13701_v6 }
 0x6c4   : > { %5495 = vrot.lane.b32.xlu0 %v5455_v36, %s10035_s23 }
 0x6c7   : > { %5601 = vrot.lane.b32.xlu1 %v5560_v3, %s10034_s27 }
 0x6c8   : > { %6115 = vrot.lane.b32.xlu0 %v6077_v61, %s14875_s22 }
 0x6c9   : > { %v5480_v13 = vpop.permute.xlu1 %5479 }
 0x6ca   : > { %v5527_v40 = vadd.f32 %v5480_v13, %v5423_v10  ;;  %v5975_v10 = vmul.f32 %v13537_v29, %v13607_v49 }
 0x6cc   : > { %5599 = vrot.lane.b32.xlu0 %v5559_v51, %s10034_s27  ;;  %v5871_v51 = vmul.f32 %v13525_v31, %v13607_v49 }
 0x6cd   : > { %v5584_v0 = vpop.permute.xlu1 %5583 }
 0x6ce   : > { %v5690_v44 = vpop.permute.xlu0 %5689  ;;  %v5631_v33 = vadd.f32 %v5584_v0, %v5527_v40 }
 0x6cf   : > { %v5736_v60 = vadd.f32 %v5690_v44, %v5632_v42  ;;  %v13757_v44 = vld [vmem:[#allocation5 + $0x8] sm:$0xff] }
 0x6d0   : > { %5499 = vrot.lane.b32.xlu0 %v5457_v23, %s10035_s23 }
 0x6d1   : > { %v5688_v20 = vpop.permute.xlu1 %5687 }
 0x6d2   : > { %v5794_v15 = vpop.permute.xlu0 %5793  ;;  %v5735_v9 = vadd.f32 %v5688_v20, %v5631_v33  ;;  %v5769_v20 = vmul.f32 %v13531_v18, %v13701_v6 }
 0x6d3   : > { %v5840_v43 = vadd.f32 %v5794_v15, %v5736_v60  ;;  %v5768_v15 = vmul.f32 %v13499_v25, %v13651_v12  ;;  %v5426_v60 = vmul.f32 %v13705_v32, %v13233_v26 }
 0x6d4   : > { %5703 = vrot.lane.b32.xlu0 %v5663_v8, %s14896_s26 }
 0x6d5   : > { %v5792_v47 = vpop.permute.xlu1 %5791 }
 0x6d6   : > { %v5898_v58 = vpop.permute.xlu0 %5897  ;;  %v5839_v34 = vadd.f32 %v5792_v47, %v5735_v9  ;;  %v6079_v9 = vmul.f32 %v13563_v1, %v13607_v49 }
 0x6d7   : > { %v5944_v62 = vadd.f32 %v5898_v58, %v5840_v43  ;;  %v5873_v58 = vmul.f32 %v13525_v31, %v13701_v6 }
 0x6d8   : > { %5603 = vrot.lane.b32.xlu0 %v5561_v52, %s10034_s27  ;;  %v5872_v52 = vmul.f32 %v13513_v54, %v13651_v12 }
 0x6d9   : > { %v5896_v37 = vpop.permute.xlu1 %5895 }
 0x6da   : > { %v6002_v55 = vpop.permute.xlu0 %6001  ;;  %v13739_v48 = vpop.f32.mrf.mxu0  ;;  %v5943_v53 = vadd.f32 %v5896_v37, %v5839_v34 }
 0x6db   : > { %v5458_v28 = vmul.f32 %v13440_v4, %v13739_v48  ;;  %v6048_v24 = vadd.f32 %v6002_v55, %v5944_v62  ;;  %v5562_v0 = vmul.f32 %v13459_v22, %v13739_v48  ;;  %v5666_v42 = vmul.f32 %v13519_v56, %v13739_v48 }
 0x6dc   : > { %5807 = vrot.lane.b32.xlu0 %v5767_v38, %s14893_s19  ;;  %v5389_v17 = vpop.f32.mrf.mxu0  ;;  %v5770_v55 = vmul.f32 %v13499_v25, %v13739_v48  ;;  %v5425_v62 = vmul.f32 %v13715_v45, %v13138_v14 }
 0x6dd   : > { %v6000_v21 = vpop.permute.xlu1 %5999  ;;  %5501 = vrot.lane.b32.xlu1 %v5458_v28, %s10035_s23  ;;  %v5977_v17 = vmul.f32 %v13537_v29, %v13701_v6 }
 0x6de   : > { %v6106_v35 = vpop.permute.xlu0 %6105  ;;  %v6047_v3 = vadd.f32 %v6000_v21, %v5943_v53  ;;  %v5976_v21 = vmul.f32 %v13545_v16, %v13651_v12 }
 0x6df   : > { %v6152_v36 = vadd.f32 %v6106_v35, %v6048_v24 }
 0x6e0   : > { %5707 = vrot.lane.b32.xlu0 %v5665_v39, %s14896_s26 }
 0x6e1   : > { %v6104_v61 = vpop.permute.xlu1 %6103  ;;  %9260 = vmatprep.subr.mxu1 %v6152_v36  ;;  %5705 = vrot.lane.b32.xlu1 %v5664_v2, %s14896_s26 }
 0x6e2   : > { %v6151_v13 = vadd.f32 %v6104_v61, %v6047_v3  ;;  %9261 = vmatpush3.msra.mxu1 %v6152_v36  ;;  %v5486_v7 = vpop.permute.xlu0 %5485  ;;  %v5874_v61 = vmul.f32 %v13513_v54, %v13739_v48 }
 0x6e3   : > { %v5530_v43 = vadd.f32 %v5486_v7, %v5426_v60 }
 0x6e4   : > { %9262 = vmatprep.subr.mxu1 %v6151_v13  ;;  %5911 = vrot.lane.b32.xlu0 %v5871_v51, %s14898_s24 }
 0x6e5   : > { %9263 = vmatpush3.msra.mxu1 %v6151_v13  ;;  %v5484_v23 = vpop.permute.xlu1 %5483  ;;  %5605 = vrot.lane.b32.xlu1 %v5562_v0, %s10034_s27 }
 0x6e6   : > { %v5590_v63 = vpop.permute.xlu0 %5589  ;;  %9265 = vmatmul.mubr.msk.f32.vlgmr.msra.gmra.mxu1 %vm6181_vm9, %v13757_v44  ;;  %v5529_v24 = vadd.f32 %v5484_v23, %v5425_v62 }
 0x6e7   : > { %9271 = vmatprep.mubr.msk.f32.mxu1 %vm6181_vm9, %v13600_v46  ;;  %v5634_v38 = vadd.f32 %v5590_v63, %v5530_v43 }
 0x6e8   : > { %5811 = vrot.lane.b32.xlu0 %v5769_v20, %s14893_s19 }
 0x6e9   : > { %v5588_v8 = vpop.permute.xlu1 %5587  ;;  %5809 = vrot.lane.b32.xlu1 %v5768_v15, %s14893_s19 }
 0x6ea   : > { %v5694_v59 = vpop.permute.xlu0 %5693  ;;  %v5633_v35 = vadd.f32 %v5588_v8, %v5529_v24  ;;  %v6080_v8 = vmul.f32 %v13556_v50, %v13651_v12 }
 0x6eb   : > { %v5738_v28 = vadd.f32 %v5694_v59, %v5634_v38  ;;  %v6081_v59 = vmul.f32 %v13563_v1, %v13701_v6 }
 0x6ec   : > { %6015 = vrot.lane.b32.xlu0 %v5975_v10, %s14873_s0 }
 0x6ed   : > { %v5692_v47 = vpop.permute.xlu1 %5691  ;;  %5709 = vrot.lane.b32.xlu1 %v5666_v42, %s14896_s26 }
 0x6ee   : > { %v5798_v40 = vpop.permute.xlu0 %5797  ;;  %v5737_v3 = vadd.f32 %v5692_v47, %v5633_v35 }
 0x6ef   : > { %v5842_v53 = vadd.f32 %v5798_v40, %v5738_v28 }
 0x6f0   : > { %5915 = vrot.lane.b32.xlu0 %v5873_v58, %s14898_s24  ;;  %v5978_v58 = vmul.f32 %v13545_v16, %v13739_v48 }
 0x6f1   : > { %v5796_v33 = vpop.permute.xlu1 %5795  ;;  %5913 = vrot.lane.b32.xlu1 %v5872_v52, %s14898_s24 }
 0x6f2   : > { %v5902_v37 = vpop.permute.xlu0 %5901  ;;  %v5841_v0 = vadd.f32 %v5796_v33, %v5737_v3 }
 0x6f3   : > { %v5946_v14 = vadd.f32 %v5902_v37, %v5842_v53 }
 0x6f4   : > { %6119 = vrot.lane.b32.xlu0 %v6079_v9, %s14875_s22 }
 0x6f5   : > { %v5900_v26 = vpop.permute.xlu1 %5899  ;;  %5813 = vrot.lane.b32.xlu1 %v5770_v55, %s14893_s19 }
 0x6f6   : > { %v6006_v34 = vpop.permute.xlu0 %6005  ;;  %v5945_v15 = vadd.f32 %v5900_v26, %v5841_v0 }
 0x6f7   : > { %v6050_v7 = vadd.f32 %v6006_v34, %v5946_v14 }
 0x6f8   : > { %6019 = vrot.lane.b32.xlu0 %v5977_v17, %s14873_s0 }
 0x6f9   : > { %v5490_v39 = vpop.permute.xlu1 %5489  ;;  %6017 = vrot.lane.b32.xlu1 %v5976_v21, %s14873_s0  ;;  %v6082_v21 = vmul.f32 %v13556_v50, %v13739_v48 }
 0x6fa   : > { %v6004_v36 = vpop.permute.xlu0 %6003  ;;  %v13799_v2 = vpop.f32.mrf.mxu0 }
 0x6fb   : > { %v5459_v13 = vmul.f32 %v13508_v30, %v13799_v2  ;;  %v6049_v10 = vadd.f32 %v6004_v36, %v5945_v15  ;;  %v5563_v52 = vmul.f32 %v13472_v5, %v13799_v2  ;;  %v5428_v36 = vmul.f32 %v13705_v32, %v13373_v41 }
 0x6fc   : > { %v5394_v51 = vpop.f32.mrf.mxu0 }
 0x6fd   : > { %v6110_v23 = vpop.permute.xlu1 %6109  ;;  %5917 = vrot.lane.b32.xlu1 %v5874_v61, %s14898_s24  ;;  %5503 = vrot.lane.b32.xlu0 %v5459_v13, %s10035_s23  ;;  %v5532_v61 = vadd.f32 %v5490_v39, %v5428_v36  ;;  %v5427_v51 = vmul.f32 %v13715_v45, %v13297_v57  ;;  %v5430_v39 = vmul.f32 %v13705_v32, %v13541_v19 }
 0x6fe   : > { %v6154_v63 = vadd.f32 %v6110_v23, %v6050_v7  ;;  %v5488_v20 = vpop.permute.xlu0 %5487  ;;  %v5429_v19 = vmul.f32 %v13715_v45, %v13474_v27 }
 0x6ff   : > { %v5531_v15 = vadd.f32 %v5488_v20, %v5427_v51 }
 0x700   : > { %9267 = vmatprep.subr.mxu1 %v6154_v63 }
 0x701   : > { %9268 = vmatpush3.msra.mxu1 %v6154_v63  ;;  %v5594_v42 = vpop.permute.xlu1 %5593  ;;  %6121 = vrot.lane.b32.xlu1 %v6080_v8, %s14875_s22 }
 0x702   : > { %6123 = vrot.lane.b32.xlu0 %v6081_v59, %s14875_s22  ;;  %v6108_v47 = vpop.permute.xlu0 %6107  ;;  %v5636_v7 = vadd.f32 %v5594_v42, %v5532_v61 }
 0x703   : > { %v6153_v40 = vadd.f32 %v6108_v47, %v6049_v10 }
 0x705   : > { %9269 = vmatprep.subr.mxu1 %v6153_v40  ;;  %v5494_v60 = vpop.permute.xlu1 %5493  ;;  %6021 = vrot.lane.b32.xlu1 %v5978_v58, %s14873_s0 }
 0x706   : > { %5607 = vrot.lane.b32.xlu0 %v5563_v52, %s10034_s27  ;;  %v5592_v33 = vpop.permute.xlu0 %5591  ;;  %9270 = vmatpush3.msra.mxu1 %v6153_v40 }
 0x707   : > { %9272 = vmatmul.mubr.msk.f32.vlgmr.msra.gmra.mxu1 %vm6181_vm9, %v13757_v44  ;;  %v5635_v59 = vadd.f32 %v5592_v33, %v5531_v15 }
 0x708   : > { %9278 = vmatprep.mubr.msk.f32.mxu1 %vm6181_vm9, %v13600_v46 }
 0x709   : > { %v5698_v43 = vpop.permute.xlu1 %5697 }
 0x70a   : > { %v5492_v37 = vpop.permute.xlu0 %5491  ;;  %v5740_v23 = vadd.f32 %v5698_v43, %v5636_v7 }
 0x70b   : > { %v5533_v36 = vadd.f32 %v5492_v37, %v5429_v19 }
 0x70d   : > { %v5598_v9 = vpop.permute.xlu1 %5597 }
 0x70e   : > { %v5696_v55 = vpop.permute.xlu0 %5695 }
 0x70f   : > { %v5739_v58 = vadd.f32 %v5696_v55, %v5635_v59  ;;  %v5667_v55 = vmul.f32 %v13483_v11, %v13799_v2 }
 0x711   : > { %v5802_v38 = vpop.permute.xlu1 %5801 }
 0x712   : > { %v5596_v62 = vpop.permute.xlu0 %5595  ;;  %v13823_v26 = vpop.f32.mrf.mxu0  ;;  %v5844_v8 = vadd.f32 %v5802_v38, %v5740_v23 }
 0x713   : > { %v5460_v28 = vmul.f32 %v13440_v4, %v13823_v26  ;;  %v5564_v14 = vmul.f32 %v13459_v22, %v13823_v26  ;;  %v5637_v27 = vadd.f32 %v5596_v62, %v5533_v36 }
 0x714   : > { %v5399_v34 = vpop.f32.mrf.mxu0 }
 0x715   : > { %v5702_v17 = vpop.permute.xlu1 %5701  ;;  %5505 = vrot.lane.b32.xlu1 %v5460_v28, %s10035_s23  ;;  %v5534_v34 = vadd.f32 %v5494_v60, %v5430_v39  ;;  %v5772_v39 = vmul.f32 %v13499_v25, %v13823_v26 }
 0x716   : > { %v5800_v24 = vpop.permute.xlu0 %5799 }
 0x717   : > { %v5843_v57 = vadd.f32 %v5800_v24, %v5739_v58 }
 0x719   : > { %v5906_v53 = vpop.permute.xlu1 %5905  ;;  %6125 = vrot.lane.b32.xlu1 %v6082_v21, %s14875_s22  ;;  %v5638_v21 = vadd.f32 %v5598_v9, %v5534_v34 }
 0x71a   : > { %v5700_v35 = vpop.permute.xlu0 %5699  ;;  %v5948_v47 = vadd.f32 %v5906_v53, %v5844_v8 }
 0x71b   : > { %v5742_v24 = vadd.f32 %v5702_v17, %v5638_v21  ;;  %v5741_v37 = vadd.f32 %v5700_v35, %v5637_v27  ;;  %v6083_v21 = vmul.f32 %v13563_v1, %v13799_v2 }
 0x71d   : > { %v5806_v3 = vpop.permute.xlu1 %5805  ;;  %5609 = vrot.lane.b32.xlu1 %v5564_v14, %s10034_s27 }
 0x71e   : > { %v5904_v13 = vpop.permute.xlu0 %5903 }
 0x71f   : > { %v5947_v38 = vadd.f32 %v5904_v13, %v5843_v57  ;;  %v5846_v13 = vadd.f32 %v5806_v3, %v5742_v24  ;;  %v6169_v24 = vld [vmem:[%s14662_s10] sm:$0xff] }
 0x721   : > { %v6010_v0 = vpop.permute.xlu1 %6009 }
 0x722   : > { %v5804_v63 = vpop.permute.xlu0 %5803  ;;  %v6052_v52 = vadd.f32 %v6010_v0, %v5948_v47 }
 0x723   : > { %v5845_v62 = vadd.f32 %v5804_v63, %v5741_v37 }
 0x725   : > { %v5910_v10 = vpop.permute.xlu1 %5909 }
 0x726   : > { %v6008_v40 = vpop.permute.xlu0 %6007  ;;  %v13838_v41 = vpop.f32.mrf.mxu0  ;;  %v5950_v17 = vadd.f32 %v5910_v10, %v5846_v13 }
 0x727   : > { %v5461_v42 = vmul.f32 %v13508_v30, %v13838_v41  ;;  %v6051_v53 = vadd.f32 %v6008_v40, %v5947_v38  ;;  %v5565_v51 = vmul.f32 %v13472_v5, %v13838_v41  ;;  %v5771_v5 = vmul.f32 %v13531_v18, %v13799_v2 }
 0x728   : > { %v5404_v28 = vpop.f32.mrf.mxu0  ;;  %v5669_v47 = vmul.f32 %v13483_v11, %v13838_v41  ;;  %v5877_v34 = vmul.f32 %v13525_v31, %v13838_v41  ;;  %v5980_v38 = vmul.f32 %v13545_v16, %v13823_v26  ;;  %v5981_v13 = vmul.f32 %v13537_v29, %v13838_v41 }
 0x729   : > { %v6114_v43 = vpop.permute.xlu1 %6113  ;;  %5507 = vrot.lane.b32.xlu0 %v5461_v42, %s10035_s23  ;;  %v5773_v42 = vmul.f32 %v13531_v18, %v13838_v41  ;;  %v5876_v28 = vmul.f32 %v13513_v54, %v13823_v26 }
 0x72a   : > { %v6156_v20 = vadd.f32 %v6114_v43, %v6052_v52  ;;  %v5908_v33 = vpop.permute.xlu0 %5907  ;;  %v5875_v52 = vmul.f32 %v13525_v31, %v13799_v2  ;;  %v5979_v43 = vmul.f32 %v13537_v29, %v13799_v2 }
 0x72b   : > { %v5949_v59 = vadd.f32 %v5908_v33, %v5845_v62 }
 0x72c   : > { %9274 = vmatprep.subr.mxu1 %v6156_v20 }
 0x72d   : > { %9275 = vmatpush3.msra.mxu1 %v6156_v20  ;;  %v6014_v30 = vpop.permute.xlu1 %6013  ;;  %5711 = vrot.lane.b32.xlu0 %v5667_v55, %s14896_s26 }
 0x72e   : > { %v6112_v60 = vpop.permute.xlu0 %6111  ;;  %v13850_v14 = vpop.f32.mrf.mxu0  ;;  %v6054_v3 = vadd.f32 %v6014_v30, %v5950_v17  ;;  %v6084_v30 = vmul.f32 %v13556_v50, %v13823_v26  ;;  %v5432_v17 = vmul.f32 %v13705_v32, %v13651_v12 }
 0x72f   : > { %v6155_v61 = vadd.f32 %v6112_v60, %v6051_v53  ;;  %v5462_v9 = vmul.f32 %v13440_v4, %v13850_v14  ;;  %v5668_v4 = vmul.f32 %v13519_v56, %v13823_v26  ;;  %v5566_v10 = vmul.f32 %v13459_v22, %v13850_v14 }
 0x730   : > { %v5409_v7 = vpop.f32.mrf.mxu0  ;;  %v5670_v11 = vmul.f32 %v13519_v56, %v13850_v14  ;;  %v5774_v18 = vmul.f32 %v13499_v25, %v13850_v14  ;;  %v5878_v31 = vmul.f32 %v13513_v54, %v13850_v14  ;;  %v6086_v19 = vmul.f32 %v13556_v50, %v13850_v14 }
 0x731   : > { %9276 = vmatprep.subr.mxu1 %v6155_v61  ;;  %v13856_v0 = vpop.permute.xlu1 %5497  ;;  %5509 = vrot.lane.b32.xlu1 %v5462_v9, %s10035_s23  ;;  %v5982_v36 = vmul.f32 %v13545_v16, %v13850_v14  ;;  %v6085_v7 = vmul.f32 %v13563_v1, %v13838_v41  ;;  %v6170_v16 = vld [vmem:[%s14662_s10 + $0x8] sm:$0xff] }
 0x732   : > { %5611 = vrot.lane.b32.xlu0 %v5565_v51, %s10034_s27  ;;  %v6012_v23 = vpop.permute.xlu0 %6011  ;;  %9277 = vmatpush3.msra.mxu1 %v6155_v61  ;;  %v5536_v37 = vadd.f32 %v13856_v0, %v5432_v17 }
 0x733   : > { %9279 = vmatmul.mubr.msk.f32.vlgmr.msra.gmra.mxu1 %vm6181_vm9, %v13757_v44  ;;  %v6053_v40 = vadd.f32 %v6012_v23, %v5949_v59 }
 0x734   : > { %9285 = vmatprep.mubr.msk.f32.mxu1 %vm6181_vm9, %v13600_v46 }
 0x735   : > { %v6118_v15 = vpop.permute.xlu1 %6117  ;;  %5713 = vrot.lane.b32.xlu1 %v5668_v4, %s14896_s26  ;;  %v5431_v4 = vmul.f32 %v13715_v45, %v13607_v49  ;;  %v5434_v49 = vmul.f32 %v13705_v32, %v13739_v48 }
 0x736   : > { %v6158_v8 = vadd.f32 %v6118_v15, %v6054_v3  ;;  %5815 = vrot.lane.b32.xlu0 %v5771_v5, %s14893_s19  ;;  %v13870_v35 = vpop.permute.xlu0 %5495 }
 0x737   : > { %v5535_v1 = vadd.f32 %v13870_v35, %v5431_v4  ;;  %v5436_v4 = vmul.f32 %v13705_v32, %v13823_v26 }
 0x738   : > { %9281 = vmatprep.subr.mxu1 %v6158_v8 }
 0x739   : > { %9282 = vmatpush3.msra.mxu1 %v6158_v8  ;;  %5613 = vrot.lane.b32.xlu1 %v5566_v10, %s10034_s27  ;;  %v5602_v33 = vpop.permute.xlu1 %5601 }
 0x73a   : > { %5715 = vrot.lane.b32.xlu0 %v5669_v47, %s14896_s26  ;;  %v6116_v63 = vpop.permute.xlu0 %6115  ;;  %v5640_v3 = vadd.f32 %v5602_v33, %v5536_v37 }
 0x73b   : > { %v6157_v58 = vadd.f32 %v6116_v63, %v6053_v40 }
 0x73d   : > { %9283 = vmatprep.subr.mxu1 %v6157_v58  ;;  %5817 = vrot.lane.b32.xlu1 %v5772_v39, %s14893_s19 }
 0x73e   : > { %5919 = vrot.lane.b32.xlu0 %v5875_v52, %s14898_s24  ;;  %v5600_v22 = vpop.permute.xlu0 %5599  ;;  %9284 = vmatpush3.msra.mxu1 %v6157_v58 }
 0x73f   : > { %9286 = vmatmul.mubr.msk.f32.vlgmr.msra.gmra.mxu1 %vm6181_vm9, %v13757_v44  ;;  %v5639_v62 = vadd.f32 %v5600_v22, %v5535_v1  ;;  %v5433_v22 = vmul.f32 %v13715_v45, %v13701_v6 }
 0x740   : > { %9292 = vmatprep.mubr.msk.f32.mxu1 %vm6181_vm9, %v13600_v46 }
 0x741   : > { %5717 = vrot.lane.b32.xlu1 %v5670_v11, %s14896_s26 }
 0x742   : > { %5819 = vrot.lane.b32.xlu0 %v5773_v42, %s14893_s19  ;;  %v13894_v57 = vpop.permute.xlu0 %5499 }
 0x745   : > { %5921 = vrot.lane.b32.xlu1 %v5876_v28, %s14898_s24 }
 0x746   : > { %6023 = vrot.lane.b32.xlu0 %v5979_v43, %s14873_s0  ;;  %v5704_v56 = vpop.permute.xlu0 %5703  ;;  %v5537_v43 = vadd.f32 %v13894_v57, %v5433_v22 }
 0x747   : > { %v5743_v59 = vadd.f32 %v5704_v56, %v5639_v62 }
 0x749   : > { %5821 = vrot.lane.b32.xlu1 %v5774_v18, %s14893_s19 }
 0x74a   : > { %5923 = vrot.lane.b32.xlu0 %v5877_v34, %s14898_s24  ;;  %v13908_v20 = vpop.permute.xlu0 %5603 }
 0x74b   : > { %v5641_v34 = vadd.f32 %v13908_v20, %v5537_v43 }
 0x74d   : > { %6025 = vrot.lane.b32.xlu1 %v5980_v38, %s14873_s0 }
 0x74e   : > { %6127 = vrot.lane.b32.xlu0 %v6083_v21, %s14875_s22  ;;  %v5808_v25 = vpop.permute.xlu0 %5807 }
 0x74f   : > { %v5502_v55 = vpop.permute.xlu1 %5501  ;;  %v5847_v40 = vadd.f32 %v5808_v25, %v5743_v59 }
 0x750   : > { %v5538_v28 = vadd.f32 %v5502_v55, %v5434_v49 }
 0x751   : > { %5925 = vrot.lane.b32.xlu1 %v5878_v31, %s14898_s24 }
 0x752   : > { %6133 = vrot.lane.b32.xlu0 %v6086_v19, %s14875_s22  ;;  %v5708_v60 = vpop.permute.xlu0 %5707 }
 0x753   : > { %v5706_v53 = vpop.permute.xlu1 %5705  ;;  %v5745_v21 = vadd.f32 %v5708_v60, %v5641_v34 }
 0x754   : > { %v5744_v15 = vadd.f32 %v5706_v53, %v5640_v3 }
 0x755   : > { %6129 = vrot.lane.b32.xlu1 %v6084_v30, %s14875_s22 }
 0x756   : > { %6173 = vperm.xlu0 %9646, %v6169_v24   ;;  %v5912_v61 = vpop.permute.xlu0 %5911 }
 0x757   : > { %v5606_v54 = vpop.permute.xlu1 %5605  ;;  %v5951_v12 = vadd.f32 %v5912_v61, %v5847_v40 }
 0x758   : > { %v5642_v56 = vadd.f32 %v5606_v54, %v5538_v28 }
 0x759   : > { %6029 = vrot.lane.b32.xlu1 %v5982_v36, %s14873_s0 }
 0x75a   : > { %v5812_v51 = vpop.permute.xlu0 %5811 }
 0x75b   : > { %v5810_v9 = vpop.permute.xlu1 %5809  ;;  %v5849_v19 = vadd.f32 %v5812_v51, %v5745_v21 }
 0x75c   : > { %v5848_v10 = vadd.f32 %v5810_v9, %v5744_v15 }
 0x75d   : > { %6027 = vrot.lane.b32.xlu1 %v5981_v13, %s14873_s0 }
 0x75e   : > { %v6016_v23 = vpop.permute.xlu0 %6015 }
 0x75f   : > { %v5710_v50 = vpop.permute.xlu1 %5709  ;;  %v6055_v0 = vadd.f32 %v6016_v23, %v5951_v12 }
 0x760   : > { %v5746_v33 = vadd.f32 %v5710_v50, %v5642_v56 }
 0x761   : > { %6131 = vrot.lane.b32.xlu1 %v6085_v7, %s14875_s22  ;;  %s9050_s22 = sshll.u32 %s10162_s28, 7 }
 0x762   : > { %v5916_v8 = vpop.permute.xlu0 %5915  ;;  %s14614_s24 = scalar_lea.hbm %s14669_s17, %s9050_s22 }
 0x763   : > { %v5914_v27 = vpop.permute.xlu1 %5913  ;;  %v5953_v30 = vadd.f32 %v5916_v8, %v5849_v19 }
 0x764   : > { %v5952_v63 = vadd.f32 %v5914_v27, %v5848_v10 }
 0x765   : > { %6178 = vperm.xlu1 %9645, %v6170_v16  }
 0x766   : > { %v6120_v39 = vpop.permute.xlu0 %6119 }
 0x767   : > { %v5814_v29 = vpop.permute.xlu1 %5813  ;;  %v6159_v42 = vadd.f32 %v6120_v39, %v6055_v0 }
 0x768   : > { %v5850_v25 = vadd.f32 %v5814_v29, %v5746_v33 }
 0x76a   : > { %v6020_v35 = vpop.permute.xlu0 %6019 }
 0x76b   : > { %v6018_v5 = vpop.permute.xlu1 %6017  ;;  %v6057_v61 = vadd.f32 %v6020_v35, %v5953_v30 }
 0x76c   : > { %v6056_v58 = vadd.f32 %v6018_v5, %v5952_v63  ;;  %v5435_v5 = vmul.f32 %v13715_v45, %v13799_v2  ;;  %v5437_v2 = vmul.f32 %v13715_v45, %v13838_v41 }
 0x76f   : > { %v5918_v47 = vpop.permute.xlu1 %5917  ;;  %v5504_v38 = vpop.permute.xlu0 %5503 }
 0x770   : > { %v5954_v53 = vadd.f32 %v5918_v47, %v5850_v25  ;;  %v5539_v15 = vadd.f32 %v5504_v38, %v5435_v5  ;;  %v5438_v47 = vmul.f32 %v13705_v32, %v13850_v14 }
 0x773   : > { %v6122_v52 = vpop.permute.xlu1 %6121 }
 0x774   : > { %v6160_v11 = vadd.f32 %v6122_v52, %v6056_v58  ;;  %v6124_v24 = vpop.permute.xlu0 %6123 }
 0x775   : > { %v6161_v55 = vadd.f32 %v6124_v24, %v6057_v61 }
 0x776   : > { %9288 = vmatprep.subr.mxu1 %v6160_v11 }
 0x777   : > { %9289 = vmatpush3.msra.mxu1 %v6160_v11  ;;  %v6022_v18 = vpop.permute.xlu1 %6021 }
 0x778   : > { %9290 = vmatprep.subr.mxu1 %v6159_v42  ;;  %v6058_v48 = vadd.f32 %v6022_v18, %v5954_v53  ;;  %v5608_v57 = vpop.permute.xlu0 %5607 }
 0x779   : > { %9291 = vmatpush3.msra.mxu1 %v6159_v42  ;;  %v5643_v10 = vadd.f32 %v5608_v57, %v5539_v15  ;;  %v6921_v15 = vld [vmem:[%s14666_s14 + $0x28] sm:$0xff] }
 0x77a   : > { %9293 = vmatmul.mubr.msk.f32.vlgmr.msra.gmra.mxu1 %vm6181_vm9, %v13757_v44 }
 0x77b   : > { %9299 = vmatprep.mubr.msk.f32.mxu1 %vm6181_vm9, %v13600_v46 }
 0x787   : > { %v5506_v31 = vpop.permute.xlu1 %5505 }
 0x788   : > { %v5540_v62 = vadd.f32 %v5506_v31, %v5436_v4 }
 0x78b   : > { %v6126_v36 = vpop.permute.xlu1 %6125 }
 0x78c   : > { %v6162_v6 = vadd.f32 %v6126_v36, %v6058_v48 }
 0x78e   : > { %9295 = vmatprep.subr.mxu1 %v6162_v6 }
 0x78f   : > { %9296 = vmatpush3.msra.mxu1 %v6162_v6  ;;  %v5610_v60 = vpop.permute.xlu1 %5609 }
 0x790   : > { %9297 = vmatprep.subr.mxu1 %v6161_v55  ;;  %v5644_v8 = vadd.f32 %v5610_v60, %v5540_v62 }
 0x791   : > { %9298 = vmatpush3.msra.mxu1 %v6161_v55 }
 0x792   : > { %9300 = vmatmul.mubr.msk.f32.vlgmr.msra.gmra.mxu1 %vm6181_vm9, %v13757_v44 }
 0x793   : > { %9306 = vmatprep.mubr.msk.f32.mxu1 %vm6181_vm9, %v13600_v46 }
 0x79b   : > { %v5508_v20 = vpop.permute.xlu0 %5507 }
 0x79c   : > { %v5541_v32 = vadd.f32 %v5508_v20, %v5437_v2 }
 0x79f   : > { %v5712_v54 = vpop.permute.xlu0 %5711 }
 0x7a0   : > { %v5747_v12 = vadd.f32 %v5712_v54, %v5643_v10  ;;  %v6920_v10 = vld [vmem:[%s14666_s14 + $0x20] sm:$0xff] }
 0x7a3   : > { %v5510_v9 = vpop.permute.xlu1 %5509 }
 0x7a4   : > { %v5612_v13 = vpop.permute.xlu0 %5611  ;;  %v5542_v58 = vadd.f32 %v5510_v9, %v5438_v47 }
 0x7a5   : > { %v5645_v33 = vadd.f32 %v5612_v13, %v5541_v32  ;;  %v6928_v13 = vld [vmem:[%s14666_s14 + $0x60] sm:$0xff] }
 0x7a6   : > { %v13966_v42 = vpop.f32.mrf.mxu1 }
 0x7a7   : > { %v5714_v50 = vpop.permute.xlu1 %5713 }
 0x7a8   : > { %v5816_v7 = vpop.permute.xlu0 %5815  ;;  %v5748_v40 = vadd.f32 %v5714_v50, %v5644_v8  ;;  %v6254_v34 = vpop.f32.mrf.mxu1 }
 0x7a9   : > { %v5851_v26 = vadd.f32 %v5816_v7, %v5747_v12  ;;  %v6919_v12 = vld [vmem:[%s14666_s14 + $0x18] sm:$0xff] }
 0x7ab   : > { %v5614_v51 = vpop.permute.xlu1 %5613 }
 0x7ac   : > { %v5716_v16 = vpop.permute.xlu0 %5715  ;;  %v5646_v0 = vadd.f32 %v5614_v51, %v5542_v58  ;;  %v6927_v51 = vld [vmem:[%s14666_s14 + $0x58] sm:$0xff] }
 0x7ad   : > { %v5749_v31 = vadd.f32 %v5716_v16, %v5645_v33  ;;  %v6926_v16 = vld [vmem:[%s14666_s14 + $0x50] sm:$0xff] }
 0x7af   : > { %v5818_v27 = vpop.permute.xlu1 %5817 }
 0x7b0   : > { %v5920_v17 = vpop.permute.xlu0 %5919  ;;  %v5852_v39 = vadd.f32 %v5818_v27, %v5748_v40  ;;  %v6925_v27 = vld [vmem:[%s14666_s14 + $0x48] sm:$0xff] }
 0x7b1   : > { %v5955_v49 = vadd.f32 %v5920_v17, %v5851_v26  ;;  %v6924_v17 = vld [vmem:[%s14666_s14 + $0x40] sm:$0xff] }
 0x7b3   : > { %v5718_v23 = vpop.permute.xlu1 %5717 }
 0x7b4   : > { %v5820_v29 = vpop.permute.xlu0 %5819  ;;  %v5750_v35 = vadd.f32 %v5718_v23, %v5646_v0  ;;  %v6917_v0 = vld [vmem:[%s14666_s14 + $0x8] sm:$0xff] }
 0x7b5   : > { %v5853_v53 = vadd.f32 %v5820_v29, %v5749_v31 }
 0x7b7   : > { %v5922_v37 = vpop.permute.xlu1 %5921 }
 0x7b8   : > { %v6024_v1 = vpop.permute.xlu0 %6023  ;;  %v5956_v11 = vadd.f32 %v5922_v37, %v5852_v39  ;;  %v6923_v37 = vld [vmem:[%s14666_s14 + $0x38] sm:$0xff] }
 0x7b9   : > { %v6059_v14 = vadd.f32 %v6024_v1, %v5955_v49 }
 0x7bb   : > { %v5822_v3 = vpop.permute.xlu1 %5821 }
 0x7bc   : > { %v5924_v63 = vpop.permute.xlu0 %5923  ;;  %v5854_v56 = vadd.f32 %v5822_v3, %v5750_v35  ;;  %v6922_v3 = vld [vmem:[%s14666_s14 + $0x30] sm:$0xff] }
 0x7bd   : > { %v5957_v24 = vadd.f32 %v5924_v63, %v5853_v53 }
 0x7bf   : > { %v6026_v59 = vpop.permute.xlu1 %6025 }
 0x7c0   : > { %v6060_v22 = vadd.f32 %v6026_v59, %v5956_v11  ;;  %v6128_v28 = vpop.permute.xlu0 %6127  ;;  %v6916_v11 = vld [vmem:[%s14666_s14] sm:$0xff] }
 0x7c1   : > { %v6163_v38 = vadd.f32 %v6128_v28, %v6059_v14 }
 0x7c3   : > { %v5926_v52 = vpop.permute.xlu1 %5925 }
 0x7c4   : > { %v5958_v21 = vadd.f32 %v5926_v52, %v5854_v56  ;;  %v6134_v45 = vpop.permute.xlu0 %6133  ;;  %v6918_v52 = vld [vmem:[%s14666_s14 + $0x10] sm:$0xff] }
 0x7c7   : > { %v6130_v43 = vpop.permute.xlu1 %6129  ;;  %v9273_v41 = vpop.f32.mrf.mxu1 }
 0x7c8   : > { %v6164_v18 = vadd.f32 %v6130_v43, %v6060_v22 }
 0x7c9   : > { %v6329_v61 = vpop.f32.mrf.mxu1 }
 0x7ca   : > { %9302 = vmatprep.subr.mxu1 %v6164_v18 }
 0x7cb   : > { %9303 = vmatpush3.msra.mxu1 %v6164_v18  ;;  %v6030_v25 = vpop.permute.xlu1 %6029 }
 0x7cc   : > { %v6062_v19 = vadd.f32 %v6030_v25, %v5958_v21  ;;  %9304 = vmatprep.subr.mxu1 %v6163_v38 }
 0x7cd   : > { %9305 = vmatpush3.msra.mxu1 %v6163_v38 }
 0x7ce   : > { %v6166_v30 = vadd.f32 %v6134_v45, %v6062_v19  ;;  %9307 = vmatmul.mubr.msk.f32.vlgmr.msra.gmra.mxu1 %vm6181_vm9, %v13757_v44 }
 0x7cf   : > { %v6028_v48 = vpop.permute.xlu1 %6027  ;;  %9313 = vmatprep.mubr.msk.f32.mxu1 %vm6181_vm9, %v13600_v46  ;;  %v6929_v46 = vld [vmem:[%s14666_s14 + $0x68] sm:$0xf] }
 0x7d0   : > { %9309 = vmatprep.subr.mxu1 %v6166_v30  ;;  %v6061_v6 = vadd.f32 %v6028_v48, %v5957_v24 }
 0x7d1   : > { %9310 = vmatpush3.msra.mxu1 %v6166_v30  ;;  %v13974_v36 = vpop.permute.xlu0 %6173 }
 0x7d2   : > { %v13977_v55 = vadd.f32 %v6254_v34, %v13974_v36  ;;  %v13980_v60 = vadd.f32 %v6329_v61, %v13974_v36 }
 0x7d3   : > { %v6132_v57 = vpop.permute.xlu1 %6131 }
 0x7d4   : > { %v6165_v20 = vadd.f32 %v6132_v57, %v6061_v6  ;;  %v6788_v54 = vand.u32 2147483647, %v13977_v55  ;;  %v6790_v50 = vand.u32 2147483647, %v13980_v60  ;;  %vm6852_vm15 = vcmp.ge.f32.partialorder %v13977_v55, 0.0 }
 0x7d5   : > { %vm6854_vm2 = vcmp.ge.f32.partialorder %v13980_v60, 0.0 }
 0x7d6   : > { %9311 = vmatprep.subr.mxu1 %v6165_v20  ;;  %v6804_v9 = vsub.f32 0.0, %v6788_v54 }
 0x7d7   : > { %9312 = vmatpush3.msra.mxu1 %v6165_v20 }
 0x7d8   : > { %9314 = vmatmul.mubr.msk.f32.vlgmr.msra.gmra.mxu1 %vm6181_vm9, %v13757_v44  ;;  %9316 = vmatprep.subr.msk.mxu1 %vm15009_vm0, %v6929_v46  ;;  %v6820_v7 = vmul.f32 1.442695, %v6804_v9  ;;  %v6806_v44 = vsub.f32 0.0, %v6790_v50 }
 0x7d9   : > { %9317 = vmatpush3.msk.msra.mxu1 %vm15010_vm14, %v6929_v46 }
 0x7da   : > { %9318 = vmatprep.subr.mxu1 %v6928_v13  ;;  %9751 = vpow2.f32 %v6820_v7  ;;  %v6824_v29 = vmul.f32 1.442695, %v6806_v44 }
 0x7db   : > { %9319 = vmatpush3.msra.mxu1 %v6928_v13 }
 0x7dc   : > { %9320 = vmatprep.subr.mxu1 %v6927_v51  ;;  %9753 = vpow2.f32 %v6824_v29 }
 0x7dd   : > { %9321 = vmatpush3.msra.mxu1 %v6927_v51 }
 0x7de   : > { %9322 = vmatprep.subr.mxu1 %v6926_v16 }
 0x7df   : > { %9323 = vmatpush3.msra.mxu1 %v6926_v16 }
 0x7e0   : > { %v14006_v23 = vpop.permute.xlu1 %6178  ;;  %9324 = vmatprep.subr.mxu1 %v6925_v27 }
 0x7e1   : > { %9325 = vmatpush3.msra.mxu1 %v6925_v27  ;;  %v6260_v4 = vadd.f32 %v13966_v42, %v14006_v23  ;;  %v14014_v1 = vadd.f32 %v9273_v41, %v14006_v23 }
 0x7e2   : > { %9326 = vmatprep.subr.mxu1 %v6924_v17 }
 0x7e3   : > { %9327 = vmatpush3.msra.mxu1 %v6924_v17  ;;  %v6789_v5 = vand.u32 2147483647, %v6260_v4  ;;  %v6791_v62 = vand.u32 2147483647, %v14014_v1  ;;  %vm6853_vm3 = vcmp.ge.f32.partialorder %v6260_v4, 0.0  ;;  %vm6855_vm4 = vcmp.ge.f32.partialorder %v14014_v1, 0.0 }
 0x7e4   : > { %9328 = vmatprep.subr.mxu1 %v6923_v37 }
 0x7e5   : > { %9329 = vmatpush3.msra.mxu1 %v6923_v37  ;;  %v6805_v8 = vsub.f32 0.0, %v6789_v5  ;;  %v6807_v59 = vsub.f32 0.0, %v6791_v62 }
 0x7e6   : > { %9330 = vmatprep.subr.mxu1 %v6922_v3 }
 0x7e7   : > { %9331 = vmatpush3.msra.mxu1 %v6922_v3  ;;  %v6822_v47 = vmul.f32 1.442695, %v6805_v8  ;;  %v6826_v40 = vmul.f32 1.442695, %v6807_v59  ;;  %v9752_v63 = vpop.eup %9751 }
 0x7e8   : > { %9332 = vmatprep.subr.mxu1 %v6921_v15  ;;  %v6868_v58 = vsub.f32 1.0, %v9752_v63  ;;  %v8983_v39 = vadd.f32 -1.0, %v9752_v63 }
 0x7e9   : > { %9333 = vmatpush3.msra.mxu1 %v6921_v15  ;;  %9755 = vpow2.f32 %v6822_v47  ;;  %v9754_v42 = vpop.eup %9753 }
 0x7ea   : > { %9334 = vmatprep.subr.mxu1 %v6920_v10  ;;  %9757 = vpow2.f32 %v6826_v40  ;;  %v6900_v26 = vsel %vm6852_vm15, %v6868_v58, %v8983_v39  ;;  %v6870_v35 = vsub.f32 1.0, %v9754_v42  ;;  %v8985_v22 = vadd.f32 -1.0, %v9754_v42 }
 0x7eb   : > { %9335 = vmatpush3.msra.mxu1 %v6920_v10  ;;  %9344 = vmatprep.mubr.msk.f32.mxu1 %vm6930_vm1, %v6900_v26 }
 0x7ec   : > { %9336 = vmatprep.subr.mxu1 %v6919_v12  ;;  %v6902_v21 = vsel %vm6854_vm2, %v6870_v35, %v8985_v22 }
 0x7ed   : > { %9337 = vmatpush3.msra.mxu1 %v6919_v12 }
 0x7ee   : > { %9338 = vmatprep.subr.mxu1 %v6918_v52 }
 0x7ef   : > { %9339 = vmatpush3.msra.mxu1 %v6918_v52 }
 0x7f0   : > { %9340 = vmatprep.subr.mxu1 %v6917_v0 }
 0x7f1   : > { %9341 = vmatpush3.msra.mxu1 %v6917_v0 }
 0x7f2   : > { %9342 = vmatprep.subr.mxu1 %v6916_v11 }
 0x7f3   : > { %v9280_v2 = vpop.f32.mrf.mxu1  ;;  %9343 = vmatpush3.msra.mxu1 %v6916_v11 }
 0x7f4   : > { %v6410_v49 = vadd.f32 %v9280_v2, %v14006_v23 }
 0x7f5   : > { %v6404_v28 = vpop.f32.mrf.mxu1 }
 0x7f6   : > { %v9756_v43 = vpop.eup %9755  ;;  %v6793_v32 = vand.u32 2147483647, %v6410_v49  ;;  %v6405_v14 = vadd.f32 %v6404_v28, %v13974_v36  ;;  %vm6857_vm6 = vcmp.ge.f32.partialorder %v6410_v49, 0.0 }
 0x7f7   : > { %v9758_v56 = vpop.eup %9757  ;;  %v6869_v18 = vsub.f32 1.0, %v9756_v43  ;;  %v8984_v34 = vadd.f32 -1.0, %v9756_v43 }
 0x7f8   : > { %v6809_v33 = vsub.f32 0.0, %v6793_v32  ;;  %v6792_v38 = vand.u32 2147483647, %v6405_v14  ;;  %v6871_v31 = vsub.f32 1.0, %v9758_v56  ;;  %v8986_v19 = vadd.f32 -1.0, %v9758_v56 }
 0x7f9   : > { %v6901_v25 = vsel %vm6853_vm3, %v6869_v18, %v8984_v34  ;;  %vm6856_vm5 = vcmp.ge.f32.partialorder %v6405_v14, 0.0 }
 0x7fa   : > { %v6830_v45 = vmul.f32 1.442695, %v6809_v33  ;;  %v6808_v41 = vsub.f32 0.0, %v6792_v38  ;;  %9345 = vmatmul.mubr.msk.f32.vlgmr.msra.gmra.mxu1 %vm6930_vm1, %v6901_v25  ;;  %v6903_v30 = vsel %vm6855_vm4, %v6871_v31, %v8986_v19 }
 0x7fb   : > { %9347 = vmatprep.mubr.msk.f32.mxu1 %vm6930_vm1, %v6902_v21 }
 0x7fc   : > { %9759 = vpow2.f32 %v6830_v45  ;;  %v6828_v53 = vmul.f32 1.442695, %v6808_v41 }
 0x7fe   : > { %9761 = vpow2.f32 %v6828_v53  ;;  %9348 = vmatmul.mubr.msk.f32.gmra.mxu1 %vm6930_vm1, %v6903_v30 }
 0x7ff   : > { %v9287_v48 = vpop.f32.mrf.mxu1 }
 0x800   : > { %v6485_v24 = vadd.f32 %v9287_v48, %v14006_v23 }
 0x801   : > { %v6479_v61 = vpop.f32.mrf.mxu1 }
 0x802   : > { %v6795_v6 = vand.u32 2147483647, %v6485_v24  ;;  %v6480_v55 = vadd.f32 %v6479_v61, %v13974_v36  ;;  %vm6859_vm8 = vcmp.ge.f32.partialorder %v6485_v24, 0.0 }
 0x804   : > { %v6811_v57 = vsub.f32 0.0, %v6795_v6  ;;  %v6794_v20 = vand.u32 2147483647, %v6480_v55  ;;  %vm6858_vm7 = vcmp.ge.f32.partialorder %v6480_v55, 0.0 }
 0x806   : > { %v6834_v60 = vmul.f32 1.442695, %v6811_v57  ;;  %v6810_v54 = vsub.f32 0.0, %v6794_v20 }
 0x808   : > { %9763 = vpow2.f32 %v6834_v60  ;;  %v6832_v46 = vmul.f32 1.442695, %v6810_v54 }
 0x809   : > { %v9760_v9 = vpop.eup %9759 }
 0x80a   : > { %9765 = vpow2.f32 %v6832_v46  ;;  %v6873_v50 = vsub.f32 1.0, %v9760_v9  ;;  %v8988_v7 = vadd.f32 -1.0, %v9760_v9 }
 0x80b   : > { %v9762_v13 = vpop.eup %9761 }
 0x80c   : > { %v6872_v51 = vsub.f32 1.0, %v9762_v13  ;;  %v8987_v16 = vadd.f32 -1.0, %v9762_v13  ;;  %v6905_v27 = vsel %vm6857_vm6, %v6873_v50, %v8988_v7  ;;  %vm7301_vm6 = vcmask 523264  }
 0x80e   : > { %v6904_v44 = vsel %vm6856_vm5, %v6872_v51, %v8987_v16 }
 0x80f   : > { %9350 = vmatprep.mubr.msk.f32.mxu1 %vm6930_vm1, %v6904_v44 }
 0x810   : > { %9351 = vmatmul.mubr.msk.f32.gmra.mxu1 %vm6930_vm1, %v6905_v27 }
 0x815   : > { %v9764_v17 = vpop.eup %9763 }
 0x816   : > { %v6875_v37 = vsub.f32 1.0, %v9764_v17  ;;  %v8990_v4 = vadd.f32 -1.0, %v9764_v17 }
 0x817   : > { %v9766_v29 = vpop.eup %9765 }
 0x818   : > { %v6874_v1 = vsub.f32 1.0, %v9766_v29  ;;  %v8989_v3 = vadd.f32 -1.0, %v9766_v29  ;;  %v6907_v62 = vsel %vm6859_vm8, %v6875_v37, %v8990_v4 }
 0x81a   : > { %v6906_v5 = vsel %vm6858_vm7, %v6874_v1, %v8989_v3  ;;  %vm8054_vm7 = vcmask 195584  }
 0x81b   : > { %9353 = vmatprep.mubr.msk.f32.mxu1 %vm6930_vm1, %v6906_v5 }
 0x81c   : > { %9354 = vmatmul.mubr.msk.f32.gmra.mxu1 %vm6930_vm1, %v6907_v62 }
 0x83a   : > { %v9294_v15 = vpop.f32.mrf.mxu1 }
 0x83b   : > { %v6560_v8 = vadd.f32 %v9294_v15, %v14006_v23 }
 0x83c   : > { %v6554_v59 = vpop.f32.mrf.mxu1 }
 0x83d   : > { %v6797_v10 = vand.u32 2147483647, %v6560_v8  ;;  %v6555_v47 = vadd.f32 %v6554_v59, %v13974_v36  ;;  %vm6861_vm0 = vcmp.ge.f32.partialorder %v6560_v8, 0.0 }
 0x83f   : > { %v6813_v40 = vsub.f32 0.0, %v6797_v10  ;;  %v6796_v63 = vand.u32 2147483647, %v6555_v47  ;;  %vm6860_vm9 = vcmp.ge.f32.partialorder %v6555_v47, 0.0 }
 0x841   : > { %v6838_v12 = vmul.f32 1.442695, %v6813_v40  ;;  %v6812_v58 = vsub.f32 0.0, %v6796_v63 }
 0x843   : > { %9767 = vpow2.f32 %v6838_v12  ;;  %v6836_v39 = vmul.f32 1.442695, %v6812_v58 }
 0x845   : > { %9769 = vpow2.f32 %v6836_v39 }
 0x850   : > { %v9768_v52 = vpop.eup %9767 }
 0x851   : > { %v6877_v11 = vsub.f32 1.0, %v9768_v52  ;;  %v8992_v42 = vadd.f32 -1.0, %v9768_v52  ;;  %v14077_v52 = vld [vmem:[#allocation7] sm:$0xff] }
 0x852   : > { %v9770_v26 = vpop.eup %9769  ;;  %v9301_v0 = vpop.f32.mrf.mxu1  ;;  %9422 = vmatprep.mubr.msk.f32.mxu0 %vm7301_vm6, %v14077_v52 }
 0x853   : > { %v6635_v2 = vadd.f32 %v9301_v0, %v14006_v23  ;;  %v6876_v49 = vsub.f32 1.0, %v9770_v26  ;;  %v8991_v35 = vadd.f32 -1.0, %v9770_v26  ;;  %v6909_v14 = vsel %vm6861_vm0, %v6877_v11, %v8992_v42 }
 0x854   : > { %v6629_v22 = vpop.f32.mrf.mxu1 }
 0x855   : > { %v6799_v28 = vand.u32 2147483647, %v6635_v2  ;;  %v6630_v43 = vadd.f32 %v6629_v22, %v13974_v36  ;;  %v6908_v32 = vsel %vm6860_vm9, %v6876_v49, %v8991_v35  ;;  %vm6863_vm15 = vcmp.ge.f32.partialorder %v6635_v2, 0.0 }
 0x856   : > { %9356 = vmatprep.mubr.msk.f32.mxu1 %vm6930_vm1, %v6908_v32 }
 0x857   : > { %v6815_v56 = vsub.f32 0.0, %v6799_v28  ;;  %v6798_v18 = vand.u32 2147483647, %v6630_v43  ;;  %9357 = vmatmul.mubr.msk.f32.gmra.mxu1 %vm6930_vm1, %v6909_v14  ;;  %vm6862_vm14 = vcmp.ge.f32.partialorder %v6630_v43, 0.0 }
 0x859   : > { %v6842_v34 = vmul.f32 1.442695, %v6815_v56  ;;  %v6814_v33 = vsub.f32 0.0, %v6798_v18 }
 0x85b   : > { %9771 = vpow2.f32 %v6842_v34  ;;  %v6840_v38 = vmul.f32 1.442695, %v6814_v33 }
 0x85d   : > { %9773 = vpow2.f32 %v6840_v38 }
 0x868   : > { %v9772_v21 = vpop.eup %9771 }
 0x869   : > { %v6879_v31 = vsub.f32 1.0, %v9772_v21  ;;  %v8994_v19 = vadd.f32 -1.0, %v9772_v21 }
 0x86a   : > { %v9774_v25 = vpop.eup %9773 }
 0x86b   : > { %v6878_v45 = vsub.f32 1.0, %v9774_v25  ;;  %v8993_v41 = vadd.f32 -1.0, %v9774_v25  ;;  %v6911_v30 = vsel %vm6863_vm15, %v6879_v31, %v8994_v19  ;;  %v14167_v25 = vld [vmem:[#allocation7 + $0x8] sm:$0xff] }
 0x86d   : > { %v6910_v53 = vsel %vm6862_vm14, %v6878_v45, %v8993_v41 }
 0x86e   : > { %9359 = vmatprep.mubr.msk.f32.mxu1 %vm6930_vm1, %v6910_v53 }
 0x86f   : > { %9360 = vmatmul.mubr.msk.f32.gmra.mxu1 %vm6930_vm1, %v6911_v30 }
 0x88e   : > { %v9308_v48 = vpop.f32.mrf.mxu1 }
 0x88f   : > { %v6710_v24 = vadd.f32 %v9308_v48, %v14006_v23 }
 0x890   : > { %v6704_v61 = vpop.f32.mrf.mxu1 }
 0x891   : > { %v6801_v6 = vand.u32 2147483647, %v6710_v24  ;;  %v6705_v55 = vadd.f32 %v6704_v61, %v13974_v36  ;;  %vm6865_vm3 = vcmp.ge.f32.partialorder %v6710_v24, 0.0 }
 0x893   : > { %v6817_v57 = vsub.f32 0.0, %v6801_v6  ;;  %v6800_v20 = vand.u32 2147483647, %v6705_v55  ;;  %vm6864_vm2 = vcmp.ge.f32.partialorder %v6705_v55, 0.0 }
 0x895   : > { %v6846_v60 = vmul.f32 1.442695, %v6817_v57  ;;  %v6816_v54 = vsub.f32 0.0, %v6800_v20 }
 0x897   : > { %9775 = vpow2.f32 %v6846_v60  ;;  %v6844_v46 = vmul.f32 1.442695, %v6816_v54 }
 0x898   : > { %v9315_v9 = vpop.f32.mrf.mxu1 }
 0x899   : > { %9777 = vpow2.f32 %v6844_v46  ;;  %v6785_v13 = vadd.f32 %v9315_v9, %v14006_v23 }
 0x89a   : > { %v6779_v50 = vpop.f32.mrf.mxu1 }
 0x89b   : > { %v6803_v7 = vand.u32 2147483647, %v6785_v13  ;;  %v6780_v51 = vadd.f32 %v6779_v50, %v13974_v36  ;;  %vm6867_vm5 = vcmp.ge.f32.partialorder %v6785_v13, 0.0 }
 0x89d   : > { %v6819_v16 = vsub.f32 0.0, %v6803_v7  ;;  %v6802_v44 = vand.u32 2147483647, %v6780_v51  ;;  %vm6866_vm4 = vcmp.ge.f32.partialorder %v6780_v51, 0.0  ;;  %v7289_v51 = vld [vmem:[%s14664_s12] sm:$0xff] }
 0x89f   : > { %v6850_v27 = vmul.f32 1.442695, %v6819_v16  ;;  %v6818_v17 = vsub.f32 0.0, %v6802_v44  ;;  %v7290_v44 = vld [vmem:[%s14664_s12 + $0x8] sm:$0xff] }
 0x8a1   : > { %9779 = vpow2.f32 %v6850_v27  ;;  %v6848_v29 = vmul.f32 1.442695, %v6818_v17 }
 0x8a3   : > { %9781 = vpow2.f32 %v6848_v29 }
 0x8a4   : > { %v9776_v37 = vpop.eup %9775 }
 0x8a5   : > { %v6881_v1 = vsub.f32 1.0, %v9776_v37  ;;  %v8996_v3 = vadd.f32 -1.0, %v9776_v37 }
 0x8a6   : > { %v9778_v4 = vpop.eup %9777 }
 0x8a7   : > { %v6880_v5 = vsub.f32 1.0, %v9778_v4  ;;  %v8995_v62 = vadd.f32 -1.0, %v9778_v4  ;;  %v6913_v15 = vsel %vm6865_vm3, %v6881_v1, %v8996_v3 }
 0x8a9   : > { %v6912_v23 = vsel %vm6864_vm2, %v6880_v5, %v8995_v62 }
 0x8aa   : > { %9362 = vmatprep.mubr.msk.f32.mxu1 %vm6930_vm1, %v6912_v23 }
 0x8ab   : > { %9363 = vmatmul.mubr.msk.f32.gmra.mxu1 %vm6930_vm1, %v6913_v15 }
 0x8ae   : > { %v9780_v36 = vpop.eup %9779 }
 0x8af   : > { %v6883_v59 = vsub.f32 1.0, %v9780_v36  ;;  %v8998_v10 = vadd.f32 -1.0, %v9780_v36 }
 0x8b0   : > { %v9782_v8 = vpop.eup %9781 }
 0x8b1   : > { %v6882_v47 = vsub.f32 1.0, %v9782_v8  ;;  %v8997_v40 = vadd.f32 -1.0, %v9782_v8  ;;  %v6915_v12 = vsel %vm6867_vm5, %v6883_v59, %v8998_v10 }
 0x8b3   : > { %v6914_v63 = vsel %vm6866_vm4, %v6882_v47, %v8997_v40 }
 0x8b4   : > { %9365 = vmatprep.mubr.msk.f32.mxu1 %vm6930_vm1, %v6914_v63 }
 0x8b5   : > { %9366 = vmatmul.mubr.msk.f32.gmra.mxu1 %vm6930_vm1, %v6915_v12 }
 0x8b6   : > { %9384 = vmatprep.mubr.msk.f32.mxu1 %vm7301_vm6, %v14077_v52 }
 0x8ba   : > { %v14069_v58 = vpop.f32.mrf.mxu1 }
 0x8bb   : > { %7241 = vrot.lane.b32.xlu1 %v14069_v58, %s14896_s26 }
 0x8bc   : > { %v14073_v39 = vpop.f32.mrf.mxu1 }
 0x8bd   : > { %7239 = vrot.lane.b32.xlu0 %v14073_v39, %s14896_s26 }
 0x8be   : > { %v14089_v26 = vpop.f32.mrf.mxu1 }
 0x8bf   : > { %7193 = vrot.lane.b32.xlu1 %v14069_v58, %s10034_s27 }
 0x8c0   : > { %v14095_v0 = vpop.f32.mrf.mxu1 }
 0x8c1   : > { %7191 = vrot.lane.b32.xlu0 %v14073_v39, %s10034_s27 }
 0x8c3   : > { %7145 = vrot.lane.b32.xlu1 %v14069_v58, %s10035_s23 }
 0x8c5   : > { %7143 = vrot.lane.b32.xlu0 %v14073_v39, %s10035_s23 }
 0x8c7   : > { %7245 = vrot.lane.b32.xlu1 %v14089_v26, %s14896_s26 }
 0x8c9   : > { %7243 = vrot.lane.b32.xlu0 %v14095_v0, %s14896_s26 }
 0x8cb   : > { %7197 = vrot.lane.b32.xlu1 %v14089_v26, %s10034_s27 }
 0x8cd   : > { %7195 = vrot.lane.b32.xlu0 %v14095_v0, %s10034_s27 }
 0x8cf   : > { %7149 = vrot.lane.b32.xlu1 %v14089_v26, %s10035_s23 }
 0x8d0   : > { %v14107_v11 = vpop.f32.mrf.mxu1 }
 0x8d1   : > { %7147 = vrot.lane.b32.xlu0 %v14095_v0, %s10035_s23 }
 0x8d2   : > { %v14113_v42 = vpop.f32.mrf.mxu1 }
 0x8d3   : > { %7249 = vrot.lane.b32.xlu1 %v14107_v11, %s14896_s26 }
 0x8d7   : > { %7201 = vrot.lane.b32.xlu1 %v14107_v11, %s10034_s27 }
 0x8db   : > { %7153 = vrot.lane.b32.xlu1 %v14107_v11, %s10035_s23 }
 0x8dc   : > { %v14117_v2 = vpop.f32.mrf.mxu1 }
 0x8dd   : > { %7253 = vrot.lane.b32.xlu0 %v14117_v2, %s14896_s26 }
 0x8de   : > { %v14131_v49 = vpop.f32.mrf.mxu1 }
 0x8df   : > { %7247 = vrot.lane.b32.xlu1 %v14113_v42, %s14896_s26 }
 0x8e1   : > { %7205 = vrot.lane.b32.xlu0 %v14117_v2, %s10034_s27 }
 0x8e3   : > { %7199 = vrot.lane.b32.xlu1 %v14113_v42, %s10034_s27 }
 0x8e5   : > { %7157 = vrot.lane.b32.xlu0 %v14117_v2, %s10035_s23 }
 0x8e7   : > { %7151 = vrot.lane.b32.xlu1 %v14113_v42, %s10035_s23 }
 0x8e9   : > { %7251 = vrot.lane.b32.xlu0 %v14131_v49, %s14896_s26 }
 0x8ed   : > { %7203 = vrot.lane.b32.xlu0 %v14131_v49, %s10034_s27 }
 0x8f1   : > { %7155 = vrot.lane.b32.xlu0 %v14131_v49, %s10035_s23 }
 0x917   : > { %v14139_v35 = vpop.f32.mrf.mxu1 }
 0x918   : > { %7257 = vrot.lane.b32.xlu1 %v14139_v35, %s14896_s26 }
 0x919   : > { %v14147_v22 = vpop.f32.mrf.mxu1 }
 0x91c   : > { %7209 = vrot.lane.b32.xlu1 %v14139_v35, %s10034_s27 }
 0x920   : > { %7161 = vrot.lane.b32.xlu1 %v14139_v35, %s10035_s23 }
 0x924   : > { %7255 = vrot.lane.b32.xlu1 %v14147_v22, %s14896_s26 }
 0x928   : > { %7207 = vrot.lane.b32.xlu1 %v14147_v22, %s10034_s27 }
 0x92c   : > { %7159 = vrot.lane.b32.xlu1 %v14147_v22, %s10035_s23 }
 0x92d   : > { %v7242_v28 = vpop.permute.xlu1 %7241 }
 0x92e   : > { %9368 = vmatprep.subr.mxu1 %v7242_v28 }
 0x92f   : > { %9369 = vmatpush3.msra.mxu1 %v7242_v28  ;;  %v7240_v43 = vpop.permute.xlu0 %7239  ;;  %v14155_v32 = vpop.f32.mrf.mxu1 }
 0x930   : > { %9370 = vmatprep.subr.mxu1 %v7240_v43  ;;  %7261 = vrot.lane.b32.xlu0 %v14155_v32, %s14896_s26 }
 0x931   : > { %v7194_v14 = vpop.permute.xlu1 %7193  ;;  %9371 = vmatpush3.msra.mxu1 %v7240_v43  ;;  %v14164_v38 = vpop.f32.mrf.mxu1 }
 0x932   : > { %9372 = vmatprep.subr.mxu1 %v7194_v14 }
 0x933   : > { %9373 = vmatpush3.msra.mxu1 %v7194_v14  ;;  %v7192_v56 = vpop.permute.xlu0 %7191 }
 0x934   : > { %9374 = vmatprep.subr.mxu1 %v7192_v56  ;;  %7213 = vrot.lane.b32.xlu0 %v14155_v32, %s10034_s27 }
 0x935   : > { %v7146_v18 = vpop.permute.xlu1 %7145  ;;  %9375 = vmatpush3.msra.mxu1 %v7192_v56 }
 0x936   : > { %9376 = vmatprep.subr.mxu1 %v7146_v18 }
 0x937   : > { %9377 = vmatpush3.msra.mxu1 %v7146_v18  ;;  %v7144_v34 = vpop.permute.xlu0 %7143 }
 0x938   : > { %9378 = vmatprep.subr.mxu1 %v7144_v34  ;;  %7165 = vrot.lane.b32.xlu0 %v14155_v32, %s10035_s23 }
 0x939   : > { %9379 = vmatpush3.msra.mxu1 %v7144_v34  ;;  %v7246_v33 = vpop.permute.xlu1 %7245 }
 0x93a   : > { %9380 = vmatprep.subr.mxu1 %v14069_v58 }
 0x93b   : > { %9381 = vmatpush3.msra.mxu1 %v14069_v58  ;;  %v7244_v21 = vpop.permute.xlu0 %7243 }
 0x93c   : > { %9382 = vmatprep.subr.mxu1 %v14073_v39  ;;  %7259 = vrot.lane.b32.xlu0 %v14164_v38, %s14896_s26 }
 0x93d   : > { %9383 = vmatpush3.msra.mxu1 %v14073_v39  ;;  %v7198_v31 = vpop.permute.xlu1 %7197 }
 0x93e   : > { %9385 = vmatmul.mubr.msk.f32.vlgmr.msra.gmra.mxu1 %vm7301_vm6, %v14167_v25  ;;  %9387 = vmatprep.subr.mxu1 %v7246_v33 }
 0x93f   : > { %9388 = vmatpush3.msra.mxu1 %v7246_v33  ;;  %9403 = vmatprep.mubr.msk.f32.mxu1 %vm7301_vm6, %v14077_v52  ;;  %v7196_v19 = vpop.permute.xlu0 %7195 }
 0x940   : > { %7211 = vrot.lane.b32.xlu0 %v14164_v38, %s10034_s27  ;;  %9389 = vmatprep.subr.mxu1 %v7244_v21 }
 0x941   : > { %v7150_v45 = vpop.permute.xlu1 %7149  ;;  %9390 = vmatpush3.msra.mxu1 %v7244_v21 }
 0x942   : > { %9391 = vmatprep.subr.mxu1 %v7198_v31 }
 0x943   : > { %9392 = vmatpush3.msra.mxu1 %v7198_v31  ;;  %v7148_v53 = vpop.permute.xlu0 %7147 }
 0x944   : > { %7163 = vrot.lane.b32.xlu0 %v14164_v38, %s10035_s23  ;;  %9393 = vmatprep.subr.mxu1 %v7196_v19 }
 0x945   : > { %v7250_v41 = vpop.permute.xlu1 %7249  ;;  %9394 = vmatpush3.msra.mxu1 %v7196_v19 }
 0x946   : > { %9395 = vmatprep.subr.mxu1 %v7150_v45  ;;  %9406 = vmatprep.subr.mxu0 %v7250_v41 }
 0x947   : > { %9396 = vmatpush3.msra.mxu1 %v7150_v45  ;;  %9407 = vmatpush3.msra.mxu0 %v7250_v41 }
 0x948   : > { %9397 = vmatprep.subr.mxu1 %v7148_v53 }
 0x949   : > { %v7202_v30 = vpop.permute.xlu1 %7201  ;;  %9398 = vmatpush3.msra.mxu1 %v7148_v53 }
 0x94a   : > { %9399 = vmatprep.subr.mxu1 %v14089_v26 }
 0x94b   : > { %9400 = vmatpush3.msra.mxu1 %v14089_v26 }
 0x94c   : > { %9401 = vmatprep.subr.mxu1 %v14095_v0 }
 0x94d   : > { %v7154_v48 = vpop.permute.xlu1 %7153  ;;  %9402 = vmatpush3.msra.mxu1 %v14095_v0 }
 0x94e   : > { %9404 = vmatmul.mubr.msk.f32.vlgmr.msra.gmra.mxu1 %vm7301_vm6, %v14167_v25 }
 0x94f   : > { %v7254_v24 = vpop.permute.xlu0 %7253  ;;  %9441 = vmatprep.mubr.msk.f32.mxu1 %vm7301_vm6, %v14077_v52 }
 0x950   : > { %9425 = vmatprep.subr.mxu1 %v7254_v24 }
 0x951   : > { %v7248_v61 = vpop.permute.xlu1 %7247  ;;  %9426 = vmatpush3.msra.mxu1 %v7254_v24  ;;  %v14282_v24 = vld [vmem:[#allocation8] sm:$0xff] }
 0x952   : > { %9408 = vmatprep.subr.mxu0 %v7248_v61 }
 0x953   : > { %9409 = vmatpush3.msra.mxu0 %v7248_v61  ;;  %v7206_v6 = vpop.permute.xlu0 %7205 }
 0x954   : > { %9410 = vmatprep.subr.mxu0 %v7202_v30 }
 0x955   : > { %9411 = vmatpush3.msra.mxu0 %v7202_v30  ;;  %v7200_v55 = vpop.permute.xlu1 %7199 }
 0x956   : > { %9412 = vmatprep.subr.mxu0 %v7200_v55 }
 0x957   : > { %9413 = vmatpush3.msra.mxu0 %v7200_v55  ;;  %v7158_v57 = vpop.permute.xlu0 %7157 }
 0x958   : > { %9414 = vmatprep.subr.mxu0 %v7154_v48 }
 0x959   : > { %9415 = vmatpush3.msra.mxu0 %v7154_v48  ;;  %v7152_v20 = vpop.permute.xlu1 %7151 }
 0x95a   : > { %9416 = vmatprep.subr.mxu0 %v7152_v20 }
 0x95b   : > { %9417 = vmatpush3.msra.mxu0 %v7152_v20  ;;  %v7252_v60 = vpop.permute.xlu0 %7251 }
 0x95c   : > { %9418 = vmatprep.subr.mxu0 %v14107_v11  ;;  %9427 = vmatprep.subr.mxu1 %v7252_v60 }
 0x95d   : > { %9419 = vmatpush3.msra.mxu0 %v14107_v11  ;;  %9428 = vmatpush3.msra.mxu1 %v7252_v60  ;;  %v14289_v60 = vld [vmem:[#allocation8 + $0x20] sm:$0xff] }
 0x95e   : > { %9420 = vmatprep.subr.mxu0 %v14113_v42  ;;  %9429 = vmatprep.subr.mxu1 %v7206_v6 }
 0x95f   : > { %9421 = vmatpush3.msra.mxu0 %v14113_v42  ;;  %v7204_v54 = vpop.permute.xlu0 %7203  ;;  %9430 = vmatpush3.msra.mxu1 %v7206_v6  ;;  %v14284_v6 = vld [vmem:[#allocation8 + $0x10] sm:$0xff] }
 0x960   : > { %9423 = vmatmul.mubr.msk.f32.vlgmr.msra.gmra.mxu0 %vm7301_vm6, %v14167_v25  ;;  %9431 = vmatprep.subr.mxu1 %v7204_v54 }
 0x961   : > { %9432 = vmatpush3.msra.mxu1 %v7204_v54  ;;  %9460 = vmatprep.mubr.msk.f32.mxu0 %vm7301_vm6, %v14077_v52 }
 0x962   : > { %9433 = vmatprep.subr.mxu1 %v7158_v57 }
 0x963   : > { %v7156_v46 = vpop.permute.xlu0 %7155  ;;  %9434 = vmatpush3.msra.mxu1 %v7158_v57 }
 0x964   : > { %9435 = vmatprep.subr.mxu1 %v7156_v46 }
 0x965   : > { %9436 = vmatpush3.msra.mxu1 %v7156_v46 }
 0x966   : > { %9437 = vmatprep.subr.mxu1 %v14117_v2 }
 0x967   : > { %9438 = vmatpush3.msra.mxu1 %v14117_v2 }
 0x968   : > { %9439 = vmatprep.subr.mxu1 %v14131_v49 }
 0x969   : > { %9440 = vmatpush3.msra.mxu1 %v14131_v49 }
 0x96a   : > { %9442 = vmatmul.mubr.msk.f32.vlgmr.msra.gmra.mxu1 %vm7301_vm6, %v14167_v25 }
 0x96b   : > { %v14203_v9 = vpop.f32.mrf.mxu1  ;;  %9479 = vmatprep.mubr.msk.f32.mxu1 %vm7301_vm6, %v14077_v52 }
 0x96c   : > { %7265 = vrot.lane.b32.xlu1 %v14203_v9, %s14896_s26 }
 0x96d   : > { %v14211_v13 = vpop.f32.mrf.mxu1 }
 0x970   : > { %7217 = vrot.lane.b32.xlu1 %v14203_v9, %s10034_s27 }
 0x974   : > { %7169 = vrot.lane.b32.xlu1 %v14203_v9, %s10035_s23 }
 0x975   : > { %v14215_v50 = vpop.f32.mrf.mxu1 }
 0x976   : > { %7269 = vrot.lane.b32.xlu0 %v14215_v50, %s14896_s26 }
 0x977   : > { %v14229_v7 = vpop.f32.mrf.mxu1 }
 0x978   : > { %7263 = vrot.lane.b32.xlu1 %v14211_v13, %s14896_s26 }
 0x97a   : > { %7221 = vrot.lane.b32.xlu0 %v14215_v50, %s10034_s27 }
 0x97c   : > { %7215 = vrot.lane.b32.xlu1 %v14211_v13, %s10034_s27 }
 0x97e   : > { %7173 = vrot.lane.b32.xlu0 %v14215_v50, %s10035_s23 }
 0x980   : > { %7167 = vrot.lane.b32.xlu1 %v14211_v13, %s10035_s23 }
 0x982   : > { %7267 = vrot.lane.b32.xlu0 %v14229_v7, %s14896_s26  ;;  %s599_s26 = sand.u32 1, %s10018_s25  }
 0x983   : > { %s14600_s0 = sshll.u32 %s599_s26, 3  ;;  %s8724_s28 = scalar_lea.sflag [#allocation4], %s599_s26 }
 0x984   : > { %7293 = vperm.xlu1 %9645, %v7289_v51   ;;  %v14293_v51 = vld [vmem:[#allocation8 + $0x8] sm:$0xff]  ;;  %s601_s21 = scalar_lea.vmem [#allocation10], %s14600_s0 }
 0x985   : > { %s8737_s18 = sshll.u32 %s601_s21, 4  ;;  %s8738_s18 = int_to_ptr.vmem [resolvable:$true] %s8737_s18 }
 0x986   : > { %7219 = vrot.lane.b32.xlu0 %v14229_v7, %s10034_s27  ;;  %s9954_s29 = scalar_lea.vmem %s8738_s18, 128  ;;  %s10050_s27 = smov [#allocation10]  }
 0x987   : > { %p9955_p9 = scmp.ne.s32.totalorder %s8738_s18, %s9954_s29 }
 0x989   : > { %p9956_p5 = pnand %p9955_p9, %p15011_p6 }
 0x98a   : > { %v7258_v16 = vpop.permute.xlu1 %7257  ;;  %7171 = vrot.lane.b32.xlu0 %v14229_v7, %s10035_s23  ;;  %s9958_s23 = sshll.u32 %s10050_s27, 4  ;;  %s9959_s23 = int_to_ptr.vmem [resolvable:$false] %s9958_s23 }
 0x98b   : > { %9444 = vmatprep.subr.mxu0 %v7258_v16  ;;  %p9957_p1 = pneg %p9956_p5  ;;  %s9960_s0 = scalar_lea.vmem %s9959_s23, 256 }
 0x98c   : > { %9445 = vmatpush3.msra.mxu0 %v7258_v16  ;;  %p9961_p3 = scmp.lt.s32.totalorder %s8738_s18, %s9959_s23  ;;  %p9962_p4 = scmp.lt.s32.totalorder %s9960_s0, %s9954_s29 }
 0x98e   : > { %v7210_v27 = vpop.permute.xlu1 %7209  ;;  %7298 = vperm.xlu0 %9646, %v7290_v44   ;;  %v14298_v44 = vld [vmem:[#allocation8 + $0x30] sm:$0xff]  ;;  %p9963_p7 = por %p9962_p4, %p9961_p3 }
 0x990   : > { %p9964_p13 = pnand %p9963_p7, %p9957_p1 }
 0x992   : > { %v7162_v17 = vpop.permute.xlu1 %7161 }
 0x996   : > { %v7256_v29 = vpop.permute.xlu1 %7255 }
 0x997   : > { %9446 = vmatprep.subr.mxu0 %v7256_v29 }
 0x998   : > { %9447 = vmatpush3.msra.mxu0 %v7256_v29 }
 0x999   : > { %9448 = vmatprep.subr.mxu0 %v7210_v27 }
 0x99a   : > { %9449 = vmatpush3.msra.mxu0 %v7210_v27  ;;  %v7208_v37 = vpop.permute.xlu1 %7207 }
 0x99b   : > { %9450 = vmatprep.subr.mxu0 %v7208_v37 }
 0x99c   : > { %9451 = vmatpush3.msra.mxu0 %v7208_v37 }
 0x99d   : > { %9452 = vmatprep.subr.mxu0 %v7162_v17 }
 0x99e   : > { %9453 = vmatpush3.msra.mxu0 %v7162_v17  ;;  %v7160_v4 = vpop.permute.xlu1 %7159 }
 0x99f   : > { %9454 = vmatprep.subr.mxu0 %v7160_v4 }
 0x9a0   : > { %9455 = vmatpush3.msra.mxu0 %v7160_v4 }
 0x9a1   : > { %9456 = vmatprep.subr.mxu0 %v14139_v35 }
 0x9a2   : > { %9457 = vmatpush3.msra.mxu0 %v14139_v35  ;;  %v7262_v1 = vpop.permute.xlu0 %7261 }
 0x9a3   : > { %9458 = vmatprep.subr.mxu0 %v14147_v22  ;;  %9463 = vmatprep.subr.mxu1 %v7262_v1 }
 0x9a4   : > { %9459 = vmatpush3.msra.mxu0 %v14147_v22  ;;  %9464 = vmatpush3.msra.mxu1 %v7262_v1  ;;  %v14305_v1 = vld [vmem:[#allocation8 + $0x18] sm:$0xff] }
 0x9a5   : > { %9461 = vmatmul.mubr.msk.f32.vlgmr.msra.gmra.mxu0 %vm7301_vm6, %v14167_v25 }
 0x9a6   : > { %v7214_v3 = vpop.permute.xlu0 %7213  ;;  %9498 = vmatprep.mubr.msk.f32.mxu0 %vm7301_vm6, %v14077_v52 }
 0x9aa   : > { %v7166_v5 = vpop.permute.xlu0 %7165 }
 0x9ae   : > { %v7260_v62 = vpop.permute.xlu0 %7259 }
 0x9af   : > { %9465 = vmatprep.subr.mxu1 %v7260_v62 }
 0x9b0   : > { %9466 = vmatpush3.msra.mxu1 %v7260_v62 }
 0x9b1   : > { %9467 = vmatprep.subr.mxu1 %v7214_v3 }
 0x9b2   : > { %v7212_v23 = vpop.permute.xlu0 %7211  ;;  %9468 = vmatpush3.msra.mxu1 %v7214_v3 }
 0x9b3   : > { %9469 = vmatprep.subr.mxu1 %v7212_v23 }
 0x9b4   : > { %9470 = vmatpush3.msra.mxu1 %v7212_v23 }
 0x9b5   : > { %9471 = vmatprep.subr.mxu1 %v7166_v5 }
 0x9b6   : > { %v7164_v15 = vpop.permute.xlu0 %7163  ;;  %9472 = vmatpush3.msra.mxu1 %v7166_v5 }
 0x9b7   : > { %9473 = vmatprep.subr.mxu1 %v7164_v15 }
 0x9b8   : > { %9474 = vmatpush3.msra.mxu1 %v7164_v15 }
 0x9b9   : > { %9475 = vmatprep.subr.mxu1 %v14155_v32 }
 0x9ba   : > { %9476 = vmatpush3.msra.mxu1 %v14155_v32 }
 0x9bb   : > { %9477 = vmatprep.subr.mxu1 %v14164_v38 }
 0x9bc   : > { %9478 = vmatpush3.msra.mxu1 %v14164_v38 }
 0x9bd   : > { %9480 = vmatmul.mubr.msk.f32.vlgmr.msra.gmra.mxu1 %vm7301_vm6, %v14167_v25 }
 0x9be   : > { %9517 = vmatprep.mubr.msk.f32.mxu1 %vm7301_vm6, %v14077_v52 }
 0x9de   : > { %v7266_v36 = vpop.permute.xlu1 %7265 }
 0x9df   : > { %9482 = vmatprep.subr.mxu0 %v7266_v36 }
 0x9e0   : > { %9483 = vmatpush3.msra.mxu0 %v7266_v36 }
 0x9e2   : > { %v7218_v8 = vpop.permute.xlu1 %7217 }
 0x9e6   : > { %v7170_v59 = vpop.permute.xlu1 %7169 }
 0x9e8   : > { %v7270_v10 = vpop.permute.xlu0 %7269 }
 0x9e9   : > { %9501 = vmatprep.subr.mxu1 %v7270_v10 }
 0x9ea   : > { %v7264_v47 = vpop.permute.xlu1 %7263  ;;  %9502 = vmatpush3.msra.mxu1 %v7270_v10 }
 0x9eb   : > { %9484 = vmatprep.subr.mxu0 %v7264_v47 }
 0x9ec   : > { %9485 = vmatpush3.msra.mxu0 %v7264_v47  ;;  %v7222_v40 = vpop.permute.xlu0 %7221 }
 0x9ed   : > { %9486 = vmatprep.subr.mxu0 %v7218_v8 }
 0x9ee   : > { %9487 = vmatpush3.msra.mxu0 %v7218_v8  ;;  %v7216_v63 = vpop.permute.xlu1 %7215 }
 0x9ef   : > { %9488 = vmatprep.subr.mxu0 %v7216_v63 }
 0x9f0   : > { %9489 = vmatpush3.msra.mxu0 %v7216_v63  ;;  %v7174_v12 = vpop.permute.xlu0 %7173 }
 0x9f1   : > { %9490 = vmatprep.subr.mxu0 %v7170_v59 }
 0x9f2   : > { %9491 = vmatpush3.msra.mxu0 %v7170_v59  ;;  %v7168_v58 = vpop.permute.xlu1 %7167 }
 0x9f3   : > { %9492 = vmatprep.subr.mxu0 %v7168_v58 }
 0x9f4   : > { %9493 = vmatpush3.msra.mxu0 %v7168_v58  ;;  %v7268_v39 = vpop.permute.xlu0 %7267 }
 0x9f5   : > { %9494 = vmatprep.subr.mxu0 %v14203_v9  ;;  %9503 = vmatprep.subr.mxu1 %v7268_v39 }
 0x9f6   : > { %9495 = vmatpush3.msra.mxu0 %v14203_v9  ;;  %9504 = vmatpush3.msra.mxu1 %v7268_v39  ;;  %v14314_v39 = vld [vmem:[#allocation8 + $0x28] sm:$0xff] }
 0x9f7   : > { %9496 = vmatprep.subr.mxu0 %v14211_v13  ;;  %9505 = vmatprep.subr.mxu1 %v7222_v40 }
 0x9f8   : > { %9497 = vmatpush3.msra.mxu0 %v14211_v13  ;;  %9506 = vmatpush3.msra.mxu1 %v7222_v40  ;;  %v7220_v52 = vpop.permute.xlu0 %7219 }
 0x9f9   : > { %9499 = vmatmul.mubr.msk.f32.vlgmr.msra.gmra.mxu0 %vm7301_vm6, %v14167_v25  ;;  %9507 = vmatprep.subr.mxu1 %v7220_v52 }
 0x9fa   : > { %9508 = vmatpush3.msra.mxu1 %v7220_v52 }
 0x9fb   : > { %9509 = vmatprep.subr.mxu1 %v7174_v12 }
 0x9fc   : > { %9510 = vmatpush3.msra.mxu1 %v7174_v12  ;;  %v7172_v26 = vpop.permute.xlu0 %7171 }
 0x9fd   : > { %9511 = vmatprep.subr.mxu1 %v7172_v26 }
 0x9fe   : > { %v9386_v0 = vpop.f32.mrf.mxu1  ;;  %9512 = vmatpush3.msra.mxu1 %v7172_v26 }
 0x9ff   : > { %v14265_v11 = vpop.permute.xlu1 %7293  ;;  %9513 = vmatprep.subr.mxu1 %v14215_v50 }
 0xa00   : > { %v7374_v42 = vpop.f32.mrf.mxu1  ;;  %9514 = vmatpush3.msra.mxu1 %v14215_v50 }
 0xa01   : > { %v7375_v2 = vadd.f32 %v7374_v42, %v14265_v11  ;;  %9515 = vmatprep.subr.mxu1 %v14229_v7 }
 0xa02   : > { %9516 = vmatpush3.msra.mxu1 %v14229_v7 }
 0xa03   : > { %v7908_v49 = vand.u32 2147483647, %v7375_v2  ;;  %9518 = vmatmul.mubr.msk.f32.vlgmr.msra.gmra.mxu1 %vm7301_vm6, %v14167_v25  ;;  %vm7972_vm1 = vcmp.ge.f32.partialorder %v7375_v2, 0.0 }
 0xa05   : > { %v7924_v35 = vsub.f32 0.0, %v7908_v49 }
 0xa07   : > { %v7940_v22 = vmul.f32 1.442695, %v7924_v35 }
 0xa09   : > { %9783 = vpow2.f32 %v7940_v22  ;;  %v14274_v28 = vpop.permute.xlu0 %7298 }
 0xa0a   : > { %v7380_v43 = vadd.f32 %v9386_v0, %v14274_v28 }
 0xa0c   : > { %v7909_v32 = vand.u32 2147483647, %v7380_v43  ;;  %vm7973_vm8 = vcmp.ge.f32.partialorder %v7380_v43, 0.0  ;;  %v14324_v43 = vld [vmem:[#allocation8 + $0x38] sm:$0xff] }
 0xa0e   : > { %v9405_v14 = vpop.f32.mrf.mxu1  ;;  %v7925_v56 = vsub.f32 0.0, %v7909_v32 }
 0xa0f   : > { %v7455_v18 = vadd.f32 %v9405_v14, %v14274_v28 }
 0xa10   : > { %v7449_v34 = vpop.f32.mrf.mxu1  ;;  %v7942_v33 = vmul.f32 1.442695, %v7925_v56 }
 0xa11   : > { %v7911_v38 = vand.u32 2147483647, %v7455_v18  ;;  %v14279_v21 = vadd.f32 %v7449_v34, %v14265_v11  ;;  %vm7975_vm9 = vcmp.ge.f32.partialorder %v7455_v18, 0.0 }
 0xa12   : > { %9785 = vpow2.f32 %v7942_v33 }
 0xa13   : > { %v7927_v25 = vsub.f32 0.0, %v7911_v38  ;;  %v7910_v31 = vand.u32 2147483647, %v14279_v21  ;;  %vm7974_vm0 = vcmp.ge.f32.partialorder %v14279_v21, 0.0 }
 0xa15   : > { %v7946_v19 = vmul.f32 1.442695, %v7927_v25  ;;  %v7926_v45 = vsub.f32 0.0, %v7910_v31 }
 0xa16   : > { %v9784_v41 = vpop.eup %9783 }
 0xa17   : > { %v7988_v53 = vsub.f32 1.0, %v9784_v41  ;;  %v9032_v30 = vadd.f32 -1.0, %v9784_v41  ;;  %9787 = vpow2.f32 %v7946_v19  ;;  %v7944_v48 = vmul.f32 1.442695, %v7926_v45 }
 0xa19   : > { %v8020_v61 = vsel %vm7972_vm1, %v7988_v53, %v9032_v30  ;;  %9789 = vpow2.f32 %v7944_v48 }
 0xa1a   : > { %v8038_v55 = vmul.f32 %v14282_v24, %v8020_v61  ;;  %v8162_v20 = vmul.f32 %v14284_v6, %v8020_v61  ;;  %v8285_v13 = vmul.f32 %v14289_v60, %v8020_v61  ;;  %v8408_v62 = vmul.f32 %v14298_v44, %v8020_v61 }
 0xa1c   : > { %v8055_v57 = vsel %vm8054_vm7, %v8038_v55, 0.0  ;;  %v8178_v9 = vsel %vm8054_vm7, %v8162_v20, 0.0  ;;  %v8301_v5 = vsel %vm8054_vm7, %v8285_v13, 0.0  ;;  %v8424_v26 = vsel %vm8054_vm7, %v8408_v62, 0.0 }
 0xa1d   : > { %8056 = vadd.xlane.f32.xlu0 %v8055_v57 }
 0xa1f   : > { %v9786_v54 = vpop.eup %9785 }
 0xa20   : > { %v9424_v46 = vpop.f32.mrf.mxu0  ;;  %v7989_v50 = vsub.f32 1.0, %v9786_v54  ;;  %v9033_v7 = vadd.f32 -1.0, %v9786_v54 }
 0xa21   : > { %v14296_v16 = vadd.f32 %v9424_v46, %v14274_v28  ;;  %8179 = vadd.xlane.f32.xlu0 %v8178_v9 }
 0xa22   : > { %v7524_v27 = vpop.f32.mrf.mxu0  ;;  %v8021_v17 = vsel %vm7973_vm8, %v7989_v50, %v9033_v7 }
 0xa23   : > { %v7913_v29 = vand.u32 2147483647, %v14296_v16  ;;  %v14302_v37 = vadd.f32 %v7524_v27, %v14265_v11  ;;  %v8039_v4 = vmul.f32 %v14293_v51, %v8021_v17  ;;  %v8163_v47 = vmul.f32 %v14305_v1, %v8021_v17 }
 0xa24   : > { %v9788_v3 = vpop.eup %9787  ;;  %v8286_v22 = vmul.f32 %v14314_v39, %v8021_v17  ;;  %v8409_v38 = vmul.f32 %v14324_v43, %v8021_v17  ;;  %vm7977_vm14 = vcmp.ge.f32.partialorder %v14296_v16, 0.0 }
 0xa25   : > { %v7991_v23 = vsub.f32 1.0, %v9788_v3  ;;  %v9035_v15 = vadd.f32 -1.0, %v9788_v3  ;;  %v7929_v36 = vsub.f32 0.0, %v7913_v29  ;;  %v7912_v8 = vand.u32 2147483647, %v14302_v37  ;;  %8302 = vadd.xlane.f32.xlu0 %v8301_v5 }
 0xa26   : > { %v9790_v59 = vpop.eup %9789  ;;  %v8058_v10 = vsel %vm8054_vm7, %v8039_v4, 0.0  ;;  %v8181_v49 = vsel %vm8054_vm7, %v8163_v47, 0.0  ;;  %v8304_v33 = vsel %vm8054_vm7, %v8286_v22, 0.0  ;;  %v8427_v19 = vsel %vm8054_vm7, %v8409_v38, 0.0 }
 0xa27   : > { %v14312_v40 = vsel %vm7975_vm9, %v7991_v23, %v9035_v15  ;;  %v7990_v63 = vsub.f32 1.0, %v9790_v59  ;;  %v9034_v12 = vadd.f32 -1.0, %v9790_v59  ;;  %v7950_v58 = vmul.f32 1.442695, %v7929_v36  ;;  %8059 = vadd.xlane.f32.xlu1 %v8058_v10 }
 0xa28   : > { %v7928_v52 = vsub.f32 0.0, %v7912_v8  ;;  %v8041_v0 = vmul.f32 %v14293_v51, %v14312_v40  ;;  %v8165_v45 = vmul.f32 %v14305_v1, %v14312_v40  ;;  %vm7976_vm15 = vcmp.ge.f32.partialorder %v14302_v37, 0.0 }
 0xa29   : > { %v14320_v42 = vsel %vm7974_vm0, %v7990_v63, %v9034_v12  ;;  %9791 = vpow2.f32 %v7950_v58  ;;  %8425 = vadd.xlane.f32.xlu0 %v8424_v26  ;;  %v8288_v37 = vmul.f32 %v14314_v39, %v14312_v40  ;;  %v8411_v10 = vmul.f32 %v14324_v43, %v14312_v40 }
 0xa2a   : > { %v7948_v2 = vmul.f32 1.442695, %v7928_v52  ;;  %v9443_v35 = vpop.f32.mrf.mxu1  ;;  %v8064_v14 = vsel %vm8054_vm7, %v8041_v0, 0.0  ;;  %v8164_v56 = vmul.f32 %v14284_v6, %v14320_v42  ;;  %v8187_v48 = vsel %vm8054_vm7, %v8165_v45, 0.0 }
 0xa2b   : > { %8182 = vadd.xlane.f32.xlu1 %v8181_v49  ;;  %v14330_v18 = vadd.f32 %v9443_v35, %v14274_v28  ;;  %v8287_v62 = vmul.f32 %v14289_v60, %v14320_v42  ;;  %v8310_v23 = vsel %vm8054_vm7, %v8288_v37, 0.0  ;;  %v8410_v58 = vmul.f32 %v14298_v44, %v14320_v42 }
 0xa2c   : > { %9793 = vpow2.f32 %v7948_v2  ;;  %v7599_v32 = vpop.f32.mrf.mxu1  ;;  %v8184_v25 = vsel %vm8054_vm7, %v8164_v56, 0.0  ;;  %v8433_v0 = vsel %vm8054_vm7, %v8411_v10, 0.0  ;;  %v8040_v56 = vmul.f32 %v14282_v24, %v14320_v42 }
 0xa2d   : > { %v14333_v34 = vadd.f32 %v7599_v32, %v14265_v11  ;;  %8065 = vadd.xlane.f32.xlu0 %v8064_v14  ;;  %v7915_v31 = vand.u32 2147483647, %v14330_v18  ;;  %v8307_v36 = vsel %vm8054_vm7, %v8287_v62, 0.0  ;;  %v8430_v40 = vsel %vm8054_vm7, %v8410_v58, 0.0 }
 0xa2e   : > { %vm7979_vm3 = vcmp.ge.f32.partialorder %v14330_v18, 0.0 }
 0xa2f   : > { %8305 = vadd.xlane.f32.xlu1 %v8304_v33  ;;  %v7914_v21 = vand.u32 2147483647, %v14333_v34  ;;  %v7931_v53 = vsub.f32 0.0, %v7915_v31  ;;  %vm7978_vm2 = vcmp.ge.f32.partialorder %v14333_v34, 0.0 }
 0xa31   : > { %8185 = vadd.xlane.f32.xlu0 %v8184_v25  ;;  %v7930_v41 = vsub.f32 0.0, %v7914_v21  ;;  %v7954_v46 = vmul.f32 1.442695, %v7931_v53  ;;  %v8061_v21 = vsel %vm8054_vm7, %v8040_v56, 0.0 }
 0xa33   : > { %8428 = vadd.xlane.f32.xlu1 %v8427_v19  ;;  %v7952_v57 = vmul.f32 1.442695, %v7930_v41 }
 0xa35   : > { %9795 = vpow2.f32 %v7952_v57 }
 0xa36   : > { %v9792_v30 = vpop.eup %9791  ;;  %9797 = vpow2.f32 %v7954_v46 }
 0xa37   : > { %v7993_v61 = vsub.f32 1.0, %v9792_v30  ;;  %v9037_v55 = vadd.f32 -1.0, %v9792_v30  ;;  %8188 = vadd.xlane.f32.xlu1 %v8187_v48 }
 0xa39   : > { %v9794_v20 = vpop.eup %9793  ;;  %v8025_v54 = vsel %vm7977_vm14, %v7993_v61, %v9037_v55 }
 0xa3a   : > { %v7992_v9 = vsub.f32 1.0, %v9794_v20  ;;  %v9036_v13 = vadd.f32 -1.0, %v9794_v20  ;;  %v8043_v50 = vmul.f32 %v14293_v51, %v8025_v54  ;;  %v8167_v17 = vmul.f32 %v14305_v1, %v8025_v54 }
 0xa3b   : > { %v8290_v15 = vmul.f32 %v14314_v39, %v8025_v54  ;;  %v8413_v2 = vmul.f32 %v14324_v43, %v8025_v54 }
 0xa3c   : > { %v8024_v7 = vsel %vm7976_vm15, %v7992_v9, %v9036_v13  ;;  %v8070_v27 = vsel %vm8054_vm7, %v8043_v50, 0.0  ;;  %v8193_v3 = vsel %vm8054_vm7, %v8167_v17, 0.0  ;;  %vm8579_vm15 = vcmask 1042434  }
 0xa3d   : > { %8071 = vadd.xlane.f32.xlu1 %v8070_v27  ;;  %v8042_v16 = vmul.f32 %v14282_v24, %v8024_v7  ;;  %v8166_v4 = vmul.f32 %v14284_v6, %v8024_v7  ;;  %v8289_v8 = vmul.f32 %v14289_v60, %v8024_v7  ;;  %v8316_v59 = vsel %vm8054_vm7, %v8290_v15, 0.0 }
 0xa3e   : > { %v8412_v22 = vmul.f32 %v14298_v44, %v8024_v7  ;;  %v8439_v14 = vsel %vm8054_vm7, %v8413_v2, 0.0 }
 0xa3f   : > { %v8067_v29 = vsel %vm8054_vm7, %v8042_v16, 0.0  ;;  %v8190_v5 = vsel %vm8054_vm7, %v8166_v4, 0.0  ;;  %v8313_v12 = vsel %vm8054_vm7, %v8289_v8, 0.0 }
 0xa40   : > { %8068 = vadd.xlane.f32.xlu0 %v8067_v29  ;;  %v8436_v38 = vsel %vm8054_vm7, %v8412_v22, 0.0 }
 0xa41   : > { %8194 = vadd.xlane.f32.xlu1 %v8193_v3 }
 0xa42   : > { %v9796_v47 = vpop.eup %9795 }
 0xa43   : > { %v9798_v63 = vpop.eup %9797  ;;  %v7994_v52 = vsub.f32 1.0, %v9796_v47  ;;  %v9038_v26 = vadd.f32 -1.0, %v9796_v47 }
 0xa44   : > { %8191 = vadd.xlane.f32.xlu0 %v8190_v5  ;;  %v7995_v49 = vsub.f32 1.0, %v9798_v63  ;;  %v9039_v35 = vadd.f32 -1.0, %v9798_v63 }
 0xa45   : > { %8311 = vadd.xlane.f32.xlu1 %v8310_v23  ;;  %v14374_v32 = vsel %vm7978_vm2, %v7994_v52, %v9038_v26  ;;  %vm8582_vm2 = vcmask 1043459  }
 0xa46   : > { %v14379_v33 = vsel %vm7979_vm3, %v7995_v49, %v9039_v35  ;;  %v8044_v34 = vmul.f32 %v14282_v24, %v14374_v32  ;;  %v8168_v42 = vmul.f32 %v14284_v6, %v14374_v32  ;;  %v8291_v35 = vmul.f32 %v14289_v60, %v14374_v32 }
 0xa47   : > { %v8045_v18 = vmul.f32 %v14293_v51, %v14379_v33  ;;  %v8169_v19 = vmul.f32 %v14305_v1, %v14379_v33  ;;  %vm8585_vm3 = vcmask 1044484  }
 0xa48   : > { %8308 = vadd.xlane.f32.xlu0 %v8307_v36  ;;  %v8073_v25 = vsel %vm8054_vm7, %v8044_v34, 0.0  ;;  %v8196_v45 = vsel %vm8054_vm7, %v8168_v42, 0.0  ;;  %v8415_v34 = vmul.f32 %v14324_v43, %v14379_v33 }
 0xa49   : > { %8317 = vadd.xlane.f32.xlu1 %v8316_v59  ;;  %v8076_v31 = vsel %vm8054_vm7, %v8045_v18, 0.0  ;;  %v8199_v41 = vsel %vm8054_vm7, %v8169_v19, 0.0  ;;  %v8414_v18 = vmul.f32 %v14298_v44, %v14374_v32 }
 0xa4b   : > { %v8442_v19 = vsel %vm8054_vm7, %v8414_v18, 0.0 }
 0xa4c   : > { %8314 = vadd.xlane.f32.xlu0 %v8313_v12 }
 0xa4d   : > { %8434 = vadd.xlane.f32.xlu1 %v8433_v0  ;;  %v8292_v0 = vmul.f32 %v14314_v39, %v14379_v33 }
 0xa50   : > { %8431 = vadd.xlane.f32.xlu0 %v8430_v40  ;;  %v8322_v40 = vsel %vm8054_vm7, %v8292_v0, 0.0 }
 0xa51   : > { %8440 = vadd.xlane.f32.xlu1 %v8439_v14  ;;  %v8319_v14 = vsel %vm8054_vm7, %v8291_v35, 0.0 }
 0xa54   : > { %8437 = vadd.xlane.f32.xlu0 %v8436_v38 }
 0xa55   : > { %8062 = vadd.xlane.f32.xlu1 %v8061_v21 }
 0xa58   : > { %8074 = vadd.xlane.f32.xlu0 %v8073_v25  ;;  %v8445_v25 = vsel %vm8054_vm7, %v8415_v34, 0.0 }
 0xa59   : > { %8077 = vadd.xlane.f32.xlu1 %v8076_v31 }
 0xa5c   : > { %8197 = vadd.xlane.f32.xlu0 %v8196_v45 }
 0xa5d   : > { %8200 = vadd.xlane.f32.xlu1 %v8199_v41 }
 0xa65   : > { %v9462_v53 = vpop.f32.mrf.mxu0 }
 0xa66   : > { %v7680_v30 = vadd.f32 %v9462_v53, %v14274_v28 }
 0xa67   : > { %v7674_v48 = vpop.f32.mrf.mxu0 }
 0xa68   : > { %v7917_v61 = vand.u32 2147483647, %v7680_v30  ;;  %v7675_v55 = vadd.f32 %v7674_v48, %v14265_v11  ;;  %vm7981_vm4 = vcmp.ge.f32.partialorder %v7680_v30, 0.0 }
 0xa6a   : > { %v7933_v57 = vsub.f32 0.0, %v7917_v61  ;;  %v7916_v20 = vand.u32 2147483647, %v7675_v55  ;;  %vm7980_vm5 = vcmp.ge.f32.partialorder %v7675_v55, 0.0 }
 0xa6c   : > { %v7958_v54 = vmul.f32 1.442695, %v7933_v57  ;;  %v7932_v46 = vsub.f32 0.0, %v7916_v20 }
 0xa6e   : > { %9799 = vpow2.f32 %v7958_v54  ;;  %v7956_v9 = vmul.f32 1.442695, %v7932_v46 }
 0xa70   : > { %9801 = vpow2.f32 %v7956_v9 }
 0xa7b   : > { %v9800_v13 = vpop.eup %9799 }
 0xa7c   : > { %v7997_v50 = vsub.f32 1.0, %v9800_v13  ;;  %v9041_v7 = vadd.f32 -1.0, %v9800_v13 }
 0xa7d   : > { %v9802_v27 = vpop.eup %9801  ;;  %v9481_v17 = vpop.f32.mrf.mxu1 }
 0xa7e   : > { %v8029_v16 = vsel %vm7981_vm4, %v7997_v50, %v9041_v7  ;;  %v7996_v29 = vsub.f32 1.0, %v9802_v27  ;;  %v9040_v4 = vadd.f32 -1.0, %v9802_v27  ;;  %v7755_v3 = vadd.f32 %v9481_v17, %v14274_v28 }
 0xa7f   : > { %v7749_v37 = vpop.f32.mrf.mxu1  ;;  %v8047_v5 = vmul.f32 %v14293_v51, %v8029_v16  ;;  %v8171_v59 = vmul.f32 %v14305_v1, %v8029_v16  ;;  %v8294_v22 = vmul.f32 %v14314_v39, %v8029_v16  ;;  %v8417_v42 = vmul.f32 %v14324_v43, %v8029_v16 }
 0xa80   : > { %v8028_v62 = vsel %vm7980_vm5, %v7996_v29, %v9040_v4  ;;  %v7919_v23 = vand.u32 2147483647, %v7755_v3  ;;  %v7750_v15 = vadd.f32 %v7749_v37, %v14265_v11  ;;  %vm7983_vm6 = vcmp.ge.f32.partialorder %v7755_v3, 0.0 }
 0xa81   : > { %v8082_v36 = vsel %vm8054_vm7, %v8047_v5, 0.0  ;;  %v8046_v8 = vmul.f32 %v14282_v24, %v8028_v62  ;;  %v8170_v12 = vmul.f32 %v14284_v6, %v8028_v62  ;;  %v8205_v26 = vsel %vm8054_vm7, %v8171_v59, 0.0 }
 0xa82   : > { %v7935_v10 = vsub.f32 0.0, %v7919_v23  ;;  %v7918_v47 = vand.u32 2147483647, %v7750_v15  ;;  %8083 = vadd.xlane.f32.xlu1 %v8082_v36  ;;  %v8293_v56 = vmul.f32 %v14289_v60, %v8028_v62  ;;  %v8328_v38 = vsel %vm8054_vm7, %v8294_v22, 0.0 }
 0xa83   : > { %v8079_v63 = vsel %vm8054_vm7, %v8046_v8, 0.0  ;;  %v8202_v49 = vsel %vm8054_vm7, %v8170_v12, 0.0  ;;  %v8416_v45 = vmul.f32 %v14298_v44, %v8028_v62  ;;  %v8451_v30 = vsel %vm8054_vm7, %v8417_v42, 0.0 }
 0xa84   : > { %v7962_v58 = vmul.f32 1.442695, %v7935_v10  ;;  %v7934_v52 = vsub.f32 0.0, %v7918_v47  ;;  %8080 = vadd.xlane.f32.xlu0 %v8079_v63  ;;  %v8325_v21 = vsel %vm8054_vm7, %v8293_v56, 0.0  ;;  %vm7982_vm1 = vcmp.ge.f32.partialorder %v7750_v15, 0.0 }
 0xa85   : > { %v8448_v55 = vsel %vm8054_vm7, %v8416_v45, 0.0  ;;  %vm8588_vm4 = vcmask 1045509   ;;  %vm8591_vm5 = vcmask 1046534  }
 0xa86   : > { %9803 = vpow2.f32 %v7962_v58  ;;  %v7960_v2 = vmul.f32 1.442695, %v7934_v52  ;;  %8206 = vadd.xlane.f32.xlu1 %v8205_v26 }
 0xa88   : > { %9805 = vpow2.f32 %v7960_v2  ;;  %8203 = vadd.xlane.f32.xlu0 %v8202_v49 }
 0xa8a   : > { %8323 = vadd.xlane.f32.xlu1 %v8322_v40 }
 0xa8c   : > { %8320 = vadd.xlane.f32.xlu0 %v8319_v14 }
 0xa8e   : > { %8329 = vadd.xlane.f32.xlu1 %v8328_v38 }
 0xa90   : > { %8326 = vadd.xlane.f32.xlu0 %v8325_v21 }
 0xa92   : > { %8446 = vadd.xlane.f32.xlu1 %v8445_v25 }
 0xa93   : > { %v9804_v31 = vpop.eup %9803 }
 0xa94   : > { %v7999_v41 = vsub.f32 1.0, %v9804_v31  ;;  %v9043_v53 = vadd.f32 -1.0, %v9804_v31  ;;  %8443 = vadd.xlane.f32.xlu0 %v8442_v19 }
 0xa95   : > { %v9806_v33 = vpop.eup %9805 }
 0xa96   : > { %v14426_v48 = vsel %vm7983_vm6, %v7999_v41, %v9043_v53  ;;  %v7998_v32 = vsub.f32 1.0, %v9806_v33  ;;  %v9042_v61 = vadd.f32 -1.0, %v9806_v33  ;;  %8452 = vadd.xlane.f32.xlu1 %v8451_v30 }
 0xa97   : > { %v8049_v57 = vmul.f32 %v14293_v51, %v14426_v48  ;;  %v8173_v9 = vmul.f32 %v14305_v1, %v14426_v48 }
 0xa98   : > { %v14431_v20 = vsel %vm7982_vm1, %v7998_v32, %v9042_v61  ;;  %8449 = vadd.xlane.f32.xlu0 %v8448_v55 }
 0xa99   : > { %v8088_v54 = vsel %vm8054_vm7, %v8049_v57, 0.0  ;;  %v8048_v46 = vmul.f32 %v14282_v24, %v14431_v20  ;;  %v8172_v50 = vmul.f32 %v14284_v6, %v14431_v20  ;;  %v8211_v7 = vsel %vm8054_vm7, %v8173_v9, 0.0 }
 0xa9a   : > { %8089 = vadd.xlane.f32.xlu1 %v8088_v54 }
 0xa9b   : > { %v8085_v13 = vsel %vm8054_vm7, %v8048_v46, 0.0  ;;  %v8208_v27 = vsel %vm8054_vm7, %v8172_v50, 0.0 }
 0xa9c   : > { %8086 = vadd.xlane.f32.xlu0 %v8085_v13 }
 0xa9e   : > { %8212 = vadd.xlane.f32.xlu1 %v8211_v7 }
 0xaa0   : > { %8209 = vadd.xlane.f32.xlu0 %v8208_v27 }
 0xaa6   : > { %v8057_v17 = vpop.xlane.xlu0 %8056 }
 0xaaa   : > { %v8180_v16 = vpop.xlane.xlu0 %8179 }
 0xaae   : > { %v8303_v29 = vpop.xlane.xlu0 %8302 }
 0xab0   : > { %v8060_v4 = vpop.xlane.xlu1 %8059 }
 0xab1   : > { %v8103_v3 = vadd.f32 %v8060_v4, %v8057_v17 }
 0xab2   : > { %v8426_v5 = vpop.xlane.xlu0 %8425 }
 0xab3   : > { %v8104_v37 = vrot.slane %v8103_v3, 4 }
 0xab4   : > { %v8183_v62 = vpop.xlane.xlu1 %8182 }
 0xab5   : > { %v8105_v23 = vadd.f32 %v8104_v37, %v8103_v3  ;;  %v8226_v15 = vadd.f32 %v8183_v62, %v8180_v16 }
 0xab6   : > { %v14443_v58 = vpop.xlane.xlu0 %8065 }
 0xab7   : > { %v8106_v36 = vrot.slane %v8105_v23, 2  ;;  %v8227_v8 = vrot.slane %v8226_v15, 4 }
 0xab8   : > { %v8306_v59 = vpop.xlane.xlu1 %8305 }
 0xab9   : > { %v8107_v10 = vadd.f32 %v8106_v36, %v8105_v23  ;;  %v8228_v47 = vadd.f32 %v8227_v8, %v8226_v15  ;;  %v8349_v63 = vadd.f32 %v8306_v59, %v8303_v29  ;;  %v9500_v12 = vpop.f32.mrf.mxu0 }
 0xaba   : > { %v14446_v52 = vadd.f32 %v9500_v12, %v14274_v28  ;;  %v8186_v45 = vpop.xlane.xlu0 %8185 }
 0xabb   : > { %v8229_v26 = vrot.slane %v8228_v47, 2  ;;  %v8350_v0 = vrot.slane %v8349_v63, 4  ;;  %v7824_v2 = vpop.f32.mrf.mxu0  ;;  %v8108_v49 = vrot.slane %v8107_v10, 1 }
 0xabc   : > { %v7921_v35 = vand.u32 2147483647, %v14446_v52  ;;  %v8429_v40 = vpop.xlane.xlu1 %8428  ;;  %v14450_v22 = vadd.f32 %v7824_v2, %v14265_v11  ;;  %vm7985_vm8 = vcmp.ge.f32.partialorder %v14446_v52, 0.0 }
 0xabd   : > { %v8230_v14 = vadd.f32 %v8229_v26, %v8228_v47  ;;  %v8351_v56 = vadd.f32 %v8350_v0, %v8349_v63  ;;  %v8472_v38 = vadd.f32 %v8429_v40, %v8426_v5  ;;  %v8109_v31 = vadd.f32 %v8108_v49, %v8107_v10 }
 0xabe   : > { %v7937_v34 = vsub.f32 0.0, %v7921_v35  ;;  %v7920_v21 = vand.u32 2147483647, %v14450_v22  ;;  %vm7984_vm9 = vcmp.ge.f32.partialorder %v14450_v22, 0.0 }
 0xabf   : > { %v8231_v18 = vrot.slane %v8230_v14, 1  ;;  %v8352_v25 = vrot.slane %v8351_v56, 2  ;;  %v8473_v42 = vrot.slane %v8472_v38, 4 }
 0xac0   : > { %v7966_v19 = vmul.f32 1.442695, %v7937_v34  ;;  %v7936_v41 = vsub.f32 0.0, %v7920_v21  ;;  %v8189_v53 = vpop.xlane.xlu1 %8188 }
 0xac1   : > { %v8232_v33 = vadd.f32 %v8231_v18, %v8230_v14  ;;  %v8353_v30 = vadd.f32 %v8352_v25, %v8351_v56  ;;  %v8474_v32 = vadd.f32 %v8473_v42, %v8472_v38  ;;  %v14453_v61 = vadd.f32 %v8189_v53, %v8186_v45 }
 0xac2   : > { %9807 = vpow2.f32 %v7966_v19  ;;  %v7964_v55 = vmul.f32 1.442695, %v7936_v41 }
 0xac3   : > { %v8528_v57 = vsel %vm2101_vm11, %v8109_v31, %v8232_v33  ;;  %v8354_v54 = vrot.slane %v8353_v30, 1  ;;  %v8475_v46 = vrot.slane %v8474_v32, 2  ;;  %v9519_v9 = vpop.f32.mrf.mxu1  ;;  %v8234_v22 = vrot.slane %v14453_v61, 4 }
 0xac4   : > { %9809 = vpow2.f32 %v7964_v55  ;;  %v14457_v13 = vadd.f32 %v9519_v9, %v14274_v28 }
 0xac5   : > { %v8355_v50 = vadd.f32 %v8354_v54, %v8353_v30  ;;  %v8476_v7 = vadd.f32 %v8475_v46, %v8474_v32  ;;  %v7899_v27 = vpop.f32.mrf.mxu1 }
 0xac6   : > { %v7923_v17 = vand.u32 2147483647, %v14457_v13  ;;  %v14461_v16 = vadd.f32 %v7899_v27, %v14265_v11  ;;  %v8072_v29 = vpop.xlane.xlu1 %8071  ;;  %v8296_v27 = vmul.f32 %v14314_v39, %v14426_v48  ;;  %vm7987_vm0 = vcmp.ge.f32.partialorder %v14457_v13, 0.0 }
 0xac7   : > { %v8536_v4 = vsel %vm2110_vm12, %v8528_v57, %v8355_v50  ;;  %v8477_v3 = vrot.slane %v8476_v7, 1 }
 0xac8   : > { %v7922_v37 = vand.u32 2147483647, %v14461_v16  ;;  %v7939_v62 = vsub.f32 0.0, %v7923_v17  ;;  %vm7986_vm14 = vcmp.ge.f32.partialorder %v14461_v16, 0.0 }
 0xac9   : > { %v8478_v5 = vadd.f32 %v8477_v3, %v8476_v7  ;;  %v8069_v23 = vpop.xlane.xlu0 %8068  ;;  %v8295_v3 = vmul.f32 %v14289_v60, %v14431_v20 }
 0xaca   : > { %v8117_v15 = vadd.f32 %v8072_v29, %v8069_v23  ;;  %v8195_v28 = vpop.xlane.xlu1 %8194  ;;  %v7938_v8 = vsub.f32 0.0, %v7922_v37  ;;  %v7970_v10 = vmul.f32 1.442695, %v7939_v62  ;;  %v8419_v37 = vmul.f32 %v14324_v43, %v14426_v48 }
 0xacb   : > { %v14466_v36 = vsel %vm2119_vm13, %v8536_v4, %v8478_v5  ;;  %v8235_v5 = vadd.f32 %v8234_v22, %v14453_v61 }
 0xacc   : > { %v8118_v59 = vrot.slane %v8117_v15, 4  ;;  %v7968_v0 = vmul.f32 1.442695, %v7938_v8  ;;  %9811 = vpow2.f32 %v7970_v10 }
 0xacd   : > { %v8192_v47 = vpop.xlane.xlu0 %8191 }
 0xace   : > { %v8119_v11 = vadd.f32 %v8118_v59, %v8117_v15  ;;  %v8240_v63 = vadd.f32 %v8195_v28, %v8192_v47  ;;  %v8312_v12 = vpop.xlane.xlu1 %8311  ;;  %9813 = vpow2.f32 %v7968_v0  ;;  %v8418_v28 = vmul.f32 %v14298_v44, %v14431_v20 }
 0xacf   : > { %v9808_v26 = vpop.eup %9807  ;;  %v8331_v0 = vsel %vm8054_vm7, %v8295_v3, 0.0  ;;  %v8457_v20 = vsel %vm8054_vm7, %v8419_v37, 0.0 }
 0xad0   : > { %v8001_v2 = vsub.f32 1.0, %v9808_v26  ;;  %v9045_v49 = vadd.f32 -1.0, %v9808_v26  ;;  %v8120_v35 = vrot.slane %v8119_v11, 2  ;;  %v8241_v40 = vrot.slane %v8240_v63, 4 }
 0xad1   : > { %v9810_v14 = vpop.eup %9809  ;;  %v8309_v56 = vpop.xlane.xlu0 %8308 }
 0xad2   : > { %v14469_v38 = vsel %vm7985_vm8, %v8001_v2, %v9045_v49  ;;  %v8000_v34 = vsub.f32 1.0, %v9810_v14  ;;  %v9044_v21 = vadd.f32 -1.0, %v9810_v14  ;;  %v8121_v18 = vadd.f32 %v8120_v35, %v8119_v11  ;;  %v8318_v25 = vpop.xlane.xlu1 %8317 }
 0xad3   : > { %v8242_v42 = vadd.f32 %v8241_v40, %v8240_v63  ;;  %v8356_v31 = vadd.f32 %v8312_v12, %v8309_v56  ;;  %v8051_v19 = vmul.f32 %v14293_v51, %v14469_v38  ;;  %v8175_v30 = vmul.f32 %v14305_v1, %v14469_v38 }
 0xad4   : > { %v14474_v45 = vsel %vm7984_vm9, %v8000_v34, %v9044_v21  ;;  %v8122_v32 = vrot.slane %v8121_v18, 1  ;;  %v8334_v63 = vsel %vm8054_vm7, %v8296_v27, 0.0  ;;  %v8298_v48 = vmul.f32 %v14314_v39, %v14469_v38 }
 0xad5   : > { %v8243_v41 = vrot.slane %v8242_v42, 2  ;;  %v8315_v52 = vpop.xlane.xlu0 %8314  ;;  %v8094_v53 = vsel %vm8054_vm7, %v8051_v19, 0.0  ;;  %v8050_v33 = vmul.f32 %v14282_v24, %v14474_v45  ;;  %v8357_v46 = vrot.slane %v8356_v31, 4 }
 0xad6   : > { %v8363_v55 = vadd.f32 %v8318_v25, %v8315_v52  ;;  %v8435_v57 = vpop.xlane.xlu1 %8434  ;;  %8095 = vadd.xlane.f32.xlu1 %v8094_v53  ;;  %v8174_v50 = vmul.f32 %v14284_v6, %v14474_v45  ;;  %v8217_v4 = vsel %vm8054_vm7, %v8175_v30, 0.0  ;;  %v8123_v8 = vadd.f32 %v8122_v32, %v8121_v18 }
 0xad7   : > { %v8244_v54 = vadd.f32 %v8243_v41, %v8242_v42  ;;  %v8091_v9 = vsel %vm8054_vm7, %v8050_v33, 0.0  ;;  %v8358_v10 = vadd.f32 %v8357_v46, %v8356_v31  ;;  %v8236_v49 = vrot.slane %v8235_v5, 2 }
 0xad8   : > { %v8364_v7 = vrot.slane %v8363_v55, 4  ;;  %8092 = vadd.xlane.f32.xlu0 %v8091_v9  ;;  %v8214_v47 = vsel %vm8054_vm7, %v8174_v50, 0.0  ;;  %v8454_v56 = vsel %vm8054_vm7, %v8418_v28, 0.0  ;;  %v8297_v25 = vmul.f32 %v14289_v60, %v14474_v45 }
 0xad9   : > { %v8245_v17 = vrot.slane %v8244_v54, 1  ;;  %v8432_v29 = vpop.xlane.xlu0 %8431  ;;  %v9812_v2 = vpop.eup %9811  ;;  %v8359_v34 = vrot.slane %v8358_v10, 2  ;;  %v8340_v19 = vsel %vm8054_vm7, %v8298_v48, 0.0  ;;  %v8237_v32 = vadd.f32 %v8236_v49, %v8235_v5 }
 0xada   : > { %v8365_v62 = vadd.f32 %v8364_v7, %v8363_v55  ;;  %v8479_v23 = vadd.f32 %v8435_v57, %v8432_v29  ;;  %v8441_v15 = vpop.xlane.xlu1 %8440  ;;  %8218 = vadd.xlane.f32.xlu1 %v8217_v4  ;;  %v8003_v52 = vsub.f32 1.0, %v9812_v2  ;;  %v9047_v53 = vadd.f32 -1.0, %v9812_v2 }
 0xadb   : > { %v8246_v59 = vadd.f32 %v8245_v17, %v8244_v54  ;;  %v9814_v41 = vpop.eup %9813  ;;  %v8421_v54 = vmul.f32 %v14324_v43, %v14469_v38  ;;  %v8360_v46 = vadd.f32 %v8359_v34, %v8358_v10  ;;  %v8337_v7 = vsel %vm8054_vm7, %v8297_v25, 0.0 }
 0xadc   : > { %v8366_v11 = vrot.slane %v8365_v62, 2  ;;  %8215 = vadd.xlane.f32.xlu0 %v8214_v47  ;;  %v8480_v12 = vrot.slane %v8479_v23, 4  ;;  %v8002_v27 = vsub.f32 1.0, %v9814_v41  ;;  %v9046_v17 = vadd.f32 -1.0, %v9814_v41 }
 0xadd   : > { %v8530_v61 = vsel %vm2101_vm11, %v8123_v8, %v8246_v59  ;;  %v8438_v26 = vpop.xlane.xlu0 %8437  ;;  %v8035_v3 = vsel %vm7987_vm0, %v8003_v52, %v9047_v53  ;;  %v8420_v8 = vmul.f32 %v14298_v44, %v14474_v45 }
 0xade   : > { %v8367_v35 = vadd.f32 %v8366_v11, %v8365_v62  ;;  %v8486_v40 = vadd.f32 %v8441_v15, %v8438_v26  ;;  %v8063_v14 = vpop.xlane.xlu1 %8062  ;;  %8335 = vadd.xlane.f32.xlu1 %v8334_v63  ;;  %v8481_v21 = vadd.f32 %v8480_v12, %v8479_v23  ;;  %v8238_v23 = vrot.slane %v8237_v32, 1 }
 0xadf   : > { %v8110_v18 = vadd.f32 %v14443_v58, %v8063_v14  ;;  %v8463_v11 = vsel %vm8054_vm7, %v8421_v54, 0.0  ;;  %v8034_v13 = vsel %vm7986_vm14, %v8002_v27, %v9046_v17  ;;  %v8361_v63 = vrot.slane %v8360_v46, 1 }
 0xae0   : > { %v8368_v42 = vrot.slane %v8367_v35, 1  ;;  %v8487_v31 = vrot.slane %v8486_v40, 4  ;;  %8332 = vadd.xlane.f32.xlu0 %v8331_v0  ;;  %v8482_v33 = vrot.slane %v8481_v21, 2  ;;  %v8239_v2 = vadd.f32 %v8238_v23, %v8237_v32 }
 0xae1   : > { %v8111_v30 = vrot.slane %v8110_v18, 4  ;;  %v8075_v22 = vpop.xlane.xlu0 %8074  ;;  %v8460_v45 = vsel %vm8054_vm7, %v8420_v8, 0.0  ;;  %v8052_v14 = vmul.f32 %v14282_v24, %v8034_v13  ;;  %v8362_v34 = vadd.f32 %v8361_v63, %v8360_v46 }
 0xae2   : > { %v8369_v55 = vadd.f32 %v8368_v42, %v8367_v35  ;;  %v8488_v57 = vadd.f32 %v8487_v31, %v8486_v40  ;;  %v8078_v58 = vpop.xlane.xlu1 %8077  ;;  %8341 = vadd.xlane.f32.xlu1 %v8340_v19  ;;  %v8483_v37 = vadd.f32 %v8482_v33, %v8481_v21  ;;  %v8176_v19 = vmul.f32 %v14284_v6, %v8034_v13 }
 0xae3   : > { %v8112_v9 = vadd.f32 %v8111_v30, %v8110_v18  ;;  %v8124_v50 = vadd.f32 %v8078_v58, %v8075_v22  ;;  %v8097_v53 = vsel %vm8054_vm7, %v8052_v14, 0.0  ;;  %v8300_v30 = vmul.f32 %v14314_v39, %v8035_v3 }
 0xae4   : > { %v8538_v29 = vsel %vm2110_vm12, %v8530_v61, %v8369_v55  ;;  %v8489_v4 = vrot.slane %v8488_v57, 2  ;;  %8338 = vadd.xlane.f32.xlu0 %v8337_v7  ;;  %v8053_v61 = vmul.f32 %v14293_v51, %v8035_v3  ;;  %v8484_v12 = vrot.slane %v8483_v37, 1 }
 0xae5   : > { %v8113_v5 = vrot.slane %v8112_v9, 2  ;;  %v8125_v62 = vrot.slane %v8124_v50, 4  ;;  %v8198_v15 = vpop.xlane.xlu0 %8197  ;;  %v8177_v51 = vmul.f32 %v14305_v1, %v8035_v3  ;;  %v8220_v55 = vsel %vm8054_vm7, %v8176_v19, 0.0 }
 0xae6   : > { %v8490_v38 = vadd.f32 %v8489_v4, %v8488_v57  ;;  %v8201_v28 = vpop.xlane.xlu1 %8200  ;;  %8458 = vadd.xlane.f32.xlu1 %v8457_v20  ;;  %v8100_v42 = vsel %vm8054_vm7, %v8053_v61, 0.0  ;;  %v8299_v6 = vmul.f32 %v14289_v60, %v8034_v13  ;;  %v8346_v58 = vsel %vm8054_vm7, %v8300_v30, 0.0 }
 0xae7   : > { %v8114_v59 = vadd.f32 %v8113_v5, %v8112_v9  ;;  %v8126_v10 = vadd.f32 %v8125_v62, %v8124_v50  ;;  %v8247_v47 = vadd.f32 %v8201_v28, %v8198_v15  ;;  %v8223_v33 = vsel %vm8054_vm7, %v8177_v51, 0.0 }
 0xae8   : > { %v8491_v48 = vrot.slane %v8490_v38, 1  ;;  %8455 = vadd.xlane.f32.xlu0 %v8454_v56  ;;  %v8485_v56 = vadd.f32 %v8484_v12, %v8483_v37  ;;  %v8423_v54 = vmul.f32 %v14324_v43, %v8035_v3  ;;  %v8343_v46 = vsel %vm8054_vm7, %v8299_v6, 0.0 }
 0xae9   : > { %v8115_v16 = vrot.slane %v8114_v59, 1  ;;  %v8127_v26 = vrot.slane %v8126_v10, 2  ;;  %v8248_v0 = vrot.slane %v8247_v47, 4  ;;  %v8422_v39 = vmul.f32 %v14298_v44, %v8034_v13 }
 0xaea   : > { %v8492_v20 = vadd.f32 %v8491_v48, %v8490_v38  ;;  %8464 = vadd.xlane.f32.xlu1 %v8463_v11  ;;  %v8469_v9 = vsel %vm8054_vm7, %v8423_v54, 0.0 }
 0xaeb   : > { %v8116_v49 = vadd.f32 %v8115_v16, %v8114_v59  ;;  %v8128_v35 = vadd.f32 %v8127_v26, %v8126_v10  ;;  %v8249_v40 = vadd.f32 %v8248_v0, %v8247_v47  ;;  %v8466_v50 = vsel %vm8054_vm7, %v8422_v39, 0.0 }
 0xaec   : > { %v14522_v21 = vsel %vm2119_vm13, %v8538_v29, %v8492_v20  ;;  %8461 = vadd.xlane.f32.xlu0 %v8460_v45  ;;  %vm8576_vm7 = vcmask 1041409  }
 0xaed   : > { %v8529_v18 = vsel %vm2101_vm11, %v8116_v49, %v8239_v2  ;;  %v8250_v25 = vrot.slane %v8249_v40, 2  ;;  %v8129_v41 = vrot.slane %v8128_v35, 1 }
 0xaee   : > { %v8537_v31 = vsel %vm2110_vm12, %v8529_v18, %v8362_v34  ;;  %8101 = vadd.xlane.f32.xlu1 %v8100_v42 }
 0xaef   : > { %v14530_v24 = vsel %vm2119_vm13, %v8537_v31, %v8485_v56  ;;  %v8251_v52 = vadd.f32 %v8250_v25, %v8249_v40  ;;  %v8130_v22 = vadd.f32 %v8129_v41, %v8128_v35 }
 0xaf0   : > { %8098 = vadd.xlane.f32.xlu0 %v8097_v53 }
 0xaf1   : > { %v8252_v1 = vrot.slane %v8251_v52, 1 }
 0xaf2   : > { %8224 = vadd.xlane.f32.xlu1 %v8223_v33 }
 0xaf3   : > { %v8253_v32 = vadd.f32 %v8252_v1, %v8251_v52 }
 0xaf4   : > { %8221 = vadd.xlane.f32.xlu0 %v8220_v55 }
 0xaf5   : > { %v14538_v57 = vsel %vm2101_vm11, %v8130_v22, %v8253_v32 }
 0xaf6   : > { %8347 = vadd.xlane.f32.xlu1 %v8346_v58 }
 0xaf8   : > { %8344 = vadd.xlane.f32.xlu0 %v8343_v46 }
 0xafa   : > { %8470 = vadd.xlane.f32.xlu1 %v8469_v9 }
 0xafc   : > { %8467 = vadd.xlane.f32.xlu0 %v8466_v50 }
 0xb0b   : > { %v8084_v60 = vpop.xlane.xlu1 %8083 }
 0xb0d   : > { %v8081_v7 = vpop.xlane.xlu0 %8080 }
 0xb0e   : > { %v8131_v11 = vadd.f32 %v8084_v60, %v8081_v7 }
 0xb0f   : > { %v8207_v27 = vpop.xlane.xlu1 %8206 }
 0xb10   : > { %v8132_v12 = vrot.slane %v8131_v11, 4 }
 0xb11   : > { %v8204_v17 = vpop.xlane.xlu0 %8203 }
 0xb12   : > { %v8254_v59 = vadd.f32 %v8207_v27, %v8204_v17  ;;  %v8133_v45 = vadd.f32 %v8132_v12, %v8131_v11  ;;  %v14549_v17 = vld [vmem:[%s14668_s16] ss:$0 sm:$0xff] }
 0xb13   : > { %v8324_v29 = vpop.xlane.xlu1 %8323 }
 0xb14   : > { %v8255_v63 = vrot.slane %v8254_v59, 4  ;;  %v8134_v52 = vrot.slane %v8133_v45, 2 }
 0xb15   : > { %v8321_v4 = vpop.xlane.xlu0 %8320 }
 0xb16   : > { %v8370_v13 = vadd.f32 %v8324_v29, %v8321_v4  ;;  %v8256_v26 = vadd.f32 %v8255_v63, %v8254_v59  ;;  %v8135_v60 = vadd.f32 %v8134_v52, %v8133_v45 }
 0xb17   : > { %v8330_v37 = vpop.xlane.xlu1 %8329 }
 0xb18   : > { %v8371_v16 = vrot.slane %v8370_v13, 4  ;;  %v8257_v35 = vrot.slane %v8256_v26, 2 }
 0xb19   : > { %v8327_v43 = vpop.xlane.xlu0 %8326 }
 0xb1a   : > { %v8377_v2 = vadd.f32 %v8330_v37, %v8327_v43  ;;  %v8372_v49 = vadd.f32 %v8371_v16, %v8370_v13  ;;  %v8258_v1 = vadd.f32 %v8257_v35, %v8256_v26 }
 0xb1b   : > { %v8447_v3 = vpop.xlane.xlu1 %8446 }
 0xb1c   : > { %v8378_v56 = vrot.slane %v8377_v2, 4  ;;  %v8373_v53 = vrot.slane %v8372_v49, 2  ;;  %v8259_v29 = vrot.slane %v8258_v1, 1 }
 0xb1d   : > { %v8444_v5 = vpop.xlane.xlu0 %8443 }
 0xb1e   : > { %v8493_v40 = vadd.f32 %v8447_v3, %v8444_v5  ;;  %v8379_v55 = vadd.f32 %v8378_v56, %v8377_v2  ;;  %v8374_v7 = vadd.f32 %v8373_v53, %v8372_v49  ;;  %v14553_v5 = vadd.f32 %v14549_v17, %v14530_v24 }
 0xb1f   : > { %v8453_v62 = vpop.xlane.xlu1 %8452  ;;  %v8260_v63 = vadd.f32 %v8259_v29, %v8258_v1 }
 0xb20   : > { %v8494_v33 = vrot.slane %v8493_v40, 4 }
 0xb21   : > { %v8450_v23 = vpop.xlane.xlu0 %8449 }
 0xb22   : > { %v8500_v14 = vadd.f32 %v8453_v62, %v8450_v23  ;;  %v8495_v4 = vadd.f32 %v8494_v33, %v8493_v40  ;;  %v8380_v62 = vrot.slane %v8379_v55, 2 }
 0xb23   : > { %v8090_v44 = vpop.xlane.xlu1 %8089 }
 0xb24   : > { %v8501_v30 = vrot.slane %v8500_v14, 4  ;;  %v8381_v26 = vadd.f32 %v8380_v62, %v8379_v55 }
 0xb25   : > { %v8087_v38 = vpop.xlane.xlu0 %8086 }
 0xb26   : > { %v8138_v25 = vadd.f32 %v8090_v44, %v8087_v38  ;;  %v8502_v37 = vadd.f32 %v8501_v30, %v8500_v14  ;;  %v8382_v52 = vrot.slane %v8381_v26, 1 }
 0xb27   : > { %v8213_v15 = vpop.xlane.xlu1 %8212 }
 0xb28   : > { %v8139_v54 = vrot.slane %v8138_v25, 4 }
 0xb29   : > { %v8210_v28 = vpop.xlane.xlu0 %8209 }
 0xb2a   : > { %v8261_v34 = vadd.f32 %v8213_v15, %v8210_v28  ;;  %v8140_v38 = vadd.f32 %v8139_v54, %v8138_v25 }
 0xb2c   : > { %v8262_v22 = vrot.slane %v8261_v34, 4 }
 0xb2e   : > { %v8263_v43 = vadd.f32 %v8262_v22, %v8261_v34 }
 0xb30   : > { %v8264_v12 = vrot.slane %v8263_v43, 2 }
 0xb5f   : > { %v8096_v8 = vpop.xlane.xlu1 %8095 }
 0xb61   : > { %v8093_v10 = vpop.xlane.xlu0 %8092 }
 0xb62   : > { %v8145_v42 = vadd.f32 %v8096_v8, %v8093_v10  ;;  %v8136_v10 = vrot.slane %v8135_v60, 1 }
 0xb63   : > { %v8219_v47 = vpop.xlane.xlu1 %8218 }
 0xb64   : > { %v8146_v46 = vrot.slane %v8145_v42, 4  ;;  %v8137_v14 = vadd.f32 %v8136_v10, %v8135_v60 }
 0xb65   : > { %v8216_v48 = vpop.xlane.xlu0 %8215 }
 0xb66   : > { %v8268_v18 = vadd.f32 %v8219_v47, %v8216_v48  ;;  %v8147_v15 = vadd.f32 %v8146_v46, %v8145_v42  ;;  %v8375_v47 = vrot.slane %v8374_v7, 1  ;;  %v8496_v48 = vrot.slane %v8495_v4, 2 }
 0xb67   : > { %v8336_v61 = vpop.xlane.xlu1 %8335  ;;  %v8265_v42 = vadd.f32 %v8264_v12, %v8263_v43 }
 0xb68   : > { %v8269_v6 = vrot.slane %v8268_v18, 4  ;;  %v8148_v45 = vrot.slane %v8147_v15, 2  ;;  %v8376_v34 = vadd.f32 %v8375_v47, %v8374_v7 }
 0xb69   : > { %v8333_v0 = vpop.xlane.xlu0 %8332 }
 0xb6a   : > { %v8384_v31 = vadd.f32 %v8336_v61, %v8333_v0  ;;  %v8270_v23 = vadd.f32 %v8269_v6, %v8268_v18  ;;  %v8503_v61 = vrot.slane %v8502_v37, 2  ;;  %v8497_v18 = vadd.f32 %v8496_v48, %v8495_v4 }
 0xb6b   : > { %v8342_v20 = vpop.xlane.xlu1 %8341  ;;  %v8149_v30 = vadd.f32 %v8148_v45, %v8147_v15  ;;  %v8539_v6 = vsel %vm2110_vm12, %v14538_v57, %v8376_v34 }
 0xb6c   : > { %v8385_v39 = vrot.slane %v8384_v31, 4  ;;  %v8271_v24 = vrot.slane %v8270_v23, 2  ;;  %v8504_v25 = vadd.f32 %v8503_v61, %v8502_v37 }
 0xb6d   : > { %v8339_v51 = vpop.xlane.xlu0 %8338 }
 0xb6e   : > { %v8391_v19 = vadd.f32 %v8342_v20, %v8339_v51  ;;  %v8386_v28 = vadd.f32 %v8385_v39, %v8384_v31  ;;  %v8141_v20 = vrot.slane %v8140_v38, 2  ;;  %v8272_v53 = vadd.f32 %v8271_v24, %v8270_v23 }
 0xb6f   : > { %v8459_v41 = vpop.xlane.xlu1 %8458  ;;  %v8498_v39 = vrot.slane %v8497_v18, 1 }
 0xb70   : > { %v8392_v9 = vrot.slane %v8391_v19, 4  ;;  %v8387_v49 = vrot.slane %v8386_v28, 2  ;;  %v8142_v33 = vadd.f32 %v8141_v20, %v8140_v38  ;;  %v8273_v29 = vrot.slane %v8272_v53, 1 }
 0xb71   : > { %v8456_v32 = vpop.xlane.xlu0 %8455 }
 0xb72   : > { %v8507_v58 = vadd.f32 %v8459_v41, %v8456_v32  ;;  %v8393_v8 = vadd.f32 %v8392_v9, %v8391_v19  ;;  %v8532_v41 = vsel %vm2101_vm11, %v8137_v14, %v8260_v63  ;;  %v8388_v22 = vadd.f32 %v8387_v49, %v8386_v28 }
 0xb73   : > { %v8465_v50 = vpop.xlane.xlu1 %8464  ;;  %v8505_v9 = vrot.slane %v8504_v25, 1  ;;  %v8143_v43 = vrot.slane %v8142_v33, 1  ;;  %v8499_v28 = vadd.f32 %v8498_v39, %v8497_v18 }
 0xb74   : > { %v8508_v27 = vrot.slane %v8507_v58, 4  ;;  %v8394_v35 = vrot.slane %v8393_v8, 2  ;;  %v8389_v62 = vrot.slane %v8388_v22, 1 }
 0xb75   : > { %v8462_v3 = vpop.xlane.xlu0 %8461  ;;  %v8144_v12 = vadd.f32 %v8143_v43, %v8142_v33 }
 0xb76   : > { %v8514_v44 = vadd.f32 %v8465_v50, %v8462_v3  ;;  %v8509_v11 = vadd.f32 %v8508_v27, %v8507_v58  ;;  %v8395_v32 = vadd.f32 %v8394_v35, %v8393_v8  ;;  %v8266_v50 = vrot.slane %v8265_v42, 1 }
 0xb77   : > { %v8102_v59 = vpop.xlane.xlu1 %8101  ;;  %v8383_v27 = vadd.f32 %v8382_v52, %v8381_v26  ;;  %v8150_v3 = vrot.slane %v8149_v30, 1  ;;  %v8506_v8 = vadd.f32 %v8505_v9, %v8504_v25  ;;  %v8390_v26 = vadd.f32 %v8389_v62, %v8388_v22 }
 0xb78   : > { %v8515_v13 = vrot.slane %v8514_v44, 4  ;;  %v8510_v51 = vrot.slane %v8509_v11, 2  ;;  %v8396_v23 = vrot.slane %v8395_v32, 1  ;;  %v8547_v35 = vsel %vm2119_vm13, %v8539_v6, %v8499_v28 }
 0xb79   : > { %v8099_v16 = vpop.xlane.xlu0 %8098  ;;  %v8540_v49 = vsel %vm2110_vm12, %v8532_v41, %v8383_v27  ;;  %v8562_v33 = vadd.f32 %v14549_v17, %v8547_v35  ;;  %v8561_v22 = vadd.f32 %v14549_v17, %v14522_v21 }
 0xb7a   : > { %v8516_v0 = vadd.f32 %v8515_v13, %v8514_v44  ;;  %v8152_v2 = vadd.f32 %v8102_v59, %v8099_v16  ;;  %v8511_v58 = vadd.f32 %v8510_v51, %v8509_v11  ;;  %v8267_v59 = vadd.f32 %v8266_v50, %v8265_v42 }
 0xb7b   : > { %v8225_v40 = vpop.xlane.xlu1 %8224  ;;  %v8274_v13 = vadd.f32 %v8273_v29, %v8272_v53  ;;  %v8151_v16 = vadd.f32 %v8150_v3, %v8149_v30  ;;  %v8397_v24 = vadd.f32 %v8396_v23, %v8395_v32  ;;  %v8548_v25 = vsel %vm2119_vm13, %v8540_v49, %v8506_v8 }
 0xb7c   : > { %v8153_v56 = vrot.slane %v8152_v2, 4  ;;  %v8517_v31 = vrot.slane %v8516_v0, 2  ;;  %v8512_v44 = vrot.slane %v8511_v58, 1  ;;  %v8563_v32 = vadd.f32 %v14549_v17, %v8548_v25 }
 0xb7d   : > { %v8222_v19 = vpop.xlane.xlu0 %8221  ;;  %v8534_v34 = vsel %vm2101_vm11, %v8151_v16, %v8274_v13  ;;  %v8578_v21 = vrot.slane %v8561_v22, 6 }
 0xb7e   : > { %v8275_v1 = vadd.f32 %v8225_v40, %v8222_v19  ;;  %v8154_v54 = vadd.f32 %v8153_v56, %v8152_v2  ;;  %v8518_v60 = vadd.f32 %v8517_v31, %v8516_v0  ;;  %v8513_v0 = vadd.f32 %v8512_v44, %v8511_v58 }
 0xb7f   : > { %v8348_v55 = vpop.xlane.xlu1 %8347  ;;  %v8533_v40 = vsel %vm2101_vm11, %v8144_v12, %v8267_v59  ;;  %v8542_v31 = vsel %vm2110_vm12, %v8534_v34, %v8397_v24  ;;  %v8559_v58 = vadd.f32 %v14549_v17, %v14466_v36 }
 0xb80   : > { %v8276_v46 = vrot.slane %v8275_v1, 4  ;;  %v8155_v38 = vrot.slane %v8154_v54, 2  ;;  %v8519_v10 = vrot.slane %v8518_v60, 1  ;;  %v8541_v42 = vsel %vm2110_vm12, %v8533_v40, %v8390_v26 }
 0xb81   : > { %v8345_v7 = vpop.xlane.xlu0 %8344  ;;  %v8549_v19 = vsel %vm2119_vm13, %v8541_v42, %v8513_v0 }
 0xb82   : > { %v8277_v4 = vadd.f32 %v8276_v46, %v8275_v1  ;;  %v8398_v37 = vadd.f32 %v8348_v55, %v8345_v7  ;;  %v8156_v2 = vadd.f32 %v8155_v38, %v8154_v54  ;;  %v8520_v14 = vadd.f32 %v8519_v10, %v8518_v60 }
 0xb83   : > { %v8471_v47 = vpop.xlane.xlu1 %8470  ;;  %v8575_v1 = vrot.slane %v14553_v5, 7  ;;  %v8564_v54 = vadd.f32 %v14549_v17, %v8549_v19  ;;  %v8581_v60 = vrot.slane %v8562_v33, 5 }
 0xb84   : > { %v8278_v15 = vrot.slane %v8277_v4, 2  ;;  %v8399_v57 = vrot.slane %v8398_v37, 4  ;;  %v8157_v52 = vrot.slane %v8156_v2, 1  ;;  %v8550_v30 = vsel %vm2119_vm13, %v8542_v31, %v8520_v14 }
 0xb85   : > { %v8468_v11 = vpop.xlane.xlu0 %8467  ;;  %v8565_v50 = vadd.f32 %v14549_v17, %v8550_v30  ;;  %v8577_v7 = vsel %vm8576_vm7, %v8575_v1, %v8559_v58  ;;  %v8587_v36 = vrot.slane %v8564_v54, 3 }
 0xb86   : > { %v8279_v63 = vadd.f32 %v8278_v15, %v8277_v4  ;;  %v8400_v48 = vadd.f32 %v8399_v57, %v8398_v37  ;;  %v8521_v61 = vadd.f32 %v8471_v47, %v8468_v11  ;;  %v8158_v39 = vadd.f32 %v8157_v52, %v8156_v2 }
 0xb87   : > { %v8584_v4 = vrot.slane %v8563_v32, 4  ;;  %v8580_v3 = vsel %vm8579_vm15, %v8578_v21, %v8577_v7  ;;  %v8590_v62 = vrot.slane %v8565_v50, 2 }
 0xb88   : > { %v8401_v20 = vrot.slane %v8400_v48, 2  ;;  %v8522_v45 = vrot.slane %v8521_v61, 4  ;;  %v8280_v51 = vrot.slane %v8279_v63, 1  ;;  %v8583_v44 = vsel %vm8582_vm2, %v8581_v60, %v8580_v3 }
 0xb89   : > { %v8586_v38 = vsel %vm8585_vm3, %v8584_v4, %v8583_v44 }
 0xb8a   : > { %v8402_v56 = vadd.f32 %v8401_v20, %v8400_v48  ;;  %v8523_v18 = vadd.f32 %v8522_v45, %v8521_v61  ;;  %v8281_v55 = vadd.f32 %v8280_v51, %v8279_v63  ;;  %v8589_v15 = vsel %vm8588_vm4, %v8587_v36, %v8586_v38 }
 0xb8b   : > { %v8592_v28 = vsel %vm8591_vm5, %v8590_v62, %v8589_v15 }
 0xb8c   : > { %v8403_v41 = vrot.slane %v8402_v56, 1  ;;  %v8524_v53 = vrot.slane %v8523_v18, 2  ;;  %v8535_v27 = vsel %vm2101_vm11, %v8158_v39, %v8281_v55  ;;  %vm8594_vm11 = vcmask 1047559  }
 0xb8e   : > { %v8525_v6 = vadd.f32 %v8524_v53, %v8523_v18  ;;  %v8404_v46 = vadd.f32 %v8403_v41, %v8402_v56 }
 0xb90   : > { %v8526_v9 = vrot.slane %v8525_v6, 1  ;;  %v8543_v37 = vsel %vm2110_vm12, %v8535_v27, %v8404_v46 }
 0xb92   : > { %v8527_v29 = vadd.f32 %v8526_v9, %v8525_v6 }
 0xb94   : > { %v8551_v43 = vsel %vm2119_vm13, %v8543_v37, %v8527_v29 }
 0xb95   : > { %v8566_v23 = vadd.f32 %v14549_v17, %v8551_v43 }
 0xb97   : > { %v8593_v57 = vrot.slane %v8566_v23, 1 }
 0xb99   : > { %v8595_v8 = vsel %vm8594_vm11, %v8593_v57, %v8592_v28 }
 0xb9a   : > { %v8597_v59 = vsel %vm621_vm10, %v8595_v8, -inf }
 0xb9b   : > { %8598 = vmax.xlane.f32.xlu0 %v8597_v59 }
 0xc24   : > { %v8599_v10 = vpop.xlane.xlu0 %8598 }
 0xc25   : > { %v8601_v47 = vrot.slane %v8599_v10, 1  ;;  %v8602_v11 = vrot.slane %v8599_v10, 2  ;;  %v8603_v17 = vrot.slane %v8599_v10, 3  ;;  %v8604_v13 = vrot.slane %v8599_v10, 4 }
 0xc26   : > { %v8605_v63 = vrot.slane %v8599_v10, 5  ;;  %v8606_v48 = vrot.slane %v8599_v10, 6  ;;  %v8607_v61 = vrot.slane %v8599_v10, 7  ;;  %v8616_v12 = vsub.f32 %v8559_v58, %v8599_v10 }
 0xc27   : > { %v8617_v16 = vsub.f32 %v14553_v5, %v8601_v47  ;;  %v8618_v26 = vsub.f32 %v8561_v22, %v8602_v11  ;;  %v8619_v24 = vsub.f32 %v8562_v33, %v8603_v17  ;;  %v8620_v0 = vsub.f32 %v8563_v32, %v8604_v13 }
 0xc28   : > { %v8621_v2 = vsub.f32 %v8564_v54, %v8605_v63  ;;  %v8622_v20 = vsub.f32 %v8565_v50, %v8606_v48  ;;  %v8624_v45 = vmul.f32 1.442695, %v8616_v12  ;;  %v8623_v49 = vsub.f32 %v8566_v23, %v8607_v61 }
 0xc29   : > { %v8626_v35 = vmul.f32 1.442695, %v8617_v16  ;;  %v8628_v40 = vmul.f32 1.442695, %v8618_v26  ;;  %v8630_v14 = vmul.f32 1.442695, %v8619_v24 }
 0xc2a   : > { %9815 = vpow2.f32 %v8624_v45  ;;  %v8632_v34 = vmul.f32 1.442695, %v8620_v0  ;;  %v8634_v51 = vmul.f32 1.442695, %v8621_v2  ;;  %v8636_v56 = vmul.f32 1.442695, %v8622_v20 }
 0xc2b   : > { %9817 = vpow2.f32 %v8626_v35  ;;  %v8638_v18 = vmul.f32 1.442695, %v8623_v49 }
 0xc2c   : > { %9819 = vpow2.f32 %v8628_v40 }
 0xc2d   : > { %9821 = vpow2.f32 %v8630_v14 }
 0xc2e   : > { %9823 = vpow2.f32 %v8632_v34 }
 0xc2f   : > { %9825 = vpow2.f32 %v8634_v51 }
 0xc30   : > { %9827 = vpow2.f32 %v8636_v56 }
 0xc31   : > { %9829 = vpow2.f32 %v8638_v18 }
 0xc37   : > { %v9816_v5 = vpop.eup %9815 }
 0xc38   : > { %v9818_v25 = vpop.eup %9817 }
 0xc39   : > { %v9820_v42 = vpop.eup %9819  ;;  %v8648_v31 = vrot.slane %v9818_v25, 7 }
 0xc3a   : > { %v9822_v19 = vpop.eup %9821  ;;  %v8650_v52 = vrot.slane %v9820_v42, 6 }
 0xc3b   : > { %v9824_v41 = vpop.eup %9823  ;;  %v8649_v53 = vsel %vm8576_vm7, %v8648_v31, %v9816_v5  ;;  %v8652_v1 = vrot.slane %v9822_v19, 5 }
 0xc3c   : > { %v9826_v33 = vpop.eup %9825  ;;  %v8651_v30 = vsel %vm8579_vm15, %v8650_v52, %v8649_v53  ;;  %v8654_v22 = vrot.slane %v9824_v41, 4 }
 0xc3d   : > { %v9828_v32 = vpop.eup %9827  ;;  %v8653_v55 = vsel %vm8582_vm2, %v8652_v1, %v8651_v30  ;;  %v8656_v6 = vrot.slane %v9826_v33, 3 }
 0xc3e   : > { %v9830_v58 = vpop.eup %9829  ;;  %v8655_v54 = vsel %vm8585_vm3, %v8654_v22, %v8653_v55  ;;  %v8658_v46 = vrot.slane %v9828_v32, 2 }
 0xc3f   : > { %v8657_v39 = vsel %vm8588_vm4, %v8656_v6, %v8655_v54  ;;  %v8660_v9 = vrot.slane %v9830_v58, 1 }
 0xc40   : > { %v8659_v50 = vsel %vm8591_vm5, %v8658_v46, %v8657_v39 }
 0xc41   : > { %v8661_v60 = vsel %vm8594_vm11, %v8660_v9, %v8659_v50 }
 0xc42   : > { %v8663_v7 = vsel %vm621_vm10, %v8661_v60, 0.0 }
 0xc43   : > { %8664 = vadd.xlane.f32.xlu1 %v8663_v7 }
 0xccc   : > { %v8665_v21 = vpop.xlane.xlu1 %8664 }
 0xccd   : > { %v8667_v27 = vrot.slane %v8665_v21, 1  ;;  %v8668_v29 = vrot.slane %v8665_v21, 2  ;;  %v8669_v4 = vrot.slane %v8665_v21, 3  ;;  %v8670_v37 = vrot.slane %v8665_v21, 4 }
 0xcce   : > { %9831 = vrcp.f32 %v8665_v21  ;;  %v8671_v36 = vrot.slane %v8665_v21, 5  ;;  %v8672_v43 = vrot.slane %v8665_v21, 6  ;;  %v8673_v3 = vrot.slane %v8665_v21, 7 }
 0xccf   : > { %9833 = vrcp.f32 %v8667_v27 }
 0xcd0   : > { %9835 = vrcp.f32 %v8668_v29 }
 0xcd1   : > { %9837 = vrcp.f32 %v8669_v4 }
 0xcd2   : > { %9839 = vrcp.f32 %v8670_v37 }
 0xcd3   : > { %9841 = vrcp.f32 %v8671_v36 }
 0xcd4   : > { %9843 = vrcp.f32 %v8672_v43 }
 0xcd5   : > { %9845 = vrcp.f32 %v8673_v3 }
 0xcdb   : > { %v9832_v62 = vpop.eup %9831 }
 0xcdc   : > { %v9834_v23 = vpop.eup %9833  ;;  %v8683_v8 = vmul.f32 %v9832_v62, %v9816_v5 }
 0xcdd   : > { %v9836_v44 = vpop.eup %9835  ;;  %v8685_v38 = vmul.f32 %v9834_v23, %v9818_v25 }
 0xcde   : > { %v9838_v15 = vpop.eup %9837  ;;  %v8687_v57 = vmul.f32 %v9836_v44, %v9820_v42 }
 0xcdf   : > { %v9840_v28 = vpop.eup %9839  ;;  %v8689_v59 = vmul.f32 %v9838_v15, %v9822_v19  ;;  %v8706_v10 = vrot.slane %v8685_v38, 7 }
 0xce0   : > { %v9842_v47 = vpop.eup %9841  ;;  %v8691_v11 = vmul.f32 %v9840_v28, %v9824_v41  ;;  %v8708_v17 = vrot.slane %v8687_v57, 6 }
 0xce1   : > { %v9844_v13 = vpop.eup %9843  ;;  %v8693_v63 = vmul.f32 %v9842_v47, %v9826_v33  ;;  %v8707_v48 = vsel %vm8576_vm7, %v8706_v10, %v8683_v8  ;;  %v8710_v61 = vrot.slane %v8689_v59, 5 }
 0xce2   : > { %v9846_v12 = vpop.eup %9845  ;;  %v8695_v16 = vmul.f32 %v9844_v13, %v9828_v32  ;;  %v8709_v26 = vsel %vm8579_vm15, %v8708_v17, %v8707_v48  ;;  %v8712_v24 = vrot.slane %v8691_v11, 4 }
 0xce3   : > { %v8697_v0 = vmul.f32 %v9846_v12, %v9830_v58  ;;  %v8711_v2 = vsel %vm8582_vm2, %v8710_v61, %v8709_v26  ;;  %v8714_v20 = vrot.slane %v8693_v63, 3 }
 0xce4   : > { %v8713_v45 = vsel %vm8585_vm3, %v8712_v24, %v8711_v2  ;;  %v8716_v49 = vrot.slane %v8695_v16, 2 }
 0xce5   : > { %v8715_v35 = vsel %vm8588_vm4, %v8714_v20, %v8713_v45  ;;  %v8718_v40 = vrot.slane %v8697_v0, 1 }
 0xce6   : > { %v8717_v14 = vsel %vm8591_vm5, %v8716_v49, %v8715_v35 }
 0xce7   : > { %v8719_v34 = vsel %vm8594_vm11, %v8718_v40, %v8717_v14 }
 0xce8   : > { %v8721_v51 = vsel %vm621_vm10, %v8719_v34, 0.0 }
 0xce9   : > { %8722 = vst [vmem:[%s601_s21] sm:$0xff] %v8721_v51 }
 0xcea   : > { %9967 = shalt.err (!%p9964_p13)
}
 0xceb   : > { %s9968_s22 = scalar_lea.hbm %s14614_s24, 128  ;;  %s9972_s19 = scalar_lea.hbm %s14669_s17, 256 }
 0xcec   : > { %p9969_p8 = scmp.ne.s32.totalorder %s14614_s24, %s9968_s22  ;;  %p9973_p2 = scmp.lt.s32.totalorder %s14614_s24, %s14669_s17 }
 0xced   : > { %p9974_p12 = scmp.lt.s32.totalorder %s9972_s19, %s9968_s22 }
 0xcee   : > { %p9970_p11 = pnand %p9969_p8, %p15011_p6 }
 0xcef   : > { %p9975_p10 = por %p9974_p12, %p9973_p2 }
 0xcf0   : > { %p9971_p0 = pneg %p9970_p11 }
 0xcf2   : > { %p9976_p9 = pnand %p9975_p10, %p9971_p0 }
 0xcf4   : > { %9979 = shalt.err (!%p9976_p9)
}
 0xcf5   : > { %9536 = dma.vmem_to_hbm [thread:$0]  (%p15011_p6), %s8738_s18, 128, %s14614_s24, %s8724_s28  }
 0xcf6 PF: > { %s15012_s29 = sld [smem:[#allocation17_spill]] }
 0xcf7   : > { %s15013_s23 = sld [smem:[#allocation15_spill]] }
 0xcf8   : > { %s15014_s0 = sld [smem:[#allocation20_spill]] }
 0xcfc   : > { %p9563_p5 = scmp.ge.s32.totalorder %s15012_s29, 2 }
 0xcfd   : > { %s8749_s2 = sand.u32 1, %s15013_s23  }
 0xcfe   : > { %p15015_p1 = scmp.ne.s32.totalorder %s15014_s0, 0  ;;  %s8750_s26 = scalar_lea.sflag [#allocation4], %s8749_s2 }
 0xd00   : > { %p9552_p3 = pnand %p9563_p5, %p15015_p1 }
 0xd02   : > { %p9553_p4 = pneg %p9552_p3 }
 0xd04   : > { %10009 = dma.done.wait (%p9553_p4), %s8750_s26, 128  }
 0xd05   : > { %10011 = vsyncadd (%p9553_p4), %s8750_s26, 4294967168  ;;  %s15016_s27 = sld [smem:[#allocation18_spill]]  ;;  %s15019_s24 = smov %s10018_s25 }
 0xd06   : > { %s15017_s22 = sld [smem:[#allocation16_spill]] }
 0xd07   : > { %s15018_s26 = sld [smem:[#allocation19_spill]] }
 0xd0b   : > { %p30_p7 = scmp.ge.s32.totalorder %s15016_s27, 4  }
 0xd0c   : > { %s15020_s25 = smov %s15017_s22 }
 0xd0d   :  { %32 = sbr.rel (!%p30_p7) target bundleno = 10 (0xa), region = 148 }
 0xd12   :  { %8755 = vsyncpa [#allocation3], 1 }
 0xd13   :  { %8757 = vsyncpa [#allocation3 + $0x1], 1 }
 0xd14   :  { %8758 = vsyncpa [#allocation6], 1 }
 0xd15   :  { %8759 = vsyncpa [#allocation9], 1 }
 0xd16   :  { %8760 = vsyncpa [#allocation4], 1 }
 0xd17   :  { %8762 = vsyncpa [#allocation4 + $0x1], 1 }

</bundles_post_ra>
